<compile_context>
chip_gen: v5e
topology: v5e:2x2
jax: 0.10.0
libtpu: 0.0.40
codegen_flags: <defaults>
</compile_context>

<pallas_src>
import functools
import numpy as np
import jax
import jax.numpy as jnp
from jax.experimental import pallas as pl
from jax.experimental.pallas import tpu as pltpu

BN_EPS = 1e-3  # matches nn.BatchNorm2d(eps=0.001)


def _round_up(v, m):
    return ((v + m - 1) // m) * m


# --------------------------------------------------------------------------
# Kernel 1: tiled  out = relu((x @ w) * scale + bias)   (the 1x1 conv)
# --------------------------------------------------------------------------
def _mm_bn_relu_kernel(x_ref, w_ref, s_ref, b_ref, o_ref):
    x = x_ref[...].astype(jnp.bfloat16)
    acc = jnp.dot(x, w_ref[...], preferred_element_type=jnp.float32)
    y = jnp.maximum(acc * s_ref[...] + b_ref[...], 0.0)
    o_ref[...] = y.astype(o_ref.dtype)


def conv1x1_bn_relu(x_nhwc, w, scale, bias, *, tm=256, out_dtype=jnp.bfloat16):
    B, H, W, cin = x_nhwc.shape
    cout = w.shape[1]
    M = B * H * W
    x2d = x_nhwc.reshape(M, cin)           # free reshape (contiguous)
    grid_m = pl.cdiv(M, tm)                # ragged tail handled by Pallas boundary
    out = pl.pallas_call(
        _mm_bn_relu_kernel,
        out_shape=jax.ShapeDtypeStruct((M, cout), out_dtype),
        grid=(grid_m,),
        in_specs=[
            pl.BlockSpec((tm, cin), lambda i: (i, 0)),
            pl.BlockSpec((cin, cout), lambda i: (0, 0)),
            pl.BlockSpec((1, cout), lambda i: (0, 0)),
            pl.BlockSpec((1, cout), lambda i: (0, 0)),
        ],
        out_specs=pl.BlockSpec((tm, cout), lambda i: (i, 0)),
        compiler_params=pltpu.CompilerParams(dimension_semantics=("parallel",)),
    )(x2d, w, scale, bias)
    return out.reshape(B, H, W, cout)


# --------------------------------------------------------------------------
# Kernel 2: 3x3 stride-1 pad-1 conv + BN + ReLU, taps done in-kernel.
# The input arrives zero-padded by 1 (the conv's own padding) and out to the
# (OH, OW) extent the stride-2 stage consumes; OW is a multiple of 8 so all
# in-kernel reshapes are tile aligned.
# --------------------------------------------------------------------------
def _conv3x3_s1_kernel(x_ref, w_ref, s_ref, b_ref, o_ref, *, OH, OW):
    cin = x_ref.shape[-1]
    cout = w_ref.shape[-1]
    x = x_ref[0].astype(jnp.float32)               # (OH+2, OW+2, cin)
    acc = jnp.zeros((OH * OW, cout), jnp.float32)
    for dy in range(3):
        for dx in range(3):
            win = x[dy:dy + OH, dx:dx + OW, :]     # (OH, OW, cin) unstrided slice
            lhs = win.reshape(OH * OW, cin).astype(jnp.bfloat16)
            acc = acc + jnp.dot(lhs, w_ref[dy * 3 + dx],
                                preferred_element_type=jnp.float32)
    y = jnp.maximum(acc * s_ref[...] + b_ref[...], 0.0)
    o_ref[0] = y.reshape(OH, OW, cout).astype(o_ref.dtype)


def conv3x3_s1_bn_relu(x_padded, w9, scale, bias, *, OH, OW):
    B, Hi, Wi, cin = x_padded.shape
    cout = w9.shape[-1]
    assert Hi == OH + 2 and Wi == OW + 2 and OW % 8 == 0
    return pl.pallas_call(
        functools.partial(_conv3x3_s1_kernel, OH=OH, OW=OW),
        out_shape=jax.ShapeDtypeStruct((B, OH, OW, cout), jnp.bfloat16),
        grid=(B,),
        in_specs=[
            pl.BlockSpec((1, OH + 2, OW + 2, cin), lambda b: (b, 0, 0, 0)),
            pl.BlockSpec((9, cin, cout), lambda b: (0, 0, 0)),
            pl.BlockSpec((1, cout), lambda b: (0, 0)),
            pl.BlockSpec((1, cout), lambda b: (0, 0)),
        ],
        out_specs=pl.BlockSpec((1, OH, OW, cout), lambda b: (b, 0, 0, 0)),
        compiler_params=pltpu.CompilerParams(dimension_semantics=("parallel",)),
    )(x_padded, w9, scale, bias)


# --------------------------------------------------------------------------
# Kernel 3: fused stride-2 stage -- branch3x3 (3x3 s2 conv), branch3x3dbl_3
# (3x3 s2 conv) and the 3x3 s2 max-pool.
#
# Inputs arrive in a "column pair" layout built by *free* reshapes in XLA:
#   x6[b, hh, p, wh, dx*C + c] = x[b, 2*hh + p, 2*wh + dx, c]   (dx in {0,1})
# so for each kernel row dy the taps dx=0,1 are one unstrided window with
# K = 2*C on the lane axis (deep MXU contraction), and the dx=2 tap is the
# low half of the next column-pair window.
# --------------------------------------------------------------------------
def _incb_s2_kernel(x_ref, y_ref,
                    w3a_ref, w3b_ref, s3_ref, b3_ref,
                    wda_ref, wdb_ref, sd_ref, bd_ref,
                    o3_ref, od_ref, op_ref, *, oh, owp, cin, cmid):
    x6 = x_ref[0]                          # (Hh, 2, Wh, 2*cin)  f32 (exact pool)
    y6 = y_ref[0].astype(jnp.float32)      # (Hh, 2, Wh, 2*cmid)
    c3 = w3a_ref.shape[-1]
    cd = wda_ref.shape[-1]
    M2 = oh * owp

    acc3 = jnp.zeros((M2, c3), jnp.float32)
    accd = jnp.zeros((M2, cd), jnp.float32)
    pool_lo = None   # running max over dy of the (dx=0, dx=1) pairs, width 2*cin
    pool_hi = None   # running max over dy of the dx=2 column,      width cin
    for dy in range(3):
        p, i0 = dy % 2, dy // 2            # row 2*i + dy == 2*(i + i0) + p
        xlo = x6[i0:i0 + oh, p, 0:owp, :]          # (oh, owp, 2*cin)  cols 2j, 2j+1
        xhi = x6[i0:i0 + oh, p, 1:1 + owp, :cin]   # (oh, owp, cin)    col  2j+2
        ylo = y6[i0:i0 + oh, p, 0:owp, :]
        yhi = y6[i0:i0 + oh, p, 1:1 + owp, :cmid]

        acc3 += jnp.dot(xlo.reshape(M2, 2 * cin).astype(jnp.bfloat16), w3a_ref[dy],
                        preferred_element_type=jnp.float32)
        acc3 += jnp.dot(xhi.reshape(M2, cin).astype(jnp.bfloat16), w3b_ref[dy],
                        preferred_element_type=jnp.float32)
        accd += jnp.dot(ylo.reshape(M2, 2 * cmid).astype(jnp.bfloat16), wda_ref[dy],
                        preferred_element_type=jnp.float32)
        accd += jnp.dot(yhi.reshape(M2, cmid).astype(jnp.bfloat16), wdb_ref[dy],
                        preferred_element_type=jnp.float32)

        pool_lo = xlo if pool_lo is None else jnp.maximum(pool_lo, xlo)
        pool_hi = xhi if pool_hi is None else jnp.maximum(pool_hi, xhi)

    b3v = jnp.maximum(acc3 * s3_ref[...] + b3_ref[...], 0.0)
    bdv = jnp.maximum(accd * sd_ref[...] + bd_ref[...], 0.0)
    o3_ref[0] = b3v.reshape(oh, owp, c3).astype(o3_ref.dtype)
    od_ref[0] = bdv.reshape(oh, owp, cd).astype(od_ref.dtype)
    # 3x3 / stride-2 max-pool: combine even/odd column halves and the dx=2 column.
    pool = jnp.maximum(jnp.maximum(pool_lo[..., :cin], pool_lo[..., cin:2 * cin]),
                       pool_hi)
    op_ref[0] = pool.astype(op_ref.dtype)


# ------------------------------ parameters ---------------------------------
class KeyGen:
    def __init__(self, key):
        self.key = key

    def __call__(self):
        self.key, sub = jax.random.split(self.key)
        return sub


def _bn_fold(out_ch):
    # BatchNorm2d eval-mode defaults: gamma=1, beta=0, mean=0, var=1
    gamma = jnp.ones((out_ch,), jnp.float32)
    beta = jnp.zeros((out_ch,), jnp.float32)
    rmean = jnp.zeros((out_ch,), jnp.float32)
    rvar = jnp.ones((out_ch,), jnp.float32)
    scale = gamma / jnp.sqrt(rvar + BN_EPS)
    bias = beta - rmean * scale
    return scale.reshape(1, -1), bias.reshape(1, -1)


def make_conv1x1(kg, cin, cout):
    w = jax.random.normal(kg(), (cin, cout), jnp.float32) * np.sqrt(2.0 / cin)
    s, b = _bn_fold(cout)
    return {'w': w.astype(jnp.bfloat16), 'scale': s, 'bias': b}


def make_conv3x3_s1(kg, cin, cout):
    # TODO(synk): PyTorch Conv2d stores weights as (Cout, Cin, kh, kw); loading a
    # real checkpoint requires transposing to this (kh, kw, Cin, Cout) tap layout
    # before the reshapes below (add a shape/value check when doing so).
    w = jax.random.normal(kg(), (3, 3, cin, cout), jnp.float32) * np.sqrt(2.0 / (9 * cin))
    s, b = _bn_fold(cout)
    return {'w': w.reshape(9, cin, cout).astype(jnp.bfloat16), 'scale': s, 'bias': b}


def make_conv3x3_s2(kg, cin, cout):
    w = jax.random.normal(kg(), (3, 3, cin, cout), jnp.float32) * np.sqrt(2.0 / (9 * cin))
    s, b = _bn_fold(cout)
    # "column pair" layout: wa[dy] stacks taps (dy,0),(dy,1) on K (K = 2*cin, deeper
    # MXU contraction); wb[dy] is the (dy,2) tap.
    wa = w[:, 0:2].reshape(3, 2 * cin, cout).astype(jnp.bfloat16)
    wb = w[:, 2].astype(jnp.bfloat16)
    return {'wa': wa, 'wb': wb, 'scale': s, 'bias': b}


def make_inception_b_params(key, in_channels):
    kg = KeyGen(key)
    return {
        'b3': make_conv3x3_s2(kg, in_channels, 384),  # branch3x3: 3x3 stride 2
        'd1': make_conv1x1(kg, in_channels, 64),      # branch3x3dbl_1: 1x1
        'd2': make_conv3x3_s1(kg, 64, 96),            # branch3x3dbl_2: 3x3 pad 1
        'd3': make_conv3x3_s2(kg, 96, 96),            # branch3x3dbl_3: 3x3 stride 2
    }


# ------------------------------- forward -----------------------------------
def inception_b_forward(params, x_nchw):
    x = jnp.transpose(x_nchw, (0, 2, 3, 1)).astype(jnp.float32)   # NHWC
    B, H, W, cin = x.shape
    oh = (H - 3) // 2 + 1
    ow = (W - 3) // 2 + 1
    owp = _round_up(ow, 8)                   # 8-aligned output column slab
    Hp = 2 * (oh + 1)                        # even, >= H, covers all stride-2 rows
    Wq = _round_up(2 * (owp + 1), 8)         # even (mult of 8), covers all s2 cols
    assert Hp >= H and Wq >= W
    # Zero padding never reaches a kept output position (conv taps and max-pool of
    # kept outputs only read rows <= 2*oh <= H-1 and cols <= 2*ow <= W-1):
    assert 2 * (oh - 1) + 2 <= H - 1 and 2 * (ow - 1) + 2 <= W - 1
    assert 2 * (owp - 1) + 2 + 1 <= Wq - 1   # widest in-kernel window stays in bounds

    p = params
    cmid = p['d2']['w'].shape[-1]            # 96
    c3 = p['b3']['wa'].shape[-1]             # 384
    cd = p['d3']['wa'].shape[-1]             # 96

    # ---- double-3x3 branch, stride-1 part ----
    y1 = conv1x1_bn_relu(x, p['d1']['w'], p['d1']['scale'], p['d1']['bias'])
    # Zero-pad y1 by 1 (the conv's own padding) and out to the (Hp, Wq) extent so
    # y2 is produced directly in the layout the stride-2 stage consumes.  The extra
    # rows/cols of y2 are finite garbage that is never read for kept outputs.
    y1p = jnp.pad(y1, ((0, 0), (1, Hp + 1 - H), (1, Wq + 1 - W), (0, 0)))
    y2 = conv3x3_s1_bn_relu(y1p, p['d2']['w'], p['d2']['scale'], p['d2']['bias'],
                            OH=Hp, OW=Wq)

    # ---- stride-2 stage: free "column pair" views (no strided HBM copies) ----
    xpad = jnp.pad(x, ((0, 0), (0, Hp - H), (0, Wq - W), (0, 0)))
    Hh, Wh = Hp // 2, Wq // 2
    x6 = xpad.reshape(B, Hh, 2, Wh, 2 * cin)     # free contiguous reshape
    y6 = y2.reshape(B, Hh, 2, Wh, 2 * cmid)      # free contiguous reshape

    o3, od, opool = pl.pallas_call(
        functools.partial(_incb_s2_kernel, oh=oh, owp=owp, cin=cin, cmid=cmid),
        out_shape=(jax.ShapeDtypeStruct((B, oh, owp, c3), jnp.float32),
                   jax.ShapeDtypeStruct((B, oh, owp, cd), jnp.float32),
                   jax.ShapeDtypeStruct((B, oh, owp, cin), jnp.float32)),
        grid=(B,),
        in_specs=[
            pl.BlockSpec((1, Hh, 2, Wh, 2 * cin), lambda b: (b, 0, 0, 0, 0)),
            pl.BlockSpec((1, Hh, 2, Wh, 2 * cmid), lambda b: (b, 0, 0, 0, 0)),
            pl.BlockSpec((3, 2 * cin, c3), lambda b: (0, 0, 0)),
            pl.BlockSpec((3, cin, c3), lambda b: (0, 0, 0)),
            pl.BlockSpec((1, c3), lambda b: (0, 0)),
            pl.BlockSpec((1, c3), lambda b: (0, 0)),
            pl.BlockSpec((3, 2 * cmid, cd), lambda b: (0, 0, 0)),
            pl.BlockSpec((3, cmid, cd), lambda b: (0, 0, 0)),
            pl.BlockSpec((1, cd), lambda b: (0, 0)),
            pl.BlockSpec((1, cd), lambda b: (0, 0)),
        ],
        out_specs=(pl.BlockSpec((1, oh, owp, c3), lambda b: (b, 0, 0, 0)),
                   pl.BlockSpec((1, oh, owp, cd), lambda b: (b, 0, 0, 0)),
                   pl.BlockSpec((1, oh, owp, cin), lambda b: (b, 0, 0, 0))),
        compiler_params=pltpu.CompilerParams(
            dimension_semantics=("parallel",),
            vmem_limit_bytes=48 * 1024 * 1024),
    )(x6, y6,
      p['b3']['wa'], p['b3']['wb'], p['b3']['scale'], p['b3']['bias'],
      p['d3']['wa'], p['d3']['wb'], p['d3']['scale'], p['d3']['bias'])

    # torch.cat([branch3x3, branch3x3dbl, branch_pool], dim=1); the column crop
    # fuses with this concat and the NCHW transpose in XLA.
    out = jnp.concatenate(
        [o3[:, :, :ow, :], od[:, :, :ow, :], opool[:, :, :ow, :]], axis=-1)
    return jnp.transpose(out, (0, 3, 1, 2))      # NCHW


# --------------------------- pure-JAX reference ------------------------------
def _reference_forward(params, x_nchw):
    x = jnp.transpose(x_nchw, (0, 2, 3, 1)).astype(jnp.float32)
    cin = x.shape[-1]
    p = params
    dn = ('NHWC', 'HWIO', 'NHWC')

    def bn_relu(v, s, b):
        return jnp.maximum(v * s.reshape(1, 1, 1, -1) + b.reshape(1, 1, 1, -1), 0.0)

    def merge(wa, wb, ci):
        wa = wa.astype(jnp.float32).reshape(3, 2, ci, -1)
        wb = wb.astype(jnp.float32).reshape(3, 1, ci, -1)
        return jnp.concatenate([wa, wb], axis=1)          # (3, 3, ci, co)

    w1 = p['d1']['w'].astype(jnp.float32).reshape(1, 1, cin, -1)
    y1 = bn_relu(jax.lax.conv_general_dilated(x, w1, (1, 1), 'VALID',
                                              dimension_numbers=dn),
                 p['d1']['scale'], p['d1']['bias'])
    w2 = p['d2']['w'].astype(jnp.float32).reshape(3, 3, 64, -1)
    y2 = bn_relu(jax.lax.conv_general_dilated(y1, w2, (1, 1), [(1, 1), (1, 1)],
                                              dimension_numbers=dn),
                 p['d2']['scale'], p['d2']['bias'])
    w3 = merge(p['b3']['wa'], p['b3']['wb'], cin)
    o3 = bn_relu(jax.lax.conv_general_dilated(x, w3, (2, 2), 'VALID',
                                              dimension_numbers=dn),
                 p['b3']['scale'], p['b3']['bias'])
    wd = merge(p['d3']['wa'], p['d3']['wb'], 96)
    od = bn_relu(jax.lax.conv_general_dilated(y2, wd, (2, 2), 'VALID',
                                              dimension_numbers=dn),
                 p['d3']['scale'], p['d3']['bias'])
    pool = jax.lax.reduce_window(x, -jnp.inf, jax.lax.max,
                                 (1, 3, 3, 1), (1, 2, 2, 1), 'VALID')
    out = jnp.concatenate([o3, od, pool], axis=-1)
    return jnp.transpose(out, (0, 3, 1, 2))


# --------------------------------- main -------------------------------------
if __name__ == "__main__":
    in_channels, H, W = 4, 16, 16
    key = jax.random.PRNGKey(0)
    pkey, xkey = jax.random.split(key)
    params = make_inception_b_params(pkey, in_channels)
    x = jax.random.normal(xkey, (2, in_channels, H, W), jnp.float32)

    fwd = jax.jit(inception_b_forward)
    out = jax.block_until_ready(fwd(params, x))

    assert out.shape == (2, 384 + 96 + in_channels, 7, 7), out.shape
    assert bool(jnp.all(jnp.isfinite(out)))

    # Numerical check against a pure-JAX (XLA) reference; tolerance covers the
    # bf16 matmul operands / bf16-stored intermediates in the kernel path.
    ref = jax.block_until_ready(jax.jit(_reference_forward)(params, x))
    np.testing.assert_allclose(np.asarray(out), np.asarray(ref), rtol=1e-1, atol=2e-1)

    print("KERNEL_OK")
</pallas_src>

<mosaic_0001>
module attributes {stable_mosaic.version = 11 : i64} {
  func.func @_conv3x3_s1_kernel(%arg0: i32, %arg1: memref<1x18x26x64xbf16, #tpu.memory_space<vmem>>, %arg2: memref<9x64x96xbf16, #tpu.memory_space<vmem>>, %arg3: memref<1x96xf32, #tpu.memory_space<vmem>>, %arg4: memref<1x96xf32, #tpu.memory_space<vmem>>, %arg5: memref<1x16x24x96xbf16, #tpu.memory_space<vmem>>) attributes {dimension_semantics = [#tpu.dimension_semantics<parallel>], iteration_bounds = array<i64: 2>, scalar_prefetch = 0 : i64, scratch_operands = 0 : i64, tpu.core_type = #tpu.core_type<tc>, window_params = [{transform_indices = @transform_0, window_bounds = array<i64: 1, 18, 26, 64>}, {pipeline_mode = #tpu.pipeline_mode<synchronous>, transform_indices = @transform_1, window_bounds = array<i64: 9, 64, 96>}, {pipeline_mode = #tpu.pipeline_mode<synchronous>, transform_indices = @transform_2, window_bounds = array<i64: 1, 96>}, {pipeline_mode = #tpu.pipeline_mode<synchronous>, transform_indices = @transform_3, window_bounds = array<i64: 1, 96>}, {transform_indices = @transform_4, window_bounds = array<i64: 1, 16, 24, 96>}]} {
    %c0 = arith.constant 0 : index
    %c0_0 = arith.constant 0 : index
    %c0_1 = arith.constant 0 : index
    %c0_2 = arith.constant 0 : index
    %0 = vector.load %arg1[%c0, %c0_0, %c0_1, %c0_2] : memref<1x18x26x64xbf16, #tpu.memory_space<vmem>>, vector<1x18x26x64xbf16>
    %1 = vector.shape_cast %0 : vector<1x18x26x64xbf16> to vector<18x26x64xbf16>
    %2 = arith.extf %1 : vector<18x26x64xbf16> to vector<18x26x64xf32>
    %cst = arith.constant 0.000000e+00 : f32
    %3 = vector.broadcast %cst : f32 to vector<384x96xf32>
    %4 = vector.extract_strided_slice %2 {offsets = [0, 0, 0], sizes = [16, 24, 64], strides = [1, 1, 1]} : vector<18x26x64xf32> to vector<16x24x64xf32>
    %5 = vector.shape_cast %4 : vector<16x24x64xf32> to vector<384x64xf32>
    %6 = arith.truncf %5 : vector<384x64xf32> to vector<384x64xbf16>
    %c0_3 = arith.constant 0 : index
    %c0_4 = arith.constant 0 : index
    %c0_5 = arith.constant 0 : index
    %7 = vector.load %arg2[%c0_3, %c0_4, %c0_5] : memref<9x64x96xbf16, #tpu.memory_space<vmem>>, vector<1x64x96xbf16>
    %8 = vector.shape_cast %7 : vector<1x64x96xbf16> to vector<64x96xbf16>
    %cst_6 = arith.constant dense<0.000000e+00> : vector<384x96xf32>
    %9 = tpu.matmul %6, %8, %cst_6 {dimension_numbers = #tpu.dot_dimension_numbers<[1], [0], [0], [1], [0, 0, 1, 1], [], []>} : vector<384x64xbf16>, vector<64x96xbf16>, vector<384x96xf32> -> vector<384x96xf32>
    %10 = arith.addf %3, %9 : vector<384x96xf32>
    %11 = vector.extract_strided_slice %2 {offsets = [0, 1, 0], sizes = [16, 24, 64], strides = [1, 1, 1]} : vector<18x26x64xf32> to vector<16x24x64xf32>
    %12 = vector.shape_cast %11 : vector<16x24x64xf32> to vector<384x64xf32>
    %13 = arith.truncf %12 : vector<384x64xf32> to vector<384x64xbf16>
    %c1 = arith.constant 1 : index
    %c0_7 = arith.constant 0 : index
    %c0_8 = arith.constant 0 : index
    %14 = vector.load %arg2[%c1, %c0_7, %c0_8] : memref<9x64x96xbf16, #tpu.memory_space<vmem>>, vector<1x64x96xbf16>
    %15 = vector.shape_cast %14 : vector<1x64x96xbf16> to vector<64x96xbf16>
    %cst_9 = arith.constant dense<0.000000e+00> : vector<384x96xf32>
    %16 = tpu.matmul %13, %15, %cst_9 {dimension_numbers = #tpu.dot_dimension_numbers<[1], [0], [0], [1], [0, 0, 1, 1], [], []>} : vector<384x64xbf16>, vector<64x96xbf16>, vector<384x96xf32> -> vector<384x96xf32>
    %17 = arith.addf %10, %16 : vector<384x96xf32>
    %18 = vector.extract_strided_slice %2 {offsets = [0, 2, 0], sizes = [16, 24, 64], strides = [1, 1, 1]} : vector<18x26x64xf32> to vector<16x24x64xf32>
    %19 = vector.shape_cast %18 : vector<16x24x64xf32> to vector<384x64xf32>
    %20 = arith.truncf %19 : vector<384x64xf32> to vector<384x64xbf16>
    %c2 = arith.constant 2 : index
    %c0_10 = arith.constant 0 : index
    %c0_11 = arith.constant 0 : index
    %21 = vector.load %arg2[%c2, %c0_10, %c0_11] : memref<9x64x96xbf16, #tpu.memory_space<vmem>>, vector<1x64x96xbf16>
    %22 = vector.shape_cast %21 : vector<1x64x96xbf16> to vector<64x96xbf16>
    %cst_12 = arith.constant dense<0.000000e+00> : vector<384x96xf32>
    %23 = tpu.matmul %20, %22, %cst_12 {dimension_numbers = #tpu.dot_dimension_numbers<[1], [0], [0], [1], [0, 0, 1, 1], [], []>} : vector<384x64xbf16>, vector<64x96xbf16>, vector<384x96xf32> -> vector<384x96xf32>
    %24 = arith.addf %17, %23 : vector<384x96xf32>
    %25 = vector.extract_strided_slice %2 {offsets = [1, 0, 0], sizes = [16, 24, 64], strides = [1, 1, 1]} : vector<18x26x64xf32> to vector<16x24x64xf32>
    %26 = vector.shape_cast %25 : vector<16x24x64xf32> to vector<384x64xf32>
    %27 = arith.truncf %26 : vector<384x64xf32> to vector<384x64xbf16>
    %c3 = arith.constant 3 : index
    %c0_13 = arith.constant 0 : index
    %c0_14 = arith.constant 0 : index
    %28 = vector.load %arg2[%c3, %c0_13, %c0_14] : memref<9x64x96xbf16, #tpu.memory_space<vmem>>, vector<1x64x96xbf16>
    %29 = vector.shape_cast %28 : vector<1x64x96xbf16> to vector<64x96xbf16>
    %cst_15 = arith.constant dense<0.000000e+00> : vector<384x96xf32>
    %30 = tpu.matmul %27, %29, %cst_15 {dimension_numbers = #tpu.dot_dimension_numbers<[1], [0], [0], [1], [0, 0, 1, 1], [], []>} : vector<384x64xbf16>, vector<64x96xbf16>, vector<384x96xf32> -> vector<384x96xf32>
    %31 = arith.addf %24, %30 : vector<384x96xf32>
    %32 = vector.extract_strided_slice %2 {offsets = [1, 1, 0], sizes = [16, 24, 64], strides = [1, 1, 1]} : vector<18x26x64xf32> to vector<16x24x64xf32>
    %33 = vector.shape_cast %32 : vector<16x24x64xf32> to vector<384x64xf32>
    %34 = arith.truncf %33 : vector<384x64xf32> to vector<384x64xbf16>
    %c4 = arith.constant 4 : index
    %c0_16 = arith.constant 0 : index
    %c0_17 = arith.constant 0 : index
    %35 = vector.load %arg2[%c4, %c0_16, %c0_17] : memref<9x64x96xbf16, #tpu.memory_space<vmem>>, vector<1x64x96xbf16>
    %36 = vector.shape_cast %35 : vector<1x64x96xbf16> to vector<64x96xbf16>
    %cst_18 = arith.constant dense<0.000000e+00> : vector<384x96xf32>
    %37 = tpu.matmul %34, %36, %cst_18 {dimension_numbers = #tpu.dot_dimension_numbers<[1], [0], [0], [1], [0, 0, 1, 1], [], []>} : vector<384x64xbf16>, vector<64x96xbf16>, vector<384x96xf32> -> vector<384x96xf32>
    %38 = arith.addf %31, %37 : vector<384x96xf32>
    %39 = vector.extract_strided_slice %2 {offsets = [1, 2, 0], sizes = [16, 24, 64], strides = [1, 1, 1]} : vector<18x26x64xf32> to vector<16x24x64xf32>
    %40 = vector.shape_cast %39 : vector<16x24x64xf32> to vector<384x64xf32>
    %41 = arith.truncf %40 : vector<384x64xf32> to vector<384x64xbf16>
    %c5 = arith.constant 5 : index
    %c0_19 = arith.constant 0 : index
    %c0_20 = arith.constant 0 : index
    %42 = vector.load %arg2[%c5, %c0_19, %c0_20] : memref<9x64x96xbf16, #tpu.memory_space<vmem>>, vector<1x64x96xbf16>
    %43 = vector.shape_cast %42 : vector<1x64x96xbf16> to vector<64x96xbf16>
    %cst_21 = arith.constant dense<0.000000e+00> : vector<384x96xf32>
    %44 = tpu.matmul %41, %43, %cst_21 {dimension_numbers = #tpu.dot_dimension_numbers<[1], [0], [0], [1], [0, 0, 1, 1], [], []>} : vector<384x64xbf16>, vector<64x96xbf16>, vector<384x96xf32> -> vector<384x96xf32>
    %45 = arith.addf %38, %44 : vector<384x96xf32>
    %46 = vector.extract_strided_slice %2 {offsets = [2, 0, 0], sizes = [16, 24, 64], strides = [1, 1, 1]} : vector<18x26x64xf32> to vector<16x24x64xf32>
    %47 = vector.shape_cast %46 : vector<16x24x64xf32> to vector<384x64xf32>
    %48 = arith.truncf %47 : vector<384x64xf32> to vector<384x64xbf16>
    %c6 = arith.constant 6 : index
    %c0_22 = arith.constant 0 : index
    %c0_23 = arith.constant 0 : index
    %49 = vector.load %arg2[%c6, %c0_22, %c0_23] : memref<9x64x96xbf16, #tpu.memory_space<vmem>>, vector<1x64x96xbf16>
    %50 = vector.shape_cast %49 : vector<1x64x96xbf16> to vector<64x96xbf16>
    %cst_24 = arith.constant dense<0.000000e+00> : vector<384x96xf32>
    %51 = tpu.matmul %48, %50, %cst_24 {dimension_numbers = #tpu.dot_dimension_numbers<[1], [0], [0], [1], [0, 0, 1, 1], [], []>} : vector<384x64xbf16>, vector<64x96xbf16>, vector<384x96xf32> -> vector<384x96xf32>
    %52 = arith.addf %45, %51 : vector<384x96xf32>
    %53 = vector.extract_strided_slice %2 {offsets = [2, 1, 0], sizes = [16, 24, 64], strides = [1, 1, 1]} : vector<18x26x64xf32> to vector<16x24x64xf32>
    %54 = vector.shape_cast %53 : vector<16x24x64xf32> to vector<384x64xf32>
    %55 = arith.truncf %54 : vector<384x64xf32> to vector<384x64xbf16>
    %c7 = arith.constant 7 : index
    %c0_25 = arith.constant 0 : index
    %c0_26 = arith.constant 0 : index
    %56 = vector.load %arg2[%c7, %c0_25, %c0_26] : memref<9x64x96xbf16, #tpu.memory_space<vmem>>, vector<1x64x96xbf16>
    %57 = vector.shape_cast %56 : vector<1x64x96xbf16> to vector<64x96xbf16>
    %cst_27 = arith.constant dense<0.000000e+00> : vector<384x96xf32>
    %58 = tpu.matmul %55, %57, %cst_27 {dimension_numbers = #tpu.dot_dimension_numbers<[1], [0], [0], [1], [0, 0, 1, 1], [], []>} : vector<384x64xbf16>, vector<64x96xbf16>, vector<384x96xf32> -> vector<384x96xf32>
    %59 = arith.addf %52, %58 : vector<384x96xf32>
    %60 = vector.extract_strided_slice %2 {offsets = [2, 2, 0], sizes = [16, 24, 64], strides = [1, 1, 1]} : vector<18x26x64xf32> to vector<16x24x64xf32>
    %61 = vector.shape_cast %60 : vector<16x24x64xf32> to vector<384x64xf32>
    %62 = arith.truncf %61 : vector<384x64xf32> to vector<384x64xbf16>
    %c8 = arith.constant 8 : index
    %c0_28 = arith.constant 0 : index
    %c0_29 = arith.constant 0 : index
    %63 = vector.load %arg2[%c8, %c0_28, %c0_29] : memref<9x64x96xbf16, #tpu.memory_space<vmem>>, vector<1x64x96xbf16>
    %64 = vector.shape_cast %63 : vector<1x64x96xbf16> to vector<64x96xbf16>
    %cst_30 = arith.constant dense<0.000000e+00> : vector<384x96xf32>
    %65 = tpu.matmul %62, %64, %cst_30 {dimension_numbers = #tpu.dot_dimension_numbers<[1], [0], [0], [1], [0, 0, 1, 1], [], []>} : vector<384x64xbf16>, vector<64x96xbf16>, vector<384x96xf32> -> vector<384x96xf32>
    %66 = arith.addf %59, %65 : vector<384x96xf32>
    %c0_31 = arith.constant 0 : index
    %c0_32 = arith.constant 0 : index
    %67 = vector.load %arg3[%c0_31, %c0_32] : memref<1x96xf32, #tpu.memory_space<vmem>>, vector<1x96xf32>
    %68 = vector.broadcast %67 : vector<1x96xf32> to vector<384x96xf32>
    %69 = arith.mulf %66, %68 : vector<384x96xf32>
    %c0_33 = arith.constant 0 : index
    %c0_34 = arith.constant 0 : index
    %70 = vector.load %arg4[%c0_33, %c0_34] : memref<1x96xf32, #tpu.memory_space<vmem>>, vector<1x96xf32>
    %71 = vector.broadcast %70 : vector<1x96xf32> to vector<384x96xf32>
    %72 = arith.addf %69, %71 : vector<384x96xf32>
    %cst_35 = arith.constant 0.000000e+00 : f32
    %73 = vector.broadcast %cst_35 : f32 to vector<384x96xf32>
    %74 = arith.maximumf %72, %73 : vector<384x96xf32>
    %75 = vector.shape_cast %74 : vector<384x96xf32> to vector<16x24x96xf32>
    %76 = arith.truncf %75 : vector<16x24x96xf32> to vector<16x24x96xbf16>
    %c0_36 = arith.constant 0 : index
    %c0_37 = arith.constant 0 : index
    %c0_38 = arith.constant 0 : index
    %c0_39 = arith.constant 0 : index
    %77 = vector.load %arg5[%c0_36, %c0_37, %c0_38, %c0_39] : memref<1x16x24x96xbf16, #tpu.memory_space<vmem>>, vector<1x16x24x96xbf16>
    %78 = vector.shape_cast %77 : vector<1x16x24x96xbf16> to vector<16x24x96xbf16>
    %79 = vector.shape_cast %76 : vector<16x24x96xbf16> to vector<1x16x24x96xbf16>
    tpu.vector_store %arg5[%c0_36, %c0_37, %c0_38, %c0_39], %79 {strides = array<i32>} : memref<1x16x24x96xbf16, #tpu.memory_space<vmem>>, vector<1x16x24x96xbf16>,
    return
  }
  func.func @transform_0(%arg0: i32) -> (i32, i32, i32, i32) {
    %c0_i32 = arith.constant 0 : i32
    %c0_i32_0 = arith.constant 0 : i32
    %c0_i32_1 = arith.constant 0 : i32
    %c0_i32_2 = arith.constant 0 : i32
    return %arg0, %c0_i32, %c0_i32_0, %c0_i32_1 : i32, i32, i32, i32
  }
  func.func @transform_1(%arg0: i32) -> (i32, i32, i32) {
    %c0_i32 = arith.constant 0 : i32
    %c0_i32_0 = arith.constant 0 : i32
    %c0_i32_1 = arith.constant 0 : i32
    %c0_i32_2 = arith.constant 0 : i32
    return %c0_i32, %c0_i32_0, %c0_i32_1 : i32, i32, i32
  }
  func.func @transform_2(%arg0: i32) -> (i32, i32) {
    %c0_i32 = arith.constant 0 : i32
    %c0_i32_0 = arith.constant 0 : i32
    %c0_i32_1 = arith.constant 0 : i32
    return %c0_i32, %c0_i32_0 : i32, i32
  }
  func.func @transform_3(%arg0: i32) -> (i32, i32) {
    %c0_i32 = arith.constant 0 : i32
    %c0_i32_0 = arith.constant 0 : i32
    %c0_i32_1 = arith.constant 0 : i32
    return %c0_i32, %c0_i32_0 : i32, i32
  }
  func.func @transform_4(%arg0: i32) -> (i32, i32, i32, i32) {
    %c0_i32 = arith.constant 0 : i32
    %c0_i32_0 = arith.constant 0 : i32
    %c0_i32_1 = arith.constant 0 : i32
    %c0_i32_2 = arith.constant 0 : i32
    return %arg0, %c0_i32, %c0_i32_0, %c0_i32_1 : i32, i32, i32, i32
  }
}

module attributes {stable_mosaic.version = 11 : i64} {
  func.func @_mm_bn_relu_kernel(%arg0: i32, %arg1: memref<256x4xf32, #tpu.memory_space<vmem>>, %arg2: memref<4x64xbf16, #tpu.memory_space<vmem>>, %arg3: memref<1x64xf32, #tpu.memory_space<vmem>>, %arg4: memref<1x64xf32, #tpu.memory_space<vmem>>, %arg5: memref<256x64xbf16, #tpu.memory_space<vmem>>) attributes {dimension_semantics = [#tpu.dimension_semantics<parallel>], iteration_bounds = array<i64: 2>, scalar_prefetch = 0 : i64, scratch_operands = 0 : i64, tpu.core_type = #tpu.core_type<tc>, window_params = [{transform_indices = @transform_0, window_bounds = array<i64: 256, 4>}, {pipeline_mode = #tpu.pipeline_mode<synchronous>, transform_indices = @transform_1, window_bounds = array<i64: 4, 64>}, {pipeline_mode = #tpu.pipeline_mode<synchronous>, transform_indices = @transform_2, window_bounds = array<i64: 1, 64>}, {pipeline_mode = #tpu.pipeline_mode<synchronous>, transform_indices = @transform_3, window_bounds = array<i64: 1, 64>}, {transform_indices = @transform_4, window_bounds = array<i64: 256, 64>}]} {
    %c0 = arith.constant 0 : index
    %c0_0 = arith.constant 0 : index
    %0 = vector.load %arg1[%c0, %c0_0] : memref<256x4xf32, #tpu.memory_space<vmem>>, vector<256x4xf32>
    %1 = arith.truncf %0 : vector<256x4xf32> to vector<256x4xbf16>
    %c0_1 = arith.constant 0 : index
    %c0_2 = arith.constant 0 : index
    %2 = vector.load %arg2[%c0_1, %c0_2] : memref<4x64xbf16, #tpu.memory_space<vmem>>, vector<4x64xbf16>
    %cst = arith.constant dense<0.000000e+00> : vector<256x64xf32>
    %3 = tpu.matmul %1, %2, %cst {dimension_numbers = #tpu.dot_dimension_numbers<[1], [0], [0], [1], [0, 0, 1, 1], [], []>} : vector<256x4xbf16>, vector<4x64xbf16>, vector<256x64xf32> -> vector<256x64xf32>
    %c0_3 = arith.constant 0 : index
    %c0_4 = arith.constant 0 : index
    %4 = vector.load %arg3[%c0_3, %c0_4] : memref<1x64xf32, #tpu.memory_space<vmem>>, vector<1x64xf32>
    %5 = vector.broadcast %4 : vector<1x64xf32> to vector<256x64xf32>
    %6 = arith.mulf %3, %5 : vector<256x64xf32>
    %c0_5 = arith.constant 0 : index
    %c0_6 = arith.constant 0 : index
    %7 = vector.load %arg4[%c0_5, %c0_6] : memref<1x64xf32, #tpu.memory_space<vmem>>, vector<1x64xf32>
    %8 = vector.broadcast %7 : vector<1x64xf32> to vector<256x64xf32>
    %9 = arith.addf %6, %8 : vector<256x64xf32>
    %cst_7 = arith.constant 0.000000e+00 : f32
    %10 = vector.broadcast %cst_7 : f32 to vector<256x64xf32>
    %11 = arith.maximumf %9, %10 : vector<256x64xf32>
    %12 = arith.truncf %11 : vector<256x64xf32> to vector<256x64xbf16>
    %c0_8 = arith.constant 0 : index
    %c0_9 = arith.constant 0 : index
    %13 = vector.load %arg5[%c0_8, %c0_9] : memref<256x64xbf16, #tpu.memory_space<vmem>>, vector<256x64xbf16>
    tpu.vector_store %arg5[%c0_8, %c0_9], %12 {strides = array<i32>} : memref<256x64xbf16, #tpu.memory_space<vmem>>, vector<256x64xbf16>,
    return
  }
  func.func @transform_0(%arg0: i32) -> (i32, i32) {
    %c0_i32 = arith.constant 0 : i32
    %c0_i32_0 = arith.constant 0 : i32
    return %arg0, %c0_i32 : i32, i32
  }
  func.func @transform_1(%arg0: i32) -> (i32, i32) {
    %c0_i32 = arith.constant 0 : i32
    %c0_i32_0 = arith.constant 0 : i32
    %c0_i32_1 = arith.constant 0 : i32
    return %c0_i32, %c0_i32_0 : i32, i32
  }
  func.func @transform_2(%arg0: i32) -> (i32, i32) {
    %c0_i32 = arith.constant 0 : i32
    %c0_i32_0 = arith.constant 0 : i32
    %c0_i32_1 = arith.constant 0 : i32
    return %c0_i32, %c0_i32_0 : i32, i32
  }
  func.func @transform_3(%arg0: i32) -> (i32, i32) {
    %c0_i32 = arith.constant 0 : i32
    %c0_i32_0 = arith.constant 0 : i32
    %c0_i32_1 = arith.constant 0 : i32
    return %c0_i32, %c0_i32_0 : i32, i32
  }
  func.func @transform_4(%arg0: i32) -> (i32, i32) {
    %c0_i32 = arith.constant 0 : i32
    %c0_i32_0 = arith.constant 0 : i32
    return %arg0, %c0_i32 : i32, i32
  }
}

module attributes {stable_mosaic.version = 11 : i64} {
  func.func @_incb_s2_kernel(%arg0: i32, %arg1: memref<1x8x2x12x8xf32, #tpu.memory_space<vmem>>, %arg2: memref<1x8x2x12x192xbf16, #tpu.memory_space<vmem>>, %arg3: memref<3x8x384xbf16, #tpu.memory_space<vmem>>, %arg4: memref<3x4x384xbf16, #tpu.memory_space<vmem>>, %arg5: memref<1x384xf32, #tpu.memory_space<vmem>>, %arg6: memref<1x384xf32, #tpu.memory_space<vmem>>, %arg7: memref<3x192x96xbf16, #tpu.memory_space<vmem>>, %arg8: memref<3x96x96xbf16, #tpu.memory_space<vmem>>, %arg9: memref<1x96xf32, #tpu.memory_space<vmem>>, %arg10: memref<1x96xf32, #tpu.memory_space<vmem>>, %arg11: memref<1x7x8x384xf32, #tpu.memory_space<vmem>>, %arg12: memref<1x7x8x96xf32, #tpu.memory_space<vmem>>, %arg13: memref<1x7x8x4xf32, #tpu.memory_space<vmem>>) attributes {dimension_semantics = [#tpu.dimension_semantics<parallel>], iteration_bounds = array<i64: 2>, scalar_prefetch = 0 : i64, scratch_operands = 0 : i64, tpu.core_type = #tpu.core_type<tc>, window_params = [{transform_indices = @transform_0, window_bounds = array<i64: 1, 8, 2, 12, 8>}, {transform_indices = @transform_1, window_bounds = array<i64: 1, 8, 2, 12, 192>}, {pipeline_mode = #tpu.pipeline_mode<synchronous>, transform_indices = @transform_2, window_bounds = array<i64: 3, 8, 384>}, {pipeline_mode = #tpu.pipeline_mode<synchronous>, transform_indices = @transform_3, window_bounds = array<i64: 3, 4, 384>}, {pipeline_mode = #tpu.pipeline_mode<synchronous>, transform_indices = @transform_4, window_bounds = array<i64: 1, 384>}, {pipeline_mode = #tpu.pipeline_mode<synchronous>, transform_indices = @transform_5, window_bounds = array<i64: 1, 384>}, {pipeline_mode = #tpu.pipeline_mode<synchronous>, transform_indices = @transform_6, window_bounds = array<i64: 3, 192, 96>}, {pipeline_mode = #tpu.pipeline_mode<synchronous>, transform_indices = @transform_7, window_bounds = array<i64: 3, 96, 96>}, {pipeline_mode = #tpu.pipeline_mode<synchronous>, transform_indices = @transform_8, window_bounds = array<i64: 1, 96>}, {pipeline_mode = #tpu.pipeline_mode<synchronous>, transform_indices = @transform_9, window_bounds = array<i64: 1, 96>}, {transform_indices = @transform_10, window_bounds = array<i64: 1, 7, 8, 384>}, {transform_indices = @transform_11, window_bounds = array<i64: 1, 7, 8, 96>}, {transform_indices = @transform_12, window_bounds = array<i64: 1, 7, 8, 4>}]} {
    %c0 = arith.constant 0 : index
    %c0_0 = arith.constant 0 : index
    %c0_1 = arith.constant 0 : index
    %c0_2 = arith.constant 0 : index
    %c0_3 = arith.constant 0 : index
    %0 = vector.load %arg1[%c0, %c0_0, %c0_1, %c0_2, %c0_3] : memref<1x8x2x12x8xf32, #tpu.memory_space<vmem>>, vector<1x8x2x12x8xf32>
    %1 = vector.shape_cast %0 : vector<1x8x2x12x8xf32> to vector<8x2x12x8xf32>
    %c0_4 = arith.constant 0 : index
    %c0_5 = arith.constant 0 : index
    %c0_6 = arith.constant 0 : index
    %c0_7 = arith.constant 0 : index
    %c0_8 = arith.constant 0 : index
    %2 = vector.load %arg2[%c0_4, %c0_5, %c0_6, %c0_7, %c0_8] : memref<1x8x2x12x192xbf16, #tpu.memory_space<vmem>>, vector<1x8x2x12x192xbf16>
    %3 = vector.shape_cast %2 : vector<1x8x2x12x192xbf16> to vector<8x2x12x192xbf16>
    %4 = arith.extf %3 : vector<8x2x12x192xbf16> to vector<8x2x12x192xf32>
    %cst = arith.constant 0.000000e+00 : f32
    %5 = vector.broadcast %cst : f32 to vector<56x384xf32>
    %cst_9 = arith.constant 0.000000e+00 : f32
    %6 = vector.broadcast %cst_9 : f32 to vector<56x96xf32>
    %7 = vector.extract_strided_slice %1 {offsets = [0, 0, 0, 0], sizes = [7, 1, 8, 8], strides = [1, 1, 1, 1]} : vector<8x2x12x8xf32> to vector<7x1x8x8xf32>
    %8 = vector.shape_cast %7 : vector<7x1x8x8xf32> to vector<7x8x8xf32>
    %9 = vector.extract_strided_slice %1 {offsets = [0, 0, 1, 0], sizes = [7, 1, 8, 4], strides = [1, 1, 1, 1]} : vector<8x2x12x8xf32> to vector<7x1x8x4xf32>
    %10 = vector.shape_cast %9 : vector<7x1x8x4xf32> to vector<7x8x4xf32>
    %11 = vector.extract_strided_slice %4 {offsets = [0, 0, 0, 0], sizes = [7, 1, 8, 192], strides = [1, 1, 1, 1]} : vector<8x2x12x192xf32> to vector<7x1x8x192xf32>
    %12 = vector.shape_cast %11 : vector<7x1x8x192xf32> to vector<7x8x192xf32>
    %13 = vector.extract_strided_slice %4 {offsets = [0, 0, 1, 0], sizes = [7, 1, 8, 96], strides = [1, 1, 1, 1]} : vector<8x2x12x192xf32> to vector<7x1x8x96xf32>
    %14 = vector.shape_cast %13 : vector<7x1x8x96xf32> to vector<7x8x96xf32>
    %15 = vector.shape_cast %8 : vector<7x8x8xf32> to vector<56x8xf32>
    %16 = arith.truncf %15 : vector<56x8xf32> to vector<56x8xbf16>
    %c0_10 = arith.constant 0 : index
    %c0_11 = arith.constant 0 : index
    %c0_12 = arith.constant 0 : index
    %17 = vector.load %arg3[%c0_10, %c0_11, %c0_12] : memref<3x8x384xbf16, #tpu.memory_space<vmem>>, vector<1x8x384xbf16>
    %18 = vector.shape_cast %17 : vector<1x8x384xbf16> to vector<8x384xbf16>
    %cst_13 = arith.constant dense<0.000000e+00> : vector<56x384xf32>
    %19 = tpu.matmul %16, %18, %cst_13 {dimension_numbers = #tpu.dot_dimension_numbers<[1], [0], [0], [1], [0, 0, 1, 1], [], []>} : vector<56x8xbf16>, vector<8x384xbf16>, vector<56x384xf32> -> vector<56x384xf32>
    %20 = arith.addf %5, %19 : vector<56x384xf32>
    %21 = vector.shape_cast %10 : vector<7x8x4xf32> to vector<56x4xf32>
    %22 = arith.truncf %21 : vector<56x4xf32> to vector<56x4xbf16>
    %c0_14 = arith.constant 0 : index
    %c0_15 = arith.constant 0 : index
    %c0_16 = arith.constant 0 : index
    %23 = vector.load %arg4[%c0_14, %c0_15, %c0_16] : memref<3x4x384xbf16, #tpu.memory_space<vmem>>, vector<1x4x384xbf16>
    %24 = vector.shape_cast %23 : vector<1x4x384xbf16> to vector<4x384xbf16>
    %cst_17 = arith.constant dense<0.000000e+00> : vector<56x384xf32>
    %25 = tpu.matmul %22, %24, %cst_17 {dimension_numbers = #tpu.dot_dimension_numbers<[1], [0], [0], [1], [0, 0, 1, 1], [], []>} : vector<56x4xbf16>, vector<4x384xbf16>, vector<56x384xf32> -> vector<56x384xf32>
    %26 = arith.addf %20, %25 : vector<56x384xf32>
    %27 = vector.shape_cast %12 : vector<7x8x192xf32> to vector<56x192xf32>
    %28 = arith.truncf %27 : vector<56x192xf32> to vector<56x192xbf16>
    %c0_18 = arith.constant 0 : index
    %c0_19 = arith.constant 0 : index
    %c0_20 = arith.constant 0 : index
    %29 = vector.load %arg7[%c0_18, %c0_19, %c0_20] : memref<3x192x96xbf16, #tpu.memory_space<vmem>>, vector<1x192x96xbf16>
    %30 = vector.shape_cast %29 : vector<1x192x96xbf16> to vector<192x96xbf16>
    %cst_21 = arith.constant dense<0.000000e+00> : vector<56x96xf32>
    %31 = tpu.matmul %28, %30, %cst_21 {dimension_numbers = #tpu.dot_dimension_numbers<[1], [0], [0], [1], [0, 0, 1, 1], [], []>} : vector<56x192xbf16>, vector<192x96xbf16>, vector<56x96xf32> -> vector<56x96xf32>
    %32 = arith.addf %6, %31 : vector<56x96xf32>
    %33 = vector.shape_cast %14 : vector<7x8x96xf32> to vector<56x96xf32>
    %34 = arith.truncf %33 : vector<56x96xf32> to vector<56x96xbf16>
    %c0_22 = arith.constant 0 : index
    %c0_23 = arith.constant 0 : index
    %c0_24 = arith.constant 0 : index
    %35 = vector.load %arg8[%c0_22, %c0_23, %c0_24] : memref<3x96x96xbf16, #tpu.memory_space<vmem>>, vector<1x96x96xbf16>
    %36 = vector.shape_cast %35 : vector<1x96x96xbf16> to vector<96x96xbf16>
    %cst_25 = arith.constant dense<0.000000e+00> : vector<56x96xf32>
    %37 = tpu.matmul %34, %36, %cst_25 {dimension_numbers = #tpu.dot_dimension_numbers<[1], [0], [0], [1], [0, 0, 1, 1], [], []>} : vector<56x96xbf16>, vector<96x96xbf16>, vector<56x96xf32> -> vector<56x96xf32>
    %38 = arith.addf %32, %37 : vector<56x96xf32>
    %39 = vector.extract_strided_slice %1 {offsets = [0, 1, 0, 0], sizes = [7, 1, 8, 8], strides = [1, 1, 1, 1]} : vector<8x2x12x8xf32> to vector<7x1x8x8xf32>
    %40 = vector.shape_cast %39 : vector<7x1x8x8xf32> to vector<7x8x8xf32>
    %41 = vector.extract_strided_slice %1 {offsets = [0, 1, 1, 0], sizes = [7, 1, 8, 4], strides = [1, 1, 1, 1]} : vector<8x2x12x8xf32> to vector<7x1x8x4xf32>
    %42 = vector.shape_cast %41 : vector<7x1x8x4xf32> to vector<7x8x4xf32>
    %43 = vector.extract_strided_slice %4 {offsets = [0, 1, 0, 0], sizes = [7, 1, 8, 192], strides = [1, 1, 1, 1]} : vector<8x2x12x192xf32> to vector<7x1x8x192xf32>
    %44 = vector.shape_cast %43 : vector<7x1x8x192xf32> to vector<7x8x192xf32>
    %45 = vector.extract_strided_slice %4 {offsets = [0, 1, 1, 0], sizes = [7, 1, 8, 96], strides = [1, 1, 1, 1]} : vector<8x2x12x192xf32> to vector<7x1x8x96xf32>
    %46 = vector.shape_cast %45 : vector<7x1x8x96xf32> to vector<7x8x96xf32>
    %47 = vector.shape_cast %40 : vector<7x8x8xf32> to vector<56x8xf32>
    %48 = arith.truncf %47 : vector<56x8xf32> to vector<56x8xbf16>
    %c1 = arith.constant 1 : index
    %c0_26 = arith.constant 0 : index
    %c0_27 = arith.constant 0 : index
    %49 = vector.load %arg3[%c1, %c0_26, %c0_27] : memref<3x8x384xbf16, #tpu.memory_space<vmem>>, vector<1x8x384xbf16>
    %50 = vector.shape_cast %49 : vector<1x8x384xbf16> to vector<8x384xbf16>
    %cst_28 = arith.constant dense<0.000000e+00> : vector<56x384xf32>
    %51 = tpu.matmul %48, %50, %cst_28 {dimension_numbers = #tpu.dot_dimension_numbers<[1], [0], [0], [1], [0, 0, 1, 1], [], []>} : vector<56x8xbf16>, vector<8x384xbf16>, vector<56x384xf32> -> vector<56x384xf32>
    %52 = arith.addf %26, %51 : vector<56x384xf32>
    %53 = vector.shape_cast %42 : vector<7x8x4xf32> to vector<56x4xf32>
    %54 = arith.truncf %53 : vector<56x4xf32> to vector<56x4xbf16>
    %c1_29 = arith.constant 1 : index
    %c0_30 = arith.constant 0 : index
    %c0_31 = arith.constant 0 : index
    %55 = vector.load %arg4[%c1_29, %c0_30, %c0_31] : memref<3x4x384xbf16, #tpu.memory_space<vmem>>, vector<1x4x384xbf16>
    %56 = vector.shape_cast %55 : vector<1x4x384xbf16> to vector<4x384xbf16>
    %cst_32 = arith.constant dense<0.000000e+00> : vector<56x384xf32>
    %57 = tpu.matmul %54, %56, %cst_32 {dimension_numbers = #tpu.dot_dimension_numbers<[1], [0], [0], [1], [0, 0, 1, 1], [], []>} : vector<56x4xbf16>, vector<4x384xbf16>, vector<56x384xf32> -> vector<56x384xf32>
    %58 = arith.addf %52, %57 : vector<56x384xf32>
    %59 = vector.shape_cast %44 : vector<7x8x192xf32> to vector<56x192xf32>
    %60 = arith.truncf %59 : vector<56x192xf32> to vector<56x192xbf16>
    %c1_33 = arith.constant 1 : index
    %c0_34 = arith.constant 0 : index
    %c0_35 = arith.constant 0 : index
    %61 = vector.load %arg7[%c1_33, %c0_34, %c0_35] : memref<3x192x96xbf16, #tpu.memory_space<vmem>>, vector<1x192x96xbf16>
    %62 = vector.shape_cast %61 : vector<1x192x96xbf16> to vector<192x96xbf16>
    %cst_36 = arith.constant dense<0.000000e+00> : vector<56x96xf32>
    %63 = tpu.matmul %60, %62, %cst_36 {dimension_numbers = #tpu.dot_dimension_numbers<[1], [0], [0], [1], [0, 0, 1, 1], [], []>} : vector<56x192xbf16>, vector<192x96xbf16>, vector<56x96xf32> -> vector<56x96xf32>
    %64 = arith.addf %38, %63 : vector<56x96xf32>
    %65 = vector.shape_cast %46 : vector<7x8x96xf32> to vector<56x96xf32>
    %66 = arith.truncf %65 : vector<56x96xf32> to vector<56x96xbf16>
    %c1_37 = arith.constant 1 : index
    %c0_38 = arith.constant 0 : index
    %c0_39 = arith.constant 0 : index
    %67 = vector.load %arg8[%c1_37, %c0_38, %c0_39] : memref<3x96x96xbf16, #tpu.memory_space<vmem>>, vector<1x96x96xbf16>
    %68 = vector.shape_cast %67 : vector<1x96x96xbf16> to vector<96x96xbf16>
    %cst_40 = arith.constant dense<0.000000e+00> : vector<56x96xf32>
    %69 = tpu.matmul %66, %68, %cst_40 {dimension_numbers = #tpu.dot_dimension_numbers<[1], [0], [0], [1], [0, 0, 1, 1], [], []>} : vector<56x96xbf16>, vector<96x96xbf16>, vector<56x96xf32> -> vector<56x96xf32>
    %70 = arith.addf %64, %69 : vector<56x96xf32>
    %71 = arith.maximumf %8, %40 : vector<7x8x8xf32>
    %72 = arith.maximumf %10, %42 : vector<7x8x4xf32>
    %73 = vector.extract_strided_slice %1 {offsets = [1, 0, 0, 0], sizes = [7, 1, 8, 8], strides = [1, 1, 1, 1]} : vector<8x2x12x8xf32> to vector<7x1x8x8xf32>
    %74 = vector.shape_cast %73 : vector<7x1x8x8xf32> to vector<7x8x8xf32>
    %75 = vector.extract_strided_slice %1 {offsets = [1, 0, 1, 0], sizes = [7, 1, 8, 4], strides = [1, 1, 1, 1]} : vector<8x2x12x8xf32> to vector<7x1x8x4xf32>
    %76 = vector.shape_cast %75 : vector<7x1x8x4xf32> to vector<7x8x4xf32>
    %77 = vector.extract_strided_slice %4 {offsets = [1, 0, 0, 0], sizes = [7, 1, 8, 192], strides = [1, 1, 1, 1]} : vector<8x2x12x192xf32> to vector<7x1x8x192xf32>
    %78 = vector.shape_cast %77 : vector<7x1x8x192xf32> to vector<7x8x192xf32>
    %79 = vector.extract_strided_slice %4 {offsets = [1, 0, 1, 0], sizes = [7, 1, 8, 96], strides = [1, 1, 1, 1]} : vector<8x2x12x192xf32> to vector<7x1x8x96xf32>
    %80 = vector.shape_cast %79 : vector<7x1x8x96xf32> to vector<7x8x96xf32>
    %81 = vector.shape_cast %74 : vector<7x8x8xf32> to vector<56x8xf32>
    %82 = arith.truncf %81 : vector<56x8xf32> to vector<56x8xbf16>
    %c2 = arith.constant 2 : index
    %c0_41 = arith.constant 0 : index
    %c0_42 = arith.constant 0 : index
    %83 = vector.load %arg3[%c2, %c0_41, %c0_42] : memref<3x8x384xbf16, #tpu.memory_space<vmem>>, vector<1x8x384xbf16>
    %84 = vector.shape_cast %83 : vector<1x8x384xbf16> to vector<8x384xbf16>
    %cst_43 = arith.constant dense<0.000000e+00> : vector<56x384xf32>
    %85 = tpu.matmul %82, %84, %cst_43 {dimension_numbers = #tpu.dot_dimension_numbers<[1], [0], [0], [1], [0, 0, 1, 1], [], []>} : vector<56x8xbf16>, vector<8x384xbf16>, vector<56x384xf32> -> vector<56x384xf32>
    %86 = arith.addf %58, %85 : vector<56x384xf32>
    %87 = vector.shape_cast %76 : vector<7x8x4xf32> to vector<56x4xf32>
    %88 = arith.truncf %87 : vector<56x4xf32> to vector<56x4xbf16>
    %c2_44 = arith.constant 2 : index
    %c0_45 = arith.constant 0 : index
    %c0_46 = arith.constant 0 : index
    %89 = vector.load %arg4[%c2_44, %c0_45, %c0_46] : memref<3x4x384xbf16, #tpu.memory_space<vmem>>, vector<1x4x384xbf16>
    %90 = vector.shape_cast %89 : vector<1x4x384xbf16> to vector<4x384xbf16>
    %cst_47 = arith.constant dense<0.000000e+00> : vector<56x384xf32>
    %91 = tpu.matmul %88, %90, %cst_47 {dimension_numbers = #tpu.dot_dimension_numbers<[1], [0], [0], [1], [0, 0, 1, 1], [], []>} : vector<56x4xbf16>, vector<4x384xbf16>, vector<56x384xf32> -> vector<56x384xf32>
    %92 = arith.addf %86, %91 : vector<56x384xf32>
    %93 = vector.shape_cast %78 : vector<7x8x192xf32> to vector<56x192xf32>
    %94 = arith.truncf %93 : vector<56x192xf32> to vector<56x192xbf16>
    %c2_48 = arith.constant 2 : index
    %c0_49 = arith.constant 0 : index
    %c0_50 = arith.constant 0 : index
    %95 = vector.load %arg7[%c2_48, %c0_49, %c0_50] : memref<3x192x96xbf16, #tpu.memory_space<vmem>>, vector<1x192x96xbf16>
    %96 = vector.shape_cast %95 : vector<1x192x96xbf16> to vector<192x96xbf16>
    %cst_51 = arith.constant dense<0.000000e+00> : vector<56x96xf32>
    %97 = tpu.matmul %94, %96, %cst_51 {dimension_numbers = #tpu.dot_dimension_numbers<[1], [0], [0], [1], [0, 0, 1, 1], [], []>} : vector<56x192xbf16>, vector<192x96xbf16>, vector<56x96xf32> -> vector<56x96xf32>
    %98 = arith.addf %70, %97 : vector<56x96xf32>
    %99 = vector.shape_cast %80 : vector<7x8x96xf32> to vector<56x96xf32>
    %100 = arith.truncf %99 : vector<56x96xf32> to vector<56x96xbf16>
    %c2_52 = arith.constant 2 : index
    %c0_53 = arith.constant 0 : index
    %c0_54 = arith.constant 0 : index
    %101 = vector.load %arg8[%c2_52, %c0_53, %c0_54] : memref<3x96x96xbf16, #tpu.memory_space<vmem>>, vector<1x96x96xbf16>
    %102 = vector.shape_cast %101 : vector<1x96x96xbf16> to vector<96x96xbf16>
    %cst_55 = arith.constant dense<0.000000e+00> : vector<56x96xf32>
    %103 = tpu.matmul %100, %102, %cst_55 {dimension_numbers = #tpu.dot_dimension_numbers<[1], [0], [0], [1], [0, 0, 1, 1], [], []>} : vector<56x96xbf16>, vector<96x96xbf16>, vector<56x96xf32> -> vector<56x96xf32>
    %104 = arith.addf %98, %103 : vector<56x96xf32>
    %105 = arith.maximumf %71, %74 : vector<7x8x8xf32>
    %106 = arith.maximumf %72, %76 : vector<7x8x4xf32>
    %c0_56 = arith.constant 0 : index
    %c0_57 = arith.constant 0 : index
    %107 = vector.load %arg5[%c0_56, %c0_57] : memref<1x384xf32, #tpu.memory_space<vmem>>, vector<1x384xf32>
    %108 = vector.broadcast %107 : vector<1x384xf32> to vector<56x384xf32>
    %109 = arith.mulf %92, %108 : vector<56x384xf32>
    %c0_58 = arith.constant 0 : index
    %c0_59 = arith.constant 0 : index
    %110 = vector.load %arg6[%c0_58, %c0_59] : memref<1x384xf32, #tpu.memory_space<vmem>>, vector<1x384xf32>
    %111 = vector.broadcast %110 : vector<1x384xf32> to vector<56x384xf32>
    %112 = arith.addf %109, %111 : vector<56x384xf32>
    %cst_60 = arith.constant 0.000000e+00 : f32
    %113 = vector.broadcast %cst_60 : f32 to vector<56x384xf32>
    %114 = arith.maximumf %112, %113 : vector<56x384xf32>
    %c0_61 = arith.constant 0 : index
    %c0_62 = arith.constant 0 : index
    %115 = vector.load %arg9[%c0_61, %c0_62] : memref<1x96xf32, #tpu.memory_space<vmem>>, vector<1x96xf32>
    %116 = vector.broadcast %115 : vector<1x96xf32> to vector<56x96xf32>
    %117 = arith.mulf %104, %116 : vector<56x96xf32>
    %c0_63 = arith.constant 0 : index
    %c0_64 = arith.constant 0 : index
    %118 = vector.load %arg10[%c0_63, %c0_64] : memref<1x96xf32, #tpu.memory_space<vmem>>, vector<1x96xf32>
    %119 = vector.broadcast %118 : vector<1x96xf32> to vector<56x96xf32>
    %120 = arith.addf %117, %119 : vector<56x96xf32>
    %cst_65 = arith.constant 0.000000e+00 : f32
    %121 = vector.broadcast %cst_65 : f32 to vector<56x96xf32>
    %122 = arith.maximumf %120, %121 : vector<56x96xf32>
    %123 = vector.shape_cast %114 : vector<56x384xf32> to vector<7x8x384xf32>
    %c0_66 = arith.constant 0 : index
    %c0_67 = arith.constant 0 : index
    %c0_68 = arith.constant 0 : index
    %c0_69 = arith.constant 0 : index
    %124 = vector.load %arg11[%c0_66, %c0_67, %c0_68, %c0_69] : memref<1x7x8x384xf32, #tpu.memory_space<vmem>>, vector<1x7x8x384xf32>
    %125 = vector.shape_cast %124 : vector<1x7x8x384xf32> to vector<7x8x384xf32>
    %126 = vector.shape_cast %123 : vector<7x8x384xf32> to vector<1x7x8x384xf32>
    tpu.vector_store %arg11[%c0_66, %c0_67, %c0_68, %c0_69], %126 {strides = array<i32>} : memref<1x7x8x384xf32, #tpu.memory_space<vmem>>, vector<1x7x8x384xf32>,
    %127 = vector.shape_cast %122 : vector<56x96xf32> to vector<7x8x96xf32>
    %c0_70 = arith.constant 0 : index
    %c0_71 = arith.constant 0 : index
    %c0_72 = arith.constant 0 : index
    %c0_73 = arith.constant 0 : index
    %128 = vector.load %arg12[%c0_70, %c0_71, %c0_72, %c0_73] : memref<1x7x8x96xf32, #tpu.memory_space<vmem>>, vector<1x7x8x96xf32>
    %129 = vector.shape_cast %128 : vector<1x7x8x96xf32> to vector<7x8x96xf32>
    %130 = vector.shape_cast %127 : vector<7x8x96xf32> to vector<1x7x8x96xf32>
    tpu.vector_store %arg12[%c0_70, %c0_71, %c0_72, %c0_73], %130 {strides = array<i32>} : memref<1x7x8x96xf32, #tpu.memory_space<vmem>>, vector<1x7x8x96xf32>,
    %131 = vector.extract_strided_slice %105 {offsets = [0, 0, 0], sizes = [7, 8, 4], strides = [1, 1, 1]} : vector<7x8x8xf32> to vector<7x8x4xf32>
    %132 = vector.extract_strided_slice %105 {offsets = [0, 0, 4], sizes = [7, 8, 4], strides = [1, 1, 1]} : vector<7x8x8xf32> to vector<7x8x4xf32>
    %133 = arith.maximumf %131, %132 : vector<7x8x4xf32>
    %134 = arith.maximumf %133, %106 : vector<7x8x4xf32>
    %c0_74 = arith.constant 0 : index
    %c0_75 = arith.constant 0 : index
    %c0_76 = arith.constant 0 : index
    %c0_77 = arith.constant 0 : index
    %135 = vector.load %arg13[%c0_74, %c0_75, %c0_76, %c0_77] : memref<1x7x8x4xf32, #tpu.memory_space<vmem>>, vector<1x7x8x4xf32>
    %136 = vector.shape_cast %135 : vector<1x7x8x4xf32> to vector<7x8x4xf32>
    %137 = vector.shape_cast %134 : vector<7x8x4xf32> to vector<1x7x8x4xf32>
    tpu.vector_store %arg13[%c0_74, %c0_75, %c0_76, %c0_77], %137 {strides = array<i32>} : memref<1x7x8x4xf32, #tpu.memory_space<vmem>>, vector<1x7x8x4xf32>,
    return
  }
  func.func @transform_0(%arg0: i32) -> (i32, i32, i32, i32, i32) {
    %c0_i32 = arith.constant 0 : i32
    %c0_i32_0 = arith.constant 0 : i32
    %c0_i32_1 = arith.constant 0 : i32
    %c0_i32_2 = arith.constant 0 : i32
    %c0_i32_3 = arith.constant 0 : i32
    return %arg0, %c0_i32, %c0_i32_0, %c0_i32_1, %c0_i32_2 : i32, i32, i32, i32, i32
  }
  func.func @transform_1(%arg0: i32) -> (i32, i32, i32, i32, i32) {
    %c0_i32 = arith.constant 0 : i32
    %c0_i32_0 = arith.constant 0 : i32
    %c0_i32_1 = arith.constant 0 : i32
    %c0_i32_2 = arith.constant 0 : i32
    %c0_i32_3 = arith.constant 0 : i32
    return %arg0, %c0_i32, %c0_i32_0, %c0_i32_1, %c0_i32_2 : i32, i32, i32, i32, i32
  }
  func.func @transform_2(%arg0: i32) -> (i32, i32, i32) {
    %c0_i32 = arith.constant 0 : i32
    %c0_i32_0 = arith.constant 0 : i32
    %c0_i32_1 = arith.constant 0 : i32
    %c0_i32_2 = arith.constant 0 : i32
    return %c0_i32, %c0_i32_0, %c0_i32_1 : i32, i32, i32
  }
  func.func @transform_3(%arg0: i32) -> (i32, i32, i32) {
    %c0_i32 = arith.constant 0 : i32
    %c0_i32_0 = arith.constant 0 : i32
    %c0_i32_1 = arith.constant 0 : i32
    %c0_i32_2 = arith.constant 0 : i32
    return %c0_i32, %c0_i32_0, %c0_i32_1 : i32, i32, i32
  }
  func.func @transform_4(%arg0: i32) -> (i32, i32) {
    %c0_i32 = arith.constant 0 : i32
    %c0_i32_0 = arith.constant 0 : i32
    %c0_i32_1 = arith.constant 0 : i32
    return %c0_i32, %c0_i32_0 : i32, i32
  }
  func.func @transform_5(%arg0: i32) -> (i32, i32) {
    %c0_i32 = arith.constant 0 : i32
    %c0_i32_0 = arith.constant 0 : i32
    %c0_i32_1 = arith.constant 0 : i32
    return %c0_i32, %c0_i32_0 : i32, i32
  }
  func.func @transform_6(%arg0: i32) -> (i32, i32, i32) {
    %c0_i32 = arith.constant 0 : i32
    %c0_i32_0 = arith.constant 0 : i32
    %c0_i32_1 = arith.constant 0 : i32
    %c0_i32_2 = arith.constant 0 : i32
    return %c0_i32, %c0_i32_0, %c0_i32_1 : i32, i32, i32
  }
  func.func @transform_7(%arg0: i32) -> (i32, i32, i32) {
    %c0_i32 = arith.constant 0 : i32
    %c0_i32_0 = arith.constant 0 : i32
    %c0_i32_1 = arith.constant 0 : i32
    %c0_i32_2 = arith.constant 0 : i32
    return %c0_i32, %c0_i32_0, %c0_i32_1 : i32, i32, i32
  }
  func.func @transform_8(%arg0: i32) -> (i32, i32) {
    %c0_i32 = arith.constant 0 : i32
    %c0_i32_0 = arith.constant 0 : i32
    %c0_i32_1 = arith.constant 0 : i32
    return %c0_i32, %c0_i32_0 : i32, i32
  }
  func.func @transform_9(%arg0: i32) -> (i32, i32) {
    %c0_i32 = arith.constant 0 : i32
    %c0_i32_0 = arith.constant 0 : i32
    %c0_i32_1 = arith.constant 0 : i32
    return %c0_i32, %c0_i32_0 : i32, i32
  }
  func.func @transform_10(%arg0: i32) -> (i32, i32, i32, i32) {
    %c0_i32 = arith.constant 0 : i32
    %c0_i32_0 = arith.constant 0 : i32
    %c0_i32_1 = arith.constant 0 : i32
    %c0_i32_2 = arith.constant 0 : i32
    return %arg0, %c0_i32, %c0_i32_0, %c0_i32_1 : i32, i32, i32, i32
  }
  func.func @transform_11(%arg0: i32) -> (i32, i32, i32, i32) {
    %c0_i32 = arith.constant 0 : i32
    %c0_i32_0 = arith.constant 0 : i32
    %c0_i32_1 = arith.constant 0 : i32
    %c0_i32_2 = arith.constant 0 : i32
    return %arg0, %c0_i32, %c0_i32_0, %c0_i32_1 : i32, i32, i32, i32
  }
  func.func @transform_12(%arg0: i32) -> (i32, i32, i32, i32) {
    %c0_i32 = arith.constant 0 : i32
    %c0_i32_0 = arith.constant 0 : i32
    %c0_i32_1 = arith.constant 0 : i32
    %c0_i32_2 = arith.constant 0 : i32
    return %arg0, %c0_i32, %c0_i32_0, %c0_i32_1 : i32, i32, i32, i32
  }
}

</mosaic_0001>

<bundles_post_ra>
// kernel: inception_b_forward.3
= control target key start
LH: loop header
LB: loop body
LE: loop exit
PB: predicated region body
PF: predicated region fallthrough
CT: control target
= control target key end

     0   :  { %s691_s15 = smov 0   ;;  %s905_s0 = inlined_call_operand.vmem [shape: f32[512,4], index: 0, kind: input, shape index: {}]   ;;  %s906_s1 = inlined_call_operand.vmem [shape: bf16[4,64], index: 1, kind: input, shape index: {}]   ;;  %s907_s2 = inlined_call_operand.vmem [shape: f32[1,64], index: 2, kind: input, shape index: {}]   ;;  %s908_s3 = inlined_call_operand.vmem [shape: f32[1,64], index: 3, kind: input, shape index: {}]   ;;  %s909_s4 = inlined_call_operand.vmem [shape: bf16[512,64], index: 4, kind: output, shape index: {}]  }
   0x1 LB: > { %s618_s16 = sadd.s32 4294967295, %s664_s15   ;;  %p622_p0 = scmp.ge.s32.totalorder %s664_s15, 1  ;;  %s664_s15 = sphi %s691_s15, %s14_s15  }
   0x2   : > { %p163_p1 = scmp.lt.s32.totalorder %s664_s15, 3 }
   0x4   : > { %p164_p2 = pnand %p622_p0, %p163_p1 }
   0x5   : > { %s623_s19 = sshll.u32 (!%p164_p2), %s618_s16, 5 }
   0x6   : > { %167 = sbr.rel (%p164_p2) target bundleno = 217 (0xd9), region = 36  ;;  %p190_p3 = scmp.lt.s32.totalorder (!%p164_p2), %s623_s19, 63 }
   0xb   : > { %v250_v0 = vld [vmem:[%s906_s1] sm:$0x3]  ;;  %vm300_vm0 = vcmask 1041408   ;;  %s911_s19 = smov (!%p190_p3, %s623_s19), 63  ;;  %vm251_vm1 = vcmask 31744   ;;  %vm529_vm2 = vcmask 519168  }
   0xc   : > { %v302_v1 = vsel %vm300_vm0, %v250_v0, 0  ;;  %s624_s20 = sshll.u32 %s911_s19, 3  ;;  %v761_v50 = vld [vmem:[%s907_s2] ss:$0 sm:$0xff]  ;;  %s626_s28 = sshll.u32 %s911_s19, 2 }
   0xd   : > { %311 = vmatpush.bf16.msra.mxu0 %v302_v1  ;;  %645 = vmatpush.bf16.msra.mxu1 %v302_v1  ;;  %s708_s23 = scalar_lea.vmem %s905_s0, %s624_s20  ;;  %v766_v51 = vld [vmem:[%s908_s3] ss:$0 sm:$0xff]  ;;  %s776_s5 = scalar_lea.vmem %s909_s4, %s626_s28 }
   0xe   : > { %646 = vmatpush.bf16.msra.mxu2 %v302_v1  ;;  %647 = vmatpush.bf16.msra.mxu3 %v302_v1  ;;  %v202_v2 = vld [vmem:[%s708_s23] sm:$0xff]  ;;  %v203_v3 = vld [vmem:[%s708_s23 + $0x8] sm:$0xff]  ;;  %v204_v14 = vld [vmem:[%s708_s23 + $0x10] sm:$0xff] }
   0xf   : > { %v210_v4 = vld [vmem:[%s708_s23 + $0x40] sm:$0xff]  ;;  %v234_v5 = vpack.c.bf16 %v203_v3, %v202_v2  ;;  %v211_v6 = vld [vmem:[%s708_s23 + $0x48] sm:$0xff]  ;;  %v205_v15 = vld [vmem:[%s708_s23 + $0x18] sm:$0xff] }
  0x10   : > { %v218_v7 = vld [vmem:[%s708_s23 + $0x80] sm:$0xff]  ;;  %v219_v8 = vld [vmem:[%s708_s23 + $0x88] sm:$0xff]  ;;  %v238_v9 = vpack.c.bf16 %v211_v6, %v210_v4  ;;  %v212_v16 = vld [vmem:[%s708_s23 + $0x50] sm:$0xff]  ;;  %v235_v22 = vpack.c.bf16 %v205_v15, %v204_v14 }
  0x11   : > { %v242_v10 = vpack.c.bf16 %v219_v8, %v218_v7  ;;  %v226_v11 = vld [vmem:[%s708_s23 + $0xc0] sm:$0xff]  ;;  %v227_v12 = vld [vmem:[%s708_s23 + $0xc8] sm:$0xff]  ;;  %627 = vmatmul.msk.bf16.vlgmr.msra.gmra.mxu0 %vm251_vm1, %v234_v5  ;;  %v213_v17 = vld [vmem:[%s708_s23 + $0x58] sm:$0xff] }
  0x12   : > { %v246_v13 = vpack.c.bf16 %v227_v12, %v226_v11  ;;  %631 = vmatmul.msk.bf16.vlgmr.msra.gmra.mxu1 %vm251_vm1, %v238_v9  ;;  %v220_v18 = vld [vmem:[%s708_s23 + $0x90] sm:$0xff]  ;;  %v221_v19 = vld [vmem:[%s708_s23 + $0x98] sm:$0xff]  ;;  %v239_v23 = vpack.c.bf16 %v213_v17, %v212_v16  ;;  %v206_v26 = vld [vmem:[%s708_s23 + $0x20] sm:$0xff] }
  0x13   : > { %635 = vmatmul.msk.bf16.vlgmr.msra.gmra.mxu2 %vm251_vm1, %v242_v10  ;;  %v228_v20 = vld [vmem:[%s708_s23 + $0xd0] sm:$0xff]  ;;  %v229_v21 = vld [vmem:[%s708_s23 + $0xd8] sm:$0xff]  ;;  %v243_v24 = vpack.c.bf16 %v221_v19, %v220_v18  ;;  %v207_v27 = vld [vmem:[%s708_s23 + $0x28] sm:$0xff] }
  0x14   : > { %639 = vmatmul.msk.bf16.vlgmr.msra.gmra.mxu3 %vm251_vm1, %v246_v13  ;;  %v247_v25 = vpack.c.bf16 %v229_v21, %v228_v20  ;;  %v214_v28 = vld [vmem:[%s708_s23 + $0x60] sm:$0xff]  ;;  %v215_v29 = vld [vmem:[%s708_s23 + $0x68] sm:$0xff]  ;;  %v236_v34 = vpack.c.bf16 %v207_v27, %v206_v26  ;;  %v208_v38 = vld [vmem:[%s708_s23 + $0x30] sm:$0xff] }
  0x15   : > { %v222_v30 = vld [vmem:[%s708_s23 + $0xa0] sm:$0xff]  ;;  %v223_v31 = vld [vmem:[%s708_s23 + $0xa8] sm:$0xff]  ;;  %v240_v35 = vpack.c.bf16 %v215_v29, %v214_v28  ;;  %v209_v39 = vld [vmem:[%s708_s23 + $0x38] sm:$0xff] }
  0x16   : > { %v230_v32 = vld [vmem:[%s708_s23 + $0xe0] sm:$0xff]  ;;  %v231_v33 = vld [vmem:[%s708_s23 + $0xe8] sm:$0xff]  ;;  %v244_v36 = vpack.c.bf16 %v223_v31, %v222_v30  ;;  %v216_v40 = vld [vmem:[%s708_s23 + $0x70] sm:$0xff]  ;;  %v237_v46 = vpack.c.bf16 %v209_v39, %v208_v38 }
  0x17   : > { %v248_v37 = vpack.c.bf16 %v231_v33, %v230_v32  ;;  %v217_v41 = vld [vmem:[%s708_s23 + $0x78] sm:$0xff]  ;;  %v224_v42 = vld [vmem:[%s708_s23 + $0xb0] sm:$0xff] }
  0x18   : > { %v225_v43 = vld [vmem:[%s708_s23 + $0xb8] sm:$0xff]  ;;  %v232_v44 = vld [vmem:[%s708_s23 + $0xf0] sm:$0xff]  ;;  %v241_v47 = vpack.c.bf16 %v217_v41, %v216_v40 }
  0x19   : > { %v233_v45 = vld [vmem:[%s708_s23 + $0xf8] sm:$0xff]  ;;  %v245_v48 = vpack.c.bf16 %v225_v43, %v224_v42 }
  0x1a   : > { %v249_v49 = vpack.c.bf16 %v233_v45, %v232_v44 }
  0x21   : > { %628 = vmatmul.msk.bf16.gmra.mxu0 %vm251_vm1, %v235_v22 }
  0x22   : > { %632 = vmatmul.msk.bf16.gmra.mxu1 %vm251_vm1, %v239_v23 }
  0x23   : > { %636 = vmatmul.msk.bf16.gmra.mxu2 %vm251_vm1, %v243_v24 }
  0x24   : > { %640 = vmatmul.msk.bf16.gmra.mxu3 %vm251_vm1, %v247_v25 }
  0x31   : > { %629 = vmatmul.msk.bf16.gmra.mxu0 %vm251_vm1, %v236_v34 }
  0x32   : > { %633 = vmatmul.msk.bf16.gmra.mxu1 %vm251_vm1, %v240_v35 }
  0x33   : > { %637 = vmatmul.msk.bf16.gmra.mxu2 %vm251_vm1, %v244_v36 }
  0x34   : > { %641 = vmatmul.msk.bf16.gmra.mxu3 %vm251_vm1, %v248_v37 }
  0x41   : > { %630 = vmatmul.msk.bf16.gmra.mxu0 %vm251_vm1, %v237_v46 }
  0x42   : > { %634 = vmatmul.msk.bf16.gmra.mxu1 %vm251_vm1, %v241_v47 }
  0x43   : > { %638 = vmatmul.msk.bf16.gmra.mxu2 %vm251_vm1, %v245_v48 }
  0x44   : > { %642 = vmatmul.msk.bf16.gmra.mxu3 %vm251_vm1, %v249_v49 }
  0x8e   : > { %v313_v52 = vpop.f32.mrf.mxu0 }
  0x8f   : > { %v397_v53 = vmul.f32 %v761_v50, %v313_v52  ;;  %v333_v54 = vpop.f32.mrf.mxu1 }
  0x90   : > { %v405_v55 = vmul.f32 %v761_v50, %v333_v54 }
  0x91   : > { %v433_v56 = vadd.f32 %v766_v51, %v397_v53 }
  0x92   : > { %v441_v57 = vadd.f32 %v766_v51, %v405_v55 }
  0x93   : > { %v465_v58 = vmax.f32 %v433_v56, 0.0 }
  0x94   : > { %v473_v59 = vmax.f32 %v441_v57, 0.0 }
  0x95   : > { %v497_v60 = vpack.c.bf16 %v465_v58, %v465_v58 }
  0x96   : > { %v353_v61 = vpop.f32.mrf.mxu2  ;;  %v505_v62 = vpack.c.bf16 %v473_v59, %v473_v59  ;;  %v315_v1 = vpop.f32.mrf.mxu0 }
  0x97   : > { %v413_v63 = vmul.f32 %v761_v50, %v353_v61  ;;  %v373_v0 = vpop.f32.mrf.mxu3  ;;  %530 = vst.msk [vmem:[%s776_s5] sm:$0xf] %vm529_vm2, %v497_v60  ;;  %v398_v3 = vmul.f32 %v761_v50, %v315_v1  ;;  %v335_v4 = vpop.f32.mrf.mxu1 }
  0x98   : > { %v421_v2 = vmul.f32 %v761_v50, %v373_v0  ;;  %538 = vst.msk [vmem:[%s776_s5 + $0x20] sm:$0xf] %vm529_vm2, %v505_v62  ;;  %v406_v6 = vmul.f32 %v761_v50, %v335_v4 }
  0x99   : > { %v449_v5 = vadd.f32 %v766_v51, %v413_v63  ;;  %v434_v8 = vadd.f32 %v766_v51, %v398_v3 }
  0x9a   : > { %v457_v7 = vadd.f32 %v766_v51, %v421_v2  ;;  %v442_v10 = vadd.f32 %v766_v51, %v406_v6 }
  0x9b   : > { %v481_v9 = vmax.f32 %v449_v5, 0.0  ;;  %v466_v12 = vmax.f32 %v434_v8, 0.0 }
  0x9c   : > { %v489_v11 = vmax.f32 %v457_v7, 0.0  ;;  %v474_v14 = vmax.f32 %v442_v10, 0.0 }
  0x9d   : > { %v513_v13 = vpack.c.bf16 %v481_v9, %v481_v9  ;;  %v498_v16 = vpack.c.bf16 %v466_v12, %v466_v12 }
  0x9e   : > { %v521_v15 = vpack.c.bf16 %v489_v11, %v489_v11  ;;  %v355_v17 = vpop.f32.mrf.mxu2  ;;  %v506_v18 = vpack.c.bf16 %v474_v14, %v474_v14  ;;  %v318_v21 = vpop.f32.mrf.mxu0 }
  0x9f   : > { %546 = vst.msk [vmem:[%s776_s5 + $0x40] sm:$0xf] %vm529_vm2, %v513_v13  ;;  %v414_v19 = vmul.f32 %v761_v50, %v355_v17  ;;  %v375_v20 = vpop.f32.mrf.mxu3  ;;  %v399_v23 = vmul.f32 %v761_v50, %v318_v21  ;;  %v338_v24 = vpop.f32.mrf.mxu1 }
  0xa0   : > { %554 = vst.msk [vmem:[%s776_s5 + $0x60] sm:$0xf] %vm529_vm2, %v521_v15  ;;  %v422_v22 = vmul.f32 %v761_v50, %v375_v20  ;;  %v407_v26 = vmul.f32 %v761_v50, %v338_v24 }
  0xa1   : > { %531 = vst.msk [vmem:[%s776_s5 + $0x4] sm:$0xf] %vm529_vm2, %v498_v16  ;;  %v450_v25 = vadd.f32 %v766_v51, %v414_v19  ;;  %v435_v28 = vadd.f32 %v766_v51, %v399_v23 }
  0xa2   : > { %539 = vst.msk [vmem:[%s776_s5 + $0x24] sm:$0xf] %vm529_vm2, %v506_v18  ;;  %v458_v27 = vadd.f32 %v766_v51, %v422_v22  ;;  %v443_v30 = vadd.f32 %v766_v51, %v407_v26 }
  0xa3   : > { %v482_v29 = vmax.f32 %v450_v25, 0.0  ;;  %v467_v32 = vmax.f32 %v435_v28, 0.0 }
  0xa4   : > { %v490_v31 = vmax.f32 %v458_v27, 0.0  ;;  %v475_v34 = vmax.f32 %v443_v30, 0.0 }
  0xa5   : > { %v514_v33 = vpack.c.bf16 %v482_v29, %v482_v29  ;;  %v499_v36 = vpack.c.bf16 %v467_v32, %v467_v32 }
  0xa6   : > { %v522_v35 = vpack.c.bf16 %v490_v31, %v490_v31  ;;  %v358_v37 = vpop.f32.mrf.mxu2  ;;  %v507_v38 = vpack.c.bf16 %v475_v34, %v475_v34  ;;  %v320_v41 = vpop.f32.mrf.mxu0 }
  0xa7   : > { %547 = vst.msk [vmem:[%s776_s5 + $0x44] sm:$0xf] %vm529_vm2, %v514_v33  ;;  %v415_v39 = vmul.f32 %v761_v50, %v358_v37  ;;  %v378_v40 = vpop.f32.mrf.mxu3  ;;  %v400_v43 = vmul.f32 %v761_v50, %v320_v41  ;;  %v340_v44 = vpop.f32.mrf.mxu1 }
  0xa8   : > { %555 = vst.msk [vmem:[%s776_s5 + $0x64] sm:$0xf] %vm529_vm2, %v522_v35  ;;  %v423_v42 = vmul.f32 %v761_v50, %v378_v40  ;;  %v408_v46 = vmul.f32 %v761_v50, %v340_v44 }
  0xa9   : > { %532 = vst.msk [vmem:[%s776_s5 + $0x8] sm:$0xf] %vm529_vm2, %v499_v36  ;;  %v451_v45 = vadd.f32 %v766_v51, %v415_v39  ;;  %v436_v48 = vadd.f32 %v766_v51, %v400_v43 }
  0xaa   : > { %540 = vst.msk [vmem:[%s776_s5 + $0x28] sm:$0xf] %vm529_vm2, %v507_v38  ;;  %v459_v47 = vadd.f32 %v766_v51, %v423_v42  ;;  %v444_v52 = vadd.f32 %v766_v51, %v408_v46 }
  0xab   : > { %v483_v49 = vmax.f32 %v451_v45, 0.0  ;;  %v468_v54 = vmax.f32 %v436_v48, 0.0 }
  0xac   : > { %v491_v53 = vmax.f32 %v459_v47, 0.0  ;;  %v476_v56 = vmax.f32 %v444_v52, 0.0 }
  0xad   : > { %v515_v55 = vpack.c.bf16 %v483_v49, %v483_v49  ;;  %v500_v58 = vpack.c.bf16 %v468_v54, %v468_v54 }
  0xae   : > { %v523_v57 = vpack.c.bf16 %v491_v53, %v491_v53  ;;  %v360_v59 = vpop.f32.mrf.mxu2  ;;  %v508_v60 = vpack.c.bf16 %v476_v56, %v476_v56  ;;  %v323_v63 = vpop.f32.mrf.mxu0 }
  0xaf   : > { %548 = vst.msk [vmem:[%s776_s5 + $0x48] sm:$0xf] %vm529_vm2, %v515_v55  ;;  %v416_v61 = vmul.f32 %v761_v50, %v360_v59  ;;  %v380_v62 = vpop.f32.mrf.mxu3  ;;  %v401_v1 = vmul.f32 %v761_v50, %v323_v63  ;;  %v343_v2 = vpop.f32.mrf.mxu1 }
  0xb0   : > { %556 = vst.msk [vmem:[%s776_s5 + $0x68] sm:$0xf] %vm529_vm2, %v523_v57  ;;  %v424_v0 = vmul.f32 %v761_v50, %v380_v62  ;;  %v409_v4 = vmul.f32 %v761_v50, %v343_v2 }
  0xb1   : > { %533 = vst.msk [vmem:[%s776_s5 + $0xc] sm:$0xf] %vm529_vm2, %v500_v58  ;;  %v452_v3 = vadd.f32 %v766_v51, %v416_v61  ;;  %v437_v6 = vadd.f32 %v766_v51, %v401_v1 }
  0xb2   : > { %541 = vst.msk [vmem:[%s776_s5 + $0x2c] sm:$0xf] %vm529_vm2, %v508_v60  ;;  %v460_v5 = vadd.f32 %v766_v51, %v424_v0  ;;  %v445_v8 = vadd.f32 %v766_v51, %v409_v4 }
  0xb3   : > { %v484_v7 = vmax.f32 %v452_v3, 0.0  ;;  %v469_v10 = vmax.f32 %v437_v6, 0.0 }
  0xb4   : > { %v492_v9 = vmax.f32 %v460_v5, 0.0  ;;  %v477_v12 = vmax.f32 %v445_v8, 0.0 }
  0xb5   : > { %v516_v11 = vpack.c.bf16 %v484_v7, %v484_v7  ;;  %v501_v14 = vpack.c.bf16 %v469_v10, %v469_v10 }
  0xb6   : > { %v524_v13 = vpack.c.bf16 %v492_v9, %v492_v9  ;;  %v363_v15 = vpop.f32.mrf.mxu2  ;;  %v509_v16 = vpack.c.bf16 %v477_v12, %v477_v12  ;;  %v325_v19 = vpop.f32.mrf.mxu0 }
  0xb7   : > { %549 = vst.msk [vmem:[%s776_s5 + $0x4c] sm:$0xf] %vm529_vm2, %v516_v11  ;;  %v417_v17 = vmul.f32 %v761_v50, %v363_v15  ;;  %v383_v18 = vpop.f32.mrf.mxu3  ;;  %v402_v21 = vmul.f32 %v761_v50, %v325_v19  ;;  %v345_v22 = vpop.f32.mrf.mxu1 }
  0xb8   : > { %557 = vst.msk [vmem:[%s776_s5 + $0x6c] sm:$0xf] %vm529_vm2, %v524_v13  ;;  %v425_v20 = vmul.f32 %v761_v50, %v383_v18  ;;  %v410_v24 = vmul.f32 %v761_v50, %v345_v22 }
  0xb9   : > { %534 = vst.msk [vmem:[%s776_s5 + $0x10] sm:$0xf] %vm529_vm2, %v501_v14  ;;  %v453_v23 = vadd.f32 %v766_v51, %v417_v17  ;;  %v438_v26 = vadd.f32 %v766_v51, %v402_v21 }
  0xba   : > { %542 = vst.msk [vmem:[%s776_s5 + $0x30] sm:$0xf] %vm529_vm2, %v509_v16  ;;  %v461_v25 = vadd.f32 %v766_v51, %v425_v20  ;;  %v446_v28 = vadd.f32 %v766_v51, %v410_v24 }
  0xbb   : > { %v485_v27 = vmax.f32 %v453_v23, 0.0  ;;  %v470_v30 = vmax.f32 %v438_v26, 0.0 }
  0xbc   : > { %v493_v29 = vmax.f32 %v461_v25, 0.0  ;;  %v478_v32 = vmax.f32 %v446_v28, 0.0 }
  0xbd   : > { %v517_v31 = vpack.c.bf16 %v485_v27, %v485_v27  ;;  %v502_v34 = vpack.c.bf16 %v470_v30, %v470_v30 }
  0xbe   : > { %v525_v33 = vpack.c.bf16 %v493_v29, %v493_v29  ;;  %v365_v35 = vpop.f32.mrf.mxu2  ;;  %v510_v36 = vpack.c.bf16 %v478_v32, %v478_v32  ;;  %v328_v39 = vpop.f32.mrf.mxu0 }
  0xbf   : > { %550 = vst.msk [vmem:[%s776_s5 + $0x50] sm:$0xf] %vm529_vm2, %v517_v31  ;;  %v418_v37 = vmul.f32 %v761_v50, %v365_v35  ;;  %v385_v38 = vpop.f32.mrf.mxu3  ;;  %v403_v41 = vmul.f32 %v761_v50, %v328_v39  ;;  %v348_v42 = vpop.f32.mrf.mxu1 }
  0xc0   : > { %558 = vst.msk [vmem:[%s776_s5 + $0x70] sm:$0xf] %vm529_vm2, %v525_v33  ;;  %v426_v40 = vmul.f32 %v761_v50, %v385_v38  ;;  %v411_v44 = vmul.f32 %v761_v50, %v348_v42 }
  0xc1   : > { %535 = vst.msk [vmem:[%s776_s5 + $0x14] sm:$0xf] %vm529_vm2, %v502_v34  ;;  %v454_v43 = vadd.f32 %v766_v51, %v418_v37  ;;  %v439_v46 = vadd.f32 %v766_v51, %v403_v41 }
  0xc2   : > { %543 = vst.msk [vmem:[%s776_s5 + $0x34] sm:$0xf] %vm529_vm2, %v510_v36  ;;  %v462_v45 = vadd.f32 %v766_v51, %v426_v40  ;;  %v447_v48 = vadd.f32 %v766_v51, %v411_v44 }
  0xc3   : > { %v486_v47 = vmax.f32 %v454_v43, 0.0  ;;  %v471_v52 = vmax.f32 %v439_v46, 0.0 }
  0xc4   : > { %v494_v49 = vmax.f32 %v462_v45, 0.0  ;;  %v479_v54 = vmax.f32 %v447_v48, 0.0 }
  0xc5   : > { %v518_v53 = vpack.c.bf16 %v486_v47, %v486_v47  ;;  %v503_v56 = vpack.c.bf16 %v471_v52, %v471_v52 }
  0xc6   : > { %v526_v55 = vpack.c.bf16 %v494_v49, %v494_v49  ;;  %v368_v57 = vpop.f32.mrf.mxu2  ;;  %v511_v58 = vpack.c.bf16 %v479_v54, %v479_v54  ;;  %v330_v61 = vpop.f32.mrf.mxu0 }
  0xc7   : > { %551 = vst.msk [vmem:[%s776_s5 + $0x54] sm:$0xf] %vm529_vm2, %v518_v53  ;;  %v419_v59 = vmul.f32 %v761_v50, %v368_v57  ;;  %v388_v60 = vpop.f32.mrf.mxu3  ;;  %v404_v63 = vmul.f32 %v761_v50, %v330_v61  ;;  %v350_v0 = vpop.f32.mrf.mxu1 }
  0xc8   : > { %559 = vst.msk [vmem:[%s776_s5 + $0x74] sm:$0xf] %vm529_vm2, %v526_v55  ;;  %v427_v62 = vmul.f32 %v761_v50, %v388_v60  ;;  %v412_v2 = vmul.f32 %v761_v50, %v350_v0 }
  0xc9   : > { %536 = vst.msk [vmem:[%s776_s5 + $0x18] sm:$0xf] %vm529_vm2, %v503_v56  ;;  %v455_v1 = vadd.f32 %v766_v51, %v419_v59  ;;  %v440_v4 = vadd.f32 %v766_v51, %v404_v63 }
  0xca   : > { %544 = vst.msk [vmem:[%s776_s5 + $0x38] sm:$0xf] %vm529_vm2, %v511_v58  ;;  %v463_v3 = vadd.f32 %v766_v51, %v427_v62  ;;  %v448_v6 = vadd.f32 %v766_v51, %v412_v2 }
  0xcb   : > { %v487_v5 = vmax.f32 %v455_v1, 0.0  ;;  %v472_v8 = vmax.f32 %v440_v4, 0.0 }
  0xcc   : > { %v495_v7 = vmax.f32 %v463_v3, 0.0  ;;  %v480_v10 = vmax.f32 %v448_v6, 0.0 }
  0xcd   : > { %v519_v9 = vpack.c.bf16 %v487_v5, %v487_v5  ;;  %v504_v12 = vpack.c.bf16 %v472_v8, %v472_v8 }
  0xce   : > { %v527_v11 = vpack.c.bf16 %v495_v7, %v495_v7  ;;  %v370_v13 = vpop.f32.mrf.mxu2  ;;  %v512_v14 = vpack.c.bf16 %v480_v10, %v480_v10 }
  0xcf   : > { %552 = vst.msk [vmem:[%s776_s5 + $0x58] sm:$0xf] %vm529_vm2, %v519_v9  ;;  %v420_v15 = vmul.f32 %v761_v50, %v370_v13  ;;  %v390_v16 = vpop.f32.mrf.mxu3 }
  0xd0   : > { %560 = vst.msk [vmem:[%s776_s5 + $0x78] sm:$0xf] %vm529_vm2, %v527_v11  ;;  %v428_v17 = vmul.f32 %v761_v50, %v390_v16 }
  0xd1   : > { %537 = vst.msk [vmem:[%s776_s5 + $0x1c] sm:$0xf] %vm529_vm2, %v504_v12  ;;  %v456_v18 = vadd.f32 %v766_v51, %v420_v15 }
  0xd2   : > { %545 = vst.msk [vmem:[%s776_s5 + $0x3c] sm:$0xf] %vm529_vm2, %v512_v14  ;;  %v464_v19 = vadd.f32 %v766_v51, %v428_v17 }
  0xd3   : > { %v488_v20 = vmax.f32 %v456_v18, 0.0 }
  0xd4   : > { %v496_v21 = vmax.f32 %v464_v19, 0.0 }
  0xd5   : > { %v520_v22 = vpack.c.bf16 %v488_v20, %v488_v20 }
  0xd6   : > { %v528_v23 = vpack.c.bf16 %v496_v21, %v496_v21 }
  0xd7   : > { %553 = vst.msk [vmem:[%s776_s5 + $0x5c] sm:$0xf] %vm529_vm2, %v520_v22 }
  0xd8   : > { %561 = vst.msk [vmem:[%s776_s5 + $0x7c] sm:$0xf] %vm529_vm2, %v528_v23 }
  0xd9 PF: > { %s14_s15 = sadd.s32 1, %s664_s15  }
  0xda   : > { %p11_p4 = scmp.ge.s32.totalorder %s14_s15, 4  }
  0xdc   :  { %13 = sbr.rel (!%p11_p4) target bundleno = 1 (0x1), region = 66 }

// kernel: inception_b_forward.4
= control target key start
LH: loop header
LB: loop body
LE: loop exit
PB: predicated region body
PF: predicated region fallthrough
CT: control target
= control target key end

     0   :  { %s4119_s15 = smov 0   ;;  %s6273_s0 = inlined_call_operand.vmem [shape: bf16[2,18,26,64], index: 0, kind: input, shape index: {}]   ;;  %s6274_s1 = inlined_call_operand.vmem [shape: bf16[9,64,96], index: 1, kind: input, shape index: {}]   ;;  %s6275_s2 = inlined_call_operand.vmem [shape: f32[1,96], index: 2, kind: input, shape index: {}]   ;;  %s6276_s3 = inlined_call_operand.vmem [shape: f32[1,96], index: 3, kind: input, shape index: {}]   ;;  %s6277_s4 = inlined_call_operand.vmem [shape: bf16[2,16,24,96], index: 4, kind: output, shape index: {}]  }
   0x1 LB: > { %s3487_s16 = sadd.s32 4294967295, %s4092_s15   ;;  %p3491_p0 = scmp.ge.s32.totalorder %s4092_s15, 1  ;;  %s4092_s15 = sphi %s4119_s15, %s14_s15  }
   0x2   : > { %p162_p1 = scmp.lt.s32.totalorder %s4092_s15, 3 }
   0x4   : > { %p163_p2 = pnand %p3491_p0, %p162_p1 }
   0x6   : > { %166 = sbr.rel (%p163_p2) target bundleno = 1032 (0x408), region = 36 }
   0xb   : > { %v3927_v0 = vld [vmem:[%s6274_s1 + $0x38] sm:$0xff]  ;;  %p188_p3 = scmp.lt.s32.totalorder %s3487_s16, 1  ;;  %v3926_v1 = vld [vmem:[%s6274_s1 + $0x30] sm:$0xff]  ;;  %v3925_v2 = vld [vmem:[%s6274_s1 + $0x28] sm:$0xff]  ;;  %vm439_vm0 = vcmask 1046528   ;;  %vm657_vm1 = vcmask 523264  }
   0xc   : > { %4045 = vmatpush.bf16.msra.mxu1 %v3927_v0  ;;  %4046 = vmatpush.bf16.msra.mxu2 %v3927_v0  ;;  %v3924_v18 = vld [vmem:[%s6274_s1 + $0x20] sm:$0xff]  ;;  %v3931_v31 = vld [vmem:[%s6274_s1 + $0x58] sm:$0xff]  ;;  %v3930_v56 = vld [vmem:[%s6274_s1 + $0x50] sm:$0xff]  ;;  %vm1084_vm2 = vcmask 1045504   ;;  %vm3383_vm3 = vcmask 781312  }
   0xd   : > { %s6865_s16 = smov (!%p188_p3, %s3487_s16), 1  ;;  %4047 = vmatpush.bf16.msra.mxu3 %v3927_v0  ;;  %734 = vmatpush.bf16.msra.mxu0 %v3927_v0  ;;  %v3935_v33 = vld [vmem:[%s6274_s1 + $0x78] sm:$0xff]  ;;  %v3934_v57 = vld [vmem:[%s6274_s1 + $0x70] sm:$0xff] }
   0xe   : > { %s4057_s21 = smul.u32 288, %s6865_s16  ;;  %v3923_v44 = vld [vmem:[%s6274_s1 + $0x18] sm:$0xff] }
   0xf   : > { %v3939_v48 = vld [vmem:[%s6274_s1 + $0x98] sm:$0xff]  ;;  %s4058_s28 = smul.u32 192, %s6865_s16 }
  0x10   : > { %4048 = vmatpush.bf16.msra.mxu1 %v3926_v1  ;;  %4049 = vmatpush.bf16.msra.mxu2 %v3926_v1  ;;  %s4142_s26 = scalar_lea.vmem %s6273_s0, %s4057_s21 }
  0x11   : > { %4050 = vmatpush.bf16.msra.mxu3 %v3926_v1  ;;  %735 = vmatpush.bf16.msra.mxu0 %v3926_v1  ;;  %v4145_v3 = vld [vmem:[%s4142_s26 + $0x40] sm:$0xff]   ;;  %v217_v4 = vld [vmem:[%s4142_s26 + $0x48] sm:$0xf]  ;;  %v4203_v34 = vld [vmem:[%s4142_s26 + $0x50] sm:$0xff]   ;;  %s5870_s5 = scalar_lea.vmem %s6277_s4, %s4058_s28 }
  0x12   : > { %v4035_v5 = vld [vmem:[%s4142_s26 + $0x80] sm:$0xff]   ;;  %v4150_v6 = vunpack.c.l.bf16 %v4145_v3  ;;  %v4153_v7 = vunpack.c.h.bf16 %v4145_v3  ;;  %v4155_v8 = vunpack.c.l.bf16 %v217_v4  ;;  %v233_v10 = vld [vmem:[%s4142_s26 + $0x88] sm:$0xf]  ;;  %v4219_v39 = vld [vmem:[%s4142_s26 + $0x4c] sm:$0x1]  ;;  %v4246_v49 = vunpack.c.l.bf16 %v4203_v34 }
  0x13   : > { %v4157_v9 = vunpack.c.l.bf16 %v4035_v5  ;;  %v4039_v11 = vld [vmem:[%s4142_s26 + $0xc0] sm:$0xff]   ;;  %v249_v12 = vld [vmem:[%s4142_s26 + $0xc8] sm:$0xf]  ;;  %v4162_v13 = vunpack.c.h.bf16 %v4035_v5  ;;  %v4164_v14 = vunpack.c.l.bf16 %v233_v10  ;;  %v4036_v45 = vld [vmem:[%s4142_s26 + $0x90] sm:$0xff]   ;;  %v4249_v50 = vunpack.c.h.bf16 %v4203_v34 }
  0x14   : > { %v4166_v15 = vunpack.c.l.bf16 %v4039_v11  ;;  %v4168_v16 = vunpack.c.h.bf16 %v4039_v11  ;;  %v4171_v17 = vld [vmem:[%s4142_s26] sm:$0xff]   ;;  %4051 = vmatpush.bf16.msra.mxu1 %v3925_v2  ;;  %4052 = vmatpush.bf16.msra.mxu2 %v3925_v2  ;;  %v468_v19 = vrot.slane %v4150_v6, 1  ;;  %v469_v20 = vrot.slane %v4153_v7, 1  ;;  %v201_v27 = vld [vmem:[%s4142_s26 + $0x8] sm:$0xf]  ;;  %v4040_v60 = vld [vmem:[%s4142_s26 + $0xd0] sm:$0xff]  }
  0x15   : > { %6449 = vst [vmem:[#allocation2_spill] sm:$0xff] %v4157_v9  ;;  %v471_v21 = vrot.slane %v4155_v8, 1  ;;  %v496_v22 = vrot.slane %v4157_v9, 1  ;;  %4053 = vmatpush.bf16.msra.mxu3 %v3925_v2  ;;  %736 = vmatpush.bf16.msra.mxu0 %v3925_v2  ;;  %v497_v23 = vrot.slane %v4162_v13, 1  ;;  %v499_v24 = vrot.slane %v4164_v14, 1  ;;  %v4289_v2 = vld [vmem:[%s4142_s26 + $0x10] sm:$0xff]  }
  0x16   : > { %6450 = vst [vmem:[#allocation3_spill] sm:$0xff] %v4162_v13  ;;  %v4182_v25 = vunpack.c.l.bf16 %v249_v12  ;;  %v524_v26 = vrot.slane %v4166_v15, 1  ;;  %v4187_v28 = vsel %vm439_vm0, %v468_v19, %v469_v20  ;;  %v525_v30 = vrot.slane %v4168_v16, 1  ;;  %v4252_v51 = vld [vmem:[%s4142_s26 + $0x8c] sm:$0x1]  ;;  %v3922_v4 = vld [vmem:[%s6274_s1 + $0x10] sm:$0xff] }
  0x17   : > { %6451 = vst [vmem:[#allocation4_spill] sm:$0xff] %v4164_v14  ;;  %v4192_v29 = vsel %vm439_vm0, %v469_v20, %v471_v21  ;;  %v6283_v32 = vunpack.c.l.bf16 %v4171_v17  ;;  %v4210_v36 = vsel %vm439_vm0, %v496_v22, %v497_v23  ;;  %v4215_v37 = vsel %vm439_vm0, %v497_v23, %v499_v24  ;;  %v4286_v1 = vld [vmem:[%s4142_s26 + $0xcc] sm:$0x1] }
  0x18   : > { %6452 = vst [vmem:[#allocation5_spill] sm:$0xff] %v4166_v15  ;;  %v4207_v35 = vpack.c.bf16 %v4192_v29, %v4187_v28  ;;  %v527_v38 = vrot.slane %v4182_v25, 1  ;;  %4054 = vmatpush.bf16.msra.mxu1 %v3924_v18  ;;  %4055 = vmatpush.bf16.msra.mxu2 %v3924_v18  ;;  %v4223_v40 = vpack.c.bf16 %v4215_v37, %v4210_v36  ;;  %v6282_v42 = vunpack.c.h.bf16 %v4171_v17  ;;  %v4306_v23 = vld [vmem:[%s4142_s26 + $0xc] sm:$0x1] }
  0x19   : > { %6453 = vst [vmem:[#allocation6_spill] sm:$0xff] %v4168_v16  ;;  %v4226_v41 = vsel %vm439_vm0, %v524_v26, %v525_v30  ;;  %v4229_v43 = vunpack.c.l.bf16 %v201_v27  ;;  %4056 = vmatpush.bf16.msra.mxu3 %v3924_v18  ;;  %737 = vmatpush.bf16.msra.mxu0 %v3924_v18  ;;  %v440_v47 = vrot.slane %v6283_v32, 1  ;;  %v6280_v55 = vunpack.c.l.bf16 %v4219_v39  ;;  %v225_v16 = vld [vmem:[%s4142_s26 + $0x68] sm:$0xf] }
  0x1a   : > { %6454 = vst [vmem:[#allocation7_spill] sm:$0xff] %v4182_v25  ;;  %v4238_v46 = vsel %vm439_vm0, %v525_v30, %v527_v38  ;;  %v441_v53 = vrot.slane %v6282_v42, 1  ;;  %v4272_v58 = vunpack.c.l.bf16 %v4036_v45  ;;  %v4274_v59 = vunpack.c.h.bf16 %v4036_v45  ;;  %v221_v30 = vld [vmem:[%s4142_s26 + $0x58] sm:$0xf]  ;;  %v3933_v25 = vld [vmem:[%s6274_s1 + $0x68] sm:$0xff] }
  0x1b   : > { %6455 = vst [vmem:[#allocation8_spill] sm:$0xff] %v4207_v35  ;;  %v4256_v52 = vpack.c.bf16 %v4238_v46, %v4226_v41  ;;  %v443_v54 = vrot.slane %v4229_v43, 1  ;;  %3524 = vmatmul.msk.bf16.vlgmr.msra.gmra.mxu1 %vm657_vm1, %v4207_v35  ;;  %3530 = vmatmul.msk.bf16.vlgmr.msra.gmra.mxu2 %vm657_vm1, %v4223_v40  ;;  %v475_v63 = vrot.slane %v4246_v49, 1  ;;  %v6279_v0 = vunpack.c.l.bf16 %v4252_v51 }
  0x1c   : > { %6456 = vst [vmem:[#allocation9_spill] sm:$0xff] %v4210_v36  ;;  %1378 = vmatpush.bf16.msrb.mxu2 %v3931_v31  ;;  %v442_v61 = vsel %vm439_vm0, %v440_v47, %v441_v53  ;;  %959 = vmatpush.bf16.msrb.mxu1 %v3923_v44  ;;  %v473_v10 = vrot.slane %v6280_v55, 1  ;;  %v476_v11 = vrot.slane %v4249_v50, 1  ;;  %v503_v12 = vrot.slane %v4272_v58, 1  ;;  %v3938_v31 = vld [vmem:[%s6274_s1 + $0x90] sm:$0xff]  ;;  %v4383_v55 = vld [vmem:[%s4142_s26 + $0x60] sm:$0xff]  }
  0x1d   : > { %6457 = vst [vmem:[#allocation10_spill] sm:$0xff] %v4215_v37  ;;  %1684 = vmatpush.bf16.msrb.mxu3 %v3935_v33  ;;  %v444_v62 = vsel %vm439_vm0, %v441_v53, %v443_v54  ;;  %2004 = vmatpush.bf16.msrb.mxu0 %v3939_v48  ;;  %v501_v18 = vrot.slane %v6279_v0, 1  ;;  %v504_v19 = vrot.slane %v4274_v59, 1  ;;  %v4301_v20 = vunpack.c.l.bf16 %v4040_v60  ;;  %v237_v48 = vld [vmem:[%s4142_s26 + $0x98] sm:$0xf] }
  0x1e   : > { %6458 = vst [vmem:[#allocation11_spill] sm:$0xff] %v4223_v40  ;;  %3536 = vmatmul.msk.bf16.vlgmr.msra.gmra.mxu3 %vm657_vm1, %v4256_v52  ;;  %v600_v5 = vpack.c.bf16 %v444_v62, %v442_v61  ;;  %v4303_v22 = vunpack.c.h.bf16 %v4040_v60  ;;  %v6278_v26 = vunpack.c.l.bf16 %v4286_v1  ;;  %v4311_v27 = vunpack.c.l.bf16 %v4289_v2  ;;  %v205_v53 = vld [vmem:[%s4142_s26 + $0x18] sm:$0xf]  ;;  %v4407_v40 = vld [vmem:[%s4142_s26 + $0xdc] sm:$0x1] }
  0x1f   : > { %6459 = vst [vmem:[#allocation12_spill] sm:$0xff] %v4226_v41  ;;  %v4320_v33 = vsel %vm439_vm0, %v499_v24, %v501_v18  ;;  %v531_v44 = vrot.slane %v4301_v20, 1  ;;  %v4325_v47 = vunpack.c.h.bf16 %v4289_v2  ;;  %v6281_v24 = vunpack.c.l.bf16 %v4306_v23  ;;  %v4377_v18 = vld [vmem:[%s4142_s26 + $0x9c] sm:$0x1] }
  0x20   : > { %6460 = vst [vmem:[#allocation13_spill] sm:$0xff] %v4238_v46  ;;  %1379 = vmatpush.bf16.msrb.mxu2 %v3930_v56  ;;  %3518 = vmatmul.msk.bf16.vlgmr.msra.gmra.mxu0 %vm657_vm1, %v600_v5  ;;  %v532_v45 = vrot.slane %v4303_v22, 1  ;;  %v529_v56 = vrot.slane %v6278_v26, 1  ;;  %v4339_v60 = vsel %vm439_vm0, %v475_v63, %v476_v11  ;;  %v4342_v61 = vsel %vm439_vm0, %v503_v12, %v504_v19  ;;  %v4356_v63 = vld [vmem:[%s4142_s26 + $0x5c] sm:$0x1] }
  0x21   : > { %6461 = vst [vmem:[#allocation14_spill] sm:$0xff] %v4252_v51  ;;  %1685 = vmatpush.bf16.msrb.mxu3 %v3934_v57  ;;  %960 = vmatpush.bf16.msrb.mxu1 %v3922_v4  ;;  %v4336_v57 = vsel %vm439_vm0, %v471_v21, %v473_v10  ;;  %v4344_v62 = vunpack.c.l.bf16 %v221_v30  ;;  %v447_v21 = vrot.slane %v4311_v27, 1  ;;  %v4358_v10 = vunpack.c.l.bf16 %v237_v48  ;;  %v253_v12 = vld [vmem:[%s4142_s26 + $0xd8] sm:$0xf]  ;;  %v4446_v46 = vld [vmem:[%s4142_s26 + $0x1c] sm:$0x1] }
  0x22   : > { %6462 = vst [vmem:[#allocation15_spill] sm:$0xff] %v4256_v52  ;;  %2005 = vmatpush.bf16.msrb.mxu0 %v3938_v31  ;;  %v4349_v4 = vsel %vm439_vm0, %v527_v38, %v529_v56  ;;  %v4352_v5 = vsel %vm439_vm0, %v531_v44, %v532_v45  ;;  %v445_v30 = vrot.slane %v6281_v24, 1  ;;  %v448_v38 = vrot.slane %v4325_v47, 1 }
  0x23   : > { %6463 = vst [vmem:[#allocation16_spill] sm:$0xff] %v4272_v58  ;;  %v478_v31 = vrot.slane %v4344_v62, 1  ;;  %v506_v44 = vrot.slane %v4358_v10, 1  ;;  %v4370_v56 = vpack.c.bf16 %v4339_v60, %v4336_v57  ;;  %v4379_v0 = vunpack.c.l.bf16 %v253_v12 }
  0x24   : > { %6464 = vst [vmem:[#allocation17_spill] sm:$0xff] %v4274_v59  ;;  %v4387_v24 = vpack.c.bf16 %v4342_v61, %v4320_v33  ;;  %v4391_v42 = vpack.c.bf16 %v4352_v5, %v4349_v4  ;;  %v446_v12 = vsel %vm439_vm0, %v443_v54, %v445_v30  ;;  %v4402_v48 = vsel %vm439_vm0, %v447_v21, %v448_v38 }
  0x25   : > { %6465 = vst [vmem:[#allocation18_spill] sm:$0xff] %v4286_v1  ;;  %v4374_v26 = vsel %vm439_vm0, %v476_v11, %v478_v31  ;;  %v4396_v32 = vsel %vm439_vm0, %v504_v19, %v506_v44  ;;  %v534_v35 = vrot.slane %v4379_v0, 1  ;;  %v4411_v11 = vunpack.c.l.bf16 %v205_v53  ;;  %1686 = vmatpush.bf16.msrb.mxu3 %v3933_v25 }
  0x26   : > { %6466 = vst [vmem:[#allocation19_spill] sm:$0xff] %v4301_v20  ;;  %v4414_v19 = vunpack.c.l.bf16 %v4383_v55  ;;  %v4037_v20 = vld [vmem:[%s4142_s26 + $0xa0] sm:$0xff]   ;;  %v6481_v54 = vunpack.c.l.bf16 %v4356_v63  ;;  %v4423_v52 = vunpack.c.h.bf16 %v4383_v55  ;;  %v601_v53 = vpack.c.bf16 %v4402_v48, %v446_v12  ;;  %v3929_v12 = vld [vmem:[%s6274_s1 + $0x48] sm:$0xff] }
  0x27   : > { %6467 = vst [vmem:[#allocation20_spill] sm:$0xff] %v4303_v22  ;;  %v4420_v30 = vsel %vm439_vm0, %v532_v45, %v534_v35  ;;  %v450_v45 = vrot.slane %v4411_v11, 1  ;;  %v4438_v1 = vunpack.c.l.bf16 %v4037_v20  ;;  %v6485_v22 = vunpack.c.l.bf16 %v4377_v18  ;;  %1380 = vmatpush.bf16.msrb.mxu2 %v3929_v12 }
  0x28   : > { %6468 = vst [vmem:[#allocation21_spill] sm:$0xff] %v4320_v33  ;;  %v480_v21 = vrot.slane %v6481_v54, 1 }
  0x29   : > { %6469 = vst [vmem:[#allocation22_spill] sm:$0xff] %v4342_v61  ;;  %v4449_v54 = vsel %vm439_vm0, %v448_v38, %v450_v45  ;;  %v4547_v61 = vld [vmem:[%s4142_s26 + $0x20] sm:$0xff]  }
  0x2a   : > { %6470 = vst [vmem:[#allocation23_spill] sm:$0xff] %v4349_v4  ;;  %v4455_v4 = vsel %vm439_vm0, %v478_v31, %v480_v21  ;;  %v510_v31 = vrot.slane %v4438_v1, 1 }
  0x2b   : > { %6471 = vst [vmem:[#allocation24_spill] sm:$0xff] %v4352_v5  ;;  %3525 = vmatmul.msk.bf16.gmra.mxu1 %vm657_vm1, %v4370_v56  ;;  %3531 = vmatmul.msk.bf16.gmra.mxu2 %vm657_vm1, %v4387_v24  ;;  %v4451_v5 = vunpack.c.h.bf16 %v4037_v20 }
  0x2c   : > { %6472 = vst [vmem:[#allocation25_spill] sm:$0xff] %v4358_v10  ;;  %v4494_v10 = vld [vmem:[%s4142_s26 + $0x6c] sm:$0x1] }
  0x2d   : > { %6473 = vst [vmem:[#allocation26_spill] sm:$0xff] %v4370_v56  ;;  %v483_v56 = vrot.slane %v4423_v52, 1  ;;  %v511_v21 = vrot.slane %v4451_v5, 1  ;;  %v6320_v12 = vunpack.c.l.bf16 %v4494_v10 }
  0x2e   : > { %6474 = vst [vmem:[#allocation27_spill] sm:$0xff] %v4377_v18  ;;  %3537 = vmatmul.msk.bf16.gmra.mxu3 %vm657_vm1, %v4391_v42  ;;  %v241_v18 = vld [vmem:[%s4142_s26 + $0xa8] sm:$0xf] }
  0x2f   : > { %6475 = vst [vmem:[#allocation28_spill] sm:$0xff] %v4379_v0  ;;  %v482_v0 = vrot.slane %v4414_v19, 1  ;;  %v4506_v25 = vunpack.c.l.bf16 %v241_v18  ;;  %v487_v18 = vrot.slane %v6320_v12, 1 }
  0x30   : > { %6476 = vst [vmem:[#allocation29_spill] sm:$0xff] %v4383_v55  ;;  %3519 = vmatmul.msk.bf16.gmra.mxu0 %vm657_vm1, %v601_v53  ;;  %v3937_v53 = vld [vmem:[%s6274_s1 + $0x88] sm:$0xff] }
  0x31   : > { %6477 = vst [vmem:[#allocation30_spill] sm:$0xff] %v4387_v24  ;;  %v508_v24 = vrot.slane %v6485_v22, 1  ;;  %v4461_v15 = vsel %vm439_vm0, %v482_v0, %v483_v56  ;;  %v6487_v22 = vunpack.c.l.bf16 %v4407_v40  ;;  %v3921_v0 = vld [vmem:[%s6274_s1 + $0x8] sm:$0xff]  ;;  %2006 = vmatpush.bf16.msrb.mxu0 %v3937_v53  ;;  %v513_v12 = vrot.slane %v4506_v25, 1 }
  0x32   : > { %6478 = vst [vmem:[#allocation31_spill] sm:$0xff] %v4391_v42  ;;  %v4041_v42 = vld [vmem:[%s4142_s26 + $0xe0] sm:$0xff]   ;;  %961 = vmatpush.bf16.msrb.mxu1 %v3921_v0 }
  0x33   : > { %6479 = vst [vmem:[#allocation32_spill] sm:$0xff] %v4396_v32  ;;  %v536_v38 = vrot.slane %v6487_v22, 1  ;;  %v4480_v22 = vunpack.c.l.bf16 %v4041_v42  ;;  %v4482_v20 = vunpack.c.h.bf16 %v4041_v42 }
  0x34   : > { %6480 = vst [vmem:[#allocation33_spill] sm:$0xff] %v4407_v40  ;;  %v4485_v40 = vsel %vm439_vm0, %v506_v44, %v508_v24  ;;  %v257_v44 = vld [vmem:[%s4142_s26 + $0xe8] sm:$0xf] }
  0x35   : > { %6482 = vst [vmem:[#allocation34_spill] sm:$0xff] %v4420_v30  ;;  %v538_v42 = vrot.slane %v4480_v22, 1  ;;  %v539_v24 = vrot.slane %v4482_v20, 1 }
  0x36   : > { %6483 = vst [vmem:[#allocation35_spill] sm:$0xff] %v4423_v52 }
  0x37   : > { %6484 = vst [vmem:[#allocation36_spill] sm:$0xff] %v4438_v1  ;;  %v4491_v1 = vsel %vm439_vm0, %v510_v31, %v511_v21  ;;  %v6495_v31 = vunpack.c.l.bf16 %v4446_v46  ;;  %v4509_v0 = vsel %vm439_vm0, %v538_v42, %v539_v24  ;;  %v4524_v42 = vpack.c.bf16 %v4455_v4, %v4374_v26 }
  0x38   : > { %6486 = vst [vmem:[#allocation37_spill] sm:$0xff] %v4451_v5  ;;  %v4487_v5 = vunpack.c.l.bf16 %v225_v16  ;;  %v4501_v16 = vsel %vm439_vm0, %v534_v35, %v536_v38  ;;  %v4516_v35 = vld [vmem:[%s4142_s26 + $0xac] sm:$0x1]  ;;  %v4518_v38 = vunpack.c.l.bf16 %v257_v44 }
  0x39   : > { %6488 = vst [vmem:[#allocation38_spill] sm:$0xff] %v4480_v22  ;;  %v452_v59 = vrot.slane %v6495_v31, 1  ;;  %v4528_v31 = vpack.c.bf16 %v4485_v40, %v4396_v32  ;;  %v4535_v53 = vpack.c.bf16 %v4501_v16, %v4420_v30  ;;  %v6330_v58 = vunpack.c.l.bf16 %v4516_v35  ;;  %v209_v32 = vld [vmem:[%s4142_s26 + $0x28] sm:$0xf]  ;;  %v229_v30 = vld [vmem:[%s4142_s26 + $0x78] sm:$0xf] }
  0x3a   : > { %6489 = vst [vmem:[#allocation39_spill] sm:$0xff] %v4482_v20  ;;  %v485_v22 = vrot.slane %v4487_v5, 1  ;;  %v4531_v20 = vld [vmem:[%s4142_s26 + $0xec] sm:$0x1]  ;;  %v4628_v13 = vunpack.c.l.bf16 %v229_v30 }
  0x3b   : > { %6490 = vst [vmem:[#allocation40_spill] sm:$0xff] %v4485_v40  ;;  %v4538_v44 = vsel %vm439_vm0, %v450_v45, %v452_v59  ;;  %v541_v40 = vrot.slane %v4518_v38, 1  ;;  %v515_v59 = vrot.slane %v6330_v58, 1  ;;  %v6334_v45 = vunpack.c.l.bf16 %v4531_v20  ;;  %3526 = vmatmul.msk.bf16.gmra.mxu1 %vm657_vm1, %v4524_v42  ;;  %3532 = vmatmul.msk.bf16.gmra.mxu2 %vm657_vm1, %v4528_v31 }
  0x3c   : > { %6491 = vst [vmem:[#allocation41_spill] sm:$0xff] %v4487_v5  ;;  %v4543_v51 = vsel %vm439_vm0, %v483_v56, %v485_v22  ;;  %v602_v56 = vpack.c.bf16 %v4538_v44, %v4449_v54 }
  0x3d   : > { %6492 = vst [vmem:[#allocation42_spill] sm:$0xff] %v4491_v1  ;;  %v4573_v58 = vsel %vm439_vm0, %v513_v12, %v515_v59  ;;  %v4591_v59 = vsel %vm439_vm0, %v539_v24, %v541_v40  ;;  %v3920_v24 = vld [vmem:[%s6274_s1] sm:$0xff] }
  0x3e   : > { %6493 = vst [vmem:[#allocation43_spill] sm:$0xff] %v4494_v10  ;;  %3538 = vmatmul.msk.bf16.gmra.mxu3 %vm657_vm1, %v4535_v53  ;;  %962 = vmatpush.bf16.msrb.mxu1 %v3920_v24 }
  0x3f   : > { %6494 = vst [vmem:[#allocation44_spill] sm:$0xff] %v4501_v16  ;;  %v4551_v16 = vsel %vm439_vm0, %v485_v22, %v487_v18  ;;  %v4567_v22 = vsel %vm439_vm0, %v511_v21, %v513_v12  ;;  %v4570_v18 = vld [vmem:[%s4142_s26 + $0x70] sm:$0xff]   ;;  %v3928_v12 = vld [vmem:[%s6274_s1 + $0x40] sm:$0xff] }
  0x40   : > { %6496 = vst [vmem:[#allocation45_spill] sm:$0xff] %v4506_v25  ;;  %v4586_v21 = vld [vmem:[%s4142_s26 + $0xb0] sm:$0xff]   ;;  %3520 = vmatmul.msk.bf16.gmra.mxu0 %vm657_vm1, %v602_v56  ;;  %v4623_v25 = vld [vmem:[%s4142_s26 + $0x7c] sm:$0x1]  ;;  %1381 = vmatpush.bf16.msrb.mxu2 %v3928_v12  ;;  %v492_v12 = vrot.slane %v4628_v13, 1 }
  0x41   : > { %6497 = vst [vmem:[#allocation46_spill] sm:$0xff] %v4509_v0  ;;  %v4618_v56 = vunpack.c.h.bf16 %v4586_v21 }
  0x42   : > { %6498 = vst [vmem:[#allocation47_spill] sm:$0xff] %v4516_v35  ;;  %v4042_v35 = vld [vmem:[%s4142_s26 + $0xf0] sm:$0xff]  }
  0x43   : > { %6499 = vst [vmem:[#allocation48_spill] sm:$0xff] %v4518_v38  ;;  %v4581_v38 = vunpack.c.h.bf16 %v4547_v61  ;;  %v518_v5 = vrot.slane %v4618_v56, 1  ;;  %v4637_v14 = vunpack.c.h.bf16 %v4042_v35 }
  0x44   : > { %6500 = vst [vmem:[#allocation49_spill] sm:$0xff] %v4524_v42  ;;  %v4578_v42 = vunpack.c.l.bf16 %v4547_v61 }
  0x45   : > { %6501 = vst [vmem:[#allocation50_spill] sm:$0xff] %v4528_v31  ;;  %v543_v31 = vrot.slane %v6334_v45, 1  ;;  %v455_v33 = vrot.slane %v4581_v38, 1 }
  0x46   : > { %6502 = vst [vmem:[#allocation51_spill] sm:$0xff] %v4531_v20  ;;  %v4598_v20 = vunpack.c.l.bf16 %v4570_v18  ;;  %v454_v37 = vrot.slane %v4578_v42, 1 }
  0x47   : > { %6503 = vst [vmem:[#allocation52_spill] sm:$0xff] %v4535_v53  ;;  %v4583_v53 = vunpack.c.l.bf16 %v209_v32  ;;  %v4594_v45 = vsel %vm439_vm0, %v541_v40, %v543_v31  ;;  %v4601_v32 = vunpack.c.h.bf16 %v4570_v18  ;;  %v3932_v40 = vld [vmem:[%s6274_s1 + $0x60] sm:$0xff]  ;;  %v4615_v31 = vunpack.c.l.bf16 %v4586_v21 }
  0x48   : > { %6504 = vst [vmem:[#allocation53_spill] sm:$0xff] %v4543_v51  ;;  %1687 = vmatpush.bf16.msrb.mxu3 %v3932_v40  ;;  %v489_v9 = vrot.slane %v4598_v20, 1  ;;  %v4641_v30 = vsel %vm439_vm0, %v454_v37, %v455_v33  ;;  %v4662_v37 = vpack.c.bf16 %v4543_v51, %v4461_v15 }
  0x49   : > { %6505 = vst [vmem:[#allocation54_spill] sm:$0xff] %v4551_v16  ;;  %v490_v10 = vrot.slane %v4601_v32, 1  ;;  %v517_v55 = vrot.slane %v4615_v31, 1  ;;  %v6520_v40 = vrot.slane %v4583_v53, 1 }
  0x4a   : > { %6506 = vst [vmem:[#allocation55_spill] sm:$0xff] %v4567_v22 }
  0x4b   : > { %6507 = vst [vmem:[#allocation56_spill] sm:$0xff] %v4570_v18  ;;  %v4633_v18 = vunpack.c.l.bf16 %v4042_v35  ;;  %v4646_v24 = vsel %vm439_vm0, %v455_v33, %v6520_v40  ;;  %v4666_v33 = vpack.c.bf16 %v4567_v22, %v4491_v1  ;;  %v4670_v40 = vpack.c.bf16 %v4591_v59, %v4509_v0  ;;  %3527 = vmatmul.msk.bf16.gmra.mxu1 %vm657_vm1, %v4662_v37 }
  0x4c   : > { %6508 = vst [vmem:[#allocation57_spill] sm:$0xff] %v4573_v58  ;;  %v4680_v22 = vpack.c.bf16 %v4646_v24, %v4641_v30  ;;  %v4683_v1 = vsel %vm439_vm0, %v489_v9, %v490_v10  ;;  %v6535_v0 = vrot.slane %v4583_v53, 1 }
  0x4d   : > { %6509 = vst [vmem:[#allocation58_spill] sm:$0xff] %v4586_v21  ;;  %v245_v21 = vld [vmem:[%s4142_s26 + $0xb8] sm:$0xf]  ;;  %3533 = vmatmul.msk.bf16.gmra.mxu2 %vm657_vm1, %v4666_v33 }
  0x4e   : > { %6510 = vst [vmem:[#allocation59_spill] sm:$0xff] %v4591_v59  ;;  %3539 = vmatmul.msk.bf16.gmra.mxu3 %vm657_vm1, %v4670_v40 }
  0x4f   : > { %6511 = vst [vmem:[#allocation60_spill] sm:$0xff] %v4594_v45 }
  0x50   : > { %6512 = vst [vmem:[#allocation61_spill] sm:$0xff] %v4598_v20  ;;  %v261_v20 = vld [vmem:[%s4142_s26 + $0xf8] sm:$0xf]  ;;  %3521 = vmatmul.msk.bf16.gmra.mxu0 %vm657_vm1, %v4680_v22 }
  0x51   : > { %6513 = vst [vmem:[#allocation62_spill] sm:$0xff] %v4601_v32  ;;  %v4650_v32 = vld [vmem:[%s4142_s26 + $0xbc] sm:$0x1] }
  0x52   : > { %6514 = vst [vmem:[#allocation63_spill] sm:$0xff] %v4615_v31  ;;  %v6522_v31 = vunpack.c.l.bf16 %v4623_v25 }
  0x53   : > { %6515 = vst [vmem:[#allocation64_spill] sm:$0xff] %v4618_v56  ;;  %v4655_v56 = vunpack.c.l.bf16 %v245_v21  ;;  %v546_v21 = vrot.slane %v4637_v14, 1 }
  0x54   : > { %6516 = vst [vmem:[#allocation65_spill] sm:$0xff] %v4623_v25  ;;  %v494_v52 = vrot.slane %v6522_v31, 1  ;;  %v545_v31 = vrot.slane %v4633_v18, 1 }
  0x55   : > { %6517 = vst [vmem:[#allocation66_spill] sm:$0xff] %v4628_v13  ;;  %v4658_v13 = vunpack.c.l.bf16 %v261_v20  ;;  %v520_v35 = vrot.slane %v4655_v56, 1  ;;  %v6527_v20 = vunpack.c.l.bf16 %v4650_v32 }
  0x56   : > { %6518 = vst [vmem:[#allocation67_spill] sm:$0xff] %v4633_v18  ;;  %v4686_v18 = vsel %vm439_vm0, %v517_v55, %v518_v5  ;;  %v4692_v59 = vsel %vm439_vm0, %v492_v12, %v494_v52  ;;  %v4711_v52 = vsel %vm439_vm0, %v545_v31, %v546_v21 }
  0x57   : > { %6519 = vst [vmem:[#allocation68_spill] sm:$0xff] %v4637_v14  ;;  %v522_v25 = vrot.slane %v6527_v20, 1  ;;  %v6375_v51 = vrot.slane %v4658_v13, 1  ;;  %v4689_v14 = vsel %vm439_vm0, %v490_v10, %v492_v12  ;;  %v4695_v20 = vsel %vm439_vm0, %v518_v5, %v520_v35  ;;  %v4714_v5 = vld [vmem:[%s4142_s26 + $0x30] sm:$0xff]  }
  0x58   : > { %6521 = vst [vmem:[#allocation69_spill] sm:$0xff] %v4650_v32  ;;  %v4733_v31 = vunpack.c.l.bf16 %v4714_v5  ;;  %v4736_v12 = vunpack.c.h.bf16 %v4714_v5  ;;  %v6536_v32 = vunpack.c.l.bf16 %v4171_v17 }
  0x59   : > { %6523 = vst [vmem:[#allocation70_spill] sm:$0xff] %v4655_v56  ;;  %v4706_v10 = vsel %vm439_vm0, %v520_v35, %v522_v25  ;;  %v4723_v55 = vsel %vm439_vm0, %v546_v21, %v6375_v51  ;;  %v4726_v25 = vld [vmem:[%s4142_s26 + $0x2c] sm:$0x1]  ;;  %v3936_v21 = vld [vmem:[%s6274_s1 + $0x80] sm:$0xff]  ;;  %v6537_v56 = vunpack.c.h.bf16 %v4171_v17 }
  0x5a   : > { %6524 = vst [vmem:[#allocation71_spill] sm:$0xff] %v4662_v37  ;;  %v6381_v9 = vunpack.c.l.bf16 %v4726_v25  ;;  %2007 = vmatpush.bf16.msrb.mxu0 %v3936_v21  ;;  %v461_v51 = vrot.slane %v4733_v31, 1  ;;  %v462_v35 = vrot.slane %v4736_v12, 1  ;;  %v4752_v37 = vpack.c.bf16 %v4686_v18, %v4573_v58 }
  0x5b   : > { %6525 = vst [vmem:[#allocation72_spill] sm:$0xff] %v4666_v33  ;;  %v4748_v33 = vpack.c.bf16 %v4683_v1, %v4551_v16  ;;  %v1085_v41 = vrot.slane %v6536_v32, 2  ;;  %v1088_v58 = vrot.slane %v4229_v43, 2 }
  0x5c   : > { %6526 = vst [vmem:[#allocation73_spill] sm:$0xff] %v4670_v40  ;;  %v459_v40 = vrot.slane %v6381_v9, 1  ;;  %v4759_v21 = vsel %vm439_vm0, %v461_v51, %v462_v35 }
  0x5d   : > { %6528 = vst [vmem:[#allocation74_spill] sm:$0xff] %v4680_v22  ;;  %v4756_v22 = vpack.c.bf16 %v4711_v52, %v4594_v45  ;;  %3528 = vmatmul.msk.bf16.gmra.mxu1 %vm657_vm1, %v4748_v33  ;;  %3534 = vmatmul.msk.bf16.gmra.mxu2 %vm657_vm1, %v4752_v37 }
  0x5e   : > { %6529 = vst [vmem:[#allocation75_spill] sm:$0xff] %v4683_v1  ;;  %v4764_v9 = vsel %vm439_vm0, %v6535_v0, %v459_v40  ;;  %v4792_v40 = vld [vmem:[%s4142_s26 + $0x3c] sm:$0x1]  ;;  %v6540_v1 = vrot.slane %v4658_v13, 1 }
  0x5f   : > { %6530 = vst [vmem:[#allocation76_spill] sm:$0xff] %v4686_v18  ;;  %v1086_v18 = vrot.slane %v6537_v56, 2  ;;  %v4782_v0 = vpack.c.bf16 %v4759_v21, %v4764_v9  ;;  %3540 = vmatmul.msk.bf16.gmra.mxu3 %vm657_vm1, %v4756_v22  ;;  %v213_v56 = vld [vmem:[%s4142_s26 + $0x38] sm:$0xf] }
  0x60   : > { %6531 = vst [vmem:[#allocation77_spill] sm:$0xff] %v4711_v52  ;;  %v4772_v52 = vld [vmem:[%s4142_s26 + $0xfc] sm:$0x1] }
  0x61   : > { %6532 = vst [vmem:[#allocation78_spill] sm:$0xff] %v4748_v33  ;;  %v1087_v51 = vsel %vm1084_vm2, %v1085_v41, %v1086_v18  ;;  %v1089_v45 = vsel %vm1084_vm2, %v1086_v18, %v1088_v58  ;;  %v3947_v41 = vld [vmem:[%s6274_s1 + $0xd8] sm:$0xff]  ;;  %3522 = vmatmul.msk.bf16.gmra.mxu0 %vm657_vm1, %v4782_v0  ;;  %v4805_v18 = vunpack.c.l.bf16 %v213_v56  ;;  %v4820_v56 = vpack.c.bf16 %v4692_v59, %v4689_v14 }
  0x62   : > { %6533 = vst [vmem:[#allocation79_spill] sm:$0xff] %v4752_v37  ;;  %v1245_v32 = vpack.c.bf16 %v1089_v45, %v1087_v51  ;;  %2542 = vmatpush.bf16.msra.mxu2 %v3947_v41  ;;  %v3951_v45 = vld [vmem:[%s6274_s1 + $0xf8] sm:$0xff]  ;;  %v6397_v37 = vunpack.c.l.bf16 %v4792_v40  ;;  %v6539_v41 = vunpack.c.l.bf16 %v4772_v52 }
  0x63   : > { %6534 = vst [vmem:[#allocation80_spill] sm:$0xff] %v4756_v22  ;;  %v3943_v51 = vld [vmem:[%s6274_s1 + $0xb8] sm:$0xff]  ;;  %2778 = vmatpush.bf16.msra.mxu3 %v3951_v45 }
  0x64   : > { %6538 = vst [vmem:[#allocation81_spill] sm:$0xff] %v4782_v0  ;;  %v3955_v22 = vld [vmem:[%s6274_s1 + $0x118] sm:$0xff]  ;;  %v550_v33 = vrot.slane %v6539_v41, 1  ;;  %2320 = vmatpush.bf16.msra.mxu1 %v3943_v51  ;;  %v464_v0 = vrot.slane %v4805_v18, 1  ;;  %v466_v36 = vrot.slane %v6397_v37, 1  ;;  %v4824_v41 = vpack.c.bf16 %v4706_v10, %v4695_v20 }
  0x65   : > { %3010 = vmatpush.bf16.msra.mxu0 %v3955_v22  ;;  %6541 = vst [vmem:[#allocation82_spill] sm:$0xff] %v4820_v56 }
  0x66   : > { %v4816_v16 = vsel %vm439_vm0, %v6540_v1, %v550_v33  ;;  %6542 = vst [vmem:[#allocation83_spill] sm:$0xff] %v4824_v41  ;;  %v4831_v45 = vsel %vm439_vm0, %v462_v35, %v464_v0  ;;  %v4834_v51 = vsel %vm439_vm0, %v464_v0, %v466_v36  ;;  %v1872_v33 = vpack.c.bf16 %v4641_v30, %v4538_v44 }
  0x67   : > { %v4828_v22 = vpack.c.bf16 %v4816_v16, %v4723_v55  ;;  %v4842_v1 = vpack.c.bf16 %v4834_v51, %v4831_v45  ;;  %v1092_v36 = vrot.slane %v4311_v27, 2  ;;  %v1093_v35 = vrot.slane %v4325_v47, 2 }
  0x68   : > { %v1095_v0 = vrot.slane %v4411_v11, 2  ;;  %v6545_v30 = vpack.c.bf16 %v4449_v54, %v4402_v48  ;;  %v1552_v44 = vpack.c.bf16 %v4578_v42, %v4411_v11  ;;  %v1099_v48 = vrot.slane %v4578_v42, 2 }
  0x69   : > { %6543 = vst [vmem:[#allocation84_spill] sm:$0xff] %v4828_v22  ;;  %v4857_v37 = vsel %vm1084_vm2, %v1092_v36, %v1093_v35  ;;  %v1100_v54 = vrot.slane %v4581_v38, 2  ;;  %v1102_v42 = vrot.slane %v4583_v53, 2 }
  0x6a   : > { %6544 = vst [vmem:[#allocation85_spill] sm:$0xff] %v4842_v1 }
  0x6d   : > { %3529 = vmatmul.msk.bf16.gmra.mxu1 %vm657_vm1, %v4820_v56  ;;  %3535 = vmatmul.msk.bf16.gmra.mxu2 %vm657_vm1, %v4824_v41 }
  0x6f   : > { %3541 = vmatmul.msk.bf16.gmra.mxu3 %vm657_vm1, %v4828_v22  ;;  %v4860_v22 = vsel %vm1084_vm2, %v1093_v35, %v1095_v0  ;;  %v344_v35 = vpack.c.bf16 %v4311_v27, %v4229_v43  ;;  %v4888_v43 = vsel %vm1084_vm2, %v1099_v48, %v1100_v54  ;;  %v1107_v48 = vrot.slane %v4736_v12, 2 }
  0x70   : > { %6549 = vst [vmem:[#allocation87_spill] sm:$0xff] %v4888_v43 }
  0x71   : > { %3523 = vmatmul.msk.bf16.gmra.mxu0 %vm657_vm1, %v4842_v1 }
  0x7d   : > { %3558 = vmatmul.msk.bf16.vlgmr.msrb.gmra.mxu1 %vm657_vm1, %v4171_v17  ;;  %3606 = vmatmul.msk.bf16.vlgmr.msrb.gmra.mxu2 %vm657_vm1, %v1245_v32  ;;  %v6546_v17 = vunpack.c.l.bf16 %v4306_v23  ;;  %v345_v23 = vpack.c.bf16 %v4411_v11, %v4325_v47  ;;  %v1873_v47 = vpack.c.bf16 %v4764_v9, %v4646_v24  ;;  %v4910_v11 = vsel %vm1084_vm2, %v1100_v54, %v1102_v42 }
  0x7e   : > { %6551 = vst [vmem:[#allocation88_spill] sm:$0xff] %v4910_v11 }
  0x7f   : > { %3654 = vmatmul.msk.bf16.vlgmr.msrb.gmra.mxu3 %vm657_vm1, %v4289_v2  ;;  %v1090_v32 = vrot.slane %v6546_v17, 2  ;;  %v6547_v2 = vunpack.c.l.bf16 %v4446_v46 }
  0x81   : > { %3702 = vmatmul.msk.bf16.vlgmr.msrb.gmra.mxu0 %vm657_vm1, %v6545_v30  ;;  %v1091_v36 = vsel %vm1084_vm2, %v1088_v58, %v1090_v32  ;;  %v1097_v56 = vrot.slane %v6547_v2, 2  ;;  %v1106_v2 = vrot.slane %v4733_v31, 2 }
  0x82   : > { %v1246_v41 = vpack.c.bf16 %v4857_v37, %v1091_v36 }
  0x83   : > { %v4885_v58 = vsel %vm1084_vm2, %v1095_v0, %v1097_v56  ;;  %v6550_v0 = vunpack.c.l.bf16 %v4726_v25 }
  0x84   : > { %6548 = vst [vmem:[#allocation86_spill] sm:$0xff] %v4885_v58  ;;  %v1247_v27 = vpack.c.bf16 %v4885_v58, %v4860_v22 }
  0x8d   : > { %3559 = vmatmul.msk.bf16.gmra.mxu1 %vm657_vm1, %v344_v35  ;;  %3607 = vmatmul.msk.bf16.gmra.mxu2 %vm657_vm1, %v1246_v41  ;;  %v1553_v41 = vpack.c.bf16 %v4583_v53, %v4581_v38  ;;  %v4935_v35 = vpack.c.bf16 %v4910_v11, %v4888_v43 }
  0x8f   : > { %3655 = vmatmul.msk.bf16.gmra.mxu3 %vm657_vm1, %v1552_v44  ;;  %v1104_v44 = vrot.slane %v6550_v0, 2  ;;  %v4951_v0 = vsel %vm1084_vm2, %v1106_v2, %v1107_v48 }
  0x90   : > { %6556 = vst [vmem:[#allocation92_spill] sm:$0xff] %v4951_v0 }
  0x91   : > { %3703 = vmatmul.msk.bf16.gmra.mxu0 %vm657_vm1, %v1872_v33  ;;  %v4913_v33 = vsel %vm1084_vm2, %v1102_v42, %v1104_v44 }
  0x92   : > { %6552 = vst [vmem:[#allocation89_spill] sm:$0xff] %v4913_v33 }
  0x98   : > { %v4899_v56 = vpop.f32.mrf.mxu1 }
  0x9d   : > { %3560 = vmatmul.msk.bf16.gmra.mxu1 %vm657_vm1, %v345_v23  ;;  %3608 = vmatmul.msk.bf16.gmra.mxu2 %vm657_vm1, %v1247_v27  ;;  %v4915_v30 = vpop.f32.mrf.mxu0  ;;  %v1109_v23 = vrot.slane %v4805_v18, 2  ;;  %v6555_v27 = vunpack.c.l.bf16 %v4792_v40  ;;  %v1113_v40 = vrot.slane %v4150_v6, 2 }
  0x9e   : > { %v4920_v25 = vpop.f32.mrf.mxu2 }
  0x9f   : > { %3656 = vmatmul.msk.bf16.gmra.mxu3 %vm657_vm1, %v1553_v41  ;;  %v1111_v42 = vrot.slane %v6555_v27, 2  ;;  %v1874_v41 = vpack.c.bf16 %v4831_v45, %v4759_v21  ;;  %v4954_v44 = vsel %vm1084_vm2, %v1107_v48, %v1109_v23 }
  0xa0   : > { %v4925_v24 = vpop.f32.mrf.mxu1  ;;  %6557 = vst [vmem:[#allocation93_spill] sm:$0xff] %v4954_v44 }
  0xa1   : > { %3704 = vmatmul.msk.bf16.gmra.mxu0 %vm657_vm1, %v1873_v47  ;;  %v4923_v17 = vpop.f32.mrf.mxu3  ;;  %v4967_v21 = vsel %vm1084_vm2, %v1109_v23, %v1111_v42  ;;  %v4987_v23 = vpack.c.bf16 %v4733_v31, %v4583_v53  ;;  %v4991_v42 = vpack.c.bf16 %v4951_v0, %v4913_v33  ;;  %v3946_v31 = vld [vmem:[%s6274_s1 + $0xd0] sm:$0xff]  ;;  %v5033_v0 = vpack.c.bf16 %v4805_v18, %v4736_v12 }
  0xa2   : > { %6553 = vst [vmem:[#allocation90_spill] sm:$0xff] %v4923_v17  ;;  %2543 = vmatpush.bf16.msra.mxu2 %v3946_v31  ;;  %v5037_v17 = vpack.c.bf16 %v4967_v21, %v4954_v44 }
  0xa3   : > { %6558 = vst [vmem:[#allocation94_spill] sm:$0xff] %v4967_v21  ;;  %v1116_v21 = vrot.slane %v4155_v8, 2 }
  0xa4   : > { %6562 = vst [vmem:[#allocation98_spill] sm:$0xff] %v4987_v23 }
  0xa5   : > { %v4927_v9 = vpop.f32.mrf.mxu0  ;;  %6563 = vst [vmem:[#allocation99_spill] sm:$0xff] %v4991_v42 }
  0xa6   : > { %v4929_v32 = vpop.f32.mrf.mxu2  ;;  %6566 = vst [vmem:[#allocation102_spill] sm:$0xff] %v5033_v0 }
  0xa7   : > { %6567 = vst [vmem:[#allocation103_spill] sm:$0xff] %v5037_v17 }
  0xa8   : > { %v4939_v54 = vpop.f32.mrf.mxu1 }
  0xa9   : > { %v4931_v36 = vpop.f32.mrf.mxu3 }
  0xaa   : > { %6554 = vst [vmem:[#allocation91_spill] sm:$0xff] %v4931_v36 }
  0xad   : > { %3561 = vmatmul.msk.bf16.gmra.mxu1 %vm657_vm1, %v4547_v61  ;;  %3609 = vmatmul.msk.bf16.gmra.mxu2 %vm657_vm1, %v4935_v35  ;;  %v4956_v47 = vpop.f32.mrf.mxu0  ;;  %v1114_v61 = vrot.slane %v4153_v7, 2 }
  0xae   : > { %v4964_v38 = vpop.f32.mrf.mxu2 }
  0xaf   : > { %3657 = vmatmul.msk.bf16.gmra.mxu3 %vm657_vm1, %v4714_v5  ;;  %v4970_v45 = vsel %vm1084_vm2, %v1113_v40, %v1114_v61  ;;  %v1555_v40 = vpack.c.bf16 %v4150_v6, %v4805_v18  ;;  %v1875_v5 = vpack.c.bf16 %v4187_v28, %v4834_v51  ;;  %v3942_v28 = vld [vmem:[%s6274_s1 + $0xb0] sm:$0xff] }
  0xb0   : > { %6559 = vst [vmem:[#allocation95_spill] sm:$0xff] %v4970_v45  ;;  %v4977_v48 = vpop.f32.mrf.mxu1  ;;  %2321 = vmatpush.bf16.msra.mxu1 %v3942_v28  ;;  %v1556_v28 = vpack.c.bf16 %v4155_v8, %v4153_v7 }
  0xb1   : > { %3705 = vmatmul.msk.bf16.gmra.mxu0 %vm657_vm1, %v1874_v41  ;;  %v4973_v2 = vpop.f32.mrf.mxu3 }
  0xb2   : > { %6560 = vst [vmem:[#allocation96_spill] sm:$0xff] %v4973_v2  ;;  %v3950_v2 = vld [vmem:[%s6274_s1 + $0xf0] sm:$0xff] }
  0xb3   : > { %2779 = vmatpush.bf16.msra.mxu3 %v3950_v2 }
  0xb5   : > { %v4979_v46 = vpop.f32.mrf.mxu0 }
  0xb6   : > { %v4981_v27 = vpop.f32.mrf.mxu2 }
  0xb8   : > { %v4993_v41 = vpop.f32.mrf.mxu1 }
  0xb9   : > { %v4983_v36 = vpop.f32.mrf.mxu3 }
  0xba   : > { %6561 = vst [vmem:[#allocation97_spill] sm:$0xff] %v4983_v36 }
  0xbd   : > { %3562 = vmatmul.msk.bf16.gmra.mxu1 %vm657_vm1, %v4987_v23  ;;  %3610 = vmatmul.msk.bf16.gmra.mxu2 %vm657_vm1, %v4991_v42  ;;  %v5003_v53 = vpop.f32.mrf.mxu0  ;;  %v6591_v42 = vld [vmem:[#allocation41_spill] sm:$0xff]  ;;  %v1127_v23 = vrot.slane %v4414_v19, 2 }
  0xbe   : > { %v5009_v36 = vpop.f32.mrf.mxu2 }
  0xbf   : > { %3658 = vmatmul.msk.bf16.gmra.mxu3 %vm657_vm1, %v1555_v40 }
  0xc0   : > { %v5020_v51 = vpop.f32.mrf.mxu1 }
  0xc1   : > { %3706 = vmatmul.msk.bf16.gmra.mxu0 %vm657_vm1, %v1875_v5  ;;  %v5012_v6 = vpop.f32.mrf.mxu3  ;;  %v3954_v5 = vld [vmem:[%s6274_s1 + $0x110] sm:$0xff] }
  0xc2   : > { %6564 = vst [vmem:[#allocation100_spill] sm:$0xff] %v5012_v6  ;;  %3011 = vmatpush.bf16.msra.mxu0 %v3954_v5  ;;  %v1876_v5 = vpack.c.bf16 %v4336_v57, %v4192_v29 }
  0xc5   : > { %v5022_v40 = vpop.f32.mrf.mxu0 }
  0xc6   : > { %v5027_v31 = vpop.f32.mrf.mxu2 }
  0xc8   : > { %v5039_v2 = vpop.f32.mrf.mxu1 }
  0xc9   : > { %v5029_v6 = vpop.f32.mrf.mxu3 }
  0xca   : > { %6565 = vst [vmem:[#allocation101_spill] sm:$0xff] %v5029_v6 }
  0xcd   : > { %3563 = vmatmul.msk.bf16.gmra.mxu1 %vm657_vm1, %v5033_v0  ;;  %3611 = vmatmul.msk.bf16.gmra.mxu2 %vm657_vm1, %v5037_v17  ;;  %v5049_v12 = vpop.f32.mrf.mxu0  ;;  %v5063_v17 = vsel %vm1084_vm2, %v1114_v61, %v1116_v21  ;;  %v1121_v0 = vrot.slane %v4249_v50, 2 }
  0xce   : > { %6569 = vst [vmem:[#allocation105_spill] sm:$0xff] %v5063_v17 }
  0xcf   : > { %3659 = vmatmul.msk.bf16.gmra.mxu3 %vm657_vm1, %v1556_v28  ;;  %v5071_v28 = vpack.c.bf16 %v5063_v17, %v4970_v45 }
  0xd0   : > { %v5052_v18 = vpop.f32.mrf.mxu2  ;;  %v5057_v7 = vpop.f32.mrf.mxu1 }
  0xd1   : > { %3707 = vmatmul.msk.bf16.gmra.mxu0 %vm657_vm1, %v1876_v5  ;;  %v5055_v6 = vpop.f32.mrf.mxu3  ;;  %6571 = vst [vmem:[#allocation107_spill] sm:$0xff] %v5071_v28 }
  0xd2   : > { %6568 = vst [vmem:[#allocation104_spill] sm:$0xff] %v5055_v6 }
  0xd5   : > { %v5060_v44 = vpop.f32.mrf.mxu0 }
  0xd8   : > { %v5065_v29 = vpop.f32.mrf.mxu2 }
  0xd9   : > { %v5067_v57 = vpop.f32.mrf.mxu3 }
  0xda   : > { %6570 = vst [vmem:[#allocation106_spill] sm:$0xff] %v5067_v57  ;;  %v5073_v5 = vpop.f32.mrf.mxu1  ;;  %v6572_v57 = vpack.c.bf16 %v4374_v26, %v4339_v60 }
  0xdd   : > { %3564 = vmatmul.msk.bf16.gmra.mxu1 %vm657_vm1, %v4145_v3  ;;  %3612 = vmatmul.msk.bf16.gmra.mxu2 %vm657_vm1, %v5071_v28  ;;  %v6574_v3 = vunpack.c.l.bf16 %v4219_v39  ;;  %v1120_v28 = vrot.slane %v4246_v49, 2  ;;  %v5111_v39 = vpack.c.bf16 %v4246_v49, %v4155_v8  ;;  %v6581_v49 = vpack.c.bf16 %v4461_v15, %v4455_v4 }
  0xde   : > { %v5079_v6 = vpop.f32.mrf.mxu0 }
  0xdf   : > { %3660 = vmatmul.msk.bf16.gmra.mxu3 %vm657_vm1, %v4203_v34  ;;  %v1118_v1 = vrot.slane %v6574_v3, 2  ;;  %v5103_v26 = vsel %vm1084_vm2, %v1120_v28, %v1121_v0  ;;  %6578 = vst [vmem:[#allocation112_spill] sm:$0xff] %v5111_v39 }
  0xe0   : > { %v5083_v61 = vpop.f32.mrf.mxu2  ;;  %6576 = vst [vmem:[#allocation110_spill] sm:$0xff] %v5103_v26 }
  0xe1   : > { %3708 = vmatmul.msk.bf16.gmra.mxu0 %vm657_vm1, %v6572_v57  ;;  %v5100_v34 = vsel %vm1084_vm2, %v1116_v21, %v1118_v1  ;;  %v1558_v1 = vpack.c.bf16 %v4414_v19, %v4344_v62 }
  0xe2   : > { %v5089_v17 = vpop.f32.mrf.mxu3  ;;  %v5091_v45 = vpop.f32.mrf.mxu1  ;;  %6575 = vst [vmem:[#allocation109_spill] sm:$0xff] %v5100_v34  ;;  %v5115_v3 = vpack.c.bf16 %v5103_v26, %v5100_v34  ;;  %v1123_v26 = vrot.slane %v4344_v62, 2  ;;  %v6583_v34 = vunpack.c.l.bf16 %v4356_v63 }
  0xe3   : > { %6573 = vst [vmem:[#allocation108_spill] sm:$0xff] %v5089_v17 }
  0xe4   : > { %6579 = vst [vmem:[#allocation113_spill] sm:$0xff] %v5115_v3 }
  0xe6   : > { %v5097_v11 = vpop.f32.mrf.mxu0 }
  0xe8   : > { %v5105_v60 = vpop.f32.mrf.mxu2 }
  0xea   : > { %v5107_v57 = vpop.f32.mrf.mxu3  ;;  %v5117_v17 = vpop.f32.mrf.mxu1 }
  0xeb   : > { %6577 = vst [vmem:[#allocation111_spill] sm:$0xff] %v5107_v57 }
  0xed   : > { %3565 = vmatmul.msk.bf16.gmra.mxu1 %vm657_vm1, %v5111_v39  ;;  %3613 = vmatmul.msk.bf16.gmra.mxu2 %vm657_vm1, %v5115_v3  ;;  %v1125_v3 = vrot.slane %v6583_v34, 2 }
  0xee   : > { %v5125_v21 = vpop.f32.mrf.mxu0 }
  0xef   : > { %3661 = vmatmul.msk.bf16.gmra.mxu3 %vm657_vm1, %v1558_v1  ;;  %v5144_v1 = vsel %vm1084_vm2, %v1121_v0, %v1123_v26  ;;  %v5147_v33 = vsel %vm1084_vm2, %v1123_v26, %v1125_v3  ;;  %v6592_v3 = vld [vmem:[#allocation54_spill] sm:$0xff] }
  0xf0   : > { %v5128_v8 = vpop.f32.mrf.mxu2  ;;  %6584 = vst [vmem:[#allocation116_spill] sm:$0xff] %v5144_v1  ;;  %v5159_v63 = vpack.c.bf16 %v5147_v33, %v5144_v1 }
  0xf1   : > { %6580 = vst [vmem:[#allocation114_spill] sm:$0xff] %v5128_v8  ;;  %3709 = vmatmul.msk.bf16.gmra.mxu0 %vm657_vm1, %v6581_v49  ;;  %v5155_v49 = vpack.c.bf16 %v4344_v62, %v4249_v50 }
  0xf2   : > { %v5134_v28 = vpop.f32.mrf.mxu3  ;;  %v5136_v57 = vpop.f32.mrf.mxu1  ;;  %6585 = vst [vmem:[#allocation117_spill] sm:$0xff] %v5147_v33 }
  0xf3   : > { %6582 = vst [vmem:[#allocation115_spill] sm:$0xff] %v5134_v28  ;;  %v6590_v28 = vld [vmem:[#allocation35_spill] sm:$0xff] }
  0xf4   : > { %6588 = vst [vmem:[#allocation120_spill] sm:$0xff] %v5155_v49  ;;  %v1559_v0 = vpack.c.bf16 %v6591_v42, %v6590_v28 }
  0xf5   : > { %6589 = vst [vmem:[#allocation121_spill] sm:$0xff] %v5159_v63 }
  0xf6   : > { %v5141_v39 = vpop.f32.mrf.mxu0 }
  0xf8   : > { %v5149_v15 = vpop.f32.mrf.mxu2 }
  0xf9   : > { %6586 = vst [vmem:[#allocation118_spill] sm:$0xff] %v5149_v15 }
  0xfa   : > { %v5151_v4 = vpop.f32.mrf.mxu3  ;;  %v964_v34 = vpop.f32.mrf.mxu1 }
  0xfb   : > { %6587 = vst [vmem:[#allocation119_spill] sm:$0xff] %v5151_v4  ;;  %v965_v50 = vadd.f32 %v964_v34, %v4915_v30  ;;  %v6593_v4 = vld [vmem:[#allocation53_spill] sm:$0xff] }
  0xfc   : > { %v6594_v33 = vpack.c.bf16 %v6592_v3, %v6593_v4 }
  0xfd   : > { %3566 = vmatmul.msk.bf16.gmra.mxu1 %vm657_vm1, %v5155_v49  ;;  %3614 = vmatmul.msk.bf16.gmra.mxu2 %vm657_vm1, %v5159_v63  ;;  %v1128_v49 = vrot.slane %v6590_v28, 2  ;;  %v1130_v63 = vrot.slane %v6591_v42, 2 }
  0xfe   : > { %v2009_v26 = vpop.f32.mrf.mxu0 }
  0xff   : > { %3662 = vmatmul.msk.bf16.gmra.mxu3 %vm657_vm1, %v1559_v0  ;;  %v5179_v30 = vsel %vm1084_vm2, %v1127_v23, %v1128_v49  ;;  %v5182_v4 = vsel %vm1084_vm2, %v1128_v49, %v1130_v63 }
 0x100   : > { %v1383_v62 = vpop.f32.mrf.mxu2  ;;  %6596 = vst [vmem:[#allocation41_spill] sm:$0xff] %v5179_v30  ;;  %v5187_v19 = vpack.c.bf16 %v5182_v4, %v5179_v30 }
 0x101   : > { %3710 = vmatmul.msk.bf16.gmra.mxu0 %vm657_vm1, %v6594_v33  ;;  %v1503_v1 = vadd.f32 %v1383_v62, %v965_v50  ;;  %6597 = vst [vmem:[#allocation54_spill] sm:$0xff] %v5182_v4  ;;  %v6605_v4 = vld [vmem:[#allocation61_spill] sm:$0xff] }
 0x102   : > { %v1689_v15 = vpop.f32.mrf.mxu3  ;;  %v966_v8 = vpop.f32.mrf.mxu1  ;;  %6598 = vst [vmem:[#allocation53_spill] sm:$0xff] %v5187_v19  ;;  %v1134_v30 = vrot.slane %v6605_v4, 2 }
 0x103   : > { %v1809_v58 = vadd.f32 %v1689_v15, %v1503_v1  ;;  %v967_v33 = vadd.f32 %v966_v8, %v4927_v9  ;;  %v6600_v15 = vld [vmem:[#allocation56_spill] sm:$0xff] }
 0x105   : > { %v5176_v43 = vadd.f32 %v2009_v26, %v1809_v58  ;;  %v6599_v58 = vld [vmem:[#allocation29_spill] sm:$0xff]  ;;  %v6601_v26 = vld [vmem:[#allocation75_spill] sm:$0xff] }
 0x106   : > { %v2011_v0 = vpop.f32.mrf.mxu0  ;;  %v6602_v3 = vpack.c.bf16 %v4689_v14, %v6601_v26 }
 0x107   : > { %6595 = vst [vmem:[#allocation35_spill] sm:$0xff] %v5176_v43 }
 0x108   : > { %v1385_v34 = vpop.f32.mrf.mxu2 }
 0x109   : > { %v1504_v50 = vadd.f32 %v1385_v34, %v967_v33 }
 0x10a   : > { %v1691_v62 = vpop.f32.mrf.mxu3  ;;  %v969_v28 = vpop.f32.mrf.mxu1 }
 0x10b   : > { %v1810_v1 = vadd.f32 %v1691_v62, %v1504_v50  ;;  %v970_v8 = vadd.f32 %v969_v28, %v4956_v47  ;;  %v6603_v62 = vld [vmem:[#allocation43_spill] sm:$0xff] }
 0x10d   : > { %3567 = vmatmul.msk.bf16.gmra.mxu1 %vm657_vm1, %v6599_v58  ;;  %3615 = vmatmul.msk.bf16.gmra.mxu2 %vm657_vm1, %v5187_v19  ;;  %v5195_v9 = vadd.f32 %v2011_v0, %v1810_v1  ;;  %v6604_v58 = vunpack.c.l.bf16 %v6603_v62  ;;  %v6606_v19 = vld [vmem:[#allocation62_spill] sm:$0xff]  ;;  %v5217_v62 = vpack.c.bf16 %v6605_v4, %v6591_v42  ;;  %v3945_v42 = vld [vmem:[%s6274_s1 + $0xc8] sm:$0xff] }
 0x10e   : > { %v2014_v23 = vpop.f32.mrf.mxu0  ;;  %2544 = vmatpush.bf16.msra.mxu2 %v3945_v42 }
 0x10f   : > { %3663 = vmatmul.msk.bf16.gmra.mxu3 %vm657_vm1, %v6600_v15  ;;  %v1132_v43 = vrot.slane %v6604_v58, 2  ;;  %v1135_v15 = vrot.slane %v6606_v19, 2 }
 0x110   : > { %v1388_v49 = vpop.f32.mrf.mxu2 }
 0x111   : > { %3711 = vmatmul.msk.bf16.gmra.mxu0 %vm657_vm1, %v6602_v3  ;;  %v1505_v33 = vadd.f32 %v1388_v49, %v970_v8  ;;  %v5209_v28 = vsel %vm1084_vm2, %v1130_v63, %v1132_v43  ;;  %v5212_v14 = vsel %vm1084_vm2, %v1134_v30, %v1135_v15  ;;  %v6609_v43 = vld [vmem:[#allocation2_spill] sm:$0xff] }
 0x112   : > { %v1694_v34 = vpop.f32.mrf.mxu3  ;;  %v971_v50 = vpop.f32.mrf.mxu1 }
 0x113   : > { %v1811_v0 = vadd.f32 %v1694_v34, %v1505_v33  ;;  %v972_v8 = vadd.f32 %v971_v50, %v4979_v46  ;;  %v6608_v34 = vld [vmem:[#allocation66_spill] sm:$0xff] }
 0x114   : > { %v1561_v63 = vpack.c.bf16 %v6609_v43, %v6608_v34 }
 0x115   : > { %v5206_v1 = vadd.f32 %v2014_v23, %v1811_v0  ;;  %v5221_v23 = vpack.c.bf16 %v5212_v14, %v5209_v28  ;;  %v6611_v0 = vld [vmem:[#allocation9_spill] sm:$0xff] }
 0x116   : > { %v2016_v47 = vpop.f32.mrf.mxu0 }
 0x117   : > { %6607 = vst [vmem:[#allocation29_spill] sm:$0xff] %v5206_v1 }
 0x118   : > { %v1390_v49 = vpop.f32.mrf.mxu2 }
 0x119   : > { %v1506_v26 = vadd.f32 %v1390_v49, %v972_v8  ;;  %v6612_v8 = vpack.c.bf16 %v6611_v0, %v4692_v59  ;;  %v3941_v59 = vld [vmem:[%s6274_s1 + $0xa8] sm:$0xff] }
 0x11a   : > { %v1696_v3 = vpop.f32.mrf.mxu3  ;;  %v974_v33 = vpop.f32.mrf.mxu1  ;;  %2322 = vmatpush.bf16.msra.mxu1 %v3941_v59  ;;  %v6621_v59 = vld [vmem:[#allocation21_spill] sm:$0xff] }
 0x11b   : > { %v1812_v58 = vadd.f32 %v1696_v3, %v1506_v26  ;;  %v975_v4 = vadd.f32 %v974_v33, %v5003_v53 }
 0x11d   : > { %3568 = vmatmul.msk.bf16.gmra.mxu1 %vm657_vm1, %v5217_v62  ;;  %3616 = vmatmul.msk.bf16.gmra.mxu2 %vm657_vm1, %v5221_v23  ;;  %v5229_v46 = vadd.f32 %v2016_v47, %v1812_v58  ;;  %v3949_v47 = vld [vmem:[%s6274_s1 + $0xe8] sm:$0xff]  ;;  %v6613_v58 = vld [vmem:[#allocation65_spill] sm:$0xff] }
 0x11e   : > { %v2019_v30 = vpop.f32.mrf.mxu0  ;;  %2780 = vmatpush.bf16.msra.mxu3 %v3949_v47  ;;  %v6618_v47 = vld [vmem:[#allocation3_spill] sm:$0xff] }
 0x11f   : > { %6610 = vst [vmem:[#allocation56_spill] sm:$0xff] %v5229_v46  ;;  %3664 = vmatmul.msk.bf16.gmra.mxu3 %vm657_vm1, %v1561_v63  ;;  %v1137_v63 = vrot.slane %v6608_v34, 2  ;;  %v6614_v46 = vunpack.c.l.bf16 %v6613_v58 }
 0x120   : > { %v1393_v50 = vpop.f32.mrf.mxu2 }
 0x121   : > { %3712 = vmatmul.msk.bf16.gmra.mxu0 %vm657_vm1, %v6612_v8  ;;  %v1507_v49 = vadd.f32 %v1393_v50, %v975_v4  ;;  %v1139_v1 = vrot.slane %v6614_v46, 2  ;;  %v5252_v4 = vsel %vm1084_vm2, %v1135_v15, %v1137_v63  ;;  %v3953_v46 = vld [vmem:[%s6274_s1 + $0x108] sm:$0xff] }
 0x122   : > { %v1699_v26 = vpop.f32.mrf.mxu3  ;;  %v976_v3 = vpop.f32.mrf.mxu1  ;;  %6616 = vst [vmem:[#allocation43_spill] sm:$0xff] %v5252_v4  ;;  %3012 = vmatpush.bf16.msra.mxu0 %v3953_v46  ;;  %v6622_v46 = vld [vmem:[#allocation10_spill] sm:$0xff] }
 0x123   : > { %v1813_v53 = vadd.f32 %v1699_v26, %v1507_v49  ;;  %v5255_v50 = vsel %vm1084_vm2, %v1137_v63, %v1139_v1  ;;  %v977_v0 = vadd.f32 %v976_v3, %v5022_v40  ;;  %v6619_v63 = vld [vmem:[#allocation4_spill] sm:$0xff] }
 0x124   : > { %6617 = vst [vmem:[#allocation61_spill] sm:$0xff] %v5255_v50  ;;  %v5267_v15 = vpack.c.bf16 %v5255_v50, %v5252_v4  ;;  %v1562_v58 = vpack.c.bf16 %v6619_v63, %v6618_v47  ;;  %v1142_v50 = vrot.slane %v6618_v47, 2  ;;  %v6635_v4 = vld [vmem:[#allocation17_spill] sm:$0xff] }
 0x125   : > { %v5249_v33 = vadd.f32 %v2019_v30, %v1813_v53  ;;  %v5263_v30 = vpack.c.bf16 %v6608_v34, %v6606_v19 }
 0x126   : > { %v2021_v42 = vpop.f32.mrf.mxu0 }
 0x127   : > { %6615 = vst [vmem:[#allocation75_spill] sm:$0xff] %v5249_v33  ;;  %v1141_v33 = vrot.slane %v6609_v43, 2 }
 0x128   : > { %v1395_v8 = vpop.f32.mrf.mxu2 }
 0x129   : > { %v1508_v49 = vadd.f32 %v1395_v8, %v977_v0  ;;  %v6623_v0 = vpack.c.bf16 %v6621_v59, %v6622_v46 }
 0x12a   : > { %v1701_v26 = vpop.f32.mrf.mxu3  ;;  %v979_v1 = vpop.f32.mrf.mxu1 }
 0x12b   : > { %v1814_v53 = vadd.f32 %v1701_v26, %v1508_v49  ;;  %v980_v34 = vadd.f32 %v979_v1, %v5049_v12  ;;  %v5289_v1 = vsel %vm1084_vm2, %v1141_v33, %v1142_v50 }
 0x12c   : > { %6625 = vst [vmem:[#allocation2_spill] sm:$0xff] %v5289_v1 }
 0x12d   : > { %3569 = vmatmul.msk.bf16.gmra.mxu1 %vm657_vm1, %v5263_v30  ;;  %3617 = vmatmul.msk.bf16.gmra.mxu2 %vm657_vm1, %v5267_v15  ;;  %v5276_v19 = vadd.f32 %v2021_v42, %v1814_v53 }
 0x12e   : > { %v2024_v40 = vpop.f32.mrf.mxu0 }
 0x12f   : > { %3665 = vmatmul.msk.bf16.gmra.mxu3 %vm657_vm1, %v1562_v58  ;;  %6620 = vst [vmem:[#allocation62_spill] sm:$0xff] %v5276_v19  ;;  %v1144_v58 = vrot.slane %v6619_v63, 2 }
 0x130   : > { %v1398_v3 = vpop.f32.mrf.mxu2 }
 0x131   : > { %3713 = vmatmul.msk.bf16.gmra.mxu0 %vm657_vm1, %v6623_v0  ;;  %v1509_v8 = vadd.f32 %v1398_v3, %v980_v34  ;;  %v5292_v59 = vsel %vm1084_vm2, %v1142_v50, %v1144_v58  ;;  %v4070_v50 = vld [vmem:[%s4142_s26 + $0x90] sm:$0xff]  }
 0x132   : > { %v1704_v49 = vpop.f32.mrf.mxu3  ;;  %v981_v26 = vpop.f32.mrf.mxu1  ;;  %6626 = vst [vmem:[#allocation9_spill] sm:$0xff] %v5292_v59  ;;  %v5297_v47 = vpack.c.bf16 %v5292_v59, %v5289_v1  ;;  %v6634_v1 = vld [vmem:[#allocation16_spill] sm:$0xff] }
 0x133   : > { %v1815_v42 = vadd.f32 %v1704_v49, %v1509_v8  ;;  %v982_v34 = vadd.f32 %v981_v26, %v5060_v44 }
 0x134   : > { %6627 = vst [vmem:[#allocation65_spill] sm:$0xff] %v5297_v47 }
 0x135   : > { %v5286_v53 = vadd.f32 %v2024_v40, %v1815_v42  ;;  %v4069_v40 = vld [vmem:[%s4142_s26 + $0x80] sm:$0xff]   ;;  %v6629_v42 = vld [vmem:[#allocation32_spill] sm:$0xff] }
 0x136   : > { %v2026_v12 = vpop.f32.mrf.mxu0 }
 0x137   : > { %6624 = vst [vmem:[#allocation66_spill] sm:$0xff] %v5286_v53  ;;  %v6632_v53 = vld [vmem:[#allocation14_spill] sm:$0xff] }
 0x138   : > { %v1400_v3 = vpop.f32.mrf.mxu2  ;;  %v6633_v59 = vunpack.c.l.bf16 %v6632_v53 }
 0x139   : > { %v1510_v46 = vadd.f32 %v1400_v3, %v982_v34  ;;  %v6630_v34 = vld [vmem:[#allocation22_spill] sm:$0xff] }
 0x13a   : > { %v1706_v43 = vpop.f32.mrf.mxu3  ;;  %v984_v0 = vpop.f32.mrf.mxu1  ;;  %v6631_v3 = vpack.c.bf16 %v6629_v42, %v6630_v34  ;;  %v1146_v19 = vrot.slane %v6633_v59, 2  ;;  %v5327_v59 = vpack.c.bf16 %v6634_v1, %v6619_v63 }
 0x13b   : > { %v1816_v8 = vadd.f32 %v1706_v43, %v1510_v46  ;;  %v985_v49 = vadd.f32 %v984_v0, %v5079_v6 }
 0x13c   : > { %v5319_v0 = vsel %vm1084_vm2, %v1144_v58, %v1146_v19  ;;  %v6639_v19 = vld [vmem:[#allocation36_spill] sm:$0xff] }
 0x13d   : > { %3570 = vmatmul.msk.bf16.gmra.mxu1 %vm657_vm1, %v4069_v40  ;;  %3618 = vmatmul.msk.bf16.gmra.mxu2 %vm657_vm1, %v5297_v47  ;;  %v5305_v44 = vadd.f32 %v2026_v12, %v1816_v8  ;;  %v1148_v47 = vrot.slane %v6634_v1, 2 }
 0x13e   : > { %v2029_v33 = vpop.f32.mrf.mxu0 }
 0x13f   : > { %3666 = vmatmul.msk.bf16.gmra.mxu3 %vm657_vm1, %v4070_v50  ;;  %6628 = vst [vmem:[#allocation3_spill] sm:$0xff] %v5305_v44  ;;  %v1149_v50 = vrot.slane %v6635_v4, 2 }
 0x140   : > { %v1403_v26 = vpop.f32.mrf.mxu2 }
 0x141   : > { %3714 = vmatmul.msk.bf16.gmra.mxu0 %vm657_vm1, %v6631_v3  ;;  %v1511_v46 = vadd.f32 %v1403_v26, %v985_v49  ;;  %v5322_v42 = vsel %vm1084_vm2, %v1148_v47, %v1149_v50 }
 0x142   : > { %v1709_v43 = vpop.f32.mrf.mxu3  ;;  %v986_v40 = vpop.f32.mrf.mxu1  ;;  %6637 = vst [vmem:[#allocation21_spill] sm:$0xff] %v5322_v42 }
 0x143   : > { %v1817_v12 = vadd.f32 %v1709_v43, %v1511_v46  ;;  %v987_v49 = vadd.f32 %v986_v40, %v5097_v11  ;;  %v6638_v46 = vld [vmem:[#allocation25_spill] sm:$0xff]  ;;  %v6641_v40 = vld [vmem:[#allocation42_spill] sm:$0xff] }
 0x144   : > { %v1564_v58 = vpack.c.bf16 %v6639_v19, %v6638_v46 }
 0x145   : > { %v5316_v8 = vadd.f32 %v2029_v33, %v1817_v12  ;;  %v5331_v33 = vpack.c.bf16 %v5322_v42, %v5319_v0  ;;  %v6642_v12 = vld [vmem:[#allocation40_spill] sm:$0xff]  ;;  %v6644_v42 = vld [vmem:[#allocation27_spill] sm:$0xff] }
 0x146   : > { %v2031_v6 = vpop.f32.mrf.mxu0  ;;  %v6645_v44 = vunpack.c.l.bf16 %v6644_v42 }
 0x147   : > { %6636 = vst [vmem:[#allocation4_spill] sm:$0xff] %v5316_v8  ;;  %v1151_v8 = vrot.slane %v6638_v46, 2 }
 0x148   : > { %v1405_v26 = vpop.f32.mrf.mxu2 }
 0x149   : > { %v1512_v34 = vadd.f32 %v1405_v26, %v987_v49  ;;  %v6643_v49 = vpack.c.bf16 %v6641_v40, %v6642_v12 }
 0x14a   : > { %v1711_v53 = vpop.f32.mrf.mxu3  ;;  %v989_v3 = vpop.f32.mrf.mxu1 }
 0x14b   : > { %v1818_v43 = vadd.f32 %v1711_v53, %v1512_v34  ;;  %v990_v63 = vadd.f32 %v989_v3, %v5125_v21  ;;  %v5353_v21 = vsel %vm1084_vm2, %v1149_v50, %v1151_v8  ;;  %v6649_v50 = vld [vmem:[#allocation45_spill] sm:$0xff] }
 0x14d   : > { %3571 = vmatmul.msk.bf16.gmra.mxu1 %vm657_vm1, %v5327_v59  ;;  %3619 = vmatmul.msk.bf16.gmra.mxu2 %vm657_vm1, %v5331_v33  ;;  %v5339_v11 = vadd.f32 %v2031_v6, %v1818_v43  ;;  %v1153_v6 = vrot.slane %v6645_v44, 2 }
 0x14e   : > { %v2034_v47 = vpop.f32.mrf.mxu0 }
 0x14f   : > { %6640 = vst [vmem:[#allocation10_spill] sm:$0xff] %v5339_v11  ;;  %3667 = vmatmul.msk.bf16.gmra.mxu3 %vm657_vm1, %v1564_v58  ;;  %v5356_v3 = vsel %vm1084_vm2, %v1151_v8, %v1153_v6  ;;  %v6652_v6 = vld [vmem:[#allocation55_spill] sm:$0xff] }
 0x150   : > { %v1408_v1 = vpop.f32.mrf.mxu2  ;;  %6647 = vst [vmem:[#allocation22_spill] sm:$0xff] %v5356_v3  ;;  %v5365_v44 = vpack.c.bf16 %v5356_v3, %v5353_v21  ;;  %v6663_v3 = vld [vmem:[#allocation64_spill] sm:$0xff] }
 0x151   : > { %3715 = vmatmul.msk.bf16.gmra.mxu0 %vm657_vm1, %v6643_v49  ;;  %v1513_v26 = vadd.f32 %v1408_v1, %v990_v63  ;;  %v5361_v49 = vpack.c.bf16 %v6638_v46, %v6635_v4 }
 0x152   : > { %v1714_v34 = vpop.f32.mrf.mxu3  ;;  %v991_v53 = vpop.f32.mrf.mxu1 }
 0x153   : > { %v1819_v43 = vadd.f32 %v1714_v34, %v1513_v26  ;;  %v992_v40 = vadd.f32 %v991_v53, %v5141_v39  ;;  %v6651_v53 = vld [vmem:[#allocation57_spill] sm:$0xff] }
 0x155   : > { %v5350_v11 = vadd.f32 %v2034_v47, %v1819_v43  ;;  %v6648_v47 = vld [vmem:[#allocation37_spill] sm:$0xff]  ;;  %v6653_v43 = vpack.c.bf16 %v6651_v53, %v6652_v6 }
 0x156   : > { %v2036_v58 = vpop.f32.mrf.mxu0  ;;  %v1565_v26 = vpack.c.bf16 %v6649_v50, %v6648_v47 }
 0x157   : > { %6646 = vst [vmem:[#allocation32_spill] sm:$0xff] %v5350_v11  ;;  %v1156_v11 = vrot.slane %v6648_v47, 2 }
 0x158   : > { %v1410_v63 = vpop.f32.mrf.mxu2 }
 0x159   : > { %v1514_v1 = vadd.f32 %v1410_v63, %v992_v40 }
 0x15a   : > { %v1716_v12 = vpop.f32.mrf.mxu3  ;;  %v994_v42 = vpop.f32.mrf.mxu1 }
 0x15b   : > { %v1820_v34 = vadd.f32 %v1716_v12, %v1514_v1  ;;  %v995_v8 = vadd.f32 %v994_v42, %v4899_v56  ;;  %v1155_v12 = vrot.slane %v6639_v19, 2 }
 0x15d   : > { %3572 = vmatmul.msk.bf16.gmra.mxu1 %vm657_vm1, %v5361_v49  ;;  %3620 = vmatmul.msk.bf16.gmra.mxu2 %vm657_vm1, %v5365_v44  ;;  %v5374_v4 = vadd.f32 %v2036_v58, %v1820_v34  ;;  %v5387_v42 = vsel %vm1084_vm2, %v1155_v12, %v1156_v11 }
 0x15e   : > { %v2039_v39 = vpop.f32.mrf.mxu0  ;;  %6655 = vst [vmem:[#allocation17_spill] sm:$0xff] %v5387_v42 }
 0x15f   : > { %3668 = vmatmul.msk.bf16.gmra.mxu3 %vm657_vm1, %v1565_v26  ;;  %6650 = vst [vmem:[#allocation14_spill] sm:$0xff] %v5374_v4  ;;  %v1158_v26 = vrot.slane %v6649_v50, 2  ;;  %v6662_v4 = vld [vmem:[#allocation63_spill] sm:$0xff] }
 0x160   : > { %v1413_v46 = vpop.f32.mrf.mxu2 }
 0x161   : > { %3716 = vmatmul.msk.bf16.gmra.mxu0 %vm657_vm1, %v6653_v43  ;;  %v1515_v40 = vadd.f32 %v1413_v46, %v995_v8  ;;  %v5390_v53 = vsel %vm1084_vm2, %v1156_v11, %v1158_v26  ;;  %v6657_v11 = vld [vmem:[#allocation58_spill] sm:$0xff] }
 0x162   : > { %v1719_v63 = vpop.f32.mrf.mxu3  ;;  %v996_v1 = vpop.f32.mrf.mxu1  ;;  %6656 = vst [vmem:[#allocation25_spill] sm:$0xff] %v5390_v53  ;;  %v5395_v19 = vpack.c.bf16 %v5390_v53, %v5387_v42  ;;  %v1162_v42 = vrot.slane %v6662_v4, 2 }
 0x163   : > { %v1821_v58 = vadd.f32 %v1719_v63, %v1515_v40  ;;  %v997_v8 = vadd.f32 %v996_v1, %v4925_v24 }
 0x165   : > { %v5384_v34 = vadd.f32 %v2039_v39, %v1821_v58  ;;  %v4071_v39 = vld [vmem:[%s4142_s26 + $0xa0] sm:$0xff]   ;;  %v6658_v58 = vld [vmem:[#allocation76_spill] sm:$0xff] }
 0x166   : > { %v2041_v56 = vpop.f32.mrf.mxu0 }
 0x167   : > { %6654 = vst [vmem:[#allocation16_spill] sm:$0xff] %v5384_v34 }
 0x168   : > { %v1415_v46 = vpop.f32.mrf.mxu2 }
 0x169   : > { %v1516_v6 = vadd.f32 %v1415_v46, %v997_v8  ;;  %v6659_v8 = vpack.c.bf16 %v4695_v20, %v6658_v58 }
 0x16a   : > { %v1721_v43 = vpop.f32.mrf.mxu3  ;;  %v999_v47 = vpop.f32.mrf.mxu1 }
 0x16b   : > { %v1822_v40 = vadd.f32 %v1721_v43, %v1516_v6  ;;  %v1000_v1 = vadd.f32 %v999_v47, %v4939_v54 }
 0x16d   : > { %3573 = vmatmul.msk.bf16.gmra.mxu1 %vm657_vm1, %v4071_v39  ;;  %3621 = vmatmul.msk.bf16.gmra.mxu2 %vm657_vm1, %v5395_v19  ;;  %v5403_v24 = vadd.f32 %v2041_v56, %v1822_v40  ;;  %v6660_v39 = vld [vmem:[#allocation47_spill] sm:$0xff] }
 0x16e   : > { %v2044_v63 = vpop.f32.mrf.mxu0  ;;  %v6661_v34 = vunpack.c.l.bf16 %v6660_v39 }
 0x16f   : > { %3669 = vmatmul.msk.bf16.gmra.mxu3 %vm657_vm1, %v6657_v11  ;;  %v1163_v11 = vrot.slane %v6663_v3, 2 }
 0x170   : > { %v1418_v12 = vpop.f32.mrf.mxu2  ;;  %v1160_v53 = vrot.slane %v6661_v34, 2  ;;  %v5425_v34 = vpack.c.bf16 %v6662_v4, %v6649_v50  ;;  %v3944_v50 = vld [vmem:[%s6274_s1 + $0xc0] sm:$0xff] }
 0x171   : > { %3717 = vmatmul.msk.bf16.gmra.mxu0 %vm657_vm1, %v6659_v8  ;;  %v1517_v46 = vadd.f32 %v1418_v12, %v1000_v1  ;;  %v5420_v20 = vsel %vm1084_vm2, %v1162_v42, %v1163_v11  ;;  %2545 = vmatpush.bf16.msra.mxu2 %v3944_v50 }
 0x172   : > { %v1724_v6 = vpop.f32.mrf.mxu3  ;;  %v1001_v43 = vpop.f32.mrf.mxu1  ;;  %v5417_v47 = vsel %vm1084_vm2, %v1158_v26, %v1160_v53  ;;  %v6666_v26 = vld [vmem:[#allocation5_spill] sm:$0xff] }
 0x173   : > { %v1823_v56 = vadd.f32 %v1724_v6, %v1517_v46  ;;  %v1002_v1 = vadd.f32 %v1001_v43, %v4977_v48  ;;  %v6665_v6 = vld [vmem:[#allocation70_spill] sm:$0xff] }
 0x174   : > { %v1567_v53 = vpack.c.bf16 %v6666_v26, %v6665_v6 }
 0x175   : > { %v5414_v40 = vadd.f32 %v2044_v63, %v1823_v56  ;;  %v5429_v63 = vpack.c.bf16 %v5420_v20, %v5417_v47  ;;  %v6668_v56 = vld [vmem:[#allocation12_spill] sm:$0xff] }
 0x176   : > { %v2046_v54 = vpop.f32.mrf.mxu0 }
 0x177   : > { %6664 = vst [vmem:[#allocation36_spill] sm:$0xff] %v5414_v40 }
 0x178   : > { %v1420_v12 = vpop.f32.mrf.mxu2 }
 0x179   : > { %v1518_v58 = vadd.f32 %v1420_v12, %v1002_v1  ;;  %v6669_v1 = vpack.c.bf16 %v6668_v56, %v4706_v10  ;;  %v3940_v10 = vld [vmem:[%s6274_s1 + $0xa0] sm:$0xff] }
 0x17a   : > { %v1726_v8 = vpop.f32.mrf.mxu3  ;;  %v1004_v46 = vpop.f32.mrf.mxu1  ;;  %2323 = vmatpush.bf16.msra.mxu1 %v3940_v10  ;;  %v6678_v10 = vld [vmem:[#allocation23_spill] sm:$0xff] }
 0x17b   : > { %v1824_v39 = vadd.f32 %v1726_v8, %v1518_v58  ;;  %v1005_v4 = vadd.f32 %v1004_v46, %v4993_v41 }
 0x17d   : > { %3574 = vmatmul.msk.bf16.gmra.mxu1 %vm657_vm1, %v5425_v34  ;;  %3622 = vmatmul.msk.bf16.gmra.mxu2 %vm657_vm1, %v5429_v63  ;;  %v5437_v48 = vadd.f32 %v2046_v54, %v1824_v39  ;;  %v3948_v54 = vld [vmem:[%s6274_s1 + $0xe0] sm:$0xff]  ;;  %v6670_v39 = vld [vmem:[#allocation69_spill] sm:$0xff] }
 0x17e   : > { %v2049_v42 = vpop.f32.mrf.mxu0  ;;  %2781 = vmatpush.bf16.msra.mxu3 %v3948_v54  ;;  %v6675_v54 = vld [vmem:[#allocation6_spill] sm:$0xff] }
 0x17f   : > { %6667 = vst [vmem:[#allocation42_spill] sm:$0xff] %v5437_v48  ;;  %3670 = vmatmul.msk.bf16.gmra.mxu3 %vm657_vm1, %v1567_v53  ;;  %v1165_v53 = vrot.slane %v6665_v6, 2  ;;  %v6671_v48 = vunpack.c.l.bf16 %v6670_v39 }
 0x180   : > { %v1423_v43 = vpop.f32.mrf.mxu2 }
 0x181   : > { %3718 = vmatmul.msk.bf16.gmra.mxu0 %vm657_vm1, %v6669_v1  ;;  %v1519_v12 = vadd.f32 %v1423_v43, %v1005_v4  ;;  %v1167_v40 = vrot.slane %v6671_v48, 2  ;;  %v5460_v4 = vsel %vm1084_vm2, %v1163_v11, %v1165_v53  ;;  %v3952_v48 = vld [vmem:[%s6274_s1 + $0x100] sm:$0xff] }
 0x182   : > { %v1729_v58 = vpop.f32.mrf.mxu3  ;;  %v1006_v8 = vpop.f32.mrf.mxu1  ;;  %6673 = vst [vmem:[#allocation27_spill] sm:$0xff] %v5460_v4  ;;  %3013 = vmatpush.bf16.msra.mxu0 %v3952_v48  ;;  %v6679_v48 = vld [vmem:[#allocation13_spill] sm:$0xff] }
 0x183   : > { %v1825_v41 = vadd.f32 %v1729_v58, %v1519_v12  ;;  %v5463_v43 = vsel %vm1084_vm2, %v1165_v53, %v1167_v40  ;;  %v1007_v56 = vadd.f32 %v1006_v8, %v5020_v51  ;;  %v6676_v53 = vld [vmem:[#allocation7_spill] sm:$0xff] }
 0x184   : > { %6674 = vst [vmem:[#allocation37_spill] sm:$0xff] %v5463_v43  ;;  %v5475_v11 = vpack.c.bf16 %v5463_v43, %v5460_v4  ;;  %v1568_v39 = vpack.c.bf16 %v6676_v53, %v6675_v54  ;;  %v1170_v43 = vrot.slane %v6675_v54, 2  ;;  %v6692_v4 = vld [vmem:[#allocation20_spill] sm:$0xff] }
 0x185   : > { %v5457_v46 = vadd.f32 %v2049_v42, %v1825_v41  ;;  %v5471_v42 = vpack.c.bf16 %v6665_v6, %v6663_v3 }
 0x186   : > { %v2051_v50 = vpop.f32.mrf.mxu0 }
 0x187   : > { %6672 = vst [vmem:[#allocation40_spill] sm:$0xff] %v5457_v46  ;;  %v1169_v46 = vrot.slane %v6666_v26, 2 }
 0x188   : > { %v1425_v1 = vpop.f32.mrf.mxu2 }
 0x189   : > { %v1520_v12 = vadd.f32 %v1425_v1, %v1007_v56  ;;  %v6680_v56 = vpack.c.bf16 %v6678_v10, %v6679_v48 }
 0x18a   : > { %v1731_v58 = vpop.f32.mrf.mxu3  ;;  %v1009_v40 = vpop.f32.mrf.mxu1 }
 0x18b   : > { %v1826_v41 = vadd.f32 %v1731_v58, %v1520_v12  ;;  %v1010_v6 = vadd.f32 %v1009_v40, %v5039_v2  ;;  %v5497_v40 = vsel %vm1084_vm2, %v1169_v46, %v1170_v43 }
 0x18c   : > { %6682 = vst [vmem:[#allocation55_spill] sm:$0xff] %v5497_v40 }
 0x18d   : > { %3575 = vmatmul.msk.bf16.gmra.mxu1 %vm657_vm1, %v5471_v42  ;;  %3623 = vmatmul.msk.bf16.gmra.mxu2 %vm657_vm1, %v5475_v11  ;;  %v5484_v3 = vadd.f32 %v2051_v50, %v1826_v41 }
 0x18e   : > { %v2054_v51 = vpop.f32.mrf.mxu0 }
 0x18f   : > { %3671 = vmatmul.msk.bf16.gmra.mxu3 %vm657_vm1, %v1568_v39  ;;  %6677 = vst [vmem:[#allocation45_spill] sm:$0xff] %v5484_v3  ;;  %v1172_v39 = vrot.slane %v6676_v53, 2 }
 0x190   : > { %v1428_v8 = vpop.f32.mrf.mxu2 }
 0x191   : > { %3719 = vmatmul.msk.bf16.gmra.mxu0 %vm657_vm1, %v6680_v56  ;;  %v1521_v1 = vadd.f32 %v1428_v8, %v1010_v6  ;;  %v5500_v10 = vsel %vm1084_vm2, %v1170_v43, %v1172_v39  ;;  %v4073_v43 = vld [vmem:[%s4142_s26 + $0xd0] sm:$0xff]  }
 0x192   : > { %v1734_v12 = vpop.f32.mrf.mxu3  ;;  %v1011_v58 = vpop.f32.mrf.mxu1  ;;  %6683 = vst [vmem:[#allocation58_spill] sm:$0xff] %v5500_v10  ;;  %v5505_v54 = vpack.c.bf16 %v5500_v10, %v5497_v40  ;;  %v6691_v40 = vld [vmem:[#allocation19_spill] sm:$0xff] }
 0x193   : > { %v1827_v50 = vadd.f32 %v1734_v12, %v1521_v1  ;;  %v1012_v6 = vadd.f32 %v1011_v58, %v5057_v7 }
 0x194   : > { %6684 = vst [vmem:[#allocation76_spill] sm:$0xff] %v5505_v54 }
 0x195   : > { %v5494_v41 = vadd.f32 %v2054_v51, %v1827_v50  ;;  %v4072_v51 = vld [vmem:[%s4142_s26 + $0xc0] sm:$0xff]  }
 0x196   : > { %v2056_v2 = vpop.f32.mrf.mxu0  ;;  %v6686_v50 = vld [vmem:[#allocation34_spill] sm:$0xff] }
 0x197   : > { %6681 = vst [vmem:[#allocation57_spill] sm:$0xff] %v5494_v41  ;;  %v6689_v41 = vld [vmem:[#allocation18_spill] sm:$0xff] }
 0x198   : > { %v1430_v8 = vpop.f32.mrf.mxu2  ;;  %v6690_v10 = vunpack.c.l.bf16 %v6689_v41 }
 0x199   : > { %v1522_v48 = vadd.f32 %v1430_v8, %v1012_v6  ;;  %v6687_v6 = vld [vmem:[#allocation24_spill] sm:$0xff] }
 0x19a   : > { %v1736_v26 = vpop.f32.mrf.mxu3  ;;  %v1014_v56 = vpop.f32.mrf.mxu1  ;;  %v6688_v8 = vpack.c.bf16 %v6686_v50, %v6687_v6  ;;  %v1174_v3 = vrot.slane %v6690_v10, 2  ;;  %v5535_v10 = vpack.c.bf16 %v6691_v40, %v6676_v53 }
 0x19b   : > { %v1828_v1 = vadd.f32 %v1736_v26, %v1522_v48  ;;  %v1015_v12 = vadd.f32 %v1014_v56, %v5073_v5 }
 0x19c   : > { %v5527_v56 = vsel %vm1084_vm2, %v1172_v39, %v1174_v3  ;;  %v6696_v3 = vld [vmem:[#allocation38_spill] sm:$0xff] }
 0x19d   : > { %3576 = vmatmul.msk.bf16.gmra.mxu1 %vm657_vm1, %v4072_v51  ;;  %3624 = vmatmul.msk.bf16.gmra.mxu2 %vm657_vm1, %v5505_v54  ;;  %v5513_v7 = vadd.f32 %v2056_v2, %v1828_v1  ;;  %v1176_v54 = vrot.slane %v6691_v40, 2 }
 0x19e   : > { %v2059_v46 = vpop.f32.mrf.mxu0 }
 0x19f   : > { %3672 = vmatmul.msk.bf16.gmra.mxu3 %vm657_vm1, %v4073_v43  ;;  %6685 = vst [vmem:[#allocation47_spill] sm:$0xff] %v5513_v7  ;;  %v1177_v43 = vrot.slane %v6692_v4, 2 }
 0x1a0   : > { %v1433_v58 = vpop.f32.mrf.mxu2 }
 0x1a1   : > { %3720 = vmatmul.msk.bf16.gmra.mxu0 %vm657_vm1, %v6688_v8  ;;  %v1523_v48 = vadd.f32 %v1433_v58, %v1015_v12  ;;  %v5530_v50 = vsel %vm1084_vm2, %v1176_v54, %v1177_v43 }
 0x1a2   : > { %v1739_v26 = vpop.f32.mrf.mxu3  ;;  %v1016_v51 = vpop.f32.mrf.mxu1  ;;  %6694 = vst [vmem:[#allocation64_spill] sm:$0xff] %v5530_v50 }
 0x1a3   : > { %v1829_v2 = vadd.f32 %v1739_v26, %v1523_v48  ;;  %v1017_v12 = vadd.f32 %v1016_v51, %v5091_v45  ;;  %v6695_v48 = vld [vmem:[#allocation28_spill] sm:$0xff]  ;;  %v6698_v51 = vld [vmem:[#allocation46_spill] sm:$0xff] }
 0x1a4   : > { %v1570_v39 = vpack.c.bf16 %v6696_v3, %v6695_v48 }
 0x1a5   : > { %v5524_v1 = vadd.f32 %v2059_v46, %v1829_v2  ;;  %v5539_v46 = vpack.c.bf16 %v5530_v50, %v5527_v56  ;;  %v6699_v2 = vld [vmem:[#allocation44_spill] sm:$0xff]  ;;  %v6701_v50 = vld [vmem:[#allocation33_spill] sm:$0xff] }
 0x1a6   : > { %v2061_v5 = vpop.f32.mrf.mxu0  ;;  %v6702_v7 = vunpack.c.l.bf16 %v6701_v50 }
 0x1a7   : > { %6693 = vst [vmem:[#allocation63_spill] sm:$0xff] %v5524_v1  ;;  %v1179_v1 = vrot.slane %v6695_v48, 2 }
 0x1a8   : > { %v1435_v58 = vpop.f32.mrf.mxu2 }
 0x1a9   : > { %v1524_v6 = vadd.f32 %v1435_v58, %v1017_v12  ;;  %v6700_v12 = vpack.c.bf16 %v6698_v51, %v6699_v2 }
 0x1aa   : > { %v1741_v41 = vpop.f32.mrf.mxu3  ;;  %v1019_v8 = vpop.f32.mrf.mxu1 }
 0x1ab   : > { %v1830_v26 = vadd.f32 %v1741_v41, %v1524_v6  ;;  %v1020_v53 = vadd.f32 %v1019_v8, %v5117_v17  ;;  %v5561_v17 = vsel %vm1084_vm2, %v1177_v43, %v1179_v1  ;;  %v6706_v43 = vld [vmem:[#allocation48_spill] sm:$0xff] }
 0x1ad   : > { %3577 = vmatmul.msk.bf16.gmra.mxu1 %vm657_vm1, %v5535_v10  ;;  %3625 = vmatmul.msk.bf16.gmra.mxu2 %vm657_vm1, %v5539_v46  ;;  %v5547_v45 = vadd.f32 %v2061_v5, %v1830_v26  ;;  %v1181_v5 = vrot.slane %v6702_v7, 2 }
 0x1ae   : > { %v2064_v54 = vpop.f32.mrf.mxu0 }
 0x1af   : > { %6697 = vst [vmem:[#allocation70_spill] sm:$0xff] %v5547_v45  ;;  %3673 = vmatmul.msk.bf16.gmra.mxu3 %vm657_vm1, %v1570_v39  ;;  %v5564_v8 = vsel %vm1084_vm2, %v1179_v1, %v1181_v5  ;;  %v6709_v5 = vld [vmem:[#allocation59_spill] sm:$0xff] }
 0x1b0   : > { %v1438_v40 = vpop.f32.mrf.mxu2  ;;  %6704 = vst [vmem:[#allocation12_spill] sm:$0xff] %v5564_v8  ;;  %v5573_v7 = vpack.c.bf16 %v5564_v8, %v5561_v17 }
 0x1b1   : > { %3721 = vmatmul.msk.bf16.gmra.mxu0 %vm657_vm1, %v6700_v12  ;;  %v1525_v58 = vadd.f32 %v1438_v40, %v1020_v53  ;;  %v5569_v12 = vpack.c.bf16 %v6695_v48, %v6692_v4 }
 0x1b2   : > { %v1744_v6 = vpop.f32.mrf.mxu3  ;;  %v1021_v41 = vpop.f32.mrf.mxu1 }
 0x1b3   : > { %v1831_v26 = vadd.f32 %v1744_v6, %v1525_v58  ;;  %v1022_v51 = vadd.f32 %v1021_v41, %v5136_v57  ;;  %v6708_v41 = vld [vmem:[#allocation60_spill] sm:$0xff] }
 0x1b5   : > { %v5558_v45 = vadd.f32 %v2064_v54, %v1831_v26  ;;  %v6705_v54 = vld [vmem:[#allocation39_spill] sm:$0xff]  ;;  %v6710_v26 = vpack.c.bf16 %v6708_v41, %v6709_v5 }
 0x1b6   : > { %v2066_v39 = vpop.f32.mrf.mxu0  ;;  %v1571_v58 = vpack.c.bf16 %v6706_v43, %v6705_v54 }
 0x1b7   : > { %6703 = vst [vmem:[#allocation5_spill] sm:$0xff] %v5558_v45  ;;  %v1184_v45 = vrot.slane %v6705_v54, 2 }
 0x1b8   : > { %v1440_v53 = vpop.f32.mrf.mxu2 }
 0x1b9   : > { %v1526_v40 = vadd.f32 %v1440_v53, %v1022_v51 }
 0x1ba   : > { %v1746_v2 = vpop.f32.mrf.mxu3  ;;  %v1024_v50 = vpop.f32.mrf.mxu1 }
 0x1bb   : > { %v1832_v6 = vadd.f32 %v1746_v2, %v1526_v40  ;;  %v1025_v1 = vadd.f32 %v1024_v50, %v4920_v25  ;;  %v1183_v2 = vrot.slane %v6696_v3, 2 }
 0x1bd   : > { %3578 = vmatmul.msk.bf16.gmra.mxu1 %vm657_vm1, %v5569_v12  ;;  %3626 = vmatmul.msk.bf16.gmra.mxu2 %vm657_vm1, %v5573_v7  ;;  %v5582_v4 = vadd.f32 %v2066_v39, %v1832_v6  ;;  %v5595_v50 = vsel %vm1084_vm2, %v1183_v2, %v1184_v45  ;;  %v4075_v2 = vld [vmem:[%s4142_s26 + $0xf0] sm:$0xff]  }
 0x1be   : > { %v2069_v57 = vpop.f32.mrf.mxu0  ;;  %6712 = vst [vmem:[#allocation7_spill] sm:$0xff] %v5595_v50 }
 0x1bf   : > { %3674 = vmatmul.msk.bf16.gmra.mxu3 %vm657_vm1, %v1571_v58  ;;  %6707 = vst [vmem:[#allocation69_spill] sm:$0xff] %v5582_v4  ;;  %v1186_v58 = vrot.slane %v6706_v43, 2  ;;  %v6718_v4 = vld [vmem:[#allocation51_spill] sm:$0xff] }
 0x1c0   : > { %v1443_v48 = vpop.f32.mrf.mxu2 }
 0x1c1   : > { %3722 = vmatmul.msk.bf16.gmra.mxu0 %vm657_vm1, %v6710_v26  ;;  %v1527_v51 = vadd.f32 %v1443_v48, %v1025_v1  ;;  %v5598_v1 = vsel %vm1084_vm2, %v1184_v45, %v1186_v58 }
 0x1c2   : > { %v1749_v53 = vpop.f32.mrf.mxu3  ;;  %v1026_v40 = vpop.f32.mrf.mxu1  ;;  %6713 = vst [vmem:[#allocation23_spill] sm:$0xff] %v5598_v1  ;;  %v5603_v54 = vpack.c.bf16 %v5598_v1, %v5595_v50  ;;  %v6719_v50 = vunpack.c.l.bf16 %v6718_v4 }
 0x1c3   : > { %v1833_v39 = vadd.f32 %v1749_v53, %v1527_v51  ;;  %v1027_v48 = vadd.f32 %v1026_v40, %v4929_v32  ;;  %v4074_v51 = vld [vmem:[%s4142_s26 + $0xe0] sm:$0xff]  }
 0x1c4   : > { %6714 = vst [vmem:[#allocation13_spill] sm:$0xff] %v5603_v54  ;;  %v4043_v53 = vld [vmem:[%s4142_s26 + $0x100] sm:$0xff]  }
 0x1c5   : > { %v5592_v6 = vadd.f32 %v2069_v57, %v1833_v39 }
 0x1c6   : > { %v2071_v25 = vpop.f32.mrf.mxu0 }
 0x1c7   : > { %6711 = vst [vmem:[#allocation6_spill] sm:$0xff] %v5592_v6  ;;  %v5621_v6 = vunpack.c.h.bf16 %v4043_v53 }
 0x1c8   : > { %v1445_v41 = vpop.f32.mrf.mxu2 }
 0x1c9   : > { %v1528_v3 = vadd.f32 %v1445_v41, %v1027_v48  ;;  %v5615_v48 = vunpack.c.l.bf16 %v4043_v53  ;;  %v6716_v41 = vld [vmem:[#allocation77_spill] sm:$0xff] }
 0x1ca   : > { %v1751_v5 = vpop.f32.mrf.mxu3  ;;  %v1029_v26 = vpop.f32.mrf.mxu1 }
 0x1cb   : > { %v1834_v57 = vadd.f32 %v1751_v5, %v1528_v3  ;;  %v1030_v40 = vadd.f32 %v1029_v26, %v4964_v38  ;;  %v6717_v3 = vpack.c.bf16 %v4723_v55, %v6716_v41  ;;  %v1862_v55 = vrot.slane %v5621_v6, 1 }
 0x1cd   : > { %3579 = vmatmul.msk.bf16.gmra.mxu1 %vm657_vm1, %v4074_v51  ;;  %3627 = vmatmul.msk.bf16.gmra.mxu2 %vm657_vm1, %v5603_v54  ;;  %v5612_v32 = vadd.f32 %v2071_v25, %v1834_v57  ;;  %v6720_v25 = vld [vmem:[#allocation67_spill] sm:$0xff]  ;;  %v1861_v54 = vrot.slane %v5615_v48, 1 }
 0x1ce   : > { %v2074_v45 = vpop.f32.mrf.mxu0  ;;  %v1190_v57 = vrot.slane %v6720_v25, 2 }
 0x1cf   : > { %3675 = vmatmul.msk.bf16.gmra.mxu3 %vm657_vm1, %v4075_v2  ;;  %6715 = vst [vmem:[#allocation34_spill] sm:$0xff] %v5612_v32  ;;  %v1188_v2 = vrot.slane %v6719_v50, 2  ;;  %v6721_v32 = vld [vmem:[#allocation68_spill] sm:$0xff] }
 0x1d0   : > { %v1448_v39 = vpop.f32.mrf.mxu2  ;;  %v1191_v38 = vrot.slane %v6721_v32, 2 }
 0x1d1   : > { %3723 = vmatmul.msk.bf16.gmra.mxu0 %vm657_vm1, %v6717_v3  ;;  %v1529_v5 = vadd.f32 %v1448_v39, %v1030_v40  ;;  %v5632_v40 = vsel %vm1084_vm2, %v1186_v58, %v1188_v2  ;;  %v5647_v58 = vsel %vm439_vm0, %v1861_v54, %v1862_v55 }
 0x1d2   : > { %v1754_v51 = vpop.f32.mrf.mxu3  ;;  %v1031_v1 = vpop.f32.mrf.mxu1  ;;  %v5635_v53 = vsel %vm1084_vm2, %v1190_v57, %v1191_v38  ;;  %6724 = vst [vmem:[#allocation19_spill] sm:$0xff] %v5647_v58  ;;  %v1893_v2 = vpack.c.bf16 %v5647_v58, %v4816_v16  ;;  %v265_v57 = vld [vmem:[%s4142_s26 + $0x108] sm:$0xf] }
 0x1d3   : > { %v1835_v26 = vadd.f32 %v1754_v51, %v1529_v5  ;;  %6723 = vst [vmem:[#allocation18_spill] sm:$0xff] %v5635_v53  ;;  %v1032_v4 = vadd.f32 %v1031_v1, %v4981_v27  ;;  %v5644_v5 = vpack.c.bf16 %v5635_v53, %v5632_v40  ;;  %v1573_v27 = vpack.c.bf16 %v5615_v48, %v4658_v13 }
 0x1d5   : > { %v5627_v8 = vadd.f32 %v2074_v45, %v1835_v26  ;;  %v5640_v45 = vpack.c.bf16 %v6720_v25, %v6706_v43  ;;  %v5663_v26 = vld [vmem:[%s4142_s26 + $0x10c] sm:$0x1] }
 0x1d6   : > { %v2076_v41 = vpop.f32.mrf.mxu0 }
 0x1d7   : > { %6722 = vst [vmem:[#allocation24_spill] sm:$0xff] %v5627_v8  ;;  %v6726_v8 = vunpack.c.l.bf16 %v4772_v52 }
 0x1d8   : > { %v1450_v50 = vpop.f32.mrf.mxu2 }
 0x1d9   : > { %v1530_v39 = vadd.f32 %v1450_v50, %v1032_v4 }
 0x1da   : > { %v1756_v3 = vpop.f32.mrf.mxu3  ;;  %v1034_v51 = vpop.f32.mrf.mxu1 }
 0x1db   : > { %v1836_v1 = vadd.f32 %v1756_v3, %v1530_v39  ;;  %v1035_v54 = vadd.f32 %v1034_v51, %v5009_v36  ;;  %v1193_v3 = vrot.slane %v4658_v13, 2 }
 0x1dd   : > { %3580 = vmatmul.msk.bf16.gmra.mxu1 %vm657_vm1, %v5640_v45  ;;  %3628 = vmatmul.msk.bf16.gmra.mxu2 %vm657_vm1, %v5644_v5  ;;  %v5657_v43 = vadd.f32 %v2076_v41, %v1836_v1  ;;  %v1195_v41 = vrot.slane %v6726_v8, 2  ;;  %v5669_v1 = vunpack.c.l.bf16 %v265_v57  ;;  %v5675_v58 = vsel %vm1084_vm2, %v1191_v38, %v1193_v3 }
 0x1de   : > { %v2079_v25 = vpop.f32.mrf.mxu0 }
 0x1df   : > { %6725 = vst [vmem:[#allocation20_spill] sm:$0xff] %v5657_v43  ;;  %3676 = vmatmul.msk.bf16.gmra.mxu3 %vm657_vm1, %v1573_v27  ;;  %v6448_v27 = vunpack.c.l.bf16 %v5663_v26 }
 0x1e0   : > { %v1453_v4 = vpop.f32.mrf.mxu2 }
 0x1e1   : > { %3724 = vmatmul.msk.bf16.gmra.mxu0 %vm657_vm1, %v1893_v2  ;;  %v1531_v16 = vadd.f32 %v1453_v4, %v1035_v54  ;;  %v5678_v2 = vsel %vm1084_vm2, %v1193_v3, %v1195_v41  ;;  %v1864_v54 = vrot.slane %v5669_v1, 1  ;;  %v1866_v52 = vrot.slane %v6448_v27, 1 }
 0x1e2   : > { %v1759_v50 = vpop.f32.mrf.mxu3  ;;  %v1036_v39 = vpop.f32.mrf.mxu1  ;;  %v5690_v38 = vpack.c.bf16 %v5678_v2, %v5675_v58 }
 0x1e3   : > { %v1837_v43 = vadd.f32 %v1759_v50, %v1531_v16  ;;  %v1037_v8 = vadd.f32 %v1036_v39, %v5027_v31  ;;  %v1574_v16 = vpack.c.bf16 %v5669_v1, %v5621_v6  ;;  %v5695_v50 = vsel %vm439_vm0, %v1862_v55, %v1864_v54 }
 0x1e4   : > { %v5698_v31 = vsel %vm439_vm0, %v1864_v54, %v1866_v52 }
 0x1e5   : > { %v5672_v36 = vadd.f32 %v2079_v25, %v1837_v43  ;;  %v5686_v43 = vpack.c.bf16 %v4658_v13, %v6721_v32  ;;  %v1894_v13 = vpack.c.bf16 %v5698_v31, %v5695_v50 }
 0x1e6   : > { %v2081_v51 = vpop.f32.mrf.mxu0 }
 0x1e7   : > { %6727 = vst [vmem:[#allocation28_spill] sm:$0xff] %v5672_v36 }
 0x1e8   : > { %v1455_v57 = vpop.f32.mrf.mxu2 }
 0x1e9   : > { %v1532_v4 = vadd.f32 %v1455_v57, %v1037_v8 }
 0x1ea   : > { %v1761_v53 = vpop.f32.mrf.mxu3  ;;  %v1039_v25 = vpop.f32.mrf.mxu1 }
 0x1eb   : > { %v1838_v39 = vadd.f32 %v1761_v53, %v1532_v4  ;;  %v1040_v55 = vadd.f32 %v1039_v25, %v5052_v18  ;;  %v6729_v18 = vpack.c.bf16 %v4860_v22, %v4857_v37  ;;  %v4076_v25 = vld [vmem:[%s4142_s26 + $0x20] sm:$0xff]  }
 0x1ed   : > { %3581 = vmatmul.msk.bf16.gmra.mxu1 %vm657_vm1, %v5686_v43  ;;  %3629 = vmatmul.msk.bf16.gmra.mxu2 %vm657_vm1, %v5690_v38  ;;  %v5706_v32 = vadd.f32 %v2081_v51, %v1838_v39 }
 0x1ee   : > { %v2084_v3 = vpop.f32.mrf.mxu0 }
 0x1ef   : > { %6728 = vst [vmem:[#allocation38_spill] sm:$0xff] %v5706_v32  ;;  %3677 = vmatmul.msk.bf16.gmra.mxu3 %vm657_vm1, %v1574_v16 }
 0x1f0   : > { %v1458_v41 = vpop.f32.mrf.mxu2 }
 0x1f1   : > { %3725 = vmatmul.msk.bf16.gmra.mxu0 %vm657_vm1, %v1894_v13  ;;  %v1533_v53 = vadd.f32 %v1458_v41, %v1040_v55  ;;  %v6730_v55 = vld [vmem:[#allocation74_spill] sm:$0xff] }
 0x1f2   : > { %v1764_v54 = vpop.f32.mrf.mxu3  ;;  %v1041_v52 = vpop.f32.mrf.mxu1 }
 0x1f3   : > { %v1839_v8 = vadd.f32 %v1764_v54, %v1533_v53  ;;  %v1042_v27 = vadd.f32 %v1041_v52, %v5065_v29 }
 0x1f5   : > { %v5711_v57 = vadd.f32 %v2084_v3, %v1839_v8 }
 0x1f6   : > { %v2086_v4 = vpop.f32.mrf.mxu0 }
 0x1f8   : > { %v1460_v51 = vpop.f32.mrf.mxu2 }
 0x1f9   : > { %v1534_v39 = vadd.f32 %v1460_v51, %v1042_v27 }
 0x1fa   : > { %v1766_v32 = vpop.f32.mrf.mxu3  ;;  %v1044_v36 = vpop.f32.mrf.mxu1 }
 0x1fb   : > { %v1840_v16 = vadd.f32 %v1766_v32, %v1534_v39  ;;  %v1045_v29 = vadd.f32 %v1044_v36, %v5083_v61  ;;  %v6732_v61 = vld [vmem:[#allocation86_spill] sm:$0xff] }
 0x1fd   : > { %3750 = vmatmul.msk.bf16.vlgmr.msra.gmra.mxu1 %vm657_vm1, %v6729_v18  ;;  %3798 = vmatmul.msk.bf16.vlgmr.msra.gmra.mxu2 %vm657_vm1, %v4076_v25  ;;  %v5720_v13 = vadd.f32 %v2086_v4, %v1840_v16  ;;  %v6731_v18 = vld [vmem:[#allocation87_spill] sm:$0xff] }
 0x1fe   : > { %v2089_v3 = vpop.f32.mrf.mxu0  ;;  %v6733_v36 = vpack.c.bf16 %v6731_v18, %v6732_v61 }
 0x1ff   : > { %3846 = vmatmul.msk.bf16.vlgmr.msra.gmra.mxu3 %vm657_vm1, %v6730_v55  ;;  %v6735_v55 = vld [vmem:[#allocation81_spill] sm:$0xff] }
 0x200   : > { %v1463_v27 = vpop.f32.mrf.mxu2 }
 0x201   : > { %3894 = vmatmul.msk.bf16.vlgmr.msra.gmra.mxu0 %vm657_vm1, %v4935_v35  ;;  %v1535_v32 = vadd.f32 %v1463_v27, %v1045_v29  ;;  %v6734_v35 = vld [vmem:[#allocation98_spill] sm:$0xff] }
 0x202   : > { %v1769_v41 = vpop.f32.mrf.mxu3  ;;  %v1046_v37 = vpop.f32.mrf.mxu1 }
 0x203   : > { %v1841_v22 = vadd.f32 %v1769_v41, %v1535_v32  ;;  %v1047_v52 = vadd.f32 %v1046_v37, %v5105_v60  ;;  %v6736_v60 = vld [vmem:[#allocation114_spill] sm:$0xff]  ;;  %v6737_v32 = vld [vmem:[#allocation99_spill] sm:$0xff] }
 0x205   : > { %v5727_v53 = vadd.f32 %v2089_v3, %v1841_v22 }
 0x206   : > { %v2091_v54 = vpop.f32.mrf.mxu0 }
 0x208   : > { %v1465_v8 = vpop.f32.mrf.mxu2 }
 0x209   : > { %v1536_v4 = vadd.f32 %v1465_v8, %v1047_v52 }
 0x20a   : > { %v1771_v51 = vpop.f32.mrf.mxu3  ;;  %v1049_v39 = vpop.f32.mrf.mxu1 }
 0x20b   : > { %v1842_v16 = vadd.f32 %v1771_v51, %v1536_v4  ;;  %v1050_v29 = vadd.f32 %v1049_v39, %v6736_v60  ;;  %v6739_v51 = vld [vmem:[#allocation118_spill] sm:$0xff]  ;;  %v6741_v39 = vld [vmem:[#allocation88_spill] sm:$0xff] }
 0x20d   : > { %3751 = vmatmul.msk.bf16.gmra.mxu1 %vm657_vm1, %v6733_v36  ;;  %3799 = vmatmul.msk.bf16.gmra.mxu2 %vm657_vm1, %v6734_v35  ;;  %v5736_v25 = vadd.f32 %v2091_v54, %v1842_v16 }
 0x20e   : > { %v2094_v3 = vpop.f32.mrf.mxu0 }
 0x20f   : > { %3847 = vmatmul.msk.bf16.gmra.mxu3 %vm657_vm1, %v6735_v55  ;;  %v6740_v55 = vld [vmem:[#allocation89_spill] sm:$0xff] }
 0x210   : > { %v1468_v27 = vpop.f32.mrf.mxu2  ;;  %v6742_v60 = vpack.c.bf16 %v6740_v55, %v6741_v39 }
 0x211   : > { %3895 = vmatmul.msk.bf16.gmra.mxu0 %vm657_vm1, %v6737_v32  ;;  %v1537_v41 = vadd.f32 %v1468_v27, %v1050_v29  ;;  %v6743_v32 = vld [vmem:[#allocation102_spill] sm:$0xff]  ;;  %v6745_v27 = vld [vmem:[#allocation85_spill] sm:$0xff] }
 0x212   : > { %v1774_v37 = vpop.f32.mrf.mxu3  ;;  %v1051_v22 = vpop.f32.mrf.mxu1 }
 0x213   : > { %v1843_v52 = vadd.f32 %v1774_v37, %v1537_v41  ;;  %v1052_v54 = vadd.f32 %v1051_v22, %v6739_v51  ;;  %v6746_v41 = vld [vmem:[#allocation90_spill] sm:$0xff] }
 0x215   : > { %v5743_v8 = vadd.f32 %v2094_v3, %v1843_v52  ;;  %v6747_v52 = vld [vmem:[#allocation103_spill] sm:$0xff] }
 0x216   : > { %v2096_v4 = vpop.f32.mrf.mxu0 }
 0x217   : > { %6738 = vst [vmem:[#allocation46_spill] sm:$0xff] %v5743_v8 }
 0x218   : > { %v1470_v16 = vpop.f32.mrf.mxu2 }
 0x219   : > { %v1538_v18 = vadd.f32 %v1470_v16, %v1052_v54 }
 0x21a   : > { %v1776_v61 = vpop.f32.mrf.mxu3  ;;  %v1054_v36 = vpop.f32.mrf.mxu1 }
 0x21b   : > { %v1844_v35 = vadd.f32 %v1776_v61, %v1538_v18  ;;  %v1055_v37 = vadd.f32 %v1054_v36, %v6746_v41  ;;  %v6750_v36 = vld [vmem:[#allocation93_spill] sm:$0xff]  ;;  %v6751_v41 = vld [vmem:[#allocation92_spill] sm:$0xff] }
 0x21c   : > { %v6752_v8 = vpack.c.bf16 %v6750_v36, %v6751_v41  ;;  %v6758_v36 = vld [vmem:[#allocation97_spill] sm:$0xff] }
 0x21d   : > { %3752 = vmatmul.msk.bf16.gmra.mxu1 %vm657_vm1, %v6742_v60  ;;  %3800 = vmatmul.msk.bf16.gmra.mxu2 %vm657_vm1, %v6743_v32  ;;  %v5752_v29 = vadd.f32 %v2096_v4, %v1844_v35  ;;  %v6749_v4 = vld [vmem:[#allocation91_spill] sm:$0xff] }
 0x21e   : > { %v2099_v3 = vpop.f32.mrf.mxu0 }
 0x21f   : > { %6744 = vst [vmem:[#allocation44_spill] sm:$0xff] %v5752_v29  ;;  %3848 = vmatmul.msk.bf16.gmra.mxu3 %vm657_vm1, %v6745_v27 }
 0x220   : > { %v1473_v22 = vpop.f32.mrf.mxu2 }
 0x221   : > { %3896 = vmatmul.msk.bf16.gmra.mxu0 %vm657_vm1, %v6747_v52  ;;  %v1539_v51 = vadd.f32 %v1473_v22, %v1055_v37  ;;  %v4077_v52 = vld [vmem:[%s4142_s26 + $0x40] sm:$0xff]   ;;  %v6754_v22 = vld [vmem:[#allocation8_spill] sm:$0xff] }
 0x222   : > { %v1779_v54 = vpop.f32.mrf.mxu3  ;;  %v1056_v16 = vpop.f32.mrf.mxu1 }
 0x223   : > { %v1845_v18 = vadd.f32 %v1779_v54, %v1539_v51  ;;  %v1057_v35 = vadd.f32 %v1056_v16, %v6749_v4  ;;  %v6755_v51 = vld [vmem:[#allocation96_spill] sm:$0xff] }
 0x225   : > { %v5759_v61 = vadd.f32 %v2099_v3, %v1845_v18  ;;  %v6756_v18 = vld [vmem:[#allocation107_spill] sm:$0xff] }
 0x226   : > { %v2101_v55 = vpop.f32.mrf.mxu0 }
 0x227   : > { %6748 = vst [vmem:[#allocation33_spill] sm:$0xff] %v5759_v61  ;;  %v6759_v61 = vld [vmem:[#allocation95_spill] sm:$0xff] }
 0x228   : > { %v1475_v39 = vpop.f32.mrf.mxu2 }
 0x229   : > { %v1540_v60 = vadd.f32 %v1475_v39, %v1057_v35 }
 0x22a   : > { %v1781_v32 = vpop.f32.mrf.mxu3  ;;  %v1059_v27 = vpop.f32.mrf.mxu1 }
 0x22b   : > { %v1846_v29 = vadd.f32 %v1781_v32, %v1540_v60  ;;  %v1060_v54 = vadd.f32 %v1059_v27, %v6755_v51  ;;  %v6760_v27 = vld [vmem:[#allocation94_spill] sm:$0xff] }
 0x22c   : > { %v6761_v51 = vpack.c.bf16 %v6759_v61, %v6760_v27  ;;  %v6768_v27 = vld [vmem:[#allocation101_spill] sm:$0xff] }
 0x22d   : > { %3753 = vmatmul.msk.bf16.gmra.mxu1 %vm657_vm1, %v6752_v8  ;;  %3801 = vmatmul.msk.bf16.gmra.mxu2 %vm657_vm1, %v4077_v52  ;;  %v5768_v37 = vadd.f32 %v2101_v55, %v1846_v29 }
 0x22e   : > { %v2104_v3 = vpop.f32.mrf.mxu0 }
 0x22f   : > { %6753 = vst [vmem:[#allocation39_spill] sm:$0xff] %v5768_v37  ;;  %3849 = vmatmul.msk.bf16.gmra.mxu3 %vm657_vm1, %v6754_v22 }
 0x230   : > { %v1478_v16 = vpop.f32.mrf.mxu2 }
 0x231   : > { %3897 = vmatmul.msk.bf16.gmra.mxu0 %vm657_vm1, %v6756_v18  ;;  %v1541_v4 = vadd.f32 %v1478_v16, %v1060_v54  ;;  %v6762_v18 = vld [vmem:[#allocation112_spill] sm:$0xff]  ;;  %v6764_v16 = vld [vmem:[#allocation26_spill] sm:$0xff] }
 0x232   : > { %v1784_v35 = vpop.f32.mrf.mxu3  ;;  %v1061_v39 = vpop.f32.mrf.mxu1 }
 0x233   : > { %v1847_v60 = vadd.f32 %v1784_v35, %v1541_v4  ;;  %v1062_v29 = vadd.f32 %v1061_v39, %v6758_v36  ;;  %v6765_v4 = vld [vmem:[#allocation100_spill] sm:$0xff] }
 0x235   : > { %v5775_v8 = vadd.f32 %v2104_v3, %v1847_v60  ;;  %v6766_v60 = vld [vmem:[#allocation113_spill] sm:$0xff] }
 0x236   : > { %v2106_v32 = vpop.f32.mrf.mxu0 }
 0x237   : > { %6757 = vst [vmem:[#allocation48_spill] sm:$0xff] %v5775_v8 }
 0x238   : > { %v1480_v55 = vpop.f32.mrf.mxu2 }
 0x239   : > { %v1542_v41 = vadd.f32 %v1480_v55, %v1062_v29 }
 0x23a   : > { %v1786_v52 = vpop.f32.mrf.mxu3  ;;  %v1064_v37 = vpop.f32.mrf.mxu1 }
 0x23b   : > { %v1848_v22 = vadd.f32 %v1786_v52, %v1542_v41  ;;  %v1065_v35 = vadd.f32 %v1064_v37, %v6765_v4 }
 0x23d   : > { %3754 = vmatmul.msk.bf16.gmra.mxu1 %vm657_vm1, %v6761_v51  ;;  %3802 = vmatmul.msk.bf16.gmra.mxu2 %vm657_vm1, %v6762_v18  ;;  %v5784_v54 = vadd.f32 %v2106_v32, %v1848_v22 }
 0x23e   : > { %v2109_v3 = vpop.f32.mrf.mxu0 }
 0x23f   : > { %6763 = vst [vmem:[#allocation60_spill] sm:$0xff] %v5784_v54  ;;  %3850 = vmatmul.msk.bf16.gmra.mxu3 %vm657_vm1, %v6764_v16  ;;  %v6769_v54 = vld [vmem:[#allocation105_spill] sm:$0xff] }
 0x240   : > { %v1483_v39 = vpop.f32.mrf.mxu2  ;;  %v6770_v16 = vld [vmem:[#allocation109_spill] sm:$0xff] }
 0x241   : > { %3898 = vmatmul.msk.bf16.gmra.mxu0 %vm657_vm1, %v6766_v60  ;;  %v1543_v36 = vadd.f32 %v1483_v39, %v1065_v35  ;;  %v2192_v8 = vpack.c.bf16 %v6770_v16, %v6769_v54  ;;  %v6771_v60 = vld [vmem:[#allocation120_spill] sm:$0xff]  ;;  %v6773_v39 = vld [vmem:[#allocation49_spill] sm:$0xff] }
 0x242   : > { %v1789_v29 = vpop.f32.mrf.mxu3  ;;  %v1066_v61 = vpop.f32.mrf.mxu1 }
 0x243   : > { %v1849_v55 = vadd.f32 %v1789_v29, %v1543_v36  ;;  %v1067_v32 = vadd.f32 %v1066_v61, %v6768_v27  ;;  %v6774_v36 = vld [vmem:[#allocation104_spill] sm:$0xff] }
 0x245   : > { %v5791_v41 = vadd.f32 %v2109_v3, %v1849_v55  ;;  %v6775_v55 = vld [vmem:[#allocation121_spill] sm:$0xff] }
 0x246   : > { %v2111_v52 = vpop.f32.mrf.mxu0 }
 0x247   : > { %6767 = vst [vmem:[#allocation59_spill] sm:$0xff] %v5791_v41 }
 0x248   : > { %v1485_v22 = vpop.f32.mrf.mxu2 }
 0x249   : > { %v1544_v51 = vadd.f32 %v1485_v22, %v1067_v32 }
 0x24a   : > { %v1791_v18 = vpop.f32.mrf.mxu3  ;;  %v1069_v37 = vpop.f32.mrf.mxu1 }
 0x24b   : > { %v1850_v4 = vadd.f32 %v1791_v18, %v1544_v51  ;;  %v1070_v29 = vadd.f32 %v1069_v37, %v6774_v36 }
 0x24d   : > { %3755 = vmatmul.msk.bf16.gmra.mxu1 %vm657_vm1, %v2192_v8  ;;  %3803 = vmatmul.msk.bf16.gmra.mxu2 %vm657_vm1, %v6771_v60  ;;  %v5799_v35 = vadd.f32 %v2111_v52, %v1850_v4  ;;  %v6777_v52 = vld [vmem:[#allocation106_spill] sm:$0xff] }
 0x24e   : > { %v2114_v3 = vpop.f32.mrf.mxu0 }
 0x24f   : > { %6772 = vst [vmem:[#allocation77_spill] sm:$0xff] %v5799_v35  ;;  %3851 = vmatmul.msk.bf16.gmra.mxu3 %vm657_vm1, %v6773_v39  ;;  %v6778_v39 = vld [vmem:[#allocation110_spill] sm:$0xff]  ;;  %v6779_v35 = vld [vmem:[#allocation116_spill] sm:$0xff] }
 0x250   : > { %v1488_v61 = vpop.f32.mrf.mxu2  ;;  %v2193_v37 = vpack.c.bf16 %v6779_v35, %v6778_v39  ;;  %v6784_v39 = vld [vmem:[#allocation111_spill] sm:$0xff] }
 0x251   : > { %3899 = vmatmul.msk.bf16.gmra.mxu0 %vm657_vm1, %v6775_v55  ;;  %v1545_v54 = vadd.f32 %v1488_v61, %v1070_v29  ;;  %v4078_v55 = vld [vmem:[%s4142_s26 + $0x60] sm:$0xff]   ;;  %v6781_v61 = vld [vmem:[#allocation71_spill] sm:$0xff] }
 0x252   : > { %v1794_v27 = vpop.f32.mrf.mxu3  ;;  %v1071_v32 = vpop.f32.mrf.mxu1 }
 0x253   : > { %v1851_v8 = vadd.f32 %v1794_v27, %v1545_v54  ;;  %v1072_v18 = vadd.f32 %v1071_v32, %v6777_v52  ;;  %v6782_v54 = vld [vmem:[#allocation108_spill] sm:$0xff] }
 0x255   : > { %v5806_v22 = vadd.f32 %v2114_v3, %v1851_v8  ;;  %v6783_v8 = vld [vmem:[#allocation53_spill] sm:$0xff] }
 0x256   : > { %v2116_v51 = vpop.f32.mrf.mxu0 }
 0x257   : > { %6776 = vst [vmem:[#allocation51_spill] sm:$0xff] %v5806_v22 }
 0x258   : > { %v1490_v16 = vpop.f32.mrf.mxu2 }
 0x259   : > { %v1546_v4 = vadd.f32 %v1490_v16, %v1072_v18 }
 0x25a   : > { %v1796_v60 = vpop.f32.mrf.mxu3  ;;  %v1074_v36 = vpop.f32.mrf.mxu1 }
 0x25b   : > { %v1852_v41 = vadd.f32 %v1796_v60, %v1546_v4  ;;  %v1075_v27 = vadd.f32 %v1074_v36, %v6782_v54 }
 0x25d   : > { %3756 = vmatmul.msk.bf16.gmra.mxu1 %vm657_vm1, %v2193_v37  ;;  %3804 = vmatmul.msk.bf16.gmra.mxu2 %vm657_vm1, %v4078_v55  ;;  %v5814_v29 = vadd.f32 %v2116_v51, %v1852_v41 }
 0x25e   : > { %v2119_v3 = vpop.f32.mrf.mxu0 }
 0x25f   : > { %6780 = vst [vmem:[#allocation67_spill] sm:$0xff] %v5814_v29  ;;  %3852 = vmatmul.msk.bf16.gmra.mxu3 %vm657_vm1, %v6781_v61  ;;  %v6785_v29 = vld [vmem:[#allocation117_spill] sm:$0xff] }
 0x260   : > { %v1493_v32 = vpop.f32.mrf.mxu2  ;;  %v6786_v61 = vld [vmem:[#allocation41_spill] sm:$0xff] }
 0x261   : > { %3900 = vmatmul.msk.bf16.gmra.mxu0 %vm657_vm1, %v6783_v8  ;;  %v1547_v35 = vadd.f32 %v1493_v32, %v1075_v27  ;;  %v2194_v22 = vpack.c.bf16 %v6786_v61, %v6785_v29  ;;  %v6787_v32 = vld [vmem:[#allocation78_spill] sm:$0xff]  ;;  %v6788_v8 = vld [vmem:[#allocation115_spill] sm:$0xff] }
 0x262   : > { %v1799_v52 = vpop.f32.mrf.mxu3  ;;  %v1076_v18 = vpop.f32.mrf.mxu1  ;;  %v6790_v61 = vld [vmem:[#allocation54_spill] sm:$0xff] }
 0x263   : > { %v1853_v16 = vadd.f32 %v1799_v52, %v1547_v35  ;;  %v1077_v41 = vadd.f32 %v1076_v18, %v6784_v39 }
 0x265   : > { %v5821_v4 = vadd.f32 %v2119_v3, %v1853_v16 }
 0x266   : > { %v2121_v60 = vpop.f32.mrf.mxu0 }
 0x268   : > { %v1495_v51 = vpop.f32.mrf.mxu2 }
 0x269   : > { %v1548_v37 = vadd.f32 %v1495_v51, %v1077_v41 }
 0x26a   : > { %v1801_v55 = vpop.f32.mrf.mxu3  ;;  %v1079_v36 = vpop.f32.mrf.mxu1 }
 0x26b   : > { %v1854_v54 = vadd.f32 %v1801_v55, %v1548_v37  ;;  %v1080_v35 = vadd.f32 %v1079_v36, %v6788_v8  ;;  %v6791_v8 = vld [vmem:[#allocation82_spill] sm:$0xff] }
 0x26d   : > { %3757 = vmatmul.msk.bf16.gmra.mxu1 %vm657_vm1, %v2194_v22  ;;  %3805 = vmatmul.msk.bf16.gmra.mxu2 %vm657_vm1, %v5217_v62  ;;  %v5829_v27 = vadd.f32 %v2121_v60, %v1854_v54  ;;  %v6789_v62 = vld [vmem:[#allocation119_spill] sm:$0xff]  ;;  %v2195_v54 = vpack.c.bf16 %v5209_v28, %v6790_v61 }
 0x26e   : > { %v2124_v3 = vpop.f32.mrf.mxu0 }
 0x26f   : > { %3853 = vmatmul.msk.bf16.gmra.mxu3 %vm657_vm1, %v6787_v32 }
 0x270   : > { %v1498_v52 = vpop.f32.mrf.mxu2 }
 0x271   : > { %3901 = vmatmul.msk.bf16.gmra.mxu0 %vm657_vm1, %v5221_v23  ;;  %v1549_v29 = vadd.f32 %v1498_v52, %v1080_v35  ;;  %v6792_v35 = vld [vmem:[#allocation35_spill] sm:$0xff] }
 0x272   : > { %v1804_v18 = vpop.f32.mrf.mxu3  ;;  %v1081_v16 = vpop.f32.mrf.mxu1 }
 0x273   : > { %v1855_v39 = vadd.f32 %v1804_v18, %v1549_v29  ;;  %v1082_v60 = vadd.f32 %v1081_v16, %v6789_v62  ;;  %v5859_v62 = vld [vmem:[%s6276_s3] ss:$0 sm:$0xff] }
 0x275   : > { %v5836_v22 = vadd.f32 %v2124_v3, %v1855_v39 }
 0x276   : > { %v2126_v41 = vpop.f32.mrf.mxu0 }
 0x278   : > { %v1500_v51 = vpop.f32.mrf.mxu2 }
 0x279   : > { %v1550_v37 = vadd.f32 %v1500_v51, %v1082_v60 }
 0x27a   : > { %v1806_v55 = vpop.f32.mrf.mxu3  ;;  %v2325_v36 = vpop.f32.mrf.mxu1 }
 0x27b   : > { %v1856_v32 = vadd.f32 %v1806_v55, %v1550_v37  ;;  %v2445_v52 = vadd.f32 %v2325_v36, %v6792_v35  ;;  %v6793_v36 = vld [vmem:[#allocation43_spill] sm:$0xff] }
 0x27d   : > { %3758 = vmatmul.msk.bf16.gmra.mxu1 %vm657_vm1, %v2195_v54  ;;  %3806 = vmatmul.msk.bf16.gmra.mxu2 %vm657_vm1, %v5263_v30  ;;  %v5844_v23 = vadd.f32 %v2126_v41, %v1856_v32  ;;  %v5854_v30 = vld [vmem:[%s6275_s2] ss:$0 sm:$0xff]  ;;  %v2196_v32 = vpack.c.bf16 %v6793_v36, %v5212_v14 }
 0x27e   : > { %v3015_v3 = vpop.f32.mrf.mxu0 }
 0x27f   : > { %3854 = vmatmul.msk.bf16.gmra.mxu3 %vm657_vm1, %v6791_v8 }
 0x280   : > { %v2547_v29 = vpop.f32.mrf.mxu2 }
 0x281   : > { %3902 = vmatmul.msk.bf16.gmra.mxu0 %vm657_vm1, %v5267_v15  ;;  %v2667_v28 = vadd.f32 %v2547_v29, %v2445_v52  ;;  %v4079_v29 = vld [vmem:[%s4142_s26 + $0x80] sm:$0xff]  }
 0x282   : > { %v2783_v18 = vpop.f32.mrf.mxu3  ;;  %v2327_v16 = vpop.f32.mrf.mxu1 }
 0x283   : > { %v2903_v39 = vadd.f32 %v2783_v18, %v2667_v28  ;;  %v2446_v15 = vadd.f32 %v2327_v16, %v5195_v9  ;;  %v6794_v18 = vld [vmem:[#allocation11_spill] sm:$0xff]  ;;  %v6795_v16 = vld [vmem:[#allocation29_spill] sm:$0xff] }
 0x285   : > { %v3135_v41 = vadd.f32 %v3015_v3, %v2903_v39 }
 0x286   : > { %v3017_v60 = vpop.f32.mrf.mxu0 }
 0x287   : > { %v3187_v51 = vmul.f32 %v5854_v30, %v3135_v41 }
 0x288   : > { %v2549_v37 = vpop.f32.mrf.mxu2 }
 0x289   : > { %v3239_v55 = vadd.f32 %v5859_v62, %v3187_v51  ;;  %v2668_v61 = vadd.f32 %v2549_v37, %v2446_v15 }
 0x28a   : > { %v2785_v54 = vpop.f32.mrf.mxu3  ;;  %v2330_v3 = vpop.f32.mrf.mxu1 }
 0x28b   : > { %v3287_v8 = vmax.f32 %v3239_v55, 0.0  ;;  %v2904_v35 = vadd.f32 %v2785_v54, %v2668_v61  ;;  %v2447_v39 = vadd.f32 %v2330_v3, %v6795_v16  ;;  %v6798_v16 = vld [vmem:[#allocation61_spill] sm:$0xff] }
 0x28d   : > { %v3335_v9 = vpack.c.bf16 %v3287_v8, %v3287_v8  ;;  %v3136_v52 = vadd.f32 %v3017_v60, %v2904_v35  ;;  %3759 = vmatmul.msk.bf16.gmra.mxu1 %vm657_vm1, %v2196_v32  ;;  %3807 = vmatmul.msk.bf16.gmra.mxu2 %vm657_vm1, %v4079_v29  ;;  %v6796_v60 = vld [vmem:[#allocation65_spill] sm:$0xff] }
 0x28e   : > { %v3020_v28 = vpop.f32.mrf.mxu0 }
 0x28f   : > { %3855 = vmatmul.msk.bf16.gmra.mxu3 %vm657_vm1, %v6794_v18  ;;  %3384 = vst.msk [vmem:[%s5870_s5] sm:$0xf] %vm3383_vm3, %v3335_v9  ;;  %v3188_v14 = vmul.f32 %v5854_v30, %v3136_v52  ;;  %v6797_v9 = vld [vmem:[#allocation56_spill] sm:$0xff] }
 0x290   : > { %v2552_v41 = vpop.f32.mrf.mxu2 }
 0x291   : > { %v3240_v51 = vadd.f32 %v5859_v62, %v3188_v14  ;;  %3903 = vmatmul.msk.bf16.gmra.mxu0 %vm657_vm1, %v6796_v60  ;;  %v2669_v15 = vadd.f32 %v2552_v41, %v2447_v39  ;;  %v6799_v39 = vld [vmem:[#allocation2_spill] sm:$0xff] }
 0x292   : > { %v2788_v37 = vpop.f32.mrf.mxu3  ;;  %v2332_v55 = vpop.f32.mrf.mxu1  ;;  %v2197_v41 = vpack.c.bf16 %v6799_v39, %v6798_v16 }
 0x293   : > { %v3288_v61 = vmax.f32 %v3240_v51, 0.0  ;;  %v2905_v54 = vadd.f32 %v2788_v37, %v2669_v15  ;;  %v2448_v3 = vadd.f32 %v2332_v55, %v6797_v9  ;;  %v6800_v55 = vld [vmem:[#allocation30_spill] sm:$0xff] }
 0x295   : > { %v3336_v36 = vpack.c.bf16 %v3288_v61, %v3288_v61  ;;  %v3137_v32 = vadd.f32 %v3020_v28, %v2905_v54 }
 0x296   : > { %v3022_v8 = vpop.f32.mrf.mxu0 }
 0x297   : > { %3385 = vst.msk [vmem:[%s5870_s5 + $0x4] sm:$0xf] %vm3383_vm3, %v3336_v36  ;;  %v3189_v35 = vmul.f32 %v5854_v30, %v3137_v32  ;;  %v6801_v36 = vld [vmem:[#allocation75_spill] sm:$0xff] }
 0x298   : > { %v2554_v52 = vpop.f32.mrf.mxu2 }
 0x299   : > { %v3241_v29 = vadd.f32 %v5859_v62, %v3189_v35  ;;  %v2670_v18 = vadd.f32 %v2554_v52, %v2448_v3 }
 0x29a   : > { %v2790_v14 = vpop.f32.mrf.mxu3  ;;  %v2335_v51 = vpop.f32.mrf.mxu1 }
 0x29b   : > { %v3289_v60 = vmax.f32 %v3241_v29, 0.0  ;;  %v2906_v15 = vadd.f32 %v2790_v14, %v2670_v18  ;;  %v2449_v32 = vadd.f32 %v2335_v51, %v6801_v36 }
 0x29d   : > { %v3337_v28 = vpack.c.bf16 %v3289_v60, %v3289_v60  ;;  %v3138_v37 = vadd.f32 %v3022_v8, %v2906_v15  ;;  %3760 = vmatmul.msk.bf16.gmra.mxu1 %vm657_vm1, %v2197_v41  ;;  %3808 = vmatmul.msk.bf16.gmra.mxu2 %vm657_vm1, %v5327_v59  ;;  %v6802_v41 = vld [vmem:[#allocation62_spill] sm:$0xff] }
 0x29e   : > { %v3025_v61 = vpop.f32.mrf.mxu0 }
 0x29f   : > { %3856 = vmatmul.msk.bf16.gmra.mxu3 %vm657_vm1, %v6800_v55  ;;  %3386 = vst.msk [vmem:[%s5870_s5 + $0x8] sm:$0xf] %vm3383_vm3, %v3337_v28  ;;  %v3190_v54 = vmul.f32 %v5854_v30, %v3138_v37  ;;  %v6803_v37 = vld [vmem:[#allocation9_spill] sm:$0xff] }
 0x2a0   : > { %v2557_v35 = vpop.f32.mrf.mxu2  ;;  %v2198_v55 = vpack.c.bf16 %v5319_v0, %v6803_v37  ;;  %v6805_v0 = vld [vmem:[#allocation66_spill] sm:$0xff] }
 0x2a1   : > { %v3242_v9 = vadd.f32 %v5859_v62, %v3190_v54  ;;  %3904 = vmatmul.msk.bf16.gmra.mxu0 %vm657_vm1, %v5331_v33  ;;  %v2671_v8 = vadd.f32 %v2557_v35, %v2449_v32 }
 0x2a2   : > { %v2793_v3 = vpop.f32.mrf.mxu3  ;;  %v2337_v59 = vpop.f32.mrf.mxu1 }
 0x2a3   : > { %v3290_v52 = vmax.f32 %v3242_v9, 0.0  ;;  %v2907_v29 = vadd.f32 %v2793_v3, %v2671_v8  ;;  %v2450_v51 = vadd.f32 %v2337_v59, %v6802_v41  ;;  %v6804_v8 = vld [vmem:[#allocation50_spill] sm:$0xff] }
 0x2a5   : > { %v3338_v18 = vpack.c.bf16 %v3290_v52, %v3290_v52  ;;  %v3139_v14 = vadd.f32 %v3025_v61, %v2907_v29 }
 0x2a6   : > { %v3027_v16 = vpop.f32.mrf.mxu0 }
 0x2a7   : > { %3387 = vst.msk [vmem:[%s5870_s5 + $0xc] sm:$0xf] %vm3383_vm3, %v3338_v18  ;;  %v3191_v39 = vmul.f32 %v5854_v30, %v3139_v14 }
 0x2a8   : > { %v2559_v60 = vpop.f32.mrf.mxu2 }
 0x2a9   : > { %v3243_v15 = vadd.f32 %v5859_v62, %v3191_v39  ;;  %v2672_v28 = vadd.f32 %v2559_v60, %v2450_v51 }
 0x2aa   : > { %v2795_v33 = vpop.f32.mrf.mxu3  ;;  %v2340_v54 = vpop.f32.mrf.mxu1 }
 0x2ab   : > { %v3291_v36 = vmax.f32 %v3243_v15, 0.0  ;;  %v2908_v32 = vadd.f32 %v2795_v33, %v2672_v28  ;;  %v2451_v59 = vadd.f32 %v2340_v54, %v6805_v0  ;;  %v6806_v28 = vld [vmem:[#allocation3_spill] sm:$0xff]  ;;  %v4080_v0 = vld [vmem:[%s4142_s26 + $0xa0] sm:$0xff]  }
 0x2ad   : > { %v3339_v61 = vpack.c.bf16 %v3291_v36, %v3291_v36  ;;  %v3140_v35 = vadd.f32 %v3027_v16, %v2908_v32  ;;  %3761 = vmatmul.msk.bf16.gmra.mxu1 %vm657_vm1, %v2198_v55  ;;  %3809 = vmatmul.msk.bf16.gmra.mxu2 %vm657_vm1, %v5361_v49  ;;  %v6807_v36 = vld [vmem:[#allocation21_spill] sm:$0xff] }
 0x2ae   : > { %v3030_v9 = vpop.f32.mrf.mxu0  ;;  %v2199_v32 = vpack.c.bf16 %v5353_v21, %v6807_v36  ;;  %v6809_v21 = vld [vmem:[#allocation4_spill] sm:$0xff] }
 0x2af   : > { %3857 = vmatmul.msk.bf16.gmra.mxu3 %vm657_vm1, %v6804_v8  ;;  %3388 = vst.msk [vmem:[%s5870_s5 + $0x10] sm:$0xf] %vm3383_vm3, %v3339_v61  ;;  %v3192_v3 = vmul.f32 %v5854_v30, %v3140_v35 }
 0x2b0   : > { %v2562_v52 = vpop.f32.mrf.mxu2 }
 0x2b1   : > { %v3244_v29 = vadd.f32 %v5859_v62, %v3192_v3  ;;  %3905 = vmatmul.msk.bf16.gmra.mxu0 %vm657_vm1, %v5365_v44  ;;  %v2673_v18 = vadd.f32 %v2562_v52, %v2451_v59  ;;  %v6808_v52 = vld [vmem:[#allocation72_spill] sm:$0xff] }
 0x2b2   : > { %v2798_v14 = vpop.f32.mrf.mxu3  ;;  %v2342_v49 = vpop.f32.mrf.mxu1 }
 0x2b3   : > { %v3292_v16 = vmax.f32 %v3244_v29, 0.0  ;;  %v2909_v39 = vadd.f32 %v2798_v14, %v2673_v18  ;;  %v2452_v33 = vadd.f32 %v2342_v49, %v6806_v28 }
 0x2b5   : > { %v3340_v41 = vpack.c.bf16 %v3292_v16, %v3292_v16  ;;  %v3141_v51 = vadd.f32 %v3030_v9, %v2909_v39 }
 0x2b6   : > { %v3032_v60 = vpop.f32.mrf.mxu0 }
 0x2b7   : > { %3389 = vst.msk [vmem:[%s5870_s5 + $0x14] sm:$0xf] %vm3383_vm3, %v3340_v41  ;;  %v3193_v15 = vmul.f32 %v5854_v30, %v3141_v51 }
 0x2b8   : > { %v2564_v37 = vpop.f32.mrf.mxu2 }
 0x2b9   : > { %v3245_v55 = vadd.f32 %v5859_v62, %v3193_v15  ;;  %v2674_v44 = vadd.f32 %v2564_v37, %v2452_v33 }
 0x2ba   : > { %v2800_v54 = vpop.f32.mrf.mxu3  ;;  %v2345_v61 = vpop.f32.mrf.mxu1 }
 0x2bb   : > { %v3293_v35 = vmax.f32 %v3245_v55, 0.0  ;;  %v2910_v9 = vadd.f32 %v2800_v54, %v2674_v44  ;;  %v2453_v18 = vadd.f32 %v2345_v61, %v6809_v21  ;;  %v6810_v55 = vld [vmem:[#allocation10_spill] sm:$0xff]  ;;  %v6813_v21 = vld [vmem:[#allocation79_spill] sm:$0xff] }
 0x2bc   : > { %v6811_v61 = vld [vmem:[#allocation22_spill] sm:$0xff] }
 0x2bd   : > { %v3341_v8 = vpack.c.bf16 %v3293_v35, %v3293_v35  ;;  %v3142_v3 = vadd.f32 %v3032_v60, %v2910_v9  ;;  %3762 = vmatmul.msk.bf16.gmra.mxu1 %vm657_vm1, %v2199_v32  ;;  %3810 = vmatmul.msk.bf16.gmra.mxu2 %vm657_vm1, %v4080_v0  ;;  %v6812_v35 = vld [vmem:[#allocation17_spill] sm:$0xff] }
 0x2be   : > { %v3035_v59 = vpop.f32.mrf.mxu0  ;;  %v2200_v9 = vpack.c.bf16 %v6812_v35, %v6811_v61  ;;  %v6816_v61 = vld [vmem:[#allocation25_spill] sm:$0xff] }
 0x2bf   : > { %3858 = vmatmul.msk.bf16.gmra.mxu3 %vm657_vm1, %v6808_v52  ;;  %3390 = vst.msk [vmem:[%s5870_s5 + $0x18] sm:$0xf] %vm3383_vm3, %v3341_v8  ;;  %v3194_v29 = vmul.f32 %v5854_v30, %v3142_v3  ;;  %v2201_v35 = vpack.c.bf16 %v5417_v47, %v6816_v61  ;;  %v6818_v47 = vld [vmem:[#allocation16_spill] sm:$0xff] }
 0x2c0   : > { %v2567_v14 = vpop.f32.mrf.mxu2 }
 0x2c1   : > { %v3246_v49 = vadd.f32 %v5859_v62, %v3194_v29  ;;  %3906 = vmatmul.msk.bf16.gmra.mxu0 %vm657_vm1, %v5395_v19  ;;  %v2675_v16 = vadd.f32 %v2567_v14, %v2453_v18  ;;  %v6814_v14 = vld [vmem:[#allocation32_spill] sm:$0xff] }
 0x2c2   : > { %v2803_v39 = vpop.f32.mrf.mxu3  ;;  %v2347_v41 = vpop.f32.mrf.mxu1 }
 0x2c3   : > { %v3294_v51 = vmax.f32 %v3246_v49, 0.0  ;;  %v2911_v60 = vadd.f32 %v2803_v39, %v2675_v16  ;;  %v2454_v44 = vadd.f32 %v2347_v41, %v6810_v55 }
 0x2c5   : > { %v3342_v15 = vpack.c.bf16 %v3294_v51, %v3294_v51  ;;  %v3143_v28 = vadd.f32 %v3035_v59, %v2911_v60 }
 0x2c6   : > { %v3037_v33 = vpop.f32.mrf.mxu0 }
 0x2c7   : > { %3391 = vst.msk [vmem:[%s5870_s5 + $0x1c] sm:$0xf] %vm3383_vm3, %v3342_v15  ;;  %v3195_v37 = vmul.f32 %v5854_v30, %v3143_v28 }
 0x2c8   : > { %v2569_v54 = vpop.f32.mrf.mxu2 }
 0x2c9   : > { %v3247_v36 = vadd.f32 %v5859_v62, %v3195_v37  ;;  %v2676_v32 = vadd.f32 %v2569_v54, %v2454_v44  ;;  %v6815_v44 = vld [vmem:[#allocation14_spill] sm:$0xff] }
 0x2ca   : > { %v2805_v19 = vpop.f32.mrf.mxu3  ;;  %v2350_v8 = vpop.f32.mrf.mxu1 }
 0x2cb   : > { %v3295_v3 = vmax.f32 %v3247_v36, 0.0  ;;  %v2912_v0 = vadd.f32 %v2805_v19, %v2676_v32  ;;  %v2455_v49 = vadd.f32 %v2350_v8, %v6814_v14 }
 0x2cd   : > { %v3343_v59 = vpack.c.bf16 %v3295_v3, %v3295_v3  ;;  %v3144_v52 = vadd.f32 %v3037_v33, %v2912_v0  ;;  %3763 = vmatmul.msk.bf16.gmra.mxu1 %vm657_vm1, %v2200_v9  ;;  %3811 = vmatmul.msk.bf16.gmra.mxu2 %vm657_vm1, %v5425_v34 }
 0x2ce   : > { %v3040_v29 = vpop.f32.mrf.mxu0 }
 0x2cf   : > { %3859 = vmatmul.msk.bf16.gmra.mxu3 %vm657_vm1, %v6813_v21  ;;  %3392 = vst.msk [vmem:[%s5870_s5 + $0x20] sm:$0xf] %vm3383_vm3, %v3343_v59  ;;  %v3196_v18 = vmul.f32 %v5854_v30, %v3144_v52 }
 0x2d0   : > { %v2572_v16 = vpop.f32.mrf.mxu2 }
 0x2d1   : > { %v3248_v39 = vadd.f32 %v5859_v62, %v3196_v18  ;;  %3907 = vmatmul.msk.bf16.gmra.mxu0 %vm657_vm1, %v5429_v63  ;;  %v2677_v41 = vadd.f32 %v2572_v16, %v2455_v49 }
 0x2d2   : > { %v2808_v51 = vpop.f32.mrf.mxu3  ;;  %v2352_v34 = vpop.f32.mrf.mxu1 }
 0x2d3   : > { %v3296_v60 = vmax.f32 %v3248_v39, 0.0  ;;  %v2913_v15 = vadd.f32 %v2808_v51, %v2677_v41  ;;  %v2456_v54 = vadd.f32 %v2352_v34, %v6815_v44 }
 0x2d5   : > { %v3344_v28 = vpack.c.bf16 %v3296_v60, %v3296_v60  ;;  %v3145_v33 = vadd.f32 %v3040_v29, %v2913_v15  ;;  %v6817_v29 = vld [vmem:[#allocation83_spill] sm:$0xff] }
 0x2d6   : > { %v3042_v37 = vpop.f32.mrf.mxu0 }
 0x2d7   : > { %3393 = vst.msk [vmem:[%s5870_s5 + $0x24] sm:$0xf] %vm3383_vm3, %v3344_v28  ;;  %v3197_v55 = vmul.f32 %v5854_v30, %v3145_v33 }
 0x2d8   : > { %v2574_v36 = vpop.f32.mrf.mxu2 }
 0x2d9   : > { %v3249_v32 = vadd.f32 %v5859_v62, %v3197_v55  ;;  %v2678_v19 = vadd.f32 %v2574_v36, %v2456_v54  ;;  %v6819_v54 = vld [vmem:[#allocation27_spill] sm:$0xff] }
 0x2da   : > { %v2810_v63 = vpop.f32.mrf.mxu3  ;;  %v2355_v9 = vpop.f32.mrf.mxu1  ;;  %v2202_v36 = vpack.c.bf16 %v6819_v54, %v5420_v20  ;;  %v6821_v20 = vld [vmem:[#allocation36_spill] sm:$0xff] }
 0x2db   : > { %v3297_v8 = vmax.f32 %v3249_v32, 0.0  ;;  %v2914_v3 = vadd.f32 %v2810_v63, %v2678_v19  ;;  %v2457_v18 = vadd.f32 %v2355_v9, %v6818_v47  ;;  %v4081_v9 = vld [vmem:[%s4142_s26 + $0xc0] sm:$0xff]  }
 0x2dd   : > { %v3345_v0 = vpack.c.bf16 %v3297_v8, %v3297_v8  ;;  %v3146_v59 = vadd.f32 %v3042_v37, %v2914_v3  ;;  %3764 = vmatmul.msk.bf16.gmra.mxu1 %vm657_vm1, %v2201_v35  ;;  %3812 = vmatmul.msk.bf16.gmra.mxu2 %vm657_vm1, %v5471_v42  ;;  %v6820_v8 = vld [vmem:[#allocation15_spill] sm:$0xff] }
 0x2de   : > { %v3045_v52 = vpop.f32.mrf.mxu0 }
 0x2df   : > { %3860 = vmatmul.msk.bf16.gmra.mxu3 %vm657_vm1, %v6817_v29  ;;  %3394 = vst.msk [vmem:[%s5870_s5 + $0x28] sm:$0xf] %vm3383_vm3, %v3345_v0  ;;  %v3198_v21 = vmul.f32 %v5854_v30, %v3146_v59  ;;  %v6822_v29 = vld [vmem:[#allocation76_spill] sm:$0xff] }
 0x2e0   : > { %v2577_v14 = vpop.f32.mrf.mxu2 }
 0x2e1   : > { %v3250_v49 = vadd.f32 %v5859_v62, %v3198_v21  ;;  %3908 = vmatmul.msk.bf16.gmra.mxu0 %vm657_vm1, %v5475_v11  ;;  %v2679_v16 = vadd.f32 %v2577_v14, %v2457_v18 }
 0x2e2   : > { %v2813_v39 = vpop.f32.mrf.mxu3  ;;  %v2357_v42 = vpop.f32.mrf.mxu1 }
 0x2e3   : > { %v3298_v41 = vmax.f32 %v3250_v49, 0.0  ;;  %v2915_v51 = vadd.f32 %v2813_v39, %v2679_v16  ;;  %v2458_v33 = vadd.f32 %v2357_v42, %v5403_v24 }
 0x2e5   : > { %v3346_v34 = vpack.c.bf16 %v3298_v41, %v3298_v41  ;;  %v3147_v60 = vadd.f32 %v3045_v52, %v2915_v51  ;;  %v6823_v51 = vld [vmem:[#allocation42_spill] sm:$0xff] }
 0x2e6   : > { %v3047_v15 = vpop.f32.mrf.mxu0 }
 0x2e7   : > { %3395 = vst.msk [vmem:[%s5870_s5 + $0x2c] sm:$0xf] %vm3383_vm3, %v3346_v34  ;;  %v3199_v28 = vmul.f32 %v5854_v30, %v3147_v60 }
 0x2e8   : > { %v2579_v37 = vpop.f32.mrf.mxu2 }
 0x2e9   : > { %v3251_v55 = vadd.f32 %v5859_v62, %v3199_v28  ;;  %v2680_v11 = vadd.f32 %v2579_v37, %v2458_v33  ;;  %v6824_v37 = vld [vmem:[#allocation37_spill] sm:$0xff] }
 0x2ea   : > { %v2815_v44 = vpop.f32.mrf.mxu3  ;;  %v2360_v32 = vpop.f32.mrf.mxu1 }
 0x2eb   : > { %v3299_v19 = vmax.f32 %v3251_v55, 0.0  ;;  %v2916_v63 = vadd.f32 %v2815_v44, %v2680_v11  ;;  %v2459_v0 = vadd.f32 %v2360_v32, %v6821_v20  ;;  %v6825_v55 = vld [vmem:[#allocation55_spill] sm:$0xff] }
 0x2ec   : > { %v2203_v11 = vpack.c.bf16 %v6825_v55, %v6824_v37  ;;  %v6830_v55 = vld [vmem:[#allocation52_spill] sm:$0xff] }
 0x2ed   : > { %v3347_v61 = vpack.c.bf16 %v3299_v19, %v3299_v19  ;;  %v3148_v35 = vadd.f32 %v3047_v15, %v2916_v63  ;;  %3765 = vmatmul.msk.bf16.gmra.mxu1 %vm657_vm1, %v2202_v36  ;;  %3813 = vmatmul.msk.bf16.gmra.mxu2 %vm657_vm1, %v4081_v9  ;;  %v6827_v9 = vld [vmem:[#allocation40_spill] sm:$0xff] }
 0x2ee   : > { %v3050_v24 = vpop.f32.mrf.mxu0 }
 0x2ef   : > { %3861 = vmatmul.msk.bf16.gmra.mxu3 %vm657_vm1, %v6820_v8  ;;  %3396 = vst.msk [vmem:[%s5870_s5 + $0x30] sm:$0xf] %vm3383_vm3, %v3347_v61  ;;  %v3200_v3 = vmul.f32 %v5854_v30, %v3148_v35  ;;  %v6826_v61 = vld [vmem:[#allocation31_spill] sm:$0xff] }
 0x2f0   : > { %v2582_v59 = vpop.f32.mrf.mxu2 }
 0x2f1   : > { %v3252_v52 = vadd.f32 %v5859_v62, %v3200_v3  ;;  %3909 = vmatmul.msk.bf16.gmra.mxu0 %vm657_vm1, %v6822_v29  ;;  %v2681_v21 = vadd.f32 %v2582_v59, %v2459_v0 }
 0x2f2   : > { %v2818_v47 = vpop.f32.mrf.mxu3  ;;  %v2362_v18 = vpop.f32.mrf.mxu1 }
 0x2f3   : > { %v3300_v14 = vmax.f32 %v3252_v52, 0.0  ;;  %v2917_v49 = vadd.f32 %v2818_v47, %v2681_v21  ;;  %v2460_v34 = vadd.f32 %v2362_v18, %v6823_v51 }
 0x2f5   : > { %v3348_v16 = vpack.c.bf16 %v3300_v14, %v3300_v14  ;;  %v3149_v39 = vadd.f32 %v3050_v24, %v2917_v49  ;;  %v6828_v14 = vld [vmem:[#allocation45_spill] sm:$0xff] }
 0x2f6   : > { %v3052_v42 = vpop.f32.mrf.mxu0 }
 0x2f7   : > { %3397 = vst.msk [vmem:[%s5870_s5 + $0x34] sm:$0xf] %vm3383_vm3, %v3348_v16  ;;  %v3201_v41 = vmul.f32 %v5854_v30, %v3149_v39 }
 0x2f8   : > { %v2584_v60 = vpop.f32.mrf.mxu2 }
 0x2f9   : > { %v3253_v15 = vadd.f32 %v5859_v62, %v3201_v41  ;;  %v2682_v28 = vadd.f32 %v2584_v60, %v2460_v34  ;;  %v6829_v41 = vld [vmem:[#allocation58_spill] sm:$0xff] }
 0x2fa   : > { %v2820_v33 = vpop.f32.mrf.mxu3  ;;  %v2365_v44 = vpop.f32.mrf.mxu1  ;;  %v2204_v51 = vpack.c.bf16 %v5527_v56, %v6829_v41  ;;  %v6831_v56 = vld [vmem:[#allocation57_spill] sm:$0xff] }
 0x2fb   : > { %v3301_v54 = vmax.f32 %v3253_v15, 0.0  ;;  %v2918_v36 = vadd.f32 %v2820_v33, %v2682_v28  ;;  %v2461_v24 = vadd.f32 %v2365_v44, %v6827_v9 }
 0x2fd   : > { %v3349_v32 = vpack.c.bf16 %v3301_v54, %v3301_v54  ;;  %v3150_v19 = vadd.f32 %v3052_v42, %v2918_v36  ;;  %3766 = vmatmul.msk.bf16.gmra.mxu1 %vm657_vm1, %v2203_v11  ;;  %3814 = vmatmul.msk.bf16.gmra.mxu2 %vm657_vm1, %v5535_v10 }
 0x2fe   : > { %v3055_v63 = vpop.f32.mrf.mxu0 }
 0x2ff   : > { %3862 = vmatmul.msk.bf16.gmra.mxu3 %vm657_vm1, %v6826_v61  ;;  %3398 = vst.msk [vmem:[%s5870_s5 + $0x38] sm:$0xf] %vm3383_vm3, %v3349_v32  ;;  %v3202_v35 = vmul.f32 %v5854_v30, %v3150_v19 }
 0x300   : > { %v2587_v8 = vpop.f32.mrf.mxu2 }
 0x301   : > { %v3254_v3 = vadd.f32 %v5859_v62, %v3202_v35  ;;  %3910 = vmatmul.msk.bf16.gmra.mxu0 %vm657_vm1, %v5539_v46  ;;  %v2683_v20 = vadd.f32 %v2587_v8, %v2461_v24 }
 0x302   : > { %v2823_v0 = vpop.f32.mrf.mxu3  ;;  %v2367_v10 = vpop.f32.mrf.mxu1 }
 0x303   : > { %v3302_v59 = vmax.f32 %v3254_v3, 0.0  ;;  %v2919_v52 = vadd.f32 %v2823_v0, %v2683_v20  ;;  %v2462_v49 = vadd.f32 %v2367_v10, %v6828_v14  ;;  %v6832_v3 = vld [vmem:[#allocation47_spill] sm:$0xff] }
 0x305   : > { %v3350_v29 = vpack.c.bf16 %v3302_v59, %v3302_v59  ;;  %v3151_v21 = vadd.f32 %v3055_v63, %v2919_v52  ;;  %v6833_v52 = vld [vmem:[#allocation64_spill] sm:$0xff] }
 0x306   : > { %v3057_v47 = vpop.f32.mrf.mxu0 }
 0x307   : > { %3399 = vst.msk [vmem:[%s5870_s5 + $0x3c] sm:$0xf] %vm3383_vm3, %v3350_v29  ;;  %v3203_v18 = vmul.f32 %v5854_v30, %v3151_v21  ;;  %v2205_v29 = vpack.c.bf16 %v5561_v17, %v6833_v52  ;;  %v6835_v17 = vld [vmem:[#allocation63_spill] sm:$0xff] }
 0x308   : > { %v2589_v16 = vpop.f32.mrf.mxu2 }
 0x309   : > { %v3255_v39 = vadd.f32 %v5859_v62, %v3203_v18  ;;  %v2684_v42 = vadd.f32 %v2589_v16, %v2462_v49  ;;  %v4082_v16 = vld [vmem:[%s4142_s26 + $0xe0] sm:$0xff]  }
 0x30a   : > { %v2825_v46 = vpop.f32.mrf.mxu3  ;;  %v2370_v34 = vpop.f32.mrf.mxu1 }
 0x30b   : > { %v3303_v60 = vmax.f32 %v3255_v39, 0.0  ;;  %v2920_v15 = vadd.f32 %v2825_v46, %v2684_v42  ;;  %v2463_v44 = vadd.f32 %v2370_v34, %v6831_v56  ;;  %v6834_v42 = vld [vmem:[#allocation73_spill] sm:$0xff] }
 0x30d   : > { %v3351_v28 = vpack.c.bf16 %v3303_v60, %v3303_v60  ;;  %v3152_v33 = vadd.f32 %v3057_v47, %v2920_v15  ;;  %3767 = vmatmul.msk.bf16.gmra.mxu1 %vm657_vm1, %v2204_v51  ;;  %3815 = vmatmul.msk.bf16.gmra.mxu2 %vm657_vm1, %v5569_v12  ;;  %v6836_v60 = vld [vmem:[#allocation13_spill] sm:$0xff] }
 0x30e   : > { %v3060_v37 = vpop.f32.mrf.mxu0 }
 0x30f   : > { %3863 = vmatmul.msk.bf16.gmra.mxu3 %vm657_vm1, %v6830_v55  ;;  %3400 = vst.msk [vmem:[%s5870_s5 + $0x40] sm:$0xf] %vm3383_vm3, %v3351_v28  ;;  %v3204_v11 = vmul.f32 %v5854_v30, %v3152_v33 }
 0x310   : > { %v2592_v54 = vpop.f32.mrf.mxu2 }
 0x311   : > { %v3256_v36 = vadd.f32 %v5859_v62, %v3204_v11  ;;  %3911 = vmatmul.msk.bf16.gmra.mxu0 %vm657_vm1, %v5573_v7  ;;  %v2685_v32 = vadd.f32 %v2592_v54, %v2463_v44 }
 0x312   : > { %v2828_v19 = vpop.f32.mrf.mxu3  ;;  %v2372_v12 = vpop.f32.mrf.mxu1 }
 0x313   : > { %v3304_v63 = vmax.f32 %v3256_v36, 0.0  ;;  %v2921_v61 = vadd.f32 %v2828_v19, %v2685_v32  ;;  %v2464_v20 = vadd.f32 %v2372_v12, %v6832_v3  ;;  %v6837_v36 = vld [vmem:[#allocation70_spill] sm:$0xff] }
 0x315   : > { %v3352_v35 = vpack.c.bf16 %v3304_v63, %v3304_v63  ;;  %v3153_v9 = vadd.f32 %v3060_v37, %v2921_v61 }
 0x316   : > { %v3062_v24 = vpop.f32.mrf.mxu0 }
 0x317   : > { %3401 = vst.msk [vmem:[%s5870_s5 + $0x44] sm:$0xf] %vm3383_vm3, %v3352_v35  ;;  %v3205_v8 = vmul.f32 %v5854_v30, %v3153_v9  ;;  %v6838_v35 = vld [vmem:[#allocation12_spill] sm:$0xff]  ;;  %v6839_v9 = vld [vmem:[#allocation7_spill] sm:$0xff] }
 0x318   : > { %v2594_v0 = vpop.f32.mrf.mxu2 }
 0x319   : > { %v3257_v10 = vadd.f32 %v5859_v62, %v3205_v8  ;;  %v2686_v7 = vadd.f32 %v2594_v0, %v2464_v20 }
 0x31a   : > { %v2830_v59 = vpop.f32.mrf.mxu3  ;;  %v2375_v21 = vpop.f32.mrf.mxu1 }
 0x31b   : > { %v3305_v47 = vmax.f32 %v3257_v10, 0.0  ;;  %v2922_v18 = vadd.f32 %v2830_v59, %v2686_v7  ;;  %v2465_v41 = vadd.f32 %v2375_v21, %v6835_v17  ;;  %v6840_v59 = vld [vmem:[#allocation80_spill] sm:$0xff] }
 0x31d   : > { %v3353_v14 = vpack.c.bf16 %v3305_v47, %v3305_v47  ;;  %v3154_v49 = vadd.f32 %v3062_v24, %v2922_v18  ;;  %3768 = vmatmul.msk.bf16.gmra.mxu1 %vm657_vm1, %v2205_v29  ;;  %3816 = vmatmul.msk.bf16.gmra.mxu2 %vm657_vm1, %v4082_v16  ;;  %v2206_v24 = vpack.c.bf16 %v6839_v9, %v6838_v35  ;;  %v6841_v29 = vld [vmem:[#allocation5_spill] sm:$0xff] }
 0x31e   : > { %v3065_v39 = vpop.f32.mrf.mxu0 }
 0x31f   : > { %3864 = vmatmul.msk.bf16.gmra.mxu3 %vm657_vm1, %v6834_v42  ;;  %3402 = vst.msk [vmem:[%s5870_s5 + $0x48] sm:$0xf] %vm3383_vm3, %v3353_v14  ;;  %v3206_v46 = vmul.f32 %v5854_v30, %v3154_v49 }
 0x320   : > { %v2597_v51 = vpop.f32.mrf.mxu2 }
 0x321   : > { %v3258_v34 = vadd.f32 %v5859_v62, %v3206_v46  ;;  %3912 = vmatmul.msk.bf16.gmra.mxu0 %vm657_vm1, %v6836_v60  ;;  %v2687_v15 = vadd.f32 %v2597_v51, %v2465_v41  ;;  %v6842_v51 = vld [vmem:[#allocation69_spill] sm:$0xff] }
 0x322   : > { %v2833_v28 = vpop.f32.mrf.mxu3  ;;  %v2377_v33 = vpop.f32.mrf.mxu1 }
 0x323   : > { %v3306_v37 = vmax.f32 %v3258_v34, 0.0  ;;  %v2923_v55 = vadd.f32 %v2833_v28, %v2687_v15  ;;  %v2466_v32 = vadd.f32 %v2377_v33, %v6837_v36  ;;  %v6843_v33 = vld [vmem:[#allocation23_spill] sm:$0xff] }
 0x325   : > { %v3354_v11 = vpack.c.bf16 %v3306_v37, %v3306_v37  ;;  %v3155_v56 = vadd.f32 %v3065_v39, %v2923_v55  ;;  %v2207_v37 = vpack.c.bf16 %v5632_v40, %v6843_v33 }
 0x326   : > { %v3067_v44 = vpop.f32.mrf.mxu0 }
 0x327   : > { %3403 = vst.msk [vmem:[%s5870_s5 + $0x4c] sm:$0xf] %vm3383_vm3, %v3354_v11  ;;  %v3207_v54 = vmul.f32 %v5854_v30, %v3155_v56 }
 0x328   : > { %v2599_v19 = vpop.f32.mrf.mxu2 }
 0x329   : > { %v3259_v12 = vadd.f32 %v5859_v62, %v3207_v54  ;;  %v2688_v63 = vadd.f32 %v2599_v19, %v2466_v32  ;;  %v6844_v32 = vld [vmem:[#allocation84_spill] sm:$0xff] }
 0x32a   : > { %v2835_v61 = vpop.f32.mrf.mxu3  ;;  %v2380_v8 = vpop.f32.mrf.mxu1 }
 0x32b   : > { %v3307_v3 = vmax.f32 %v3259_v12, 0.0  ;;  %v2924_v20 = vadd.f32 %v2835_v61, %v2688_v63  ;;  %v2467_v21 = vadd.f32 %v2380_v8, %v6841_v29  ;;  %v6845_v12 = vld [vmem:[#allocation6_spill] sm:$0xff] }
 0x32d   : > { %v3355_v0 = vpack.c.bf16 %v3307_v3, %v3307_v3  ;;  %v3156_v10 = vadd.f32 %v3067_v44, %v2924_v20  ;;  %3769 = vmatmul.msk.bf16.gmra.mxu1 %vm657_vm1, %v2206_v24  ;;  %3817 = vmatmul.msk.bf16.gmra.mxu2 %vm657_vm1, %v5640_v45 }
 0x32e   : > { %v3070_v7 = vpop.f32.mrf.mxu0 }
 0x32f   : > { %3865 = vmatmul.msk.bf16.gmra.mxu3 %vm657_vm1, %v6840_v59  ;;  %3404 = vst.msk [vmem:[%s5870_s5 + $0x50] sm:$0xf] %vm3383_vm3, %v3355_v0  ;;  %v3208_v52 = vmul.f32 %v5854_v30, %v3156_v10  ;;  %v2177_v10 = vrot.slane %v5615_v48, 2  ;;  %v2180_v59 = vrot.slane %v5669_v1, 2 }
 0x330   : > { %v2602_v47 = vpop.f32.mrf.mxu2 }
 0x331   : > { %v3260_v18 = vadd.f32 %v5859_v62, %v3208_v52  ;;  %3913 = vmatmul.msk.bf16.gmra.mxu0 %vm657_vm1, %v5644_v5  ;;  %v2689_v14 = vadd.f32 %v2602_v47, %v2467_v21 }
 0x332   : > { %v2838_v49 = vpop.f32.mrf.mxu3  ;;  %v2382_v45 = vpop.f32.mrf.mxu1 }
 0x333   : > { %v3308_v16 = vmax.f32 %v3260_v18, 0.0  ;;  %v2925_v39 = vadd.f32 %v2838_v49, %v2689_v14  ;;  %v2468_v34 = vadd.f32 %v2382_v45, %v6842_v51  ;;  %v6847_v49 = vld [vmem:[#allocation18_spill] sm:$0xff]  ;;  %v6848_v45 = vld [vmem:[#allocation19_spill] sm:$0xff] }
 0x334   : > { %v2208_v48 = vpack.c.bf16 %v5675_v58, %v6847_v49 }
 0x335   : > { %v3356_v42 = vpack.c.bf16 %v3308_v16, %v3308_v16  ;;  %v3157_v46 = vadd.f32 %v3070_v7, %v2925_v39  ;;  %v2178_v7 = vrot.slane %v5621_v6, 2  ;;  %v2729_v16 = vpack.c.bf16 %v5695_v50, %v6848_v45  ;;  %v270_v45 = vld [vmem:[%s4142_s26 + $0x11c] sm:$0x1] }
 0x336   : > { %v3072_v17 = vpop.f32.mrf.mxu0 }
 0x337   : > { %3405 = vst.msk [vmem:[%s5870_s5 + $0x54] sm:$0xf] %vm3383_vm3, %v3356_v42  ;;  %v3209_v41 = vmul.f32 %v5854_v30, %v3157_v46  ;;  %v2179_v39 = vsel %vm1084_vm2, %v2177_v10, %v2178_v7  ;;  %v6107_v42 = vsel %vm1084_vm2, %v2178_v7, %v2180_v59 }
 0x338   : > { %v2604_v60 = vpop.f32.mrf.mxu2  ;;  %v2961_v58 = vpack.c.bf16 %v6107_v42, %v2179_v39 }
 0x339   : > { %v3261_v15 = vadd.f32 %v5859_v62, %v3209_v41  ;;  %v2690_v28 = vadd.f32 %v2604_v60, %v2468_v34  ;;  %v4044_v41 = vld [vmem:[%s4142_s26 + $0x110] sm:$0xff]   ;;  %v4083_v60 = vld [vmem:[%s4142_s26 + $0x100] sm:$0xff]  }
 0x33a   : > { %v2840_v5 = vpop.f32.mrf.mxu3  ;;  %v2385_v55 = vpop.f32.mrf.mxu1  ;;  %v4026_v33 = vunpack.c.l.bf16 %v4044_v41 }
 0x33b   : > { %v3309_v11 = vmax.f32 %v3261_v15, 0.0  ;;  %v2926_v56 = vadd.f32 %v2840_v5, %v2690_v28  ;;  %v2469_v40 = vadd.f32 %v2385_v55, %v6845_v12  ;;  %v6849_v28 = vld [vmem:[#allocation24_spill] sm:$0xff] }
 0x33d   : > { %v3357_v44 = vpack.c.bf16 %v3309_v11, %v3309_v11  ;;  %v3158_v54 = vadd.f32 %v3072_v17, %v2926_v56  ;;  %3770 = vmatmul.msk.bf16.gmra.mxu1 %vm657_vm1, %v2207_v37  ;;  %3818 = vmatmul.msk.bf16.gmra.mxu2 %vm657_vm1, %v5686_v43  ;;  %v6119_v37 = vunpack.c.h.bf16 %v4044_v41  ;;  %v342_v41 = vunpack.c.l.bf16 %v270_v45 }
 0x33e   : > { %v3075_v36 = vpop.f32.mrf.mxu0 }
 0x33f   : > { %3866 = vmatmul.msk.bf16.gmra.mxu3 %vm657_vm1, %v6844_v32  ;;  %3406 = vst.msk [vmem:[%s5870_s5 + $0x58] sm:$0xf] %vm3383_vm3, %v3357_v44  ;;  %v3210_v19 = vmul.f32 %v5854_v30, %v3158_v54  ;;  %v2720_v12 = vrot.slane %v6119_v37, 1 }
 0x340   : > { %v2607_v63 = vpop.f32.mrf.mxu2 }
 0x341   : > { %v3262_v61 = vadd.f32 %v5859_v62, %v3210_v19  ;;  %3914 = vmatmul.msk.bf16.gmra.mxu0 %vm657_vm1, %v5690_v38  ;;  %v2691_v35 = vadd.f32 %v2607_v63, %v2469_v40  ;;  %v6846_v38 = vld [vmem:[#allocation34_spill] sm:$0xff]  ;;  %v2719_v19 = vrot.slane %v4026_v33, 1 }
 0x342   : > { %v2843_v9 = vpop.f32.mrf.mxu3  ;;  %v2387_v43 = vpop.f32.mrf.mxu1 }
 0x343   : > { %v3310_v24 = vmax.f32 %v3262_v61, 0.0  ;;  %v2927_v8 = vadd.f32 %v2843_v9, %v2691_v35  ;;  %v2470_v29 = vadd.f32 %v2387_v43, %v6846_v38  ;;  %v6850_v35 = vunpack.c.l.bf16 %v5663_v26 }
 0x344   : > { %v2951_v43 = vrot.slane %v4026_v33, 2  ;;  %v2209_v26 = vpack.c.bf16 %v2179_v39, %v5678_v2 }
 0x345   : > { %v3358_v3 = vpack.c.bf16 %v3310_v24, %v3310_v24  ;;  %v3159_v20 = vadd.f32 %v3075_v36, %v2927_v8  ;;  %v2182_v9 = vrot.slane %v6850_v35, 2  ;;  %v2952_v24 = vrot.slane %v6119_v37, 2 }
 0x346   : > { %v3077_v0 = vpop.f32.mrf.mxu0 }
 0x347   : > { %3407 = vst.msk [vmem:[%s5870_s5 + $0x5c] sm:$0xf] %vm3383_vm3, %v3358_v3  ;;  %v3211_v52 = vmul.f32 %v5854_v30, %v3159_v20  ;;  %v6851_v3 = vld [vmem:[#allocation20_spill] sm:$0xff] }
 0x348   : > { %v2609_v21 = vpop.f32.mrf.mxu2 }
 0x349   : > { %v3263_v47 = vadd.f32 %v5859_v62, %v3211_v52  ;;  %v2692_v18 = vadd.f32 %v2609_v21, %v2470_v29  ;;  %v2494_v29 = vpack.c.bf16 %v4026_v33, %v5669_v1  ;;  %v2724_v33 = vrot.slane %v342_v41, 1 }
 0x34a   : > { %v2845_v14 = vpop.f32.mrf.mxu3  ;;  %v2390_v6 = vpop.f32.mrf.mxu1 }
 0x34b   : > { %v3311_v46 = vmax.f32 %v3263_v47, 0.0  ;;  %v2928_v17 = vadd.f32 %v2845_v14, %v2692_v18  ;;  %v2471_v5 = vadd.f32 %v2390_v6, %v6849_v28  ;;  %v2183_v18 = vsel %vm1084_vm2, %v2180_v59, %v2182_v9  ;;  %v269_v6 = vld [vmem:[%s4142_s26 + $0x118] sm:$0xf]  ;;  %v6852_v59 = vld [vmem:[#allocation28_spill] sm:$0xff] }
 0x34c   : > { %v2953_v14 = vsel %vm1084_vm2, %v2951_v43, %v2952_v24 }
 0x34d   : > { %v3359_v51 = vpack.c.bf16 %v3311_v46, %v3311_v46  ;;  %v3160_v34 = vadd.f32 %v3077_v0, %v2928_v17  ;;  %3771 = vmatmul.msk.bf16.gmra.mxu1 %vm657_vm1, %v2208_v48  ;;  %3819 = vmatmul.msk.bf16.gmra.mxu2 %vm657_vm1, %v4083_v60  ;;  %v2721_v0 = vsel %vm439_vm0, %v2719_v19, %v2720_v12  ;;  %v341_v17 = vunpack.c.l.bf16 %v269_v6 }
 0x34e   : > { %v3080_v15 = vpop.f32.mrf.mxu0  ;;  %v2730_v47 = vpack.c.bf16 %v2721_v0, %v5698_v31  ;;  %v2962_v2 = vpack.c.bf16 %v2953_v14, %v2183_v18 }
 0x34f   : > { %3867 = vmatmul.msk.bf16.gmra.mxu3 %vm657_vm1, %v2729_v16  ;;  %3408 = vst.msk [vmem:[%s5870_s5 + $0x60] sm:$0xf] %vm3383_vm3, %v3359_v51  ;;  %v3212_v50 = vmul.f32 %v5854_v30, %v3160_v34 }
 0x350   : > { %v2612_v55 = vpop.f32.mrf.mxu2 }
 0x351   : > { %v3264_v11 = vadd.f32 %v5859_v62, %v3212_v50  ;;  %3915 = vmatmul.msk.bf16.gmra.mxu0 %vm657_vm1, %v2961_v58  ;;  %v2693_v56 = vadd.f32 %v2612_v55, %v2471_v5  ;;  %v2722_v5 = vrot.slane %v341_v17, 1 }
 0x352   : > { %v2848_v44 = vpop.f32.mrf.mxu3  ;;  %v2392_v54 = vpop.f32.mrf.mxu1 }
 0x353   : > { %v3312_v36 = vmax.f32 %v3264_v11, 0.0  ;;  %v2929_v32 = vadd.f32 %v2848_v44, %v2693_v56  ;;  %v2472_v20 = vadd.f32 %v2392_v54, %v6851_v3  ;;  %v2954_v44 = vrot.slane %v341_v17, 2 }
 0x354   : > { %v2956_v54 = vrot.slane %v342_v41, 2  ;;  %v2495_v3 = vpack.c.bf16 %v341_v17, %v6119_v37 }
 0x355   : > { %v3360_v40 = vpack.c.bf16 %v3312_v36, %v3312_v36  ;;  %v3161_v63 = vadd.f32 %v3080_v15, %v2929_v32  ;;  %v6853_v32 = vld [vmem:[#allocation38_spill] sm:$0xff] }
 0x356   : > { %v3082_v61 = vpop.f32.mrf.mxu0 }
 0x357   : > { %3409 = vst.msk [vmem:[%s5870_s5 + $0x64] sm:$0xf] %vm3383_vm3, %v3360_v40  ;;  %v3213_v8 = vmul.f32 %v5854_v30, %v3161_v63  ;;  %v2723_v40 = vsel %vm439_vm0, %v2720_v12, %v2722_v5  ;;  %v2725_v63 = vsel %vm439_vm0, %v2722_v5, %v2724_v33 }
 0x358   : > { %v2614_v10 = vpop.f32.mrf.mxu2  ;;  %v2731_v0 = vpack.c.bf16 %v2725_v63, %v2723_v40 }
 0x359   : > { %v3265_v7 = vadd.f32 %v5859_v62, %v3213_v8  ;;  %v2694_v52 = vadd.f32 %v2614_v10, %v2472_v20  ;;  %v2210_v8 = vpack.c.bf16 %v2183_v18, %v6107_v42  ;;  %v2955_v10 = vsel %vm1084_vm2, %v2952_v24, %v2954_v44 }
 0x35a   : > { %v2850_v38 = vpop.f32.mrf.mxu3  ;;  %v2395_v21 = vpop.f32.mrf.mxu1 }
 0x35b   : > { %v3313_v49 = vmax.f32 %v3265_v7, 0.0  ;;  %v2930_v48 = vadd.f32 %v2850_v38, %v2694_v52  ;;  %v2473_v39 = vadd.f32 %v2395_v21, %v6852_v59  ;;  %v2957_v7 = vsel %vm1084_vm2, %v2954_v44, %v2956_v54 }
 0x35d   : > { %v3361_v16 = vpack.c.bf16 %v3313_v49, %v3313_v49  ;;  %v3162_v46 = vadd.f32 %v3082_v61, %v2930_v48  ;;  %3772 = vmatmul.msk.bf16.gmra.mxu1 %vm657_vm1, %v2209_v26  ;;  %3820 = vmatmul.msk.bf16.gmra.mxu2 %vm657_vm1, %v2494_v29  ;;  %v2963_v29 = vpack.c.bf16 %v2957_v7, %v2955_v10  ;;  %v6854_v10 = vld [vmem:[#allocation46_spill] sm:$0xff] }
 0x35e   : > { %v3085_v1 = vpop.f32.mrf.mxu0 }
 0x35f   : > { %3868 = vmatmul.msk.bf16.gmra.mxu3 %vm657_vm1, %v2730_v47  ;;  %3410 = vst.msk [vmem:[%s5870_s5 + $0x68] sm:$0xf] %vm3383_vm3, %v3361_v16  ;;  %v3214_v31 = vmul.f32 %v5854_v30, %v3162_v46 }
 0x360   : > { %v2617_v51 = vpop.f32.mrf.mxu2 }
 0x361   : > { %v3266_v34 = vadd.f32 %v5859_v62, %v3214_v31  ;;  %3916 = vmatmul.msk.bf16.gmra.mxu0 %vm657_vm1, %v2962_v2  ;;  %v2695_v60 = vadd.f32 %v2617_v51, %v2473_v39 }
 0x362   : > { %v2853_v58 = vpop.f32.mrf.mxu3  ;;  %v2397_v15 = vpop.f32.mrf.mxu1 }
 0x363   : > { %v3314_v50 = vmax.f32 %v3266_v34, 0.0  ;;  %v2931_v28 = vadd.f32 %v2853_v58, %v2695_v60  ;;  %v2474_v19 = vadd.f32 %v2397_v15, %v6853_v32 }
 0x365   : > { %v3362_v55 = vpack.c.bf16 %v3314_v50, %v3314_v50  ;;  %v3163_v11 = vadd.f32 %v3085_v1, %v2931_v28  ;;  %v6186_v50 = vld [vmem:[%s6276_s3] ss:$0 sm:$0xff] }
 0x366   : > { %v3087_v56 = vpop.f32.mrf.mxu0 }
 0x367   : > { %3411 = vst.msk [vmem:[%s5870_s5 + $0x6c] sm:$0xf] %vm3383_vm3, %v3362_v55  ;;  %v3215_v36 = vmul.f32 %v5854_v30, %v3163_v11 }
 0x368   : > { %v2619_v61 = vpop.f32.mrf.mxu2 }
 0x369   : > { %v3267_v35 = vadd.f32 %v5859_v62, %v3215_v36  ;;  %v2696_v9 = vadd.f32 %v2619_v61, %v2474_v19 }
 0x36a   : > { %v2855_v43 = vpop.f32.mrf.mxu3  ;;  %v2400_v20 = vpop.f32.mrf.mxu1 }
 0x36b   : > { %v3315_v52 = vmax.f32 %v3267_v35, 0.0  ;;  %v2932_v12 = vadd.f32 %v2855_v43, %v2696_v9  ;;  %v2475_v37 = vadd.f32 %v2400_v20, %v5711_v57 }
 0x36d   : > { %v3363_v38 = vpack.c.bf16 %v3315_v52, %v3315_v52  ;;  %v3164_v26 = vadd.f32 %v3087_v56, %v2932_v12  ;;  %3773 = vmatmul.msk.bf16.gmra.mxu1 %vm657_vm1, %v2210_v8  ;;  %3821 = vmatmul.msk.bf16.gmra.mxu2 %vm657_vm1, %v2495_v3 }
 0x36e   : > { %v3090_v21 = vpop.f32.mrf.mxu0 }
 0x36f   : > { %3869 = vmatmul.msk.bf16.gmra.mxu3 %vm657_vm1, %v2731_v0  ;;  %3412 = vst.msk [vmem:[%s5870_s5 + $0x70] sm:$0xf] %vm3383_vm3, %v3363_v38  ;;  %v3216_v42 = vmul.f32 %v5854_v30, %v3164_v26 }
 0x370   : > { %v2622_v24 = vpop.f32.mrf.mxu2 }
 0x371   : > { %v3268_v47 = vadd.f32 %v5859_v62, %v3216_v42  ;;  %3917 = vmatmul.msk.bf16.gmra.mxu0 %vm657_vm1, %v2963_v29  ;;  %v2697_v18 = vadd.f32 %v2622_v24, %v2475_v37 }
 0x372   : > { %v2858_v14 = vpop.f32.mrf.mxu3  ;;  %v2402_v49 = vpop.f32.mrf.mxu1 }
 0x373   : > { %v3316_v48 = vmax.f32 %v3268_v47, 0.0  ;;  %v2933_v6 = vadd.f32 %v2858_v14, %v2697_v18  ;;  %v2476_v57 = vadd.f32 %v2402_v49, %v5720_v13  ;;  %v6855_v18 = vld [vmem:[#allocation44_spill] sm:$0xff] }
 0x375   : > { %v3364_v45 = vpack.c.bf16 %v3316_v48, %v3316_v48  ;;  %v3165_v16 = vadd.f32 %v3090_v21, %v2933_v6 }
 0x376   : > { %v3092_v46 = vpop.f32.mrf.mxu0 }
 0x377   : > { %3413 = vst.msk [vmem:[%s5870_s5 + $0x74] sm:$0xf] %vm3383_vm3, %v3364_v45  ;;  %v3217_v2 = vmul.f32 %v5854_v30, %v3165_v16  ;;  %v6179_v30 = vld [vmem:[%s6275_s2] ss:$0 sm:$0xff] }
 0x378   : > { %v2624_v1 = vpop.f32.mrf.mxu2 }
 0x379   : > { %v3269_v31 = vadd.f32 %v5859_v62, %v3217_v2  ;;  %v2698_v59 = vadd.f32 %v2624_v1, %v2476_v57 }
 0x37a   : > { %v2860_v39 = vpop.f32.mrf.mxu3  ;;  %v2405_v17 = vpop.f32.mrf.mxu1 }
 0x37b   : > { %v3317_v41 = vmax.f32 %v3269_v31, 0.0  ;;  %v2934_v51 = vadd.f32 %v2860_v39, %v2698_v59  ;;  %v2477_v62 = vadd.f32 %v2405_v17, %v5727_v53  ;;  %v6856_v39 = vld [vmem:[#allocation33_spill] sm:$0xff] }
 0x37d   : > { %v3365_v34 = vpack.c.bf16 %v3317_v41, %v3317_v41  ;;  %v3166_v60 = vadd.f32 %v3092_v46, %v2934_v51 }
 0x37e   : > { %v3095_v58 = vpop.f32.mrf.mxu0 }
 0x37f   : > { %3414 = vst.msk [vmem:[%s5870_s5 + $0x78] sm:$0xf] %vm3383_vm3, %v3365_v34  ;;  %v3218_v13 = vmul.f32 %v6179_v30, %v3166_v60 }
 0x380   : > { %v2627_v15 = vpop.f32.mrf.mxu2 }
 0x381   : > { %v3270_v28 = vadd.f32 %v6186_v50, %v3218_v13  ;;  %v2699_v5 = vadd.f32 %v2627_v15, %v2477_v62 }
 0x382   : > { %v2863_v33 = vpop.f32.mrf.mxu3  ;;  %v2407_v55 = vpop.f32.mrf.mxu1 }
 0x383   : > { %v3318_v11 = vmax.f32 %v3270_v28, 0.0  ;;  %v2935_v56 = vadd.f32 %v2863_v33, %v2699_v5  ;;  %v2478_v32 = vadd.f32 %v2407_v55, %v5736_v25  ;;  %v6857_v55 = vld [vmem:[#allocation39_spill] sm:$0xff] }
 0x385   : > { %v3366_v44 = vpack.c.bf16 %v3318_v11, %v3318_v11  ;;  %v3167_v54 = vadd.f32 %v3095_v58, %v2935_v56 }
 0x386   : > { %v3097_v36 = vpop.f32.mrf.mxu0 }
 0x387   : > { %3415 = vst.msk [vmem:[%s5870_s5 + $0x7c] sm:$0xf] %vm3383_vm3, %v3366_v44  ;;  %v3219_v53 = vmul.f32 %v6179_v30, %v3167_v54 }
 0x388   : > { %v2629_v19 = vpop.f32.mrf.mxu2 }
 0x389   : > { %v3271_v40 = vadd.f32 %v6186_v50, %v3219_v53  ;;  %v2700_v63 = vadd.f32 %v2629_v19, %v2478_v32 }
 0x38a   : > { %v2865_v61 = vpop.f32.mrf.mxu3  ;;  %v2410_v35 = vpop.f32.mrf.mxu1 }
 0x38b   : > { %v3319_v9 = vmax.f32 %v3271_v40, 0.0  ;;  %v2936_v43 = vadd.f32 %v2865_v61, %v2700_v63  ;;  %v2479_v7 = vadd.f32 %v2410_v35, %v6854_v10 }
 0x38d   : > { %v3367_v8 = vpack.c.bf16 %v3319_v9, %v3319_v9  ;;  %v3168_v3 = vadd.f32 %v3097_v36, %v2936_v43  ;;  %v6858_v9 = vld [vmem:[#allocation48_spill] sm:$0xff] }
 0x38e   : > { %v3100_v20 = vpop.f32.mrf.mxu0 }
 0x38f   : > { %3416 = vst.msk [vmem:[%s5870_s5 + $0x80] sm:$0xf] %vm3383_vm3, %v3367_v8  ;;  %v3220_v0 = vmul.f32 %v6179_v30, %v3168_v3 }
 0x390   : > { %v2632_v52 = vpop.f32.mrf.mxu2 }
 0x391   : > { %v3272_v25 = vadd.f32 %v6186_v50, %v3220_v0  ;;  %v2701_v12 = vadd.f32 %v2632_v52, %v2479_v7 }
 0x392   : > { %v2868_v38 = vpop.f32.mrf.mxu3  ;;  %v2412_v26 = vpop.f32.mrf.mxu1 }
 0x393   : > { %v3320_v29 = vmax.f32 %v3272_v25, 0.0  ;;  %v2937_v21 = vadd.f32 %v2868_v38, %v2701_v12  ;;  %v2480_v14 = vadd.f32 %v2412_v26, %v6855_v18 }
 0x395   : > { %v3368_v42 = vpack.c.bf16 %v3320_v29, %v3320_v29  ;;  %v3169_v37 = vadd.f32 %v3100_v20, %v2937_v21  ;;  %v6859_v29 = vld [vmem:[#allocation60_spill] sm:$0xff] }
 0x396   : > { %v3102_v24 = vpop.f32.mrf.mxu0 }
 0x397   : > { %3417 = vst.msk [vmem:[%s5870_s5 + $0x84] sm:$0xf] %vm3383_vm3, %v3368_v42  ;;  %v3221_v47 = vmul.f32 %v6179_v30, %v3169_v37 }
 0x398   : > { %v2634_v49 = vpop.f32.mrf.mxu2 }
 0x399   : > { %v3273_v48 = vadd.f32 %v6186_v50, %v3221_v47  ;;  %v2702_v6 = vadd.f32 %v2634_v49, %v2480_v14 }
 0x39a   : > { %v2870_v45 = vpop.f32.mrf.mxu3  ;;  %v2415_v16 = vpop.f32.mrf.mxu1 }
 0x39b   : > { %v3321_v46 = vmax.f32 %v3273_v48, 0.0  ;;  %v2938_v2 = vadd.f32 %v2870_v45, %v2702_v6  ;;  %v2481_v17 = vadd.f32 %v2415_v16, %v6856_v39 }
 0x39d   : > { %v3369_v57 = vpack.c.bf16 %v3321_v46, %v3321_v46  ;;  %v3170_v1 = vadd.f32 %v3102_v24, %v2938_v2  ;;  %v6860_v46 = vld [vmem:[#allocation59_spill] sm:$0xff] }
 0x39e   : > { %v3105_v31 = vpop.f32.mrf.mxu0 }
 0x39f   : > { %3418 = vst.msk [vmem:[%s5870_s5 + $0x88] sm:$0xf] %vm3383_vm3, %v3369_v57  ;;  %v3222_v59 = vmul.f32 %v6179_v30, %v3170_v1 }
 0x3a0   : > { %v2637_v41 = vpop.f32.mrf.mxu2 }
 0x3a1   : > { %v3274_v51 = vadd.f32 %v6186_v50, %v3222_v59  ;;  %v2703_v34 = vadd.f32 %v2637_v41, %v2481_v17 }
 0x3a2   : > { %v2873_v60 = vpop.f32.mrf.mxu3  ;;  %v2417_v58 = vpop.f32.mrf.mxu1 }
 0x3a3   : > { %v3322_v13 = vmax.f32 %v3274_v51, 0.0  ;;  %v2939_v62 = vadd.f32 %v2873_v60, %v2703_v34  ;;  %v2482_v11 = vadd.f32 %v2417_v58, %v6857_v55 }
 0x3a5   : > { %v3370_v15 = vpack.c.bf16 %v3322_v13, %v3322_v13  ;;  %v3171_v28 = vadd.f32 %v3105_v31, %v2939_v62  ;;  %v6861_v13 = vld [vmem:[#allocation77_spill] sm:$0xff] }
 0x3a6   : > { %v3107_v5 = vpop.f32.mrf.mxu0 }
 0x3a7   : > { %3419 = vst.msk [vmem:[%s5870_s5 + $0x8c] sm:$0xf] %vm3383_vm3, %v3370_v15  ;;  %v3223_v33 = vmul.f32 %v6179_v30, %v3171_v28 }
 0x3a8   : > { %v2639_v56 = vpop.f32.mrf.mxu2 }
 0x3a9   : > { %v3275_v44 = vadd.f32 %v6186_v50, %v3223_v33  ;;  %v2704_v54 = vadd.f32 %v2639_v56, %v2482_v11 }
 0x3aa   : > { %v2875_v36 = vpop.f32.mrf.mxu3  ;;  %v2420_v53 = vpop.f32.mrf.mxu1 }
 0x3ab   : > { %v3323_v32 = vmax.f32 %v3275_v44, 0.0  ;;  %v2940_v19 = vadd.f32 %v2875_v36, %v2704_v54  ;;  %v2483_v43 = vadd.f32 %v2420_v53, %v6858_v9 }
 0x3ad   : > { %v3371_v40 = vpack.c.bf16 %v3323_v32, %v3323_v32  ;;  %v3172_v63 = vadd.f32 %v3107_v5, %v2940_v19  ;;  %v6862_v32 = vld [vmem:[#allocation51_spill] sm:$0xff] }
 0x3ae   : > { %v3110_v61 = vpop.f32.mrf.mxu0 }
 0x3af   : > { %3420 = vst.msk [vmem:[%s5870_s5 + $0x90] sm:$0xf] %vm3383_vm3, %v3371_v40  ;;  %v3224_v35 = vmul.f32 %v6179_v30, %v3172_v63 }
 0x3b0   : > { %v2642_v8 = vpop.f32.mrf.mxu2 }
 0x3b1   : > { %v3276_v3 = vadd.f32 %v6186_v50, %v3224_v35  ;;  %v2705_v20 = vadd.f32 %v2642_v8, %v2483_v43 }
 0x3b2   : > { %v2878_v0 = vpop.f32.mrf.mxu3  ;;  %v2422_v10 = vpop.f32.mrf.mxu1 }
 0x3b3   : > { %v3324_v7 = vmax.f32 %v3276_v3, 0.0  ;;  %v2941_v52 = vadd.f32 %v2878_v0, %v2705_v20  ;;  %v2484_v21 = vadd.f32 %v2422_v10, %v6859_v29 }
 0x3b5   : > { %v3372_v25 = vpack.c.bf16 %v3324_v7, %v3324_v7  ;;  %v3173_v12 = vadd.f32 %v3110_v61, %v2941_v52  ;;  %v6863_v7 = vld [vmem:[#allocation67_spill] sm:$0xff] }
 0x3b6   : > { %v3112_v38 = vpop.f32.mrf.mxu0 }
 0x3b7   : > { %3421 = vst.msk [vmem:[%s5870_s5 + $0x94] sm:$0xf] %vm3383_vm3, %v3372_v25  ;;  %v3225_v26 = vmul.f32 %v6179_v30, %v3173_v12 }
 0x3b8   : > { %v2644_v42 = vpop.f32.mrf.mxu2 }
 0x3b9   : > { %v3277_v37 = vadd.f32 %v6186_v50, %v3225_v26  ;;  %v2706_v24 = vadd.f32 %v2644_v42, %v2484_v21 }
 0x3ba   : > { %v2880_v47 = vpop.f32.mrf.mxu3  ;;  %v2425_v18 = vpop.f32.mrf.mxu1 }
 0x3bb   : > { %v3325_v14 = vmax.f32 %v3277_v37, 0.0  ;;  %v2942_v49 = vadd.f32 %v2880_v47, %v2706_v24  ;;  %v2485_v2 = vadd.f32 %v2425_v18, %v6860_v46 }
 0x3bd   : > { %v3373_v48 = vpack.c.bf16 %v3325_v14, %v3325_v14  ;;  %v3174_v6 = vadd.f32 %v3112_v38, %v2942_v49 }
 0x3be   : > { %v3115_v45 = vpop.f32.mrf.mxu0 }
 0x3bf   : > { %3422 = vst.msk [vmem:[%s5870_s5 + $0x98] sm:$0xf] %vm3383_vm3, %v3373_v48  ;;  %v3226_v16 = vmul.f32 %v6179_v30, %v3174_v6 }
 0x3c0   : > { %v2647_v57 = vpop.f32.mrf.mxu2 }
 0x3c1   : > { %v3278_v1 = vadd.f32 %v6186_v50, %v3226_v16  ;;  %v2707_v31 = vadd.f32 %v2647_v57, %v2485_v2 }
 0x3c2   : > { %v2883_v59 = vpop.f32.mrf.mxu3  ;;  %v2427_v39 = vpop.f32.mrf.mxu1 }
 0x3c3   : > { %v3326_v17 = vmax.f32 %v3278_v1, 0.0  ;;  %v2943_v41 = vadd.f32 %v2883_v59, %v2707_v31  ;;  %v2486_v62 = vadd.f32 %v2427_v39, %v6861_v13 }
 0x3c5   : > { %v3374_v51 = vpack.c.bf16 %v3326_v17, %v3326_v17  ;;  %v3175_v34 = vadd.f32 %v3115_v45, %v2943_v41 }
 0x3c6   : > { %v3117_v60 = vpop.f32.mrf.mxu0 }
 0x3c7   : > { %3423 = vst.msk [vmem:[%s5870_s5 + $0x9c] sm:$0xf] %vm3383_vm3, %v3374_v51  ;;  %v3227_v58 = vmul.f32 %v6179_v30, %v3175_v34 }
 0x3c8   : > { %v2649_v15 = vpop.f32.mrf.mxu2 }
 0x3c9   : > { %v3279_v28 = vadd.f32 %v6186_v50, %v3227_v58  ;;  %v2708_v5 = vadd.f32 %v2649_v15, %v2486_v62 }
 0x3ca   : > { %v2885_v33 = vpop.f32.mrf.mxu3  ;;  %v2430_v55 = vpop.f32.mrf.mxu1 }
 0x3cb   : > { %v3327_v11 = vmax.f32 %v3279_v28, 0.0  ;;  %v2944_v56 = vadd.f32 %v2885_v33, %v2708_v5  ;;  %v2487_v19 = vadd.f32 %v2430_v55, %v6862_v32 }
 0x3cd   : > { %v3375_v44 = vpack.c.bf16 %v3327_v11, %v3327_v11  ;;  %v3176_v54 = vadd.f32 %v3117_v60, %v2944_v56 }
 0x3ce   : > { %v3120_v36 = vpop.f32.mrf.mxu0 }
 0x3cf   : > { %3424 = vst.msk [vmem:[%s5870_s5 + $0xa0] sm:$0xf] %vm3383_vm3, %v3375_v44  ;;  %v3228_v53 = vmul.f32 %v6179_v30, %v3176_v54 }
 0x3d0   : > { %v2652_v40 = vpop.f32.mrf.mxu2 }
 0x3d1   : > { %v3280_v63 = vadd.f32 %v6186_v50, %v3228_v53  ;;  %v2709_v61 = vadd.f32 %v2652_v40, %v2487_v19 }
 0x3d2   : > { %v2888_v35 = vpop.f32.mrf.mxu3  ;;  %v2432_v9 = vpop.f32.mrf.mxu1 }
 0x3d3   : > { %v3328_v43 = vmax.f32 %v3280_v63, 0.0  ;;  %v2945_v8 = vadd.f32 %v2888_v35, %v2709_v61  ;;  %v2488_v52 = vadd.f32 %v2432_v9, %v6863_v7 }
 0x3d5   : > { %v3376_v3 = vpack.c.bf16 %v3328_v43, %v3328_v43  ;;  %v3177_v20 = vadd.f32 %v3120_v36, %v2945_v8 }
 0x3d6   : > { %v3122_v0 = vpop.f32.mrf.mxu0 }
 0x3d7   : > { %3425 = vst.msk [vmem:[%s5870_s5 + $0xa4] sm:$0xf] %vm3383_vm3, %v3376_v3  ;;  %v3229_v10 = vmul.f32 %v6179_v30, %v3177_v20 }
 0x3d8   : > { %v2654_v25 = vpop.f32.mrf.mxu2 }
 0x3d9   : > { %v3281_v12 = vadd.f32 %v6186_v50, %v3229_v10  ;;  %v2710_v38 = vadd.f32 %v2654_v25, %v2488_v52 }
 0x3da   : > { %v2890_v26 = vpop.f32.mrf.mxu3  ;;  %v2435_v29 = vpop.f32.mrf.mxu1 }
 0x3db   : > { %v3329_v21 = vmax.f32 %v3281_v12, 0.0  ;;  %v2946_v42 = vadd.f32 %v2890_v26, %v2710_v38  ;;  %v2489_v14 = vadd.f32 %v2435_v29, %v5821_v4 }
 0x3dd   : > { %v3377_v37 = vpack.c.bf16 %v3329_v21, %v3329_v21  ;;  %v3178_v24 = vadd.f32 %v3122_v0, %v2946_v42 }
 0x3de   : > { %v3125_v47 = vpop.f32.mrf.mxu0 }
 0x3df   : > { %3426 = vst.msk [vmem:[%s5870_s5 + $0xa8] sm:$0xf] %vm3383_vm3, %v3377_v37  ;;  %v3230_v18 = vmul.f32 %v6179_v30, %v3178_v24 }
 0x3e0   : > { %v2657_v49 = vpop.f32.mrf.mxu2 }
 0x3e1   : > { %v3282_v48 = vadd.f32 %v6186_v50, %v3230_v18  ;;  %v2711_v6 = vadd.f32 %v2657_v49, %v2489_v14 }
 0x3e2   : > { %v2893_v45 = vpop.f32.mrf.mxu3  ;;  %v2437_v16 = vpop.f32.mrf.mxu1 }
 0x3e3   : > { %v3330_v46 = vmax.f32 %v3282_v48, 0.0  ;;  %v2947_v2 = vadd.f32 %v2893_v45, %v2711_v6  ;;  %v2490_v59 = vadd.f32 %v2437_v16, %v5829_v27 }
 0x3e5   : > { %v3378_v57 = vpack.c.bf16 %v3330_v46, %v3330_v46  ;;  %v3179_v1 = vadd.f32 %v3125_v47, %v2947_v2 }
 0x3e6   : > { %v3127_v39 = vpop.f32.mrf.mxu0 }
 0x3e7   : > { %3427 = vst.msk [vmem:[%s5870_s5 + $0xac] sm:$0xf] %vm3383_vm3, %v3378_v57  ;;  %v3231_v31 = vmul.f32 %v6179_v30, %v3179_v1 }
 0x3e8   : > { %v2659_v17 = vpop.f32.mrf.mxu2 }
 0x3e9   : > { %v3283_v4 = vadd.f32 %v6186_v50, %v3231_v31  ;;  %v2712_v41 = vadd.f32 %v2659_v17, %v2490_v59 }
 0x3ea   : > { %v2895_v51 = vpop.f32.mrf.mxu3  ;;  %v2440_v34 = vpop.f32.mrf.mxu1 }
 0x3eb   : > { %v3331_v60 = vmax.f32 %v3283_v4, 0.0  ;;  %v2948_v58 = vadd.f32 %v2895_v51, %v2712_v41  ;;  %v2491_v28 = vadd.f32 %v2440_v34, %v5836_v22 }
 0x3ed   : > { %v3379_v13 = vpack.c.bf16 %v3331_v60, %v3331_v60  ;;  %v3180_v62 = vadd.f32 %v3127_v39, %v2948_v58 }
 0x3ee   : > { %v3130_v11 = vpop.f32.mrf.mxu0 }
 0x3ef   : > { %3428 = vst.msk [vmem:[%s5870_s5 + $0xb0] sm:$0xf] %vm3383_vm3, %v3379_v13  ;;  %v3232_v15 = vmul.f32 %v6179_v30, %v3180_v62 }
 0x3f0   : > { %v2662_v5 = vpop.f32.mrf.mxu2 }
 0x3f1   : > { %v3284_v27 = vadd.f32 %v6186_v50, %v3232_v15  ;;  %v2713_v33 = vadd.f32 %v2662_v5, %v2491_v28 }
 0x3f2   : > { %v2898_v55 = vpop.f32.mrf.mxu3  ;;  %v2442_v54 = vpop.f32.mrf.mxu1 }
 0x3f3   : > { %v3332_v56 = vmax.f32 %v3284_v27, 0.0  ;;  %v2949_v44 = vadd.f32 %v2898_v55, %v2713_v33  ;;  %v2492_v19 = vadd.f32 %v2442_v54, %v5844_v23 }
 0x3f5   : > { %v3380_v36 = vpack.c.bf16 %v3332_v56, %v3332_v56  ;;  %v3181_v53 = vadd.f32 %v3130_v11, %v2949_v44 }
 0x3f6   : > { %v3132_v43 = vpop.f32.mrf.mxu0 }
 0x3f7   : > { %3429 = vst.msk [vmem:[%s5870_s5 + $0xb4] sm:$0xf] %vm3383_vm3, %v3380_v36  ;;  %v3233_v32 = vmul.f32 %v6179_v30, %v3181_v53 }
 0x3f8   : > { %v2664_v22 = vpop.f32.mrf.mxu2 }
 0x3f9   : > { %v3285_v40 = vadd.f32 %v6186_v50, %v3233_v32  ;;  %v2714_v63 = vadd.f32 %v2664_v22, %v2492_v19 }
 0x3fa   : > { %v2900_v61 = vpop.f32.mrf.mxu3 }
 0x3fb   : > { %v3333_v35 = vmax.f32 %v3285_v40, 0.0  ;;  %v2950_v9 = vadd.f32 %v2900_v61, %v2714_v63 }
 0x3fd   : > { %v3381_v8 = vpack.c.bf16 %v3333_v35, %v3333_v35  ;;  %v3182_v3 = vadd.f32 %v3132_v43, %v2950_v9 }
 0x3ff   : > { %3430 = vst.msk [vmem:[%s5870_s5 + $0xb8] sm:$0xf] %vm3383_vm3, %v3381_v8  ;;  %v3234_v20 = vmul.f32 %v6179_v30, %v3182_v3 }
 0x401   : > { %v3286_v0 = vadd.f32 %v6186_v50, %v3234_v20 }
 0x403   : > { %v3334_v10 = vmax.f32 %v3286_v0, 0.0 }
 0x405   : > { %v3382_v7 = vpack.c.bf16 %v3334_v10, %v3334_v10 }
 0x407   : > { %3431 = vst.msk [vmem:[%s5870_s5 + $0xbc] sm:$0xf] %vm3383_vm3, %v3382_v7 }
 0x408 PF: > { %s14_s15 = sadd.s32 1, %s4092_s15  }
 0x409   : > { %p11_p4 = scmp.ge.s32.totalorder %s14_s15, 4  }
 0x40b   :  { %13 = sbr.rel (!%p11_p4) target bundleno = 1 (0x1), region = 74 }

// kernel: inception_b_forward.5
= control target key start
LH: loop header
LB: loop body
LE: loop exit
PB: predicated region body
PF: predicated region fallthrough
CT: control target
= control target key end

     0   :  { %s3330_s21 = smov 0   ;;  %s4693_s0 = inlined_call_operand.vmem [shape: f32[2,8,2,12,8], index: 0, kind: input, shape index: {}]   ;;  %s4694_s1 = inlined_call_operand.vmem [shape: bf16[2,8,2,12,192], index: 1, kind: input, shape index: {}]   ;;  %s4695_s2 = inlined_call_operand.vmem [shape: bf16[3,8,384], index: 2, kind: input, shape index: {}]   ;;  %s4696_s3 = inlined_call_operand.vmem [shape: bf16[3,4,384], index: 3, kind: input, shape index: {}]   ;;  %s4697_s4 = inlined_call_operand.vmem [shape: f32[1,384], index: 4, kind: input, shape index: {}]   ;;  %s4698_s5 = inlined_call_operand.vmem [shape: f32[1,384], index: 5, kind: input, shape index: {}]   ;;  %s4699_s6 = inlined_call_operand.vmem [shape: bf16[3,192,96], index: 6, kind: input, shape index: {}]   ;;  %s4700_s7 = inlined_call_operand.vmem [shape: bf16[3,96,96], index: 7, kind: input, shape index: {}]   ;;  %s4701_s8 = inlined_call_operand.vmem [shape: f32[1,96], index: 8, kind: input, shape index: {}]   ;;  %s4702_s9 = inlined_call_operand.vmem [shape: f32[1,96], index: 9, kind: input, shape index: {}]   ;;  %s4703_s10 = inlined_call_operand.vmem [shape: f32[2,7,8,384], index: 10, kind: output, shape index: {0}]   ;;  %s4704_s11 = inlined_call_operand.vmem [shape: f32[2,7,8,96], index: 11, kind: output, shape index: {1}]   ;;  %s4705_s12 = inlined_call_operand.vmem [shape: f32[2,7,8,4], index: 12, kind: output, shape index: {2}]  }
   0x1 LB: > { %s2738_s22 = sadd.s32 4294967295, %s3262_s21   ;;  %p2742_p0 = scmp.ge.s32.totalorder %s3262_s21, 1  ;;  %s3262_s21 = sphi %s3330_s21, %s23_s21  }
   0x2   : > { %p377_p1 = scmp.lt.s32.totalorder %s3262_s21, 3 }
   0x4   : > { %p378_p2 = pnand %p2742_p0, %p377_p1 }
   0x6   : > { %381 = sbr.rel (%p378_p2) target bundleno = 585 (0x249), region = 60 }
   0xb   : > { %v618_v0 = vld [vmem:[%s4696_s3] sm:$0x3f]  ;;  %p434_p3 = scmp.lt.s32.totalorder %s2738_s22, 1  ;;  %v570_v3 = vld [vmem:[%s4695_s2 + $0x8] sm:$0xf]  ;;  %vm749_vm0 = vcmask 1043456  }
   0xc   : > { %620 = vst [vmem:[#allocation1] ss:$4 sm:$0xff] %v618_v0  ;;  %v3344_v1 = vld [vmem:[%s4695_s2] sm:$0xff]  ;;  %v732_v5 = vunpack.c.l.b16 %v570_v3  ;;  %vm637_vm1 = vcmask 1041408   ;;  %vm585_vm2 = vcmask 1046528   ;;  %vm624_vm3 = vcmask 31744  }
   0xd   : > { %s4773_s22 = smov (!%p434_p3, %s2738_s22), 1  ;;  %v730_v2 = vunpack.c.l.b16 %v3344_v1  ;;  %v2868_v6 = vld [vmem:[%s4696_s3 + $0x6] sm:$0x3f]  ;;  %v3166_v54 = vld [vmem:[%s4699_s6 + $0x38] sm:$0xff]  ;;  %v3165_v61 = vld [vmem:[%s4699_s6 + $0x30] sm:$0xff]  ;;  %vm736_vm4 = vcmask 64512  }
   0xe   : > { %s3154_s29 = sshll.u32 %s4773_s22, 8  ;;  %v3176_v11 = vld [vmem:[%s4700_s7 + $0x28] sm:$0xff]  ;;  %v735_v19 = vpack.c.b16 %v732_v5, %v732_v5  ;;  %v3175_v28 = vld [vmem:[%s4700_s7 + $0x20] sm:$0xff]  ;;  %v3174_v57 = vld [vmem:[%s4700_s7 + $0x18] sm:$0xff]  ;;  %vm969_vm5 = vcmask 785408   ;;  %vm1082_vm6 = vcmask 523264  }
   0xf   : > { %v733_v4 = vpack.c.b16 %v730_v2, %v730_v2  ;;  %s3361_s16 = scalar_lea.vmem %s4693_s0, %s3154_s29  ;;  %v3173_v62 = vld [vmem:[%s4700_s7 + $0x10] sm:$0xff]  ;;  %v3164_v63 = vld [vmem:[%s4699_s6 + $0x28] sm:$0xff]  ;;  %v3163_v2 = vld [vmem:[%s4699_s6 + $0x20] sm:$0xff]  ;;  %s3477_s14 = scalar_lea.vmem %s4694_s1, %s3154_s29 }
  0x10   : > { %v3364_v7 = vld [vmem:[%s3361_s16] sm:$0xff]  ;;  %v461_v8 = vld [vmem:[%s3361_s16 + $0x8] sm:$0xf]  ;;  %v757_v39 = vsel %vm749_vm0, %v735_v19, 0  ;;  %s3264_s27 = smov 124   ;;  %s3216_s15 = smul.u32 168, %s4773_s22 }
  0x11   : > { %v3368_v9 = vld [vmem:[%s3361_s16 + $0x20] sm:$0xff]  ;;  %v751_v10 = vsel %vm749_vm0, %v733_v4, 0  ;;  %v465_v12 = vld [vmem:[%s3361_s16 + $0x28] sm:$0xf]  ;;  %v586_v13 = vrot.slane %v3364_v7, 1  ;;  %v587_v14 = vrot.slane %v461_v8, 1 }
  0x12   : > { %v589_v15 = vrot.slane %v3368_v9, 1  ;;  %v3378_v16 = vld [vmem:[%s3361_s16 + $0x40] sm:$0xff]  ;;  %v590_v24 = vrot.slane %v465_v12, 1  ;;  %v469_v26 = vld [vmem:[%s3361_s16 + $0x48] sm:$0xf]  ;;  %v3461_v5 = vpack.c.bf16 %v3368_v9, %v3364_v7  ;;  %v2854_v8 = vld [vmem:[%s4695_s2 + $0xc] sm:$0xff]  ;;  %s4449_s18 = scalar_lea.vmem %s4703_s10, %s3216_s15 }
  0x13   : > { %v621_v17 = vld.sshfl [vmem:[#allocation1] sm:$0xff pattern:$0x73625140]  ;;  %v622_v18 = vld.sshfl [vmem:[#allocation1 + $0x8] sm:$0xff pattern:$0x73625140]  ;;  %v588_v23 = vsel %vm585_vm2, %v586_v13, %v587_v14  ;;  %v1161_v7 = vunpack.c.h.b16 %v2854_v8 }
  0x14   : > { %v638_v20 = vsel %vm637_vm1, %v621_v17, 0  ;;  %v640_v21 = vsel %vm637_vm1, %v622_v18, 0  ;;  %v623_v22 = vld.sshfl [vmem:[#allocation1 + $0x10] sm:$0xff pattern:$0x73625140]  ;;  %v3386_v27 = vld [vmem:[%s3361_s16 + $0x60] sm:$0xff]  ;;  %v591_v29 = vsel %vm585_vm2, %v589_v15, %v590_v24 }
  0x15   : > { %651 = vmatpush.bf16.msra.mxu0 %v638_v20  ;;  %3213 = vmatpush.bf16.msra.mxu1 %v640_v21  ;;  %v642_v25 = vsel %vm637_vm1, %v623_v22, 0  ;;  %1341 = vst [vmem:[#allocation1] ss:$4 sm:$0xff] %v2868_v6  ;;  %v473_v30 = vld [vmem:[%s3361_s16 + $0x68] sm:$0xf]  ;;  %v592_v31 = vrot.slane %v3378_v16, 1  ;;  %v3398_v35 = vpack.c.bf16 %v591_v29, %v588_v23 }
  0x16   : > { %707 = vmatpush.bf16.msra.mxu2 %v642_v25  ;;  %3214 = vmatpush.bf16.msra.mxu3 %v642_v25  ;;  %v593_v32 = vrot.slane %v469_v26, 1  ;;  %v595_v33 = vrot.slane %v3386_v27, 1  ;;  %v3396_v34 = vld [vmem:[%s3361_s16 + $0xc0] sm:$0xff]  ;;  %v596_v36 = vrot.slane %v473_v30, 1  ;;  %v485_v37 = vld [vmem:[%s3361_s16 + $0xc8] sm:$0xf] }
  0x17   : > { %v604_v38 = vrot.slane %v3396_v34, 1  ;;  %v3404_v40 = vld [vmem:[%s3361_s16 + $0x80] sm:$0xff]  ;;  %v605_v42 = vrot.slane %v485_v37, 1  ;;  %v477_v43 = vld [vmem:[%s3361_s16 + $0x88] sm:$0xf]  ;;  %v3162_v6 = vld [vmem:[%s4699_s6 + $0x18] sm:$0xff] }
  0x18   : > { %v594_v41 = vsel %vm585_vm2, %v592_v31, %v593_v32  ;;  %v3409_v44 = vld [vmem:[%s3361_s16 + $0xa0] sm:$0xff]  ;;  %v481_v45 = vld [vmem:[%s3361_s16 + $0xa8] sm:$0xf]  ;;  %2750 = vmatmul.msk.bf16.vlgmr.msra.gmra.mxu0 %vm624_vm3, %v3398_v35  ;;  %v597_v46 = vsel %vm585_vm2, %v595_v33, %v596_v36  ;;  %v598_v48 = vrot.slane %v3404_v40, 1  ;;  %v599_v49 = vrot.slane %v477_v43, 1  ;;  %v3161_v13 = vld [vmem:[%s4699_s6 + $0x10] sm:$0xff] }
  0x19   : > { %679 = vmatpush.bf16.msrb.mxu0 %v640_v21  ;;  %822 = vmatpush.bf16.msrb.mxu1 %v757_v39  ;;  %v3415_v47 = vpack.c.bf16 %v594_v41, %v591_v29  ;;  %v615_v50 = vpack.c.bf16 %v597_v46, %v594_v41  ;;  %v606_v51 = vsel %vm585_vm2, %v604_v38, %v605_v42  ;;  %v601_v52 = vrot.slane %v3409_v44, 1  ;;  %v3172_v0 = vld [vmem:[%s4700_s7 + $0x8] sm:$0xff]  ;;  %v3171_v3 = vld [vmem:[%s4700_s7] sm:$0xff]  ;;  %s3217_s25 = smul.u32 56, %s4773_s22 }
  0x1a   : > { %766 = vmatpush.bf16.msrb.mxu3 %v751_v10  ;;  %984 = vmatpush.bf16.msrb.mxu2 %v3176_v11  ;;  %v602_v53 = vrot.slane %v481_v45, 1  ;;  %v3425_v55 = vpack.c.bf16 %v606_v51, %v606_v51  ;;  %v600_v56 = vsel %vm585_vm2, %v598_v48, %v599_v49  ;;  %v1160_v10 = vunpack.c.l.b16 %v2854_v8  ;;  %v3483_v14 = vld [vmem:[%s3477_s14 + $0x20] sm:$0xff]  ;;  %v495_v15 = vld [vmem:[%s3477_s14 + $0x28] sm:$0x3] }
  0x1b   : > { %2758 = vmatmul.msk.bf16.vlgmr.msra.gmra.mxu2 %vm624_vm3, %v3398_v35  ;;  %2755 = vmatmul.msk.bf16.vlgmr.msra.gmra.mxu1 %vm624_vm3, %v615_v50  ;;  %v3433_v59 = vpack.c.bf16 %v600_v56, %v597_v46  ;;  %v1164_v11 = vpack.c.b16 %v1161_v7, %v1161_v7  ;;  %v3489_v19 = vunpack.c.l.bf16 %v3483_v14  ;;  %v528_v20 = vunpack.c.l.bf16 %v495_v15  ;;  %v3492_v21 = vld [vmem:[%s3477_s14 + $0x40] sm:$0xff]  ;;  %v499_v22 = vld [vmem:[%s3477_s14 + $0x48] sm:$0x3]  ;;  %s4582_s13 = scalar_lea.vmem %s4705_s12, %s3217_s25 }
  0x1c   : > { %v603_v58 = vsel %vm585_vm2, %v601_v52, %v602_v53  ;;  %2761 = vmatmul.msk.bf16.vlgmr.msra.gmra.mxu3 %vm624_vm3, %v3425_v55  ;;  %v1163_v12 = vpack.c.b16 %v1160_v10, %v1160_v10  ;;  %v3496_v23 = vunpack.c.l.bf16 %v3492_v21  ;;  %v534_v24 = vunpack.c.l.bf16 %v499_v22  ;;  %v3499_v25 = vld [vmem:[%s3477_s14] sm:$0xff]  ;;  %v491_v26 = vld [vmem:[%s3477_s14 + $0x8] sm:$0x3] }
  0x1d   : > { %v3437_v60 = vpack.c.bf16 %v606_v51, %v603_v58  ;;  %v616_v4 = vpack.c.bf16 %v603_v58, %v600_v56  ;;  %v1182_v17 = vsel %vm749_vm0, %v1164_v11, 0  ;;  %v893_v29 = vrot.slane %v528_v20, 1  ;;  %v3160_v41 = vld [vmem:[%s4699_s6 + $0x8] sm:$0xff]  ;;  %v3159_v48 = vld [vmem:[%s4699_s6] sm:$0xff] }
  0x1e   : > { %985 = vmatpush.bf16.msrb.mxu2 %v3175_v28  ;;  %1095 = vmatpush.bf16.msra.mxu3 %v3166_v54  ;;  %v1179_v18 = vsel %vm749_vm0, %v1163_v12, 0  ;;  %v892_v28 = vrot.slane %v3489_v19, 1  ;;  %v895_v30 = vrot.slane %v3496_v23, 1  ;;  %v896_v31 = vrot.slane %v534_v24, 1  ;;  %v3534_v49 = vld [vmem:[%s3477_s14 + $0x60] sm:$0xff]  ;;  %v3170_v24 = vld [vmem:[%s4699_s6 + $0x58] sm:$0xff] }
  0x1f   : > { %1194 = vmatpush.bf16.msra.mxu1 %v1179_v18  ;;  %v731_v32 = vunpack.c.h.b16 %v3344_v1  ;;  %v3509_v33 = vpack.c.bf16 %v3386_v27, %v3378_v16  ;;  %v520_v36 = vunpack.c.l.bf16 %v3499_v25  ;;  %v522_v37 = vunpack.c.l.bf16 %v491_v26  ;;  %4726 = vst [vmem:[#allocation3_spill] sm:$0xff] %v3534_v49  ;;  %v3543_v56 = vld [vmem:[%s3477_s14 + $0x80] sm:$0xff]  ;;  %v511_v11 = vld [vmem:[%s3477_s14 + $0xa8] sm:$0x3] }
  0x20   : > { %v3515_v38 = vsel %vm585_vm2, %v892_v28, %v893_v29  ;;  %v3518_v1 = vsel %vm585_vm2, %v895_v30, %v896_v31  ;;  %v3539_v52 = vunpack.c.l.bf16 %v3534_v49  ;;  %4728 = vst [vmem:[#allocation5_spill] sm:$0xff] %v3543_v56  ;;  %v3547_v58 = vunpack.c.l.bf16 %v3543_v56  ;;  %v3571_v10 = vld [vmem:[%s3477_s14 + $0xa0] sm:$0xff]  ;;  %v515_v22 = vld [vmem:[%s3477_s14 + $0xc8] sm:$0x3] }
  0x21   : > { %4725 = vst [vmem:[#allocation2_spill] sm:$0xff] %v3515_v38  ;;  %v734_v42 = vpack.c.b16 %v731_v32, %v731_v32  ;;  %v889_v43 = vrot.slane %v520_v36, 1  ;;  %v890_v45 = vrot.slane %v522_v37, 1  ;;  %v3576_v15 = vunpack.c.l.bf16 %v3571_v10  ;;  %v3581_v20 = vld [vmem:[%s3477_s14 + $0xc0] sm:$0xff] }
  0x22   : > { %986 = vmatpush.bf16.msrb.mxu2 %v3174_v57  ;;  %1096 = vmatpush.bf16.msra.mxu3 %v3165_v61  ;;  %4727 = vst [vmem:[#allocation4_spill] sm:$0xff] %v3539_v52  ;;  %v507_v57 = vld [vmem:[%s3477_s14 + $0x88] sm:$0x3]  ;;  %v3588_v26 = vunpack.c.l.bf16 %v3581_v20  ;;  %v558_v28 = vunpack.c.l.bf16 %v515_v22  ;;  %v568_v37 = vpack.c.bf16 %v3396_v34, %v3396_v34 }
  0x23   : > { %v754_v46 = vsel %vm749_vm0, %v734_v42, 0  ;;  %v891_v51 = vsel %vm585_vm2, %v889_v43, %v890_v45  ;;  %4729 = vst [vmem:[#allocation6_spill] sm:$0xff] %v3547_v58  ;;  %v546_v61 = vunpack.c.l.bf16 %v507_v57  ;;  %v904_v29 = vrot.slane %v3576_v15, 1  ;;  %v3167_v57 = vld [vmem:[%s4699_s6 + $0x40] sm:$0xff] }
  0x24   : > { %794 = vmatpush.bf16.msra.mxu0 %v754_v46  ;;  %v917_v54 = vpack.c.bf16 %v3515_v38, %v891_v51  ;;  %4732 = vst [vmem:[#allocation9_spill] sm:$0xff] %v3571_v10  ;;  %v907_v31 = vrot.slane %v3588_v26, 1  ;;  %v908_v32 = vrot.slane %v558_v28, 1  ;;  %v843_v46 = vpack.c.bf16 %v3489_v19, %v520_v36  ;;  %v3977_v38 = vld [vmem:[%s3477_s14 + $0xd0] sm:$0xff] }
  0x25   : > { %4733 = vst [vmem:[#allocation10_spill] sm:$0xff] %v3576_v15  ;;  %v849_v22 = vpack.c.bf16 %v3588_v26, %v3588_v26  ;;  %v533_v28 = vunpack.c.h.bf16 %v3492_v21  ;;  %v3181_v21 = vld [vmem:[%s4699_s6 + $0x80] sm:$0xff] }
  0x26   : > { %987 = vmatpush.bf16.msrb.mxu2 %v3173_v62  ;;  %1097 = vmatpush.bf16.msra.mxu3 %v3164_v63  ;;  %v898_v62 = vrot.slane %v3539_v52, 1  ;;  %4734 = vst [vmem:[#allocation11_spill] sm:$0xff] %v3588_v26  ;;  %v3601_v42 = vsel %vm585_vm2, %v907_v31, %v908_v32  ;;  %v3182_v31 = vld [vmem:[%s4699_s6 + $0x88] sm:$0xff] }
  0x27   : > { %4736 = vst [vmem:[#allocation13_spill] sm:$0xff] %v3601_v42  ;;  %v920_v36 = vpack.c.bf16 %v3601_v42, %v3601_v42  ;;  %v4711_v42 = vunpack.c.h.bf16 %v3543_v56 }
  0x28   : > { %2751 = vmatmul.msk.bf16.gmra.mxu0 %vm624_vm3, %v615_v50 }
  0x2a   : > { %988 = vmatpush.bf16.msrb.mxu2 %v3172_v0  ;;  %1098 = vmatpush.bf16.msra.mxu3 %v3163_v2  ;;  %v901_v0 = vrot.slane %v3547_v58, 1  ;;  %v902_v2 = vrot.slane %v546_v61, 1  ;;  %v3637_v61 = vld [vmem:[%s3361_s16 + $0x10] sm:$0xff] }
  0x2b   : > { %2759 = vmatmul.msk.bf16.gmra.mxu2 %vm624_vm3, %v615_v50  ;;  %2756 = vmatmul.msk.bf16.gmra.mxu1 %vm624_vm3, %v616_v4  ;;  %v503_v50 = vld [vmem:[%s3477_s14 + $0x68] sm:$0x3] }
  0x2c   : > { %2762 = vmatmul.msk.bf16.vlgmr.msrb.gmra.mxu3 %vm736_vm4, %v3461_v5  ;;  %v540_v53 = vunpack.c.l.bf16 %v503_v50  ;;  %v3168_v50 = vld [vmem:[%s4699_s6 + $0x48] sm:$0xff] }
  0x2e   : > { %989 = vmatpush.bf16.msrb.mxu2 %v3171_v3  ;;  %1099 = vmatpush.bf16.msra.mxu3 %v3162_v6  ;;  %v899_v63 = vrot.slane %v540_v53, 1  ;;  %v567_v3 = vpack.c.bf16 %v3409_v44, %v3404_v40  ;;  %v3560_v6 = vsel %vm585_vm2, %v901_v0, %v902_v2  ;;  %v1343_v53 = vld.sshfl [vmem:[#allocation1 + $0x8] sm:$0xff pattern:$0x73625140]  ;;  %v3184_v0 = vld [vmem:[%s4699_s6 + $0x98] sm:$0xff] }
  0x2f   : > { %4731 = vst [vmem:[#allocation8_spill] sm:$0xff] %v3560_v6  ;;  %v1342_v2 = vld.sshfl [vmem:[#allocation1] sm:$0xff pattern:$0x73625140] }
  0x32   : > { %1222 = vmatpush.bf16.msra.mxu2 %v1182_v17  ;;  %1100 = vmatpush.bf16.msra.mxu3 %v3161_v13  ;;  %v552_v17 = vunpack.c.l.bf16 %v511_v11  ;;  %v3660_v11 = vld [vmem:[%s3361_s16 + $0x50] sm:$0xff] }
  0x34   : > { %v905_v30 = vrot.slane %v552_v17, 1 }
  0x36   : > { %1101 = vmatpush.bf16.msra.mxu3 %v3160_v41  ;;  %v3598_v41 = vsel %vm585_vm2, %v904_v29, %v905_v30 }
  0x37   : > { %4735 = vst [vmem:[#allocation12_spill] sm:$0xff] %v3598_v41  ;;  %v919_v45 = vpack.c.bf16 %v3598_v41, %v3560_v6 }
  0x38   : > { %2752 = vmatmul.msk.bf16.gmra.mxu0 %vm624_vm3, %v616_v4 }
  0x3a   : > { %1102 = vmatpush.bf16.msra.mxu3 %v3159_v48  ;;  %v1344_v48 = vld.sshfl [vmem:[#allocation1 + $0x10] sm:$0xff pattern:$0x73625140] }
  0x3b   : > { %2760 = vmatmul.msk.bf16.gmra.mxu2 %vm624_vm3, %v616_v4  ;;  %2757 = vmatmul.msk.bf16.gmra.mxu1 %vm624_vm3, %v3425_v55  ;;  %v3557_v4 = vsel %vm585_vm2, %v898_v62, %v899_v63  ;;  %v1361_v51 = vsel %vm637_vm1, %v1344_v48, 0  ;;  %v3640_v62 = vld [vmem:[%s3361_s16 + $0x30] sm:$0xff]  ;;  %v847_v63 = vpack.c.bf16 %v3576_v15, %v3547_v58 }
  0x3c   : > { %2763 = vmatmul.msk.bf16.gmra.mxu3 %vm736_vm4, %v3509_v33  ;;  %4730 = vst [vmem:[#allocation7_spill] sm:$0xff] %v3557_v4  ;;  %v918_v18 = vpack.c.bf16 %v3557_v4, %v3518_v1  ;;  %v3935_v58 = vld [vmem:[%s3477_s14 + $0x90] sm:$0xf] }
  0x48   : > { %2753 = vmatmul.msk.bf16.gmra.mxu0 %vm624_vm3, %v3425_v55  ;;  %v2855_v55 = vld [vmem:[%s4695_s2 + $0x14] sm:$0xf] }
  0x49   : > { %v1162_v7 = vunpack.c.l.b16 %v2855_v55  ;;  %v3023_v55 = vld [vmem:[%s4696_s3 + $0xc] sm:$0x3f] }
  0x4a   : > { %1958 = vst [vmem:[#allocation1] ss:$4 sm:$0xff] %v3023_v55 }
  0x4b   : > { %2798 = vmatmul.msk.bf16.vlgmr.msrb.gmra.mxu2 %vm969_vm5, %v917_v54  ;;  %2770 = vmatmul.msk.bf16.vlgmr.msrb.gmra.mxu1 %vm736_vm4, %v3461_v5  ;;  %v1165_v12 = vpack.c.b16 %v1162_v7, %v1162_v7  ;;  %v845_v54 = vpack.c.bf16 %v3539_v52, %v3496_v23  ;;  %v1357_v7 = vsel %vm637_vm1, %v1342_v2, 0 }
  0x4c   : > { %2764 = vmatmul.msk.bf16.gmra.mxu3 %vm736_vm4, %v567_v3  ;;  %1426 = vmatpush.bf16.msrb.mxu2 %v1361_v51 }
  0x4d   : > { %v1185_v13 = vsel %vm749_vm0, %v1165_v12, 0  ;;  %v3663_v12 = vld [vmem:[%s3361_s16 + $0x70] sm:$0xff] }
  0x4e   : > { %1250 = vmatpush.bf16.msrb.mxu3 %v1185_v13  ;;  %v3667_v13 = vpack.c.bf16 %v3663_v12, %v3660_v11 }
  0x58   : > { %2754 = vmatmul.msk.bf16.vlgmr.msrb.gmra.mxu0 %vm624_vm3, %v3398_v35  ;;  %v3169_v35 = vld [vmem:[%s4699_s6 + $0x50] sm:$0xff] }
  0x59   : > { %1127 = vmatpush.bf16.msrb.mxu0 %v3170_v24  ;;  %v527_v24 = vunpack.c.h.bf16 %v3483_v14  ;;  %v521_v14 = vunpack.c.h.bf16 %v3499_v25 }
  0x5b   : > { %2799 = vmatmul.msk.bf16.gmra.mxu2 %vm969_vm5, %v918_v18  ;;  %2771 = vmatmul.msk.bf16.gmra.mxu1 %vm736_vm4, %v3509_v33  ;;  %v3678_v29 = vpack.c.bf16 %v533_v28, %v527_v24 }
  0x5c   : > { %2765 = vmatmul.msk.bf16.gmra.mxu3 %vm736_vm4, %v568_v37 }
  0x5d   : > { %1128 = vmatpush.bf16.msrb.mxu0 %v3169_v35  ;;  %4737 = vst [vmem:[#allocation14_spill] sm:$0xff] %v3678_v29  ;;  %v547_v29 = vunpack.c.l.bf16 %v3935_v58  ;;  %v505_v58 = vld [vmem:[%s3477_s14 + $0x78] sm:$0x3] }
  0x61   : > { %1129 = vmatpush.bf16.msrb.mxu0 %v3168_v50  ;;  %v844_v50 = vpack.c.bf16 %v527_v24, %v521_v14  ;;  %v3735_v24 = vld [vmem:[%s3361_s16 + $0xd0] sm:$0xff] }
  0x62   : > { %4738 = vst [vmem:[#allocation15_spill] sm:$0xff] %v3735_v24  ;;  %v3179_v14 = vld [vmem:[%s4699_s6 + $0x70] sm:$0xff] }
  0x65   : > { %1130 = vmatpush.bf16.msrb.mxu0 %v3167_v57  ;;  %v3723_v57 = vld [vmem:[%s4695_s2 + $0x18] sm:$0xff] }
  0x66   : > { %v1813_v2 = vunpack.c.l.b16 %v3723_v57 }
  0x68   : > { %2766 = vmatmul.msk.bf16.vlgmr.msra.gmra.mxu0 %vm736_vm4, %v3461_v5  ;;  %v1359_v5 = vsel %vm637_vm1, %v1343_v53, 0 }
  0x69   : > { %1398 = vmatpush.bf16.msrb.mxu1 %v1359_v5  ;;  %1370 = vmatpush.bf16.msra.mxu0 %v1357_v7 }
  0x6b   : > { %2800 = vmatmul.msk.bf16.gmra.mxu2 %vm969_vm5, %v919_v45  ;;  %2772 = vmatmul.msk.bf16.gmra.mxu1 %vm736_vm4, %v567_v3  ;;  %v3696_v45 = vld [vmem:[%s3361_s16 + $0x90] sm:$0xff] }
  0x6c   : > { %1103 = vmatmul.bf16.vlgmr.msra.gmra.mxu3 %v843_v46  ;;  %v3699_v46 = vld [vmem:[%s3361_s16 + $0xb0] sm:$0xff] }
  0x6d   : > { %1585 = vmatpush.bf16.msra.mxu3 %v3184_v0  ;;  %v3705_v51 = vpack.c.bf16 %v3699_v46, %v3696_v45 }
  0x78   : > { %2767 = vmatmul.msk.bf16.gmra.mxu0 %vm736_vm4, %v3509_v33  ;;  %v1151_v33 = vpack.c.bf16 %v3640_v62, %v3637_v61 }
  0x7b   : > { %2801 = vmatmul.msk.bf16.gmra.mxu2 %vm969_vm5, %v920_v36  ;;  %2773 = vmatmul.msk.bf16.gmra.mxu1 %vm736_vm4, %v568_v37 }
  0x7c   : > { %1108 = vmatmul.bf16.gmra.mxu3 %v845_v54  ;;  %v3180_v54 = vld [vmem:[%s4699_s6 + $0x78] sm:$0xff] }
  0x88   : > { %2768 = vmatmul.msk.bf16.gmra.mxu0 %vm736_vm4, %v567_v3  ;;  %v3183_v3 = vld [vmem:[%s4699_s6 + $0x90] sm:$0xff] }
  0x89   : > { %1586 = vmatpush.bf16.msra.mxu3 %v3183_v3 }
  0x8b   : > { %2860 = vmatmul.msk.bf16.vlgmr.msra.gmra.mxu2 %vm736_vm4, %v1151_v33  ;;  %2856 = vmatmul.msk.bf16.vlgmr.msra.gmra.mxu1 %vm736_vm4, %v1151_v33 }
  0x8c   : > { %1113 = vmatmul.bf16.gmra.mxu3 %v847_v63  ;;  %v3194_v63 = vld [vmem:[%s4700_s7 + $0x58] sm:$0xff] }
  0x8d   : > { %1587 = vmatpush.bf16.msra.mxu3 %v3182_v31  ;;  %1757 = vmatpush.bf16.msra.mxu1 %v3194_v63 }
  0x91   : > { %1588 = vmatpush.bf16.msra.mxu3 %v3181_v21 }
  0x95   : > { %v653_v17 = vpop.f32.mrf.mxu0  ;;  %1589 = vmatpush.bf16.msra.mxu3 %v3180_v54 }
  0x98   : > { %v3669_v18 = vpop.f32.mrf.mxu1  ;;  %2769 = vmatmul.msk.bf16.gmra.mxu0 %vm736_vm4, %v568_v37 }
  0x99   : > { %1590 = vmatpush.bf16.msra.mxu3 %v3179_v14  ;;  %v1306_v14 = vrot.slane %v3637_v61, 1  ;;  %v3177_v61 = vld [vmem:[%s4699_s6 + $0x60] sm:$0xff] }
  0x9b   : > { %2861 = vmatmul.msk.bf16.gmra.mxu2 %vm736_vm4, %v3667_v13  ;;  %2857 = vmatmul.msk.bf16.gmra.mxu1 %vm736_vm4, %v3667_v13 }
  0x9c   : > { %1118 = vmatmul.bf16.gmra.mxu3 %v849_v22  ;;  %v4706_v22 = vunpack.c.h.bf16 %v3534_v49 }
  0x9d   : > { %v655_v32 = vpop.f32.mrf.mxu0 }
  0x9e   : > { %v3682_v30 = vpop.f32.mrf.mxu2 }
  0x9f   : > { %v3687_v37 = vpop.f32.mrf.mxu3 }
  0xa0   : > { %v3689_v35 = vpop.f32.mrf.mxu1 }
  0xa5   : > { %v658_v53 = vpop.f32.mrf.mxu0 }
  0xa6   : > { %v3701_v48 = vpop.f32.mrf.mxu2 }
  0xa7   : > { %v726_v5 = vpop.f32.mrf.mxu3 }
  0xa8   : > { %v3707_v25 = vpop.f32.mrf.mxu1  ;;  %2850 = vmatmul.msk.bf16.vlgmr.msrb.gmra.mxu0 %vm1082_vm6, %v844_v50  ;;  %v3747_v50 = vpack.c.bf16 %v3735_v24, %v3735_v24 }
  0xab   : > { %2862 = vmatmul.msk.bf16.gmra.mxu2 %vm736_vm4, %v3705_v51  ;;  %2858 = vmatmul.msk.bf16.gmra.mxu1 %vm736_vm4, %v3705_v51 }
  0xac   : > { %2864 = vmatmul.msk.bf16.vlgmr.msrb.gmra.mxu3 %vm736_vm4, %v1151_v33  ;;  %v1816_v33 = vpack.c.b16 %v1813_v2, %v1813_v2 }
  0xad   : > { %v660_v0 = vpop.f32.mrf.mxu0 }
  0xae   : > { %v3714_v36 = vpop.f32.mrf.mxu2  ;;  %v1832_v31 = vsel %vm749_vm0, %v1816_v33, 0  ;;  %v467_v33 = vld [vmem:[%s3361_s16 + $0x38] sm:$0xf] }
  0xaf   : > { %v768_v55 = vpop.f32.mrf.mxu3  ;;  %1847 = vmatpush.bf16.msra.mxu2 %v1832_v31  ;;  %v1310_v8 = vrot.slane %v467_v33, 1 }
  0xb0   : > { %v3729_v7 = vadd.f32 %v768_v55, %v653_v17  ;;  %v3731_v3 = vpop.f32.mrf.mxu1  ;;  %v846_v17 = vpack.c.bf16 %v4706_v22, %v533_v28  ;;  %v3193_v55 = vld [vmem:[%s4700_s7 + $0x50] sm:$0xff]  ;;  %v463_v28 = vld [vmem:[%s3361_s16 + $0x18] sm:$0xf] }
  0xb1   : > { %1758 = vmatpush.bf16.msra.mxu1 %v3193_v55  ;;  %v1307_v43 = vrot.slane %v463_v28, 1 }
  0xb3   : > { %v1308_v55 = vsel %vm585_vm2, %v1306_v14, %v1307_v43  ;;  %v471_v14 = vld [vmem:[%s3361_s16 + $0x58] sm:$0xf] }
  0xb5   : > { %v663_v5 = vpop.f32.mrf.mxu0 }
  0xb6   : > { %v3741_v21 = vpop.f32.mrf.mxu2 }
  0xb7   : > { %v770_v54 = vpop.f32.mrf.mxu3 }
  0xb8   : > { %v3749_v63 = vadd.f32 %v770_v54, %v655_v32  ;;  %v3751_v2 = vpop.f32.mrf.mxu1  ;;  %2851 = vmatmul.msk.bf16.gmra.mxu0 %vm1082_vm6, %v846_v17  ;;  %v3178_v32 = vld [vmem:[%s4699_s6 + $0x68] sm:$0xff]  ;;  %v1309_v17 = vrot.slane %v3640_v62, 1 }
  0xb9   : > { %1591 = vmatpush.bf16.msra.mxu3 %v3178_v32  ;;  %v3192_v62 = vld [vmem:[%s4700_s7 + $0x48] sm:$0xff] }
  0xba   : > { %v1311_v26 = vsel %vm585_vm2, %v1309_v17, %v1310_v8  ;;  %1759 = vmatpush.bf16.msra.mxu1 %v3192_v62  ;;  %v475_v17 = vld [vmem:[%s3361_s16 + $0x78] sm:$0xf]  ;;  %v1315_v62 = vrot.slane %v3663_v12, 1 }
  0xbb   : > { %2863 = vmatmul.msk.bf16.gmra.mxu2 %vm736_vm4, %v3747_v50  ;;  %2859 = vmatmul.msk.bf16.gmra.mxu1 %vm736_vm4, %v3747_v50  ;;  %v3790_v43 = vpack.c.bf16 %v1311_v26, %v1308_v55  ;;  %v3188_v55 = vld [vmem:[%s4699_s6 + $0xb8] sm:$0xff] }
  0xbc   : > { %2865 = vmatmul.msk.bf16.gmra.mxu3 %vm736_vm4, %v3667_v13  ;;  %v4710_v13 = vunpack.c.h.bf16 %v3571_v10  ;;  %1617 = vmatpush.bf16.msrb.mxu0 %v3188_v55  ;;  %v3820_v10 = vunpack.c.h.bf16 %v3581_v20 }
  0xbd   : > { %v665_v54 = vpop.f32.mrf.mxu0  ;;  %1592 = vmatpush.bf16.msra.mxu3 %v3177_v61  ;;  %v1312_v61 = vrot.slane %v3660_v11, 1 }
  0xbe   : > { %v3763_v31 = vpop.f32.mrf.mxu2  ;;  %4739 = vst [vmem:[#allocation16_spill] sm:$0xff] %v3820_v10 }
  0xbf   : > { %v773_v22 = vpop.f32.mrf.mxu3 }
  0xc0   : > { %v3772_v39 = vadd.f32 %v773_v22, %v658_v53  ;;  %v698_v41 = vpop.f32.mrf.mxu1 }
  0xc1   : > { %v848_v41 = vpack.c.bf16 %v4710_v13, %v4711_v42 }
  0xc5   : > { %v668_v8 = vpop.f32.mrf.mxu0 }
  0xc6   : > { %v3784_v53 = vpop.f32.mrf.mxu2 }
  0xc7   : > { %v775_v22 = vpop.f32.mrf.mxu3 }
  0xc8   : > { %v3792_v28 = vadd.f32 %v775_v22, %v660_v0  ;;  %v824_v33 = vpop.f32.mrf.mxu1  ;;  %2852 = vmatmul.msk.bf16.gmra.mxu0 %vm1082_vm6, %v848_v41  ;;  %v1814_v0 = vunpack.c.h.b16 %v3723_v57  ;;  %v1313_v22 = vrot.slane %v471_v14, 1 }
  0xc9   : > { %v3798_v32 = vadd.f32 %v824_v33, %v3682_v30  ;;  %v3191_v30 = vld [vmem:[%s4700_s7 + $0x40] sm:$0xff]  ;;  %v1316_v33 = vrot.slane %v475_v17, 1 }
  0xca   : > { %v1817_v13 = vpack.c.b16 %v1814_v0, %v1814_v0  ;;  %1760 = vmatpush.bf16.msra.mxu1 %v3191_v30  ;;  %v1314_v12 = vsel %vm585_vm2, %v1312_v61, %v1313_v22  ;;  %v483_v61 = vld [vmem:[%s3361_s16 + $0xb8] sm:$0xf] }
  0xcb   : > { %2877 = vmatmul.msk.bf16.vlgmr.msrb.gmra.mxu2 %vm624_vm3, %v3790_v43  ;;  %2873 = vmatmul.msk.bf16.vlgmr.msrb.gmra.mxu1 %vm624_vm3, %v3790_v43  ;;  %v1317_v14 = vsel %vm585_vm2, %v1315_v62, %v1316_v33  ;;  %v1318_v62 = vrot.slane %v3696_v45, 1 }
  0xcc   : > { %2866 = vmatmul.msk.bf16.gmra.mxu3 %vm736_vm4, %v3705_v51  ;;  %v1835_v15 = vsel %vm749_vm0, %v1817_v13, 0  ;;  %v3832_v0 = vpack.c.bf16 %v1317_v14, %v1314_v12 }
  0xcd   : > { %v670_v41 = vpop.f32.mrf.mxu0  ;;  %1875 = vmatpush.bf16.msrb.mxu3 %v1835_v15  ;;  %v3190_v15 = vld [vmem:[%s4700_s7 + $0x38] sm:$0xff] }
  0xce   : > { %v3804_v26 = vpop.f32.mrf.mxu2  ;;  %1761 = vmatpush.bf16.msra.mxu1 %v3190_v15  ;;  %v1321_v41 = vrot.slane %v3699_v46, 1  ;;  %v492_v46 = vld [vmem:[%s3477_s14 + $0x10] sm:$0xf] }
  0xcf   : > { %v778_v51 = vpop.f32.mrf.mxu3  ;;  %v496_v15 = vld [vmem:[%s3477_s14 + $0x30] sm:$0xf] }
  0xd0   : > { %v3817_v57 = vadd.f32 %v778_v51, %v663_v5  ;;  %v826_v42 = vpop.f32.mrf.mxu1  ;;  %v850_v5 = vpack.c.bf16 %v3820_v10, %v3820_v10  ;;  %v1322_v51 = vrot.slane %v483_v61, 1  ;;  %v523_v61 = vunpack.c.l.bf16 %v492_v46 }
  0xd1   : > { %v3824_v11 = vadd.f32 %v826_v42, %v3701_v48  ;;  %v479_v48 = vld [vmem:[%s3361_s16 + $0x98] sm:$0xf] }
  0xd2   : > { %v1319_v33 = vrot.slane %v479_v48, 1  ;;  %v1323_v45 = vsel %vm585_vm2, %v1321_v41, %v1322_v51 }
  0xd5   : > { %v681_v20 = vpop.f32.mrf.mxu0 }
  0xd6   : > { %v3828_v17 = vpop.f32.mrf.mxu2 }
  0xd7   : > { %v780_v55 = vpop.f32.mrf.mxu3 }
  0xd8   : > { %v3834_v13 = vadd.f32 %v780_v55, %v665_v54  ;;  %v829_v30 = vpop.f32.mrf.mxu1  ;;  %2853 = vmatmul.msk.bf16.gmra.mxu0 %vm1082_vm6, %v850_v5 }
  0xd9   : > { %v3840_v42 = vadd.f32 %v829_v30, %v3714_v36  ;;  %v3187_v36 = vld [vmem:[%s4699_s6 + $0xb0] sm:$0xff]  ;;  %v1320_v30 = vsel %vm585_vm2, %v1318_v62, %v1319_v33  ;;  %v487_v33 = vld [vmem:[%s3361_s16 + $0xd8] sm:$0xf] }
  0xda   : > { %1618 = vmatpush.bf16.msrb.mxu0 %v3187_v36  ;;  %v529_v36 = vunpack.c.l.bf16 %v496_v15 }
  0xdb   : > { %2878 = vmatmul.msk.bf16.gmra.mxu2 %vm624_vm3, %v3832_v0  ;;  %2874 = vmatmul.msk.bf16.gmra.mxu1 %vm624_vm3, %v3832_v0 }
  0xdc   : > { %2867 = vmatmul.msk.bf16.gmra.mxu3 %vm736_vm4, %v3747_v50  ;;  %v3189_v50 = vld [vmem:[%s4700_s7 + $0x30] sm:$0xff]  ;;  %v1468_v62 = vpack.c.bf16 %v529_v36, %v523_v61  ;;  %v1665_v6 = vrot.slane %v529_v36, 1 }
  0xdd   : > { %v683_v22 = vpop.f32.mrf.mxu0  ;;  %1762 = vmatpush.bf16.msra.mxu1 %v3189_v50  ;;  %v1325_v50 = vrot.slane %v487_v33, 1 }
  0xde   : > { %v3849_v54 = vpop.f32.mrf.mxu2 }
  0xdf   : > { %v783_v12 = vpop.f32.mrf.mxu3 }
  0xe0   : > { %v3858_v14 = vadd.f32 %v783_v12, %v668_v8  ;;  %v831_v5 = vpop.f32.mrf.mxu1  ;;  %v3872_v8 = vpack.c.bf16 %v1323_v45, %v1320_v30  ;;  %v1959_v30 = vld.sshfl [vmem:[#allocation1] sm:$0xff pattern:$0x73625140] }
  0xe1   : > { %v3864_v55 = vadd.f32 %v831_v5, %v3741_v21  ;;  %v1974_v46 = vsel %vm637_vm1, %v1959_v30, 0 }
  0xe2   : > { %1987 = vmatpush.bf16.msrb.mxu1 %v1974_v46 }
  0xe5   : > { %v796_v12 = vpop.f32.mrf.mxu0 }
  0xe6   : > { %v3870_v48 = vpop.f32.mrf.mxu2  ;;  %v3874_v10 = vadd.f32 %v796_v12, %v681_v20  ;;  %v1960_v20 = vld.sshfl [vmem:[#allocation1 + $0x8] sm:$0xff pattern:$0x73625140] }
  0xe7   : > { %v785_v4 = vpop.f32.mrf.mxu3 }
  0xe8   : > { %v834_v21 = vpop.f32.mrf.mxu1  ;;  %2869 = vmatmul.msk.bf16.vlgmr.msra.gmra.mxu0 %vm624_vm3, %v3790_v43  ;;  %v3186_v4 = vld [vmem:[%s4699_s6 + $0xa8] sm:$0xff]  ;;  %v1324_v43 = vrot.slane %v3735_v24, 1 }
  0xe9   : > { %v3881_v41 = vadd.f32 %v834_v21, %v3763_v31  ;;  %v1976_v31 = vsel %vm637_vm1, %v1960_v20, 0  ;;  %1619 = vmatpush.bf16.msrb.mxu0 %v3186_v4  ;;  %v500_v20 = vld [vmem:[%s3477_s14 + $0x50] sm:$0xf] }
  0xea   : > { %2015 = vmatpush.bf16.msrb.mxu2 %v1976_v31  ;;  %v1326_v33 = vsel %vm585_vm2, %v1324_v43, %v1325_v50  ;;  %v535_v31 = vunpack.c.l.bf16 %v500_v20  ;;  %v493_v43 = vld [vmem:[%s3477_s14 + $0x18] sm:$0x3] }
  0xeb   : > { %2879 = vmatmul.msk.bf16.gmra.mxu2 %vm624_vm3, %v3872_v8  ;;  %2875 = vmatmul.msk.bf16.gmra.mxu1 %vm624_vm3, %v3872_v8  ;;  %v3907_v4 = vpack.c.bf16 %v1326_v33, %v1326_v33  ;;  %v497_v50 = vld [vmem:[%s3477_s14 + $0x38] sm:$0x3] }
  0xec   : > { %1593 = vmatmul.bf16.vlgmr.msra.gmra.mxu3 %v1468_v62  ;;  %v531_v33 = vunpack.c.l.bf16 %v497_v50 }
  0xed   : > { %v798_v5 = vpop.f32.mrf.mxu0 }
  0xee   : > { %v3886_v51 = vpop.f32.mrf.mxu2  ;;  %v3893_v45 = vadd.f32 %v798_v5, %v683_v22  ;;  %v504_v22 = vld [vmem:[%s3477_s14 + $0x70] sm:$0xf] }
  0xef   : > { %v1104_v15 = vpop.f32.mrf.mxu3  ;;  %v541_v30 = vunpack.c.l.bf16 %v504_v22  ;;  %v1662_v22 = vrot.slane %v523_v61, 1 }
  0xf0   : > { %v3897_v12 = vadd.f32 %v1104_v15, %v3804_v26  ;;  %v836_v21 = vpop.f32.mrf.mxu1 }
  0xf1   : > { %v3900_v62 = vadd.f32 %v836_v21, %v3784_v53  ;;  %v1470_v53 = vpack.c.bf16 %v541_v30, %v535_v31 }
  0xf5   : > { %v3909_v46 = vpop.f32.mrf.mxu0 }
  0xf6   : > { %v3905_v5 = vpop.f32.mrf.mxu2 }
  0xf7   : > { %v1106_v26 = vpop.f32.mrf.mxu3 }
  0xf8   : > { %v3912_v15 = vadd.f32 %v1106_v26, %v3828_v17  ;;  %v3914_v24 = vpop.f32.mrf.mxu1  ;;  %2870 = vmatmul.msk.bf16.gmra.mxu0 %vm624_vm3, %v3832_v0  ;;  %v525_v17 = vunpack.c.l.bf16 %v493_v43  ;;  %v3185_v0 = vld [vmem:[%s4699_s6 + $0xa0] sm:$0xff]  ;;  %v3938_v43 = vld [vmem:[%s3477_s14 + $0xb0] sm:$0xf] }
  0xf9   : > { %1620 = vmatpush.bf16.msrb.mxu0 %v3185_v0  ;;  %v4722_v0 = vunpack.c.l.bf16 %v3938_v43 }
  0xfa   : > { %v1663_v52 = vrot.slane %v525_v17, 1 }
  0xfb   : > { %2880 = vmatmul.msk.bf16.gmra.mxu2 %vm624_vm3, %v3907_v4  ;;  %2876 = vmatmul.msk.bf16.gmra.mxu1 %vm624_vm3, %v3907_v4 }
  0xfc   : > { %1598 = vmatmul.bf16.gmra.mxu3 %v1470_v53  ;;  %v1666_v53 = vrot.slane %v531_v33, 1  ;;  %v1664_v61 = vsel %vm585_vm2, %v1662_v22, %v1663_v52  ;;  %v1472_v52 = vpack.c.bf16 %v4722_v0, %v547_v29  ;;  %v543_v22 = vunpack.c.l.bf16 %v505_v58 }
  0xfd   : > { %v3929_v20 = vpop.f32.mrf.mxu0  ;;  %v1671_v0 = vrot.slane %v541_v30, 1  ;;  %v3984_v30 = vunpack.c.l.bf16 %v3977_v38 }
  0xfe   : > { %v3924_v21 = vpop.f32.mrf.mxu2  ;;  %v1667_v36 = vsel %vm585_vm2, %v1665_v6, %v1666_v53  ;;  %v3010_v53 = vld [vmem:[%s4695_s2 + $0x20] sm:$0xf] }
  0xff   : > { %v1109_v26 = vpop.f32.mrf.mxu3  ;;  %v1690_v33 = vpack.c.bf16 %v1667_v36, %v1664_v61  ;;  %v1668_v36 = vrot.slane %v535_v31, 1 }
 0x100   : > { %v3932_v56 = vadd.f32 %v1109_v26, %v3849_v54  ;;  %v841_v49 = vpop.f32.mrf.mxu1 }
 0x101   : > { %v3946_v49 = vpack.c.bf16 %v3378_v16, %v3368_v9  ;;  %v501_v16 = vld [vmem:[%s3477_s14 + $0x58] sm:$0x3] }
 0x105   : > { %v3948_v54 = vpop.f32.mrf.mxu0 }
 0x106   : > { %v1008_v50 = vpop.f32.mrf.mxu2 }
 0x107   : > { %v1111_v17 = vpop.f32.mrf.mxu3 }
 0x108   : > { %v3951_v26 = vadd.f32 %v1111_v17, %v3870_v48  ;;  %v1196_v50 = vpop.f32.mrf.mxu1  ;;  %2871 = vmatmul.msk.bf16.gmra.mxu0 %vm624_vm3, %v3872_v8  ;;  %v537_v8 = vunpack.c.l.bf16 %v501_v16  ;;  %v1672_v16 = vrot.slane %v543_v22, 1 }
 0x109   : > { %v3960_v9 = vadd.f32 %v1196_v50, %v3729_v7  ;;  %v1815_v7 = vunpack.c.l.b16 %v3010_v53 }
 0x10b   : > { %3011 = vmatmul.msk.bf16.vlgmr.msra.gmra.mxu2 %vm736_vm4, %v3946_v49  ;;  %3005 = vmatmul.msk.bf16.vlgmr.msra.gmra.mxu1 %vm969_vm5, %v1690_v33  ;;  %v1818_v50 = vpack.c.b16 %v1815_v7, %v1815_v7 }
 0x10c   : > { %1603 = vmatmul.bf16.gmra.mxu3 %v1472_v52 }
 0x10d   : > { %v3971_v61 = vpop.f32.mrf.mxu0 }
 0x10e   : > { %v1224_v6 = vpop.f32.mrf.mxu2 }
 0x10f   : > { %v3966_v48 = vadd.f32 %v1224_v6, %v3874_v10  ;;  %v1114_v17 = vpop.f32.mrf.mxu3  ;;  %v1669_v10 = vrot.slane %v537_v8, 1  ;;  %v1838_v6 = vsel %vm749_vm0, %v1818_v50, 0  ;;  %v1673_v8 = vsel %vm585_vm2, %v1671_v0, %v1672_v16  ;;  %v509_v0 = vld [vmem:[%s3477_s14 + $0x98] sm:$0x3] }
 0x110   : > { %v3974_v33 = vadd.f32 %v1114_v17, %v3886_v51  ;;  %v1198_v52 = vpop.f32.mrf.mxu1  ;;  %3215 = vmatpush.bf16.msra.mxu3 %v1838_v6  ;;  %1903 = vmatpush.bf16.msra.mxu0 %v1838_v6 }
 0x111   : > { %v3980_v58 = vadd.f32 %v1198_v52, %v3749_v63  ;;  %v1670_v53 = vsel %vm585_vm2, %v1668_v36, %v1669_v10  ;;  %v3993_v63 = vpack.c.bf16 %v3404_v40, %v3386_v27  ;;  %v513_v40 = vld [vmem:[%s3477_s14 + $0xb8] sm:$0x3]  ;;  %v802_v36 = vadd.f32 %v3909_v46, %v3669_v18 }
 0x112   : > { %v1691_v17 = vpack.c.bf16 %v1673_v8, %v1670_v53  ;;  %v555_v16 = vunpack.c.l.bf16 %v513_v40  ;;  %v804_v40 = vadd.f32 %v3929_v20, %v3689_v35  ;;  %v517_v20 = vld [vmem:[%s3477_s14 + $0xd8] sm:$0x3] }
 0x114   : > { %v1678_v46 = vrot.slane %v555_v16, 1 }
 0x115   : > { %v3995_v22 = vpop.f32.mrf.mxu0 }
 0x116   : > { %v1226_v31 = vpop.f32.mrf.mxu2 }
 0x117   : > { %v3987_v51 = vadd.f32 %v1226_v31, %v3893_v45  ;;  %v1116_v7 = vpop.f32.mrf.mxu3  ;;  %v1474_v45 = vpack.c.bf16 %v3984_v30, %v3984_v30  ;;  %v1674_v31 = vrot.slane %v547_v29, 1 }
 0x118   : > { %v3998_v50 = vadd.f32 %v1116_v7, %v3905_v5  ;;  %v1201_v52 = vpop.f32.mrf.mxu1  ;;  %2872 = vmatmul.msk.bf16.gmra.mxu0 %vm624_vm3, %v3907_v4  ;;  %v549_v4 = vunpack.c.l.bf16 %v509_v0  ;;  %v3156_v0 = vld [vmem:[%s3477_s14 + $0x14] sm:$0xf] }
 0x119   : > { %v4008_v27 = vadd.f32 %v1201_v52, %v3772_v39  ;;  %v4740_v39 = vunpack.c.l.bf16 %v3938_v43 }
 0x11a   : > { %v1675_v8 = vrot.slane %v549_v4, 1  ;;  %v4034_v4 = vpack.c.bf16 %v3396_v34, %v3409_v44  ;;  %v807_v34 = vadd.f32 %v3948_v54, %v3707_v25  ;;  %v3206_v25 = vld [vmem:[%s4699_s6 + $0x118] sm:$0xff] }
 0x11b   : > { %3012 = vmatmul.msk.bf16.gmra.mxu2 %vm736_vm4, %v3993_v63  ;;  %3006 = vmatmul.msk.bf16.gmra.mxu1 %vm969_vm5, %v1691_v17  ;;  %v1677_v7 = vrot.slane %v4740_v39, 1 }
 0x11c   : > { %1608 = vmatmul.bf16.gmra.mxu3 %v1474_v45  ;;  %v2881_v45 = vld [vmem:[%s3477_s14 + $0x30] sm:$0xf0]  ;;  %2234 = vmatpush.bf16.msra.mxu1 %v3206_v25 }
 0x11d   : > { %v813_v6 = vpop.f32.mrf.mxu0  ;;  %v2884_v43 = vor.u32 %v3156_v0, %v2881_v45 }
 0x11e   : > { %v1229_v5 = vpop.f32.mrf.mxu2 }
 0x11f   : > { %v4014_v10 = vadd.f32 %v1229_v5, %v802_v36  ;;  %v1119_v53 = vpop.f32.mrf.mxu3  ;;  %v1676_v36 = vsel %vm585_vm2, %v1674_v31, %v1675_v8  ;;  %v561_v31 = vunpack.c.l.bf16 %v517_v20 }
 0x120   : > { %v4019_v52 = vadd.f32 %v1119_v53, %v3924_v21  ;;  %v1203_v18 = vpop.f32.mrf.mxu1  ;;  %v1679_v21 = vsel %vm585_vm2, %v1677_v7, %v1678_v46 }
 0x121   : > { %v4022_v17 = vadd.f32 %v1203_v18, %v3792_v28  ;;  %v1692_v53 = vpack.c.bf16 %v1679_v21, %v1676_v36  ;;  %v1680_v18 = vrot.slane %v3984_v30, 1  ;;  %v1681_v45 = vrot.slane %v561_v31, 1  ;;  %v2885_v36 = vld [vmem:[%s3477_s14 + $0x70] sm:$0xf0] }
 0x123   : > { %v1682_v30 = vsel %vm585_vm2, %v1680_v18, %v1681_v45  ;;  %v2889_v18 = vld [vmem:[%s3477_s14 + $0xb0] sm:$0xf0] }
 0x124   : > { %v1693_v20 = vpack.c.bf16 %v1682_v30, %v1682_v30 }
 0x125   : > { %v1132_v28 = vpop.f32.mrf.mxu0 }
 0x126   : > { %v1231_v29 = vpop.f32.mrf.mxu2  ;;  %v4037_v16 = vadd.f32 %v1132_v28, %v3897_v12 }
 0x127   : > { %v4029_v5 = vadd.f32 %v1231_v29, %v804_v40  ;;  %v1121_v6 = vpop.f32.mrf.mxu3  ;;  %v3157_v29 = vld [vmem:[%s3477_s14 + $0x54] sm:$0xf] }
 0x128   : > { %v1206_v39 = vpop.f32.mrf.mxu1  ;;  %2965 = vmatmul.msk.bf16.vlgmr.msrb.gmra.mxu0 %vm1082_vm6, %v2884_v43  ;;  %v4070_v43 = vld [vmem:[%s3361_s16 + $0xe0] sm:$0xff]  ;;  %v2888_v6 = vor.u32 %v3157_v29, %v2885_v36 }
 0x129   : > { %v4043_v35 = vadd.f32 %v1206_v39, %v3817_v57  ;;  %v3212_v57 = vld [vmem:[%s4700_s7 + $0x88] sm:$0xff] }
 0x12a   : > { %2338 = vmatpush.bf16.msra.mxu2 %v3212_v57  ;;  %v3205_v57 = vld [vmem:[%s4699_s6 + $0x110] sm:$0xff] }
 0x12b   : > { %3013 = vmatmul.msk.bf16.gmra.mxu2 %vm736_vm4, %v4034_v4  ;;  %3007 = vmatmul.msk.bf16.gmra.mxu1 %vm969_vm5, %v1692_v53 }
 0x12c   : > { %3015 = vmatmul.msk.bf16.vlgmr.msrb.gmra.mxu3 %vm736_vm4, %v3946_v49  ;;  %2235 = vmatpush.bf16.msra.mxu1 %v3205_v57 }
 0x12d   : > { %v1134_v54 = vpop.f32.mrf.mxu0 }
 0x12e   : > { %v1234_v44 = vpop.f32.mrf.mxu2  ;;  %v4060_v8 = vadd.f32 %v1134_v54, %v3912_v15  ;;  %v809_v15 = vadd.f32 %v3971_v61, %v3731_v3  ;;  %v3211_v3 = vld [vmem:[%s4700_s7 + $0x80] sm:$0xff] }
 0x12f   : > { %v4051_v12 = vadd.f32 %v1234_v44, %v807_v34  ;;  %v1252_v7 = vpop.f32.mrf.mxu3  ;;  %2339 = vmatpush.bf16.msra.mxu2 %v3211_v3 }
 0x130   : > { %v1273_v46 = vadd.f32 %v1252_v7, %v3798_v32  ;;  %v1208_v0 = vpop.f32.mrf.mxu1  ;;  %v4079_v32 = vpack.c.bf16 %v4070_v43, %v4070_v43  ;;  %v3158_v7 = vld [vmem:[%s3477_s14 + $0x94] sm:$0xf] }
 0x131   : > { %v4065_v40 = vadd.f32 %v1208_v0, %v3834_v13  ;;  %v3210_v0 = vld [vmem:[%s4700_s7 + $0x78] sm:$0xff]  ;;  %v2892_v29 = vor.u32 %v3158_v7, %v2889_v18 }
 0x133   : > { %2340 = vmatpush.bf16.msra.mxu2 %v3210_v0 }
 0x135   : > { %v1137_v53 = vpop.f32.mrf.mxu0 }
 0x136   : > { %v1236_v21 = vpop.f32.mrf.mxu2  ;;  %v4082_v13 = vadd.f32 %v1137_v53, %v3932_v56  ;;  %v812_v56 = vadd.f32 %v3995_v22, %v3751_v2  ;;  %v1961_v53 = vld.sshfl [vmem:[#allocation1 + $0x10] sm:$0xff pattern:$0x73625140] }
 0x137   : > { %v4074_v28 = vadd.f32 %v1236_v21, %v809_v15  ;;  %v1254_v39 = vpop.f32.mrf.mxu3 }
 0x138   : > { %v1276_v34 = vadd.f32 %v1254_v39, %v3824_v11  ;;  %v1211_v44 = vpop.f32.mrf.mxu1  ;;  %2966 = vmatmul.msk.bf16.gmra.mxu0 %vm1082_vm6, %v2888_v6  ;;  %v3209_v39 = vld [vmem:[%s4700_s7 + $0x70] sm:$0xff] }
 0x139   : > { %v4092_v61 = vadd.f32 %v1211_v44, %v3858_v14  ;;  %v1978_v44 = vsel %vm637_vm1, %v1961_v53, 0  ;;  %2341 = vmatpush.bf16.msra.mxu2 %v3209_v39  ;;  %v3197_v53 = vld [vmem:[%s4699_s6 + $0xd0] sm:$0xff] }
 0x13a   : > { %2043 = vmatpush.bf16.msrb.mxu3 %v1978_v44 }
 0x13b   : > { %3014 = vmatmul.msk.bf16.gmra.mxu2 %vm736_vm4, %v4079_v32  ;;  %3008 = vmatmul.msk.bf16.gmra.mxu1 %vm969_vm5, %v1693_v20 }
 0x13c   : > { %3016 = vmatmul.msk.bf16.gmra.mxu3 %vm736_vm4, %v3993_v63 }
 0x13d   : > { %v1139_v25 = vpop.f32.mrf.mxu0 }
 0x13e   : > { %v1239_v11 = vpop.f32.mrf.mxu2  ;;  %v4105_v14 = vadd.f32 %v1139_v25, %v3951_v26  ;;  %v560_v25 = vunpack.c.h.bf16 %v3977_v38  ;;  %v3208_v38 = vld [vmem:[%s4700_s7 + $0x68] sm:$0xff] }
 0x13f   : > { %v4099_v31 = vadd.f32 %v1239_v11, %v812_v56  ;;  %v1257_v54 = vpop.f32.mrf.mxu3  ;;  %v3201_v56 = vld [vmem:[%s4699_s6 + $0xf0] sm:$0xff]  ;;  %2342 = vmatpush.bf16.msra.mxu2 %v3208_v38 }
 0x140   : > { %v1279_v2 = vadd.f32 %v1257_v54, %v3840_v42  ;;  %v1213_v22 = vpop.f32.mrf.mxu1  ;;  %v1475_v18 = vpack.c.bf16 %v560_v25, %v560_v25 }
 0x145   : > { %v1142_v36 = vpop.f32.mrf.mxu0 }
 0x146   : > { %v1241_v45 = vpop.f32.mrf.mxu2  ;;  %v4114_v15 = vadd.f32 %v1142_v36, %v3974_v33  ;;  %v3202_v33 = vld [vmem:[%s4699_s6 + $0xf8] sm:$0xff] }
 0x147   : > { %v1259_v26 = vpop.f32.mrf.mxu3  ;;  %2202 = vmatpush.bf16.msrb.mxu0 %v3202_v33 }
 0x148   : > { %v4117_v21 = vadd.f32 %v1259_v26, %v3864_v55  ;;  %v1400_v6 = vpop.f32.mrf.mxu1  ;;  %2967 = vmatmul.msk.bf16.gmra.mxu0 %vm1082_vm6, %v2892_v29  ;;  %v3198_v26 = vld [vmem:[%s4699_s6 + $0xd8] sm:$0xff] }
 0x149   : > { %v4123_v42 = vadd.f32 %v1400_v6, %v3966_v48  ;;  %v3204_v48 = vld [vmem:[%s4699_s6 + $0x108] sm:$0xff] }
 0x14a   : > { %2236 = vmatpush.bf16.msra.mxu1 %v3204_v48 }
 0x14b   : > { %3028 = vmatmul.msk.bf16.vlgmr.msrb.gmra.mxu2 %vm624_vm3, %v3415_v47  ;;  %3024 = vmatmul.msk.bf16.vlgmr.msrb.gmra.mxu1 %vm624_vm3, %v3415_v47 }
 0x14c   : > { %3017 = vmatmul.msk.bf16.gmra.mxu3 %vm736_vm4, %v4034_v4  ;;  %2203 = vmatpush.bf16.msrb.mxu0 %v3201_v56 }
 0x14d   : > { %v1144_v20 = vpop.f32.mrf.mxu0 }
 0x14e   : > { %v1428_v30 = vpop.f32.mrf.mxu2  ;;  %v4142_v3 = vadd.f32 %v1144_v20, %v3998_v50  ;;  %v3200_v50 = vld [vmem:[%s4699_s6 + $0xe8] sm:$0xff] }
 0x14f   : > { %v4132_v55 = vadd.f32 %v1428_v30, %v1273_v46  ;;  %v1262_v46 = vpop.f32.mrf.mxu3  ;;  %v840_v30 = vadd.f32 %v3914_v24, %v3687_v37  ;;  %v3196_v37 = vld [vmem:[%s4699_s6 + $0xc8] sm:$0xff] }
 0x150   : > { %v1285_v11 = vadd.f32 %v1262_v46, %v3881_v41  ;;  %v1402_v57 = vpop.f32.mrf.mxu1  ;;  %2204 = vmatpush.bf16.msrb.mxu0 %v3200_v50  ;;  %v4216_v50 = vld [vmem:[%s3361_s16 + $0xe8] sm:$0xf] }
 0x151   : > { %v4150_v54 = vadd.f32 %v1402_v57, %v3987_v51  ;;  %v3199_v51 = vld [vmem:[%s4699_s6 + $0xe0] sm:$0xff]  ;;  %4742 = vst [vmem:[#allocation18_spill] sm:$0xff] %v4216_v50 }
 0x154   : > { %2205 = vmatpush.bf16.msrb.mxu0 %v3199_v51 }
 0x155   : > { %v1147_v0 = vpop.f32.mrf.mxu0 }
 0x156   : > { %v1430_v22 = vpop.f32.mrf.mxu2  ;;  %v4158_v45 = vadd.f32 %v1147_v0, %v4019_v52  ;;  %v1948_v0 = vrot.slane %v4216_v50, 1 }
 0x157   : > { %v4155_v7 = vadd.f32 %v1430_v22, %v1276_v34  ;;  %v1264_v41 = vpop.f32.mrf.mxu3 }
 0x158   : > { %v1288_v29 = vadd.f32 %v1264_v41, %v3900_v62  ;;  %v1405_v36 = vpop.f32.mrf.mxu1  ;;  %2968 = vmatmul.msk.bf16.gmra.mxu0 %vm1082_vm6, %v1475_v18 }
 0x159   : > { %v4171_v52 = vadd.f32 %v1405_v36, %v4014_v10  ;;  %v3203_v10 = vld [vmem:[%s4699_s6 + $0x100] sm:$0xff]  ;;  %2206 = vmatpush.bf16.msrb.mxu0 %v3198_v26 }
 0x15a   : > { %2237 = vmatpush.bf16.msra.mxu1 %v3203_v10 }
 0x15b   : > { %3029 = vmatmul.msk.bf16.gmra.mxu2 %vm624_vm3, %v3433_v59  ;;  %3025 = vmatmul.msk.bf16.gmra.mxu1 %vm624_vm3, %v3433_v59 }
 0x15c   : > { %3018 = vmatmul.msk.bf16.gmra.mxu3 %vm736_vm4, %v4079_v32 }
 0x15d   : > { %v1149_v6 = vpop.f32.mrf.mxu0  ;;  %2207 = vmatpush.bf16.msrb.mxu0 %v3197_v53 }
 0x15e   : > { %v1433_v34 = vpop.f32.mrf.mxu2 }
 0x15f   : > { %v4180_v62 = vadd.f32 %v1433_v34, %v1279_v2  ;;  %v1267_v33 = vpop.f32.mrf.mxu3  ;;  %v3207_v2 = vld [vmem:[%s4700_s7 + $0x60] sm:$0xff] }
 0x160   : > { %v1291_v39 = vadd.f32 %v1267_v33, %v840_v30  ;;  %v1407_v48 = vpop.f32.mrf.mxu1  ;;  %2343 = vmatpush.bf16.msra.mxu2 %v3207_v2 }
 0x161   : > { %v4194_v20 = vadd.f32 %v1407_v48, %v4029_v5  ;;  %2208 = vmatpush.bf16.msrb.mxu0 %v3196_v37  ;;  %v3195_v5 = vld [vmem:[%s4699_s6 + $0xc0] sm:$0xff] }
 0x165   : > { %v1372_v46 = vpop.f32.mrf.mxu0  ;;  %2209 = vmatpush.bf16.msrb.mxu0 %v3195_v5 }
 0x166   : > { %v1435_v24 = vpop.f32.mrf.mxu2  ;;  %v4203_v56 = vadd.f32 %v1372_v46, %v3960_v9 }
 0x167   : > { %v4200_v44 = vadd.f32 %v1435_v24, %v4117_v21  ;;  %v1269_v57 = vpop.f32.mrf.mxu3 }
 0x168   : > { %v1410_v25 = vpop.f32.mrf.mxu1  ;;  %3019 = vmatmul.msk.bf16.vlgmr.msra.gmra.mxu0 %vm736_vm4, %v3946_v49  ;;  %v1947_v49 = vrot.slane %v4070_v43, 1 }
 0x169   : > { %4741 = vst [vmem:[#allocation17_spill] sm:$0xff] %v4200_v44  ;;  %v4213_v21 = vadd.f32 %v1410_v25, %v4051_v12  ;;  %v4749_v25 = vld [vmem:[#allocation4_spill] sm:$0xff] }
 0x16a   : > { %v1949_v36 = vsel %vm585_vm2, %v1947_v49, %v1948_v0 }
 0x16b   : > { %3030 = vmatmul.msk.bf16.gmra.mxu2 %vm624_vm3, %v3437_v60  ;;  %3026 = vmatmul.msk.bf16.gmra.mxu1 %vm624_vm3, %v3437_v60 }
 0x16c   : > { %3021 = vmatmul.msk.bf16.vlgmr.msra.gmra.mxu3 %vm736_vm4, %v4034_v4 }
 0x16d   : > { %v1374_v18 = vpop.f32.mrf.mxu0 }
 0x16e   : > { %v1438_v9 = vpop.f32.mrf.mxu2  ;;  %v4227_v12 = vadd.f32 %v1374_v18, %v3980_v58 }
 0x16f   : > { %v4222_v22 = vadd.f32 %v1438_v9, %v1285_v11  ;;  %v4229_v41 = vpop.f32.mrf.mxu3  ;;  %v4237_v11 = vpack.c.bf16 %v1949_v36, %v1949_v36  ;;  %v4750_v9 = vld [vmem:[#allocation6_spill] sm:$0xff]  ;;  %v4753_v36 = vld [vmem:[#allocation5_spill] sm:$0xff] }
 0x170   : > { %v1412_v38 = vpop.f32.mrf.mxu1  ;;  %v2087_v49 = vpack.c.bf16 %v4750_v9, %v4749_v25  ;;  %v4758_v9 = vld [vmem:[#allocation10_spill] sm:$0xff] }
 0x171   : > { %4743 = vst [vmem:[#allocation19_spill] sm:$0xff] %v4222_v22  ;;  %v4232_v51 = vadd.f32 %v1412_v38, %v4074_v28  ;;  %v3235_v22 = vld [vmem:[%s3361_s16 + $0x60] sm:$0xff] }
 0x175   : > { %v1377_v26 = vpop.f32.mrf.mxu0 }
 0x176   : > { %v1440_v34 = vpop.f32.mrf.mxu2  ;;  %v4240_v10 = vadd.f32 %v1377_v26, %v4008_v27 }
 0x177   : > { %v4235_v4 = vadd.f32 %v1440_v34, %v1288_v29  ;;  %v4242_v6 = vpop.f32.mrf.mxu3  ;;  %v4754_v34 = vunpack.c.h.bf16 %v4753_v36  ;;  %v3233_v36 = vld [vmem:[%s3361_s16 + $0x50] sm:$0xff] }
 0x178   : > { %v1415_v58 = vpop.f32.mrf.mxu1  ;;  %3020 = vmatmul.msk.bf16.gmra.mxu0 %vm736_vm4, %v3993_v63 }
 0x179   : > { %4744 = vst [vmem:[#allocation20_spill] sm:$0xff] %v4235_v4  ;;  %v4249_v28 = vadd.f32 %v1415_v58, %v4099_v31  ;;  %v2085_v31 = vpack.c.bf16 %v3496_v23, %v3489_v19 }
 0x17b   : > { %3031 = vmatmul.msk.bf16.gmra.mxu2 %vm624_vm3, %v4237_v11  ;;  %3027 = vmatmul.msk.bf16.gmra.mxu1 %vm624_vm3, %v4237_v11 }
 0x17c   : > { %3022 = vmatmul.msk.bf16.gmra.mxu3 %vm736_vm4, %v4079_v32 }
 0x17d   : > { %v1379_v30 = vpop.f32.mrf.mxu0 }
 0x17e   : > { %v1443_v29 = vpop.f32.mrf.mxu2  ;;  %v4258_v33 = vadd.f32 %v1379_v30, %v4022_v17  ;;  %v4748_v17 = vld [vmem:[#allocation14_spill] sm:$0xff]  ;;  %v4756_v30 = vld [vmem:[#allocation7_spill] sm:$0xff] }
 0x17f   : > { %v4255_v27 = vadd.f32 %v1443_v29, %v1291_v39  ;;  %v4260_v63 = vpop.f32.mrf.mxu3  ;;  %v4746_v39 = vld [vmem:[#allocation2_spill] sm:$0xff]  ;;  %v4755_v29 = vld [vmem:[#allocation8_spill] sm:$0xff] }
 0x180   : > { %v1417_v53 = vpop.f32.mrf.mxu1  ;;  %v4747_v46 = vpack.c.bf16 %v3518_v1, %v4746_v39 }
 0x181   : > { %4745 = vst [vmem:[#allocation21_spill] sm:$0xff] %v4255_v27  ;;  %v4757_v53 = vpack.c.bf16 %v4755_v29, %v4756_v30  ;;  %v4762_v27 = vld [vmem:[#allocation16_spill] sm:$0xff] }
 0x185   : > { %v1382_v2 = vpop.f32.mrf.mxu0 }
 0x186   : > { %v1445_v48 = vpop.f32.mrf.mxu2  ;;  %v4265_v37 = vadd.f32 %v1382_v2, %v4043_v35  ;;  %v3230_v2 = vld [vmem:[%s3361_s16 + $0x10] sm:$0xff] }
 0x187   : > { %v4267_v24 = vpop.f32.mrf.mxu3 }
 0x188   : > { %v1764_v32 = vpop.f32.mrf.mxu1  ;;  %2210 = vmatmul.bf16.vlgmr.msrb.gmra.mxu0 %v2085_v31  ;;  %v3229_v31 = vld [vmem:[%s3361_s16] sm:$0xff] }
 0x189   : > { %v1790_v39 = vmax.f32 %v3229_v31, %v3230_v2  ;;  %v4760_v2 = vld [vmem:[#allocation9_spill] sm:$0xff] }
 0x18b   : > { %3148 = vmatmul.msk.bf16.vlgmr.msra.gmra.mxu2 %vm969_vm5, %v4747_v46  ;;  %3108 = vmatmul.msk.bf16.vlgmr.msra.gmra.mxu1 %vm1082_vm6, %v4748_v17  ;;  %v3231_v17 = vld [vmem:[%s3361_s16 + $0x20] sm:$0xff] }
 0x18c   : > { %3032 = vmatmul.msk.bf16.vlgmr.msrb.gmra.mxu3 %vm624_vm3, %v3415_v47 }
 0x18d   : > { %v1384_v19 = vpop.f32.mrf.mxu0 }
 0x18e   : > { %v4275_v57 = vpop.f32.mrf.mxu2  ;;  %v4280_v23 = vadd.f32 %v1384_v19, %v4065_v40  ;;  %v4751_v40 = vld [vmem:[#allocation3_spill] sm:$0xff]  ;;  %v4315_v19 = vmax.f32 %v1790_v39, %v3231_v17  ;;  %v4761_v39 = vunpack.c.h.bf16 %v4760_v2 }
 0x18f   : > { %v4282_v35 = vpop.f32.mrf.mxu3  ;;  %v4752_v38 = vunpack.c.h.bf16 %v4751_v40 }
 0x190   : > { %v4284_v5 = vpop.f32.mrf.mxu1  ;;  %2528 = vrot.lane.b32.xlu0 %v4315_v19, %s3264_s27  ;;  %v2090_v4 = vpack.c.bf16 %v4762_v27, %v4761_v39 }
 0x191   : > { %v2088_v26 = vpack.c.bf16 %v4754_v34, %v4752_v38  ;;  %v3232_v38 = vld [vmem:[%s3361_s16 + $0x40] sm:$0xff] }
 0x192   : > { %v1792_v34 = vmax.f32 %v3232_v38, %v3233_v36 }
 0x194   : > { %v4335_v50 = vmax.f32 %v1792_v34, %v3235_v22 }
 0x195   : > { %v1387_v18 = vpop.f32.mrf.mxu0 }
 0x196   : > { %v4286_v1 = vpop.f32.mrf.mxu2  ;;  %v4291_v0 = vadd.f32 %v1387_v18, %v4092_v61  ;;  %2532 = vrot.lane.b32.xlu1 %v4335_v50, %s3264_s27 }
 0x197   : > { %v4293_v47 = vpop.f32.mrf.mxu3 }
 0x198   : > { %v4299_v58 = vpop.f32.mrf.mxu1  ;;  %2215 = vmatmul.bf16.gmra.mxu0 %v2087_v49  ;;  %v4759_v49 = vld [vmem:[#allocation11_spill] sm:$0xff] }
 0x199   : > { %v2089_v18 = vpack.c.bf16 %v4759_v49, %v4758_v9 }
 0x19b   : > { %3149 = vmatmul.msk.bf16.gmra.mxu2 %vm969_vm5, %v4757_v53  ;;  %3109 = vmatmul.msk.bf16.gmra.mxu1 %vm1082_vm6, %v2088_v26  ;;  %v3234_v26 = vld [vmem:[%s3361_s16 + $0x30] sm:$0xff]  ;;  %v518_v53 = vld [vmem:[%s3477_s14 + $0xe0] sm:$0xff] }
 0x19c   : > { %3033 = vmatmul.msk.bf16.gmra.mxu3 %vm624_vm3, %v3433_v59  ;;  %v1791_v29 = vmax.f32 %v3231_v17, %v3234_v26  ;;  %v4764_v17 = vld [vmem:[#allocation12_spill] sm:$0xff]  ;;  %v562_v36 = vunpack.c.l.bf16 %v518_v53 }
 0x19d   : > { %v1389_v48 = vpop.f32.mrf.mxu0 }
 0x19e   : > { %v4306_v61 = vpop.f32.mrf.mxu2  ;;  %v519_v48 = vld [vmem:[%s3477_s14 + $0xe8] sm:$0x3]  ;;  %v4337_v44 = vmax.f32 %v1791_v29, %v3232_v38  ;;  %v2267_v38 = vrot.slane %v562_v36, 1  ;;  %v3236_v29 = vld [vmem:[%s3361_s16 + $0x70] sm:$0xff]  ;;  %s4566_s14 = scalar_lea.vmem %s4704_s11, %s3217_s25 }
 0x19f   : > { %v4312_v46 = vpop.f32.mrf.mxu3  ;;  %v564_v26 = vunpack.c.l.bf16 %v519_v48  ;;  %v3237_v48 = vld [vmem:[%s3361_s16 + $0xc0] sm:$0xff] }
 0x1a0   : > { %v4317_v25 = vpop.f32.mrf.mxu1  ;;  %2530 = vrot.lane.b32.xlu0 %v4337_v44, %s3264_s27 }
 0x1a1   : > { %v2268_v34 = vrot.slane %v564_v26, 1  ;;  %v563_v26 = vunpack.c.h.bf16 %v518_v53 }
 0x1a5   : > { %v1622_v40 = vpop.f32.mrf.mxu0 }
 0x1a6   : > { %v4321_v59 = vpop.f32.mrf.mxu2  ;;  %v1623_v30 = vadd.f32 %v1622_v40, %v4229_v41  ;;  %v4763_v41 = vld [vmem:[#allocation13_spill] sm:$0xff] }
 0x1a7   : > { %v1611_v31 = vpop.f32.mrf.mxu3  ;;  %v4765_v40 = vpack.c.bf16 %v4763_v41, %v4764_v17 }
 0x1a8   : > { %v1641_v9 = vadd.f32 %v1623_v30, %v4037_v16  ;;  %v4340_v49 = vpop.f32.mrf.mxu1  ;;  %2220 = vmatmul.bf16.gmra.mxu0 %v2089_v18  ;;  %v1793_v30 = vmax.f32 %v3235_v22, %v3236_v29  ;;  %v4766_v31 = vld [vmem:[#allocation15_spill] sm:$0xff] }
 0x1a9   : > { %v1796_v2 = vmax.f32 %v3237_v48, %v4766_v31 }
 0x1aa   : > { %v4350_v27 = vadd.f32 %v1764_v32, %v1641_v9  ;;  %v3238_v32 = vld [vmem:[%s3361_s16 + $0x80] sm:$0xff] }
 0x1ab   : > { %3150 = vmatmul.msk.bf16.gmra.mxu2 %vm969_vm5, %v4765_v40  ;;  %3110 = vmatmul.msk.bf16.gmra.mxu1 %vm1082_vm6, %v2090_v4  ;;  %v4362_v9 = vmax.f32 %v1793_v30, %v3238_v32  ;;  %v4365_v4 = vmax.f32 %v1796_v2, %v4070_v43  ;;  %v2269_v40 = vsel %vm585_vm2, %v2267_v38, %v2268_v34 }
 0x1ac   : > { %3034 = vmatmul.msk.bf16.gmra.mxu3 %vm624_vm3, %v3437_v60  ;;  %v2091_v43 = vpack.c.bf16 %v562_v36, %v562_v36  ;;  %v2092_v34 = vpack.c.bf16 %v563_v26, %v563_v26  ;;  %v3239_v36 = vld [vmem:[%s3361_s16 + $0x90] sm:$0xff] }
 0x1ad   : > { %v1624_v18 = vpop.f32.mrf.mxu0  ;;  %2534 = vrot.lane.b32.xlu1 %v4362_v9, %s3264_s27  ;;  %2540 = vrot.lane.b32.xlu0 %v4365_v4, %s3264_s27  ;;  %v1794_v2 = vmax.f32 %v3238_v32, %v3239_v36  ;;  %v4409_v32 = vld [vmem:[%s4697_s4] sm:$0x7] }
 0x1ae   : > { %v4353_v16 = vpop.f32.mrf.mxu2  ;;  %v1625_v39 = vadd.f32 %v1624_v18, %v4242_v6  ;;  %v2274_v18 = vpack.c.bf16 %v2269_v40, %v2269_v40 }
 0x1af   : > { %v1877_v41 = vpop.f32.mrf.mxu3 }
 0x1b0   : > { %v1642_v17 = vadd.f32 %v1625_v39, %v4060_v8  ;;  %v4368_v60 = vpop.f32.mrf.mxu1 }
 0x1b2   : > { %v4376_v22 = vadd.f32 %v4284_v5, %v1642_v17  ;;  %v3240_v17 = vld [vmem:[%s3361_s16 + $0xa0] sm:$0xff] }
 0x1b3   : > { %v4398_v40 = vmax.f32 %v1794_v2, %v3240_v17 }
 0x1b5   : > { %v1627_v8 = vpop.f32.mrf.mxu0  ;;  %2536 = vrot.lane.b32.xlu2 %v4398_v40, %s3264_s27 }
 0x1b6   : > { %v4378_v6 = vpop.f32.mrf.mxu2  ;;  %v1628_v29 = vadd.f32 %v1627_v8, %v4260_v63 }
 0x1b7   : > { %v1879_v38 = vpop.f32.mrf.mxu3 }
 0x1b8   : > { %v1643_v30 = vadd.f32 %v1628_v29, %v4082_v13  ;;  %v4382_v31 = vpop.f32.mrf.mxu1  ;;  %2225 = vmatmul.bf16.gmra.mxu0 %v2091_v43 }
 0x1ba   : > { %v4386_v5 = vadd.f32 %v4299_v58, %v1643_v30  ;;  %v4423_v30 = vperm.slane %v4409_v32, 0 }
 0x1bb   : > { %3151 = vmatmul.msk.bf16.gmra.mxu2 %vm969_vm5, %v2274_v18  ;;  %3111 = vmatmul.msk.bf16.gmra.mxu1 %vm1082_vm6, %v2092_v34  ;;  %v3241_v18 = vld [vmem:[%s3361_s16 + $0xb0] sm:$0xff] }
 0x1bc   : > { %3035 = vmatmul.msk.bf16.gmra.mxu3 %vm624_vm3, %v4237_v11  ;;  %v1795_v8 = vmax.f32 %v3240_v17, %v3241_v18  ;;  %v1925_v17 = vadd.f32 %v1877_v41, %v4123_v42  ;;  %v1927_v41 = vadd.f32 %v4286_v1, %v4227_v12 }
 0x1bd   : > { %v1629_v63 = vpop.f32.mrf.mxu0 }
 0x1be   : > { %v4389_v53 = vpop.f32.mrf.mxu2  ;;  %v1630_v13 = vadd.f32 %v1629_v63, %v4267_v24  ;;  %v4425_v63 = vmax.f32 %v1795_v8, %v3237_v48 }
 0x1bf   : > { %v4395_v39 = vpop.f32.mrf.mxu3 }
 0x1c0   : > { %v1644_v58 = vadd.f32 %v1630_v13, %v4105_v14  ;;  %v1781_v26 = vpop.f32.mrf.mxu1  ;;  %v4416_v14 = vld [vmem:[%s4698_s5] sm:$0x7]  ;;  %2538 = vrot.lane.b32.xlu2 %v4425_v63, %s3264_s27 }
 0x1c1   : > { %v4443_v26 = vperm.slane %v4416_v14, 1 }
 0x1c2   : > { %v4404_v43 = vadd.f32 %v4317_v25, %v1644_v58  ;;  %v1924_v25 = vadd.f32 %v4275_v57, %v4203_v56  ;;  %v4436_v56 = vperm.slane %v4409_v32, 1 }
 0x1c5   : > { %v1632_v24 = vpop.f32.mrf.mxu0 }
 0x1c6   : > { %v1866_v11 = vpop.f32.mrf.mxu2  ;;  %v1633_v29 = vadd.f32 %v1632_v24, %v4282_v35  ;;  %v4429_v35 = vperm.slane %v4416_v14, 0 }
 0x1c7   : > { %v4420_v34 = vpop.f32.mrf.mxu3 }
 0x1c8   : > { %v1645_v36 = vadd.f32 %v1633_v29, %v4114_v15  ;;  %v1989_v2 = vpop.f32.mrf.mxu1 }
 0x1c9   : > { %v2064_v13 = vadd.f32 %v1989_v2, %v1924_v25 }
 0x1ca   : > { %v4439_v57 = vadd.f32 %v4340_v49, %v1645_v36 }
 0x1cb   : > { %v2393_v48 = vmul.f32 %v4423_v30, %v2064_v13  ;;  %v1928_v13 = vadd.f32 %v1879_v38, %v4150_v54  ;;  %v1930_v54 = vadd.f32 %v4306_v61, %v4240_v10 }
 0x1cd   : > { %v2422_v11 = vadd.f32 %v4429_v35, %v2393_v48  ;;  %v1634_v24 = vpop.f32.mrf.mxu0 }
 0x1ce   : > { %v2017_v15 = vpop.f32.mrf.mxu2  ;;  %v1635_v49 = vadd.f32 %v1634_v24, %v4293_v47 }
 0x1cf   : > { %v2065_v58 = vadd.f32 %v2017_v15, %v1925_v17  ;;  %v2443_v18 = vmax.f32 %v2422_v11, 0.0  ;;  %v1887_v8 = vpop.f32.mrf.mxu3 }
 0x1d0   : > { %v1646_v25 = vadd.f32 %v1635_v49, %v4142_v3  ;;  %v1991_v36 = vpop.f32.mrf.mxu1 }
 0x1d1   : > { %v2394_v42 = vmul.f32 %v4436_v56, %v2065_v58  ;;  %2493 = vst [vmem:[%s4449_s18] sm:$0xff] %v2443_v18  ;;  %v2067_v2 = vadd.f32 %v1991_v36, %v1927_v41  ;;  %v1931_v18 = vadd.f32 %v4395_v39, %v4171_v52 }
 0x1d2   : > { %v4460_v48 = vadd.f32 %v4368_v60, %v1646_v25 }
 0x1d3   : > { %v2423_v29 = vadd.f32 %v4443_v26, %v2394_v42  ;;  %v2396_v47 = vmul.f32 %v4423_v30, %v2067_v2 }
 0x1d5   : > { %v2444_v17 = vmax.f32 %v2423_v29, 0.0  ;;  %v2425_v1 = vadd.f32 %v4429_v35, %v2396_v47  ;;  %v1637_v58 = vpop.f32.mrf.mxu0 }
 0x1d6   : > { %v2019_v15 = vpop.f32.mrf.mxu2  ;;  %v1638_v11 = vadd.f32 %v1637_v58, %v4312_v46 }
 0x1d7   : > { %2494 = vst [vmem:[%s4449_s18 + $0x8] sm:$0xff] %v2444_v17  ;;  %v2068_v12 = vadd.f32 %v2019_v15, %v1928_v13  ;;  %v2446_v38 = vmax.f32 %v2425_v1, 0.0  ;;  %v1889_v24 = vpop.f32.mrf.mxu3  ;;  %v1933_v13 = vadd.f32 %v4321_v59, %v4258_v33  ;;  %v1934_v15 = vadd.f32 %v4420_v34, %v4194_v20 }
 0x1d8   : > { %v1647_v42 = vadd.f32 %v1638_v11, %v4158_v45  ;;  %v1994_v49 = vpop.f32.mrf.mxu1 }
 0x1d9   : > { %v2397_v3 = vmul.f32 %v4436_v56, %v2068_v12  ;;  %2496 = vst [vmem:[%s4449_s18 + $0x18] sm:$0xff] %v2446_v38  ;;  %v2070_v41 = vadd.f32 %v1994_v49, %v1930_v54  ;;  %v1936_v54 = vadd.f32 %v4353_v16, %v4265_v37  ;;  %v1937_v49 = vadd.f32 %v1887_v8, %v4213_v21 }
 0x1da   : > { %v4475_v25 = vadd.f32 %v4382_v31, %v1647_v42 }
 0x1db   : > { %v2426_v60 = vadd.f32 %v4443_v26, %v2397_v3  ;;  %v2399_v46 = vmul.f32 %v4423_v30, %v2070_v41 }
 0x1dd   : > { %v2447_v29 = vmax.f32 %v2426_v60, 0.0  ;;  %v2428_v36 = vadd.f32 %v4429_v35, %v2399_v46  ;;  %v1639_v45 = vpop.f32.mrf.mxu0 }
 0x1de   : > { %v2022_v10 = vpop.f32.mrf.mxu2 }
 0x1df   : > { %2497 = vst [vmem:[%s4449_s18 + $0x20] sm:$0xff] %v2447_v29  ;;  %v2071_v61 = vadd.f32 %v2022_v10, %v1931_v18  ;;  %v2449_v17 = vmax.f32 %v2428_v36, 0.0  ;;  %v1892_v52 = vpop.f32.mrf.mxu3 }
 0x1e0   : > { %v1996_v31 = vpop.f32.mrf.mxu1 }
 0x1e1   : > { %v2400_v2 = vmul.f32 %v4436_v56, %v2071_v61  ;;  %2499 = vst [vmem:[%s4449_s18 + $0x30] sm:$0xff] %v2449_v17  ;;  %v2073_v47 = vadd.f32 %v1996_v31, %v1933_v13  ;;  %v1939_v61 = vadd.f32 %v4378_v6, %v4280_v23  ;;  %v1940_v13 = vadd.f32 %v1889_v24, %v4232_v51 }
 0x1e3   : > { %v2429_v39 = vadd.f32 %v4443_v26, %v2400_v2  ;;  %v2402_v1 = vmul.f32 %v4423_v30, %v2073_v47 }
 0x1e5   : > { %v2450_v12 = vmax.f32 %v2429_v39, 0.0  ;;  %v2431_v33 = vadd.f32 %v4429_v35, %v2402_v1  ;;  %v4490_v59 = vpop.f32.mrf.mxu0 }
 0x1e6   : > { %v2024_v58 = vpop.f32.mrf.mxu2 }
 0x1e7   : > { %2500 = vst [vmem:[%s4449_s18 + $0x38] sm:$0xff] %v2450_v12  ;;  %v2074_v3 = vadd.f32 %v2024_v58, %v1934_v15  ;;  %v2452_v38 = vmax.f32 %v2431_v33, 0.0  ;;  %v1894_v60 = vpop.f32.mrf.mxu3  ;;  %v1942_v12 = vadd.f32 %v4389_v53, %v4291_v0  ;;  %v1943_v33 = vadd.f32 %v1892_v52, %v4249_v28 }
 0x1e8   : > { %v1999_v34 = vpop.f32.mrf.mxu1 }
 0x1e9   : > { %v2403_v11 = vmul.f32 %v4436_v56, %v2074_v3  ;;  %2502 = vst [vmem:[%s4449_s18 + $0x48] sm:$0xff] %v2452_v38  ;;  %v2076_v42 = vadd.f32 %v1999_v34, %v1936_v54 }
 0x1eb   : > { %v2432_v20 = vadd.f32 %v4443_v26, %v2403_v11  ;;  %v2405_v18 = vmul.f32 %v4423_v30, %v2076_v42 }
 0x1ed   : > { %v2453_v41 = vmax.f32 %v2432_v20, 0.0  ;;  %v2434_v10 = vadd.f32 %v4429_v35, %v2405_v18  ;;  %v4501_v37 = vpop.f32.mrf.mxu0 }
 0x1ee   : > { %v2027_v29 = vpop.f32.mrf.mxu2 }
 0x1ef   : > { %2503 = vst [vmem:[%s4449_s18 + $0x50] sm:$0xff] %v2453_v41  ;;  %v2077_v46 = vadd.f32 %v2027_v29, %v1937_v49  ;;  %v2455_v36 = vmax.f32 %v2434_v10, 0.0  ;;  %v4506_v45 = vpop.f32.mrf.mxu3  ;;  %v4539_v10 = vld [vmem:[%s4701_s8] ss:$0 sm:$0xff] }
 0x1f0   : > { %v2001_v8 = vpop.f32.mrf.mxu1 }
 0x1f1   : > { %v2406_v16 = vmul.f32 %v4436_v56, %v2077_v46  ;;  %2505 = vst [vmem:[%s4449_s18 + $0x60] sm:$0xff] %v2455_v36  ;;  %v2079_v2 = vadd.f32 %v2001_v8, %v1939_v61  ;;  %v1926_v36 = vadd.f32 %v4490_v59, %v4132_v55  ;;  %v3244_v55 = vld [vmem:[%s3361_s16 + $0x28] sm:$0xf] }
 0x1f3   : > { %v2435_v21 = vadd.f32 %v4443_v26, %v2406_v16  ;;  %v2408_v39 = vmul.f32 %v4423_v30, %v2079_v2  ;;  %v4544_v16 = vld [vmem:[%s4702_s9] ss:$0 sm:$0xff]  ;;  %v3242_v2 = vld [vmem:[%s3361_s16 + $0x8] sm:$0xf] }
 0x1f5   : > { %v2456_v17 = vmax.f32 %v2435_v21, 0.0  ;;  %v2437_v23 = vadd.f32 %v4429_v35, %v2408_v39  ;;  %v4514_v6 = vpop.f32.mrf.mxu0 }
 0x1f6   : > { %v2029_v31 = vpop.f32.mrf.mxu2 }
 0x1f7   : > { %2506 = vst [vmem:[%s4449_s18 + $0x68] sm:$0xff] %v2456_v17  ;;  %v2080_v47 = vadd.f32 %v2029_v31, %v1940_v13  ;;  %v2458_v1 = vmax.f32 %v2437_v23, 0.0  ;;  %v4519_v58 = vpop.f32.mrf.mxu3  ;;  %v3243_v13 = vld [vmem:[%s3361_s16 + $0x18] sm:$0xf]  ;;  %v4556_v31 = vperm.slane %v4416_v14, 2 }
 0x1f8   : > { %v2004_v24 = vpop.f32.mrf.mxu1  ;;  %v1797_v17 = vmax.f32 %v3242_v2, %v3243_v13 }
 0x1f9   : > { %v2409_v15 = vmul.f32 %v4436_v56, %v2080_v47  ;;  %2508 = vst [vmem:[%s4449_s18 + $0x78] sm:$0xff] %v2458_v1  ;;  %v2082_v3 = vadd.f32 %v2004_v24, %v1942_v12 }
 0x1fa   : > { %v2378_v59 = vmax.f32 %v1797_v17, %v3244_v55 }
 0x1fb   : > { %v2438_v51 = vadd.f32 %v4443_v26, %v2409_v15  ;;  %v2411_v54 = vmul.f32 %v4423_v30, %v2082_v3  ;;  %v2563_v3 = vrot.slane %v4315_v19, 1 }
 0x1fd   : > { %v2459_v11 = vmax.f32 %v2438_v51, 0.0  ;;  %v2440_v0 = vadd.f32 %v4429_v35, %v2411_v54  ;;  %v4527_v53 = vpop.f32.mrf.mxu0  ;;  %v2564_v51 = vrot.slane %v2378_v59, 1 }
 0x1fe   : > { %v2032_v38 = vpop.f32.mrf.mxu2 }
 0x1ff   : > { %2509 = vst [vmem:[%s4449_s18 + $0x80] sm:$0xff] %v2459_v11  ;;  %v2083_v60 = vadd.f32 %v2032_v38, %v1943_v33  ;;  %v2461_v34 = vmax.f32 %v2440_v0, 0.0  ;;  %v4530_v42 = vpop.f32.mrf.mxu3 }
 0x200   : > { %v2006_v41 = vpop.f32.mrf.mxu1 }
 0x201   : > { %v2412_v20 = vmul.f32 %v4436_v56, %v2083_v60  ;;  %2511 = vst [vmem:[%s4449_s18 + $0x90] sm:$0xff] %v2461_v34  ;;  %v1929_v60 = vadd.f32 %v4501_v37, %v4155_v7  ;;  %v3246_v41 = vld [vmem:[%s3361_s16 + $0x98] sm:$0xf]  ;;  %v3247_v7 = vld [vmem:[%s3361_s16 + $0x48] sm:$0xf] }
 0x202   : > { %v2529_v24 = vpop.permute.xlu0 %2528  ;;  %v3248_v37 = vld [vmem:[%s3361_s16 + $0x58] sm:$0xf] }
 0x203   : > { %v2441_v49 = vadd.f32 %v4443_v26, %v2412_v20  ;;  %v2549_v11 = vmax.f32 %v4315_v19, %v2529_v24 }
 0x205   : > { %v2462_v28 = vmax.f32 %v2441_v49, 0.0  ;;  %v2211_v30 = vpop.f32.mrf.mxu0  ;;  %v4586_v49 = vld [vmem:[%s3361_s16 + $0x88] sm:$0xf] }
 0x206   : > { %v2034_v52 = vpop.f32.mrf.mxu2 }
 0x207   : > { %2512 = vst [vmem:[%s4449_s18 + $0x98] sm:$0xff] %v2462_v28  ;;  %v1922_v18 = vpop.f32.mrf.mxu3  ;;  %v1801_v28 = vmax.f32 %v4586_v49, %v3246_v41  ;;  %v1799_v52 = vmax.f32 %v3247_v7, %v3248_v37  ;;  %v3254_v37 = vld [vmem:[%s3361_s16 + $0xc8] sm:$0xf] }
 0x208   : > { %v2239_v35 = vpop.f32.mrf.mxu1 }
 0x209   : > { %v2240_v29 = vadd.f32 %v2239_v35, %v2211_v30  ;;  %v3249_v30 = vld [vmem:[%s3361_s16 + $0x38] sm:$0xf] }
 0x20a   : > { %v1798_v18 = vmax.f32 %v3244_v55, %v3249_v30  ;;  %v2575_v55 = vrot.slane %v4398_v40, 1 }
 0x20b   : > { %v2258_v46 = vadd.f32 %v2240_v29, %v4350_v27  ;;  %v4549_v27 = vperm.slane %v4409_v32, 2 }
 0x20c   : > { %v2379_v13 = vmax.f32 %v1798_v18, %v3247_v7 }
 0x20d   : > { %v2213_v61 = vpop.f32.mrf.mxu0 }
 0x20e   : > { %v2345_v56 = vpop.f32.mrf.mxu2 }
 0x20f   : > { %v2364_v26 = vadd.f32 %v2345_v56, %v2258_v46  ;;  %v2045_v21 = vpop.f32.mrf.mxu3 }
 0x210   : > { %v2066_v39 = vadd.f32 %v2045_v21, %v1926_v36  ;;  %v2241_v47 = vpop.f32.mrf.mxu1  ;;  %v3251_v36 = vld [vmem:[%s3361_s16 + $0x68] sm:$0xf] }
 0x211   : > { %v2468_v8 = vmul.f32 %v4539_v10, %v2364_v26  ;;  %v2242_v15 = vadd.f32 %v2241_v47, %v2213_v61  ;;  %v3250_v26 = vld [vmem:[%s3361_s16 + $0xa8] sm:$0xf]  ;;  %v2380_v21 = vmax.f32 %v1799_v52, %v3251_v36  ;;  %v3255_v52 = vld [vmem:[%s3361_s16 + $0xd8] sm:$0xf] }
 0x212   : > { %v2395_v32 = vmul.f32 %v4549_v27, %v2066_v39  ;;  %v2382_v61 = vmax.f32 %v1801_v28, %v3250_v26  ;;  %v3253_v28 = vld [vmem:[%s3361_s16 + $0x78] sm:$0xf]  ;;  %v1803_v30 = vmax.f32 %v3254_v37, %v3255_v52 }
 0x213   : > { %v2479_v23 = vadd.f32 %v4544_v16, %v2468_v8  ;;  %v2259_v14 = vadd.f32 %v2242_v15, %v4376_v22  ;;  %v2565_v22 = vsel %vm585_vm2, %v2563_v3, %v2564_v51  ;;  %v1932_v8 = vadd.f32 %v4514_v6, %v4180_v62  ;;  %v2537_v15 = vpop.permute.xlu2 %2536  ;;  %v2531_v62 = vpop.permute.xlu0 %2530 }
 0x214   : > { %v2424_v33 = vadd.f32 %v4556_v31, %v2395_v32  ;;  %v2591_v20 = vmax.f32 %v2549_v11, %v2565_v22  ;;  %v2553_v32 = vmax.f32 %v4398_v40, %v2537_v15  ;;  %v2566_v3 = vrot.slane %v4337_v44, 1 }
 0x215   : > { %v2486_v12 = vmax.f32 %v2479_v23, 0.0  ;;  %v2216_v38 = vpop.f32.mrf.mxu0  ;;  %v2576_v23 = vrot.slane %v2382_v61, 1  ;;  %v1800_v7 = vmax.f32 %v3251_v36, %v3253_v28  ;;  %v4768_v36 = vld [vmem:[#allocation18_spill] sm:$0xff]  ;;  %v2572_v15 = vrot.slane %v4362_v9, 1 }
 0x216   : > { %v2347_v1 = vpop.f32.mrf.mxu2  ;;  %v2445_v0 = vmax.f32 %v2424_v33, 0.0  ;;  %2598 = vst.msk [vmem:[%s4582_s13] sm:$0xff] %vm624_vm3, %v2591_v20  ;;  %v3252_v20 = vld [vmem:[%s3361_s16 + $0xb8] sm:$0xf] }
 0x217   : > { %2514 = vst.msk [vmem:[%s4566_s14] sm:$0xff] %vm969_vm5, %v2486_v12  ;;  %v2365_v54 = vadd.f32 %v2347_v1, %v2259_v14  ;;  %v2047_v19 = vpop.f32.mrf.mxu3  ;;  %v2570_v12 = vrot.slane %v2380_v21, 1  ;;  %v2533_v14 = vpop.permute.xlu1 %2532  ;;  %v2569_v1 = vrot.slane %v4335_v50, 1  ;;  %v2577_v51 = vsel %vm585_vm2, %v2575_v55, %v2576_v23 }
 0x218   : > { %2495 = vst [vmem:[%s4449_s18 + $0x10] sm:$0xff] %v2445_v0  ;;  %v2069_v35 = vadd.f32 %v2047_v19, %v1929_v60  ;;  %v2244_v29 = vpop.f32.mrf.mxu1  ;;  %v2551_v24 = vmax.f32 %v4335_v50, %v2533_v14  ;;  %v2595_v40 = vmax.f32 %v2553_v32, %v2577_v51  ;;  %v2550_v0 = vmax.f32 %v4337_v44, %v2531_v62 }
 0x219   : > { %v2469_v34 = vmul.f32 %v4539_v10, %v2365_v54  ;;  %v2245_v56 = vadd.f32 %v2244_v29, %v2216_v38  ;;  %v2571_v11 = vsel %vm585_vm2, %v2569_v1, %v2570_v12  ;;  %v2567_v54 = vrot.slane %v2379_v13, 1 }
 0x21a   : > { %v2398_v2 = vmul.f32 %v4549_v27, %v2069_v35  ;;  %v2593_v60 = vmax.f32 %v2551_v24, %v2571_v11  ;;  %v1802_v19 = vmax.f32 %v3250_v26, %v3252_v20  ;;  %2602 = vst.msk [vmem:[%s4582_s13 + $0x20] sm:$0xff] %vm624_vm3, %v2595_v40  ;;  %v2381_v61 = vmax.f32 %v1800_v7, %v4586_v49 }
 0x21b   : > { %v2480_v46 = vadd.f32 %v4544_v16, %v2469_v34  ;;  %v2260_v39 = vadd.f32 %v2245_v56, %v4386_v5  ;;  %v2568_v41 = vsel %vm585_vm2, %v2566_v3, %v2567_v54  ;;  %v2384_v21 = vmax.f32 %v1803_v30, %v4768_v36  ;;  %v4770_v36 = vld [vmem:[#allocation20_spill] sm:$0xff] }
 0x21c   : > { %v2427_v59 = vadd.f32 %v4556_v31, %v2398_v2  ;;  %v2592_v44 = vmax.f32 %v2550_v0, %v2568_v41  ;;  %v2383_v29 = vmax.f32 %v1802_v19, %v3254_v37  ;;  %2600 = vst.msk [vmem:[%s4582_s13 + $0x10] sm:$0xff] %vm624_vm3, %v2593_v60  ;;  %v2573_v55 = vrot.slane %v2381_v61, 1  ;;  %v4769_v41 = vld [vmem:[#allocation19_spill] sm:$0xff] }
 0x21d   : > { %v2487_v17 = vmax.f32 %v2480_v46, 0.0  ;;  %v2218_v5 = vpop.f32.mrf.mxu0  ;;  %v4767_v46 = vld [vmem:[#allocation17_spill] sm:$0xff]  ;;  %v2581_v1 = vrot.slane %v4365_v4, 1  ;;  %v1938_v28 = vadd.f32 %v4506_v45, %v4769_v41 }
 0x21e   : > { %v2350_v47 = vpop.f32.mrf.mxu2  ;;  %v2448_v33 = vmax.f32 %v2427_v59, 0.0  ;;  %v1935_v56 = vadd.f32 %v4527_v53, %v4767_v46  ;;  %2599 = vst.msk [vmem:[%s4582_s13 + $0x8] sm:$0xff] %vm624_vm3, %v2592_v44 }
 0x21f   : > { %2515 = vst.msk [vmem:[%s4566_s14 + $0x8] sm:$0xff] %vm969_vm5, %v2487_v17  ;;  %v2366_v6 = vadd.f32 %v2350_v47, %v2260_v39  ;;  %v2050_v38 = vpop.f32.mrf.mxu3  ;;  %v2578_v17 = vrot.slane %v4425_v63, 1  ;;  %v2579_v39 = vrot.slane %v2383_v29, 1  ;;  %v2539_v47 = vpop.permute.xlu2 %2538 }
 0x220   : > { %2498 = vst [vmem:[%s4449_s18 + $0x28] sm:$0xff] %v2448_v33  ;;  %v2072_v50 = vadd.f32 %v2050_v38, %v1932_v8  ;;  %v2246_v34 = vpop.f32.mrf.mxu1  ;;  %v2554_v23 = vmax.f32 %v4425_v63, %v2539_v47  ;;  %v2535_v49 = vpop.permute.xlu1 %2534  ;;  %v2574_v63 = vsel %vm585_vm2, %v2572_v15, %v2573_v55 }
 0x221   : > { %v2470_v22 = vmul.f32 %v4539_v10, %v2366_v6  ;;  %v2247_v35 = vadd.f32 %v2246_v34, %v2218_v5  ;;  %v2541_v59 = vpop.permute.xlu0 %2540  ;;  %v2580_v12 = vsel %vm585_vm2, %v2578_v17, %v2579_v39  ;;  %v2552_v14 = vmax.f32 %v4362_v9, %v2535_v49 }
 0x222   : > { %v2401_v26 = vmul.f32 %v4549_v27, %v2072_v50  ;;  %v2596_v6 = vmax.f32 %v2554_v23, %v2580_v12  ;;  %v2582_v5 = vrot.slane %v2384_v21, 1  ;;  %v2555_v33 = vmax.f32 %v4365_v4, %v2541_v59 }
 0x223   : > { %v2481_v18 = vadd.f32 %v4544_v16, %v2470_v22  ;;  %v2261_v2 = vadd.f32 %v2247_v35, %v4404_v43  ;;  %v2594_v3 = vmax.f32 %v2552_v14, %v2574_v63  ;;  %v1941_v21 = vadd.f32 %v4519_v58, %v4770_v36 }
 0x224   : > { %v2430_v53 = vadd.f32 %v4556_v31, %v2401_v26  ;;  %v2583_v11 = vsel %vm585_vm2, %v2581_v1, %v2582_v5  ;;  %2603 = vst.msk [vmem:[%s4582_s13 + $0x28] sm:$0xff] %vm624_vm3, %v2596_v6 }
 0x225   : > { %v2488_v8 = vmax.f32 %v2481_v18, 0.0  ;;  %v2221_v32 = vpop.f32.mrf.mxu0  ;;  %v2597_v22 = vmax.f32 %v2555_v33, %v2583_v11  ;;  %2601 = vst.msk [vmem:[%s4582_s13 + $0x18] sm:$0xff] %vm624_vm3, %v2594_v3 }
 0x226   : > { %v2352_v13 = vpop.f32.mrf.mxu2  ;;  %v2451_v62 = vmax.f32 %v2430_v53, 0.0 }
 0x227   : > { %2516 = vst.msk [vmem:[%s4566_s14 + $0x10] sm:$0xff] %vm969_vm5, %v2488_v8  ;;  %v2367_v43 = vadd.f32 %v2352_v13, %v2261_v2  ;;  %v2052_v51 = vpop.f32.mrf.mxu3 }
 0x228   : > { %2501 = vst [vmem:[%s4449_s18 + $0x40] sm:$0xff] %v2451_v62  ;;  %v2075_v40 = vadd.f32 %v2052_v51, %v1935_v56  ;;  %v2249_v9 = vpop.f32.mrf.mxu1 }
 0x229   : > { %v2471_v24 = vmul.f32 %v4539_v10, %v2367_v43  ;;  %v2250_v38 = vadd.f32 %v2249_v9, %v2221_v32  ;;  %2604 = vst.msk [vmem:[%s4582_s13 + $0x30] sm:$0xff] %vm624_vm3, %v2597_v22  ;;  %v4771_v43 = vld [vmem:[#allocation21_spill] sm:$0xff] }
 0x22a   : > { %v2404_v60 = vmul.f32 %v4549_v27, %v2075_v40  ;;  %v1944_v32 = vadd.f32 %v4530_v42, %v4771_v43 }
 0x22b   : > { %v2482_v54 = vadd.f32 %v4544_v16, %v2471_v24  ;;  %v2262_v4 = vadd.f32 %v2250_v38, %v4439_v57 }
 0x22c   : > { %v2433_v19 = vadd.f32 %v4556_v31, %v2404_v60 }
 0x22d   : > { %v2489_v0 = vmax.f32 %v2482_v54, 0.0  ;;  %v2223_v34 = vpop.f32.mrf.mxu0 }
 0x22e   : > { %v2355_v20 = vpop.f32.mrf.mxu2  ;;  %v2454_v7 = vmax.f32 %v2433_v19, 0.0 }
 0x22f   : > { %2517 = vst.msk [vmem:[%s4566_s14 + $0x18] sm:$0xff] %vm969_vm5, %v2489_v0  ;;  %v2368_v50 = vadd.f32 %v2355_v20, %v2262_v4  ;;  %v2055_v37 = vpop.f32.mrf.mxu3 }
 0x230   : > { %2504 = vst [vmem:[%s4449_s18 + $0x58] sm:$0xff] %v2454_v7  ;;  %v2078_v30 = vadd.f32 %v2055_v37, %v1938_v28  ;;  %v2251_v57 = vpop.f32.mrf.mxu1 }
 0x231   : > { %v2472_v52 = vmul.f32 %v4539_v10, %v2368_v50  ;;  %v2252_v35 = vadd.f32 %v2251_v57, %v2223_v34 }
 0x232   : > { %v2407_v44 = vmul.f32 %v4549_v27, %v2078_v30 }
 0x233   : > { %v2483_v18 = vadd.f32 %v4544_v16, %v2472_v52  ;;  %v2263_v46 = vadd.f32 %v2252_v35, %v4460_v48 }
 0x234   : > { %v2436_v26 = vadd.f32 %v4556_v31, %v2407_v44 }
 0x235   : > { %v2490_v29 = vmax.f32 %v2483_v18, 0.0  ;;  %v2226_v61 = vpop.f32.mrf.mxu0 }
 0x236   : > { %v2357_v56 = vpop.f32.mrf.mxu2  ;;  %v2457_v8 = vmax.f32 %v2436_v26, 0.0 }
 0x237   : > { %2518 = vst.msk [vmem:[%s4566_s14 + $0x20] sm:$0xff] %vm969_vm5, %v2490_v29  ;;  %v2369_v45 = vadd.f32 %v2357_v56, %v2263_v46  ;;  %v2057_v2 = vpop.f32.mrf.mxu3 }
 0x238   : > { %2507 = vst [vmem:[%s4449_s18 + $0x70] sm:$0xff] %v2457_v8  ;;  %v2081_v17 = vadd.f32 %v2057_v2, %v1941_v21  ;;  %v2254_v39 = vpop.f32.mrf.mxu1 }
 0x239   : > { %v2473_v13 = vmul.f32 %v4539_v10, %v2369_v45  ;;  %v2255_v47 = vadd.f32 %v2254_v39, %v2226_v61 }
 0x23a   : > { %v2410_v53 = vmul.f32 %v4549_v27, %v2081_v17 }
 0x23b   : > { %v2484_v48 = vadd.f32 %v4544_v16, %v2473_v13  ;;  %v2264_v15 = vadd.f32 %v2255_v47, %v4475_v25 }
 0x23c   : > { %v2439_v49 = vadd.f32 %v4556_v31, %v2410_v53 }
 0x23d   : > { %v2491_v23 = vmax.f32 %v2484_v48, 0.0  ;;  %v2228_v59 = vpop.f32.mrf.mxu0 }
 0x23e   : > { %v2360_v55 = vpop.f32.mrf.mxu2  ;;  %v2460_v12 = vmax.f32 %v2439_v49, 0.0 }
 0x23f   : > { %2519 = vst.msk [vmem:[%s4566_s14 + $0x28] sm:$0xff] %vm969_vm5, %v2491_v23  ;;  %v2370_v58 = vadd.f32 %v2360_v55, %v2264_v15  ;;  %v2060_v14 = vpop.f32.mrf.mxu3 }
 0x240   : > { %2510 = vst [vmem:[%s4449_s18 + $0x88] sm:$0xff] %v2460_v12  ;;  %v2084_v62 = vadd.f32 %v2060_v14, %v1944_v32  ;;  %v2256_v6 = vpop.f32.mrf.mxu1 }
 0x241   : > { %v2474_v1 = vmul.f32 %v4539_v10, %v2370_v58 }
 0x242   : > { %v2413_v63 = vmul.f32 %v4549_v27, %v2084_v62 }
 0x243   : > { %v2485_v25 = vadd.f32 %v4544_v16, %v2474_v1 }
 0x244   : > { %v2442_v24 = vadd.f32 %v4556_v31, %v2413_v63 }
 0x245   : > { %v2492_v5 = vmax.f32 %v2485_v25, 0.0 }
 0x246   : > { %v2362_v51 = vpop.f32.mrf.mxu2  ;;  %v2463_v3 = vmax.f32 %v2442_v24, 0.0 }
 0x247   : > { %2520 = vst.msk [vmem:[%s4566_s14 + $0x30] sm:$0xff] %vm969_vm5, %v2492_v5  ;;  %v2062_v33 = vpop.f32.mrf.mxu3 }
 0x248   : > { %2513 = vst [vmem:[%s4449_s18 + $0xa0] sm:$0xff] %v2463_v3 }
 0x249 PF: > { %s23_s21 = sadd.s32 1, %s3262_s21  }
 0x24a   : > { %p20_p4 = scmp.ge.s32.totalorder %s23_s21, 4  }
 0x24c   :  { %22 = sbr.rel (!%p20_p4) target bundleno = 1 (0x1), region = 125 }

</bundles_post_ra>
